<compile_context>
chip_gen: v6e
topology: v6e:2x2x1
jax: 0.10.0
libtpu: 0.0.40
codegen_flags: <defaults>
</compile_context>

<pallas_src>
import math
import functools

import jax
import jax.numpy as jnp
from jax.experimental import pallas as pl
from jax.experimental.pallas import tpu as pltpu

LN_EPS = 1e-5
BN_EPS = 1e-5
PER_LAYER_ARGS = 30  # number of weight refs per ConformerLayer


# ----------------------------------------------------------------------------
# in-kernel helpers
# ----------------------------------------------------------------------------
def _layernorm(x, w, b):
    mu = jnp.mean(x, axis=-1, keepdims=True)
    var = jnp.mean((x - mu) ** 2, axis=-1, keepdims=True)
    return (x - mu) * jax.lax.rsqrt(var + LN_EPS) * w + b


def _sigmoid(x):
    return 1.0 / (1.0 + jnp.exp(-x))


def _silu(x):
    return x * _sigmoid(x)


# ----------------------------------------------------------------------------
# One ConformerLayer, operating on VMEM-resident values (called in a static
# Python loop inside the fused kernel).
# ----------------------------------------------------------------------------
def _layer_body(x2, neg, w, pad_scr, *, bsz, t, d, num_heads):
    (f1_lnw, f1_lnb, f1_w1, f1_b1, f1_w2, f1_b2,
     a_lnw, a_lnb, a_wqkv, a_bqkv, a_wo, a_bo,
     c_lnw, c_lnb, c_pw1w, c_pw1b, c_dww, c_dwb, c_bng, c_bnb, c_pw2w, c_pw2b,
     f2_lnw, f2_lnb, f2_w1, f2_b1, f2_w2, f2_b2,
     fin_lnw, fin_lnb) = w

    # ---------------- FFN1 (half step) + residual --------------------------
    h = _layernorm(x2, f1_lnw[...], f1_lnb[...])
    h = jnp.dot(h, f1_w1[...], preferred_element_type=jnp.float32) + f1_b1[...]
    h = _silu(h)
    h = jnp.dot(h, f1_w2[...], preferred_element_type=jnp.float32) + f1_b2[...]
    x2 = 0.5 * h + x2

    # ---------------- Multi-head self-attention + residual -----------------
    hd = d // num_heads
    scale = 1.0 / math.sqrt(hd)
    xn = _layernorm(x2, a_lnw[...], a_lnb[...])
    # fused QKV projection: one (D, 3D) matmul
    qkv = jnp.dot(xn, a_wqkv[...], preferred_element_type=jnp.float32) + a_bqkv[...]
    q = (qkv[:, :d] * scale).reshape(bsz, t, d)
    k = qkv[:, d:2 * d].reshape(bsz, t, d)
    v = qkv[:, 2 * d:].reshape(bsz, t, d)

    heads = []
    for hi in range(num_heads):                  # static, small H; batched over B
        sl = slice(hi * hd, (hi + 1) * hd)
        s = jnp.einsum('bqd,bkd->bqk', q[:, :, sl], k[:, :, sl],
                       preferred_element_type=jnp.float32)     # (B, T, T)
        s = s - neg
        s = s - jnp.max(s, axis=-1, keepdims=True)
        p = jnp.exp(s)
        p = p / jnp.sum(p, axis=-1, keepdims=True)
        heads.append(jnp.einsum('bqk,bkd->bqd', p, v[:, :, sl],
                                preferred_element_type=jnp.float32))
    attn = jnp.concatenate(heads, axis=-1).reshape(bsz * t, d)
    x2 = x2 + jnp.dot(attn, a_wo[...], preferred_element_type=jnp.float32) + a_bo[...]

    # ---------------- Convolution module + residual -------------------------
    k_taps = c_dww.shape[0]
    pad = (k_taps - 1) // 2
    xn = _layernorm(x2, c_lnw[...], c_lnb[...])
    h = jnp.dot(xn, c_pw1w[...], preferred_element_type=jnp.float32) + c_pw1b[...]
    glu = (h[:, :d] * _sigmoid(h[:, d:])).reshape(bsz, t, d)    # GLU over channels

    # zero-padded GLU held once in a VMEM scratch; taps read static windows
    zpad = jnp.zeros((bsz, pad, d), dtype=jnp.float32)
    pad_scr[...] = jnp.concatenate([zpad, glu, zpad], axis=1)   # (B, T+2p, D)

    dw = c_dww[...]                              # (K, 1, D) — hoisted out of loop
    acc = jnp.zeros((bsz, t, d), dtype=jnp.float32)
    for j in range(k_taps):                      # depthwise conv taps (static)
        acc = acc + pad_scr[:, j:j + t, :] * dw[j]
    acc = acc + c_dwb[...]

    flat = acc.reshape(bsz * t, d)
    mean = jnp.mean(flat, axis=0, keepdims=True)                # BatchNorm (train)
    var = jnp.mean((flat - mean) ** 2, axis=0, keepdims=True)
    hb = (flat - mean) * jax.lax.rsqrt(var + BN_EPS) * c_bng[...] + c_bnb[...]
    hb = _silu(hb)
    x2 = x2 + jnp.dot(hb, c_pw2w[...], preferred_element_type=jnp.float32) + c_pw2b[...]

    # ---------------- FFN2 (half step) + residual + final LayerNorm --------
    h = _layernorm(x2, f2_lnw[...], f2_lnb[...])
    h = jnp.dot(h, f2_w1[...], preferred_element_type=jnp.float32) + f2_b1[...]
    h = _silu(h)
    h = jnp.dot(h, f2_w2[...], preferred_element_type=jnp.float32) + f2_b2[...]
    x2 = 0.5 * h + x2
    return _layernorm(x2, fin_lnw[...], fin_lnb[...])


# ----------------------------------------------------------------------------
# Fused whole-network Pallas kernel: all layers in one launch
# ----------------------------------------------------------------------------
def conformer_kernel(*refs, num_layers, num_heads):
    n_in = 2 + PER_LAYER_ARGS * num_layers
    x_ref, mask_ref = refs[0], refs[1]
    o_ref = refs[n_in]
    pad_scr = refs[n_in + 1]

    x = x_ref[...]                               # (B, T, D)
    bsz, t, d = x.shape
    x2 = x.reshape(bsz * t, d)                   # row-major (B*T, D) working view

    # key-padding bias, computed ONCE and reused by every layer
    neg = mask_ref[...][:, None, :] * 1e30       # (B, 1, T); 1.0 = padded key

    for li in range(num_layers):                 # static layer loop (weights stay in VMEM)
        w = refs[2 + PER_LAYER_ARGS * li: 2 + PER_LAYER_ARGS * (li + 1)]
        x2 = _layer_body(x2, neg, w, pad_scr,
                         bsz=bsz, t=t, d=d, num_heads=num_heads)

    o_ref[...] = x2.reshape(bsz, t, d)


# ----------------------------------------------------------------------------
# Wrapper: one pallas_call for the whole Conformer
# ----------------------------------------------------------------------------
def _layer_args(p):
    return (
        p["ffn1"]["ln_w"], p["ffn1"]["ln_b"], p["ffn1"]["w1"], p["ffn1"]["b1"],
        p["ffn1"]["w2"], p["ffn1"]["b2"],
        p["attn"]["ln_w"], p["attn"]["ln_b"], p["attn"]["wqkv"], p["attn"]["bqkv"],
        p["attn"]["wo"], p["attn"]["bo"],
        p["conv"]["ln_w"], p["conv"]["ln_b"], p["conv"]["pw1_w"], p["conv"]["pw1_b"],
        p["conv"]["dw_w"], p["conv"]["dw_b"], p["conv"]["bn_g"], p["conv"]["bn_b"],
        p["conv"]["pw2_w"], p["conv"]["pw2_b"],
        p["ffn2"]["ln_w"], p["ffn2"]["ln_b"], p["ffn2"]["w1"], p["ffn2"]["b1"],
        p["ffn2"]["w2"], p["ffn2"]["b2"],
        p["final_ln_w"], p["final_ln_b"],
    )


def conformer_forward(x, lengths, params, num_heads):
    b, t, d = x.shape
    layers = params["layers"]
    num_layers = len(layers)
    k_taps = layers[0]["conv"]["dw_w"].shape[0]
    pad = (k_taps - 1) // 2

    # encoder padding mask (1.0 = padded); requires max(lengths) == T,
    # exactly like the PyTorch module.
    mask_f = (jnp.arange(t)[None, :] >= lengths[:, None]).astype(jnp.float32)

    args = [x, mask_f]
    for lp in layers:
        la = _layer_args(lp)
        assert len(la) == PER_LAYER_ARGS
        args.extend(la)

    vmem = pl.BlockSpec(memory_space=pltpu.MemorySpace.VMEM)
    out = pl.pallas_call(
        functools.partial(conformer_kernel,
                          num_layers=num_layers, num_heads=num_heads),
        out_shape=jax.ShapeDtypeStruct((b, t, d), jnp.float32),
        in_specs=[vmem] * len(args),
        out_specs=vmem,
        scratch_shapes=[pltpu.VMEM((b, t + 2 * pad, d), jnp.float32)],
    )(*args)
    return out, lengths


# ----------------------------------------------------------------------------
# Deterministic parameter init
# ----------------------------------------------------------------------------
def init_params(key, num_layers, d, f, k):
    def nrm(kk, shape, scale=0.1):
        return scale * jax.random.normal(kk, shape, dtype=jnp.float32)

    layers = []
    for li in range(num_layers):
        ks = jax.random.split(jax.random.fold_in(key, li), 32)
        ffn1 = dict(ln_w=1.0 + nrm(ks[0], (1, d)), ln_b=nrm(ks[1], (1, d)),
                    w1=nrm(ks[2], (d, f)), b1=nrm(ks[3], (1, f)),
                    w2=nrm(ks[4], (f, d)), b2=nrm(ks[5], (1, d)))
        wq, wk, wv = nrm(ks[8], (d, d)), nrm(ks[9], (d, d)), nrm(ks[10], (d, d))
        bq, bk, bv = nrm(ks[11], (1, d)), nrm(ks[12], (1, d)), nrm(ks[13], (1, d))
        attn = dict(ln_w=1.0 + nrm(ks[6], (1, d)), ln_b=nrm(ks[7], (1, d)),
                    wqkv=jnp.concatenate([wq, wk, wv], axis=1),     # (D, 3D) packed
                    bqkv=jnp.concatenate([bq, bk, bv], axis=1),     # (1, 3D) packed
                    wo=nrm(ks[14], (d, d)), bo=nrm(ks[15], (1, d)))
        conv = dict(ln_w=1.0 + nrm(ks[16], (1, d)), ln_b=nrm(ks[17], (1, d)),
                    pw1_w=nrm(ks[18], (d, 2 * d)), pw1_b=nrm(ks[19], (1, 2 * d)),
                    dw_w=nrm(ks[20], (k, 1, d)), dw_b=nrm(ks[21], (1, d)),
                    bn_g=1.0 + nrm(ks[22], (1, d)), bn_b=nrm(ks[23], (1, d)),
                    pw2_w=nrm(ks[24], (d, d)), pw2_b=nrm(ks[25], (1, d)))
        ffn2 = dict(ln_w=1.0 + nrm(ks[26], (1, d)), ln_b=nrm(ks[27], (1, d)),
                    w1=nrm(ks[28], (d, f)), b1=nrm(ks[29], (1, f)),
                    w2=nrm(ks[30], (f, d)), b2=nrm(ks[31], (1, d)))
        fks = jax.random.split(jax.random.fold_in(key, 1000 + li), 2)
        layers.append(dict(ffn1=ffn1, attn=attn, conv=conv, ffn2=ffn2,
                           final_ln_w=1.0 + nrm(fks[0], (1, d)),
                           final_ln_b=nrm(fks[1], (1, d))))
    return dict(layers=layers)


# ----------------------------------------------------------------------------
if __name__ == "__main__":
    # Conformer(input_dim=32, num_heads=4, ffn_dim=64, num_layers=2,
    #           depthwise_conv_kernel_size=7)
    D, H, F, L, K = 32, 4, 64, 2, 7
    B, T = 2, 16

    key = jax.random.PRNGKey(0)
    kx, kp = jax.random.split(key)
    x = jax.random.normal(kx, (B, T, D), dtype=jnp.float32)
    lengths = jnp.array([T, 11], dtype=jnp.int32)   # max(lengths) == T

    params = init_params(kp, L, D, F, K)

    fwd = jax.jit(conformer_forward, static_argnames=("num_heads",))
    out, out_lengths = fwd(x, lengths, params, num_heads=H)
    out = jax.block_until_ready(out)
    assert out.shape == (B, T, D) and out.dtype == jnp.float32
    assert bool(jnp.all(jnp.isfinite(out)))
    print("KERNEL_OK")
</pallas_src>

<mosaic_0001>
module attributes {stable_mosaic.version = 11 : i64} {
  func.func @conformer_kernel(%arg0: memref<2x16x32xf32, #tpu.memory_space<vmem>>, %arg1: memref<2x16xf32, #tpu.memory_space<vmem>>, %arg2: memref<1x32xf32, #tpu.memory_space<vmem>>, %arg3: memref<1x32xf32, #tpu.memory_space<vmem>>, %arg4: memref<32x64xf32, #tpu.memory_space<vmem>>, %arg5: memref<1x64xf32, #tpu.memory_space<vmem>>, %arg6: memref<64x32xf32, #tpu.memory_space<vmem>>, %arg7: memref<1x32xf32, #tpu.memory_space<vmem>>, %arg8: memref<1x32xf32, #tpu.memory_space<vmem>>, %arg9: memref<1x32xf32, #tpu.memory_space<vmem>>, %arg10: memref<32x96xf32, #tpu.memory_space<vmem>>, %arg11: memref<1x96xf32, #tpu.memory_space<vmem>>, %arg12: memref<32x32xf32, #tpu.memory_space<vmem>>, %arg13: memref<1x32xf32, #tpu.memory_space<vmem>>, %arg14: memref<1x32xf32, #tpu.memory_space<vmem>>, %arg15: memref<1x32xf32, #tpu.memory_space<vmem>>, %arg16: memref<32x64xf32, #tpu.memory_space<vmem>>, %arg17: memref<1x64xf32, #tpu.memory_space<vmem>>, %arg18: memref<7x1x32xf32, #tpu.memory_space<vmem>>, %arg19: memref<1x32xf32, #tpu.memory_space<vmem>>, %arg20: memref<1x32xf32, #tpu.memory_space<vmem>>, %arg21: memref<1x32xf32, #tpu.memory_space<vmem>>, %arg22: memref<32x32xf32, #tpu.memory_space<vmem>>, %arg23: memref<1x32xf32, #tpu.memory_space<vmem>>, %arg24: memref<1x32xf32, #tpu.memory_space<vmem>>, %arg25: memref<1x32xf32, #tpu.memory_space<vmem>>, %arg26: memref<32x64xf32, #tpu.memory_space<vmem>>, %arg27: memref<1x64xf32, #tpu.memory_space<vmem>>, %arg28: memref<64x32xf32, #tpu.memory_space<vmem>>, %arg29: memref<1x32xf32, #tpu.memory_space<vmem>>, %arg30: memref<1x32xf32, #tpu.memory_space<vmem>>, %arg31: memref<1x32xf32, #tpu.memory_space<vmem>>, %arg32: memref<1x32xf32, #tpu.memory_space<vmem>>, %arg33: memref<1x32xf32, #tpu.memory_space<vmem>>, %arg34: memref<32x64xf32, #tpu.memory_space<vmem>>, %arg35: memref<1x64xf32, #tpu.memory_space<vmem>>, %arg36: memref<64x32xf32, #tpu.memory_space<vmem>>, %arg37: memref<1x32xf32, #tpu.memory_space<vmem>>, %arg38: memref<1x32xf32, #tpu.memory_space<vmem>>, %arg39: memref<1x32xf32, #tpu.memory_space<vmem>>, %arg40: memref<32x96xf32, #tpu.memory_space<vmem>>, %arg41: memref<1x96xf32, #tpu.memory_space<vmem>>, %arg42: memref<32x32xf32, #tpu.memory_space<vmem>>, %arg43: memref<1x32xf32, #tpu.memory_space<vmem>>, %arg44: memref<1x32xf32, #tpu.memory_space<vmem>>, %arg45: memref<1x32xf32, #tpu.memory_space<vmem>>, %arg46: memref<32x64xf32, #tpu.memory_space<vmem>>, %arg47: memref<1x64xf32, #tpu.memory_space<vmem>>, %arg48: memref<7x1x32xf32, #tpu.memory_space<vmem>>, %arg49: memref<1x32xf32, #tpu.memory_space<vmem>>, %arg50: memref<1x32xf32, #tpu.memory_space<vmem>>, %arg51: memref<1x32xf32, #tpu.memory_space<vmem>>, %arg52: memref<32x32xf32, #tpu.memory_space<vmem>>, %arg53: memref<1x32xf32, #tpu.memory_space<vmem>>, %arg54: memref<1x32xf32, #tpu.memory_space<vmem>>, %arg55: memref<1x32xf32, #tpu.memory_space<vmem>>, %arg56: memref<32x64xf32, #tpu.memory_space<vmem>>, %arg57: memref<1x64xf32, #tpu.memory_space<vmem>>, %arg58: memref<64x32xf32, #tpu.memory_space<vmem>>, %arg59: memref<1x32xf32, #tpu.memory_space<vmem>>, %arg60: memref<1x32xf32, #tpu.memory_space<vmem>>, %arg61: memref<1x32xf32, #tpu.memory_space<vmem>>, %arg62: memref<2x16x32xf32, #tpu.memory_space<vmem>>, %arg63: memref<2x22x32xf32, #tpu.memory_space<vmem>>) attributes {dimension_semantics = [], scalar_prefetch = 0 : i64, scratch_operands = 1 : i64, tpu.core_type = #tpu.core_type<tc>} {
    %c0 = arith.constant 0 : index
    %c0_0 = arith.constant 0 : index
    %c0_1 = arith.constant 0 : index
    %0 = vector.load %arg0[%c0, %c0_0, %c0_1] : memref<2x16x32xf32, #tpu.memory_space<vmem>>, vector<2x16x32xf32>
    %1 = vector.shape_cast %0 : vector<2x16x32xf32> to vector<32x32xf32>
    %c0_2 = arith.constant 0 : index
    %c0_3 = arith.constant 0 : index
    %2 = vector.load %arg1[%c0_2, %c0_3] : memref<2x16xf32, #tpu.memory_space<vmem>>, vector<2x16xf32>
    %3 = vector.shape_cast %2 : vector<2x16xf32> to vector<2x1x16xf32>
    %cst = arith.constant 1.000000e+30 : f32
    %4 = vector.broadcast %cst : f32 to vector<2x1x16xf32>
    %5 = arith.mulf %3, %4 : vector<2x1x16xf32>
    %c0_4 = arith.constant 0 : index
    %c0_5 = arith.constant 0 : index
    %6 = vector.load %arg2[%c0_4, %c0_5] : memref<1x32xf32, #tpu.memory_space<vmem>>, vector<1x32xf32>
    %c0_6 = arith.constant 0 : index
    %c0_7 = arith.constant 0 : index
    %7 = vector.load %arg3[%c0_6, %c0_7] : memref<1x32xf32, #tpu.memory_space<vmem>>, vector<1x32xf32>
    %cst_8 = arith.constant dense<0.000000e+00> : vector<32xf32>
    %8 = vector.multi_reduction <add>, %1, %cst_8 [1] : vector<32x32xf32> to vector<32xf32>
    %9 = vector.shape_cast %8 : vector<32xf32> to vector<32x1xf32>
    %cst_9 = arith.constant 3.200000e+01 : f32
    %10 = vector.broadcast %cst_9 : f32 to vector<32x1xf32>
    %11 = arith.divf %9, %10 : vector<32x1xf32>
    %12 = vector.broadcast %11 : vector<32x1xf32> to vector<32x32xf32>
    %13 = arith.subf %1, %12 : vector<32x32xf32>
    %14 = arith.mulf %13, %13 : vector<32x32xf32>
    %cst_10 = arith.constant dense<0.000000e+00> : vector<32xf32>
    %15 = vector.multi_reduction <add>, %14, %cst_10 [1] : vector<32x32xf32> to vector<32xf32>
    %16 = vector.shape_cast %15 : vector<32xf32> to vector<32x1xf32>
    %cst_11 = arith.constant 3.200000e+01 : f32
    %17 = vector.broadcast %cst_11 : f32 to vector<32x1xf32>
    %18 = arith.divf %16, %17 : vector<32x1xf32>
    %19 = vector.broadcast %11 : vector<32x1xf32> to vector<32x32xf32>
    %20 = arith.subf %1, %19 : vector<32x32xf32>
    %cst_12 = arith.constant 9.99999974E-6 : f32
    %21 = vector.broadcast %cst_12 : f32 to vector<32x1xf32>
    %22 = arith.addf %18, %21 : vector<32x1xf32>
    %23 = math.rsqrt %22 : vector<32x1xf32>
    %24 = vector.broadcast %23 : vector<32x1xf32> to vector<32x32xf32>
    %25 = arith.mulf %20, %24 : vector<32x32xf32>
    %26 = vector.broadcast %6 : vector<1x32xf32> to vector<32x32xf32>
    %27 = arith.mulf %25, %26 : vector<32x32xf32>
    %28 = vector.broadcast %7 : vector<1x32xf32> to vector<32x32xf32>
    %29 = arith.addf %27, %28 : vector<32x32xf32>
    %c0_13 = arith.constant 0 : index
    %c0_14 = arith.constant 0 : index
    %30 = vector.load %arg4[%c0_13, %c0_14] : memref<32x64xf32, #tpu.memory_space<vmem>>, vector<32x64xf32>
    %cst_15 = arith.constant dense<0.000000e+00> : vector<32x64xf32>
    %31 = tpu.matmul %29, %30, %cst_15 {dimension_numbers = #tpu.dot_dimension_numbers<[1], [0], [0], [1], [0, 0, 1, 1], [], []>} : vector<32x32xf32>, vector<32x64xf32>, vector<32x64xf32> -> vector<32x64xf32>
    %c0_16 = arith.constant 0 : index
    %c0_17 = arith.constant 0 : index
    %32 = vector.load %arg5[%c0_16, %c0_17] : memref<1x64xf32, #tpu.memory_space<vmem>>, vector<1x64xf32>
    %33 = vector.broadcast %32 : vector<1x64xf32> to vector<32x64xf32>
    %34 = arith.addf %31, %33 : vector<32x64xf32>
    %cst_18 = arith.constant 0.000000e+00 : f32
    %35 = vector.broadcast %cst_18 : f32 to vector<32x64xf32>
    %36 = arith.subf %35, %34 : vector<32x64xf32>
    %37 = math.exp %36 : vector<32x64xf32>
    %cst_19 = arith.constant 1.000000e+00 : f32
    %38 = vector.broadcast %cst_19 : f32 to vector<32x64xf32>
    %39 = arith.addf %38, %37 : vector<32x64xf32>
    %cst_20 = arith.constant 1.000000e+00 : f32
    %40 = vector.broadcast %cst_20 : f32 to vector<32x64xf32>
    %41 = arith.divf %40, %39 : vector<32x64xf32>
    %42 = arith.mulf %34, %41 : vector<32x64xf32>
    %c0_21 = arith.constant 0 : index
    %c0_22 = arith.constant 0 : index
    %43 = vector.load %arg6[%c0_21, %c0_22] : memref<64x32xf32, #tpu.memory_space<vmem>>, vector<64x32xf32>
    %cst_23 = arith.constant dense<0.000000e+00> : vector<32x32xf32>
    %44 = tpu.matmul %42, %43, %cst_23 {dimension_numbers = #tpu.dot_dimension_numbers<[1], [0], [0], [1], [0, 0, 1, 1], [], []>} : vector<32x64xf32>, vector<64x32xf32>, vector<32x32xf32> -> vector<32x32xf32>
    %c0_24 = arith.constant 0 : index
    %c0_25 = arith.constant 0 : index
    %45 = vector.load %arg7[%c0_24, %c0_25] : memref<1x32xf32, #tpu.memory_space<vmem>>, vector<1x32xf32>
    %46 = vector.broadcast %45 : vector<1x32xf32> to vector<32x32xf32>
    %47 = arith.addf %44, %46 : vector<32x32xf32>
    %cst_26 = arith.constant 5.000000e-01 : f32
    %48 = vector.broadcast %cst_26 : f32 to vector<32x32xf32>
    %49 = arith.mulf %48, %47 : vector<32x32xf32>
    %50 = arith.addf %49, %1 : vector<32x32xf32>
    %c0_27 = arith.constant 0 : index
    %c0_28 = arith.constant 0 : index
    %51 = vector.load %arg8[%c0_27, %c0_28] : memref<1x32xf32, #tpu.memory_space<vmem>>, vector<1x32xf32>
    %c0_29 = arith.constant 0 : index
    %c0_30 = arith.constant 0 : index
    %52 = vector.load %arg9[%c0_29, %c0_30] : memref<1x32xf32, #tpu.memory_space<vmem>>, vector<1x32xf32>
    %cst_31 = arith.constant dense<0.000000e+00> : vector<32xf32>
    %53 = vector.multi_reduction <add>, %50, %cst_31 [1] : vector<32x32xf32> to vector<32xf32>
    %54 = vector.shape_cast %53 : vector<32xf32> to vector<32x1xf32>
    %cst_32 = arith.constant 3.200000e+01 : f32
    %55 = vector.broadcast %cst_32 : f32 to vector<32x1xf32>
    %56 = arith.divf %54, %55 : vector<32x1xf32>
    %57 = vector.broadcast %56 : vector<32x1xf32> to vector<32x32xf32>
    %58 = arith.subf %50, %57 : vector<32x32xf32>
    %59 = arith.mulf %58, %58 : vector<32x32xf32>
    %cst_33 = arith.constant dense<0.000000e+00> : vector<32xf32>
    %60 = vector.multi_reduction <add>, %59, %cst_33 [1] : vector<32x32xf32> to vector<32xf32>
    %61 = vector.shape_cast %60 : vector<32xf32> to vector<32x1xf32>
    %cst_34 = arith.constant 3.200000e+01 : f32
    %62 = vector.broadcast %cst_34 : f32 to vector<32x1xf32>
    %63 = arith.divf %61, %62 : vector<32x1xf32>
    %64 = vector.broadcast %56 : vector<32x1xf32> to vector<32x32xf32>
    %65 = arith.subf %50, %64 : vector<32x32xf32>
    %cst_35 = arith.constant 9.99999974E-6 : f32
    %66 = vector.broadcast %cst_35 : f32 to vector<32x1xf32>
    %67 = arith.addf %63, %66 : vector<32x1xf32>
    %68 = math.rsqrt %67 : vector<32x1xf32>
    %69 = vector.broadcast %68 : vector<32x1xf32> to vector<32x32xf32>
    %70 = arith.mulf %65, %69 : vector<32x32xf32>
    %71 = vector.broadcast %51 : vector<1x32xf32> to vector<32x32xf32>
    %72 = arith.mulf %70, %71 : vector<32x32xf32>
    %73 = vector.broadcast %52 : vector<1x32xf32> to vector<32x32xf32>
    %74 = arith.addf %72, %73 : vector<32x32xf32>
    %c0_36 = arith.constant 0 : index
    %c0_37 = arith.constant 0 : index
    %75 = vector.load %arg10[%c0_36, %c0_37] : memref<32x96xf32, #tpu.memory_space<vmem>>, vector<32x96xf32>
    %cst_38 = arith.constant dense<0.000000e+00> : vector<32x96xf32>
    %76 = tpu.matmul %74, %75, %cst_38 {dimension_numbers = #tpu.dot_dimension_numbers<[1], [0], [0], [1], [0, 0, 1, 1], [], []>} : vector<32x32xf32>, vector<32x96xf32>, vector<32x96xf32> -> vector<32x96xf32>
    %c0_39 = arith.constant 0 : index
    %c0_40 = arith.constant 0 : index
    %77 = vector.load %arg11[%c0_39, %c0_40] : memref<1x96xf32, #tpu.memory_space<vmem>>, vector<1x96xf32>
    %78 = vector.broadcast %77 : vector<1x96xf32> to vector<32x96xf32>
    %79 = arith.addf %76, %78 : vector<32x96xf32>
    %80 = vector.extract_strided_slice %79 {offsets = [0, 0], sizes = [32, 32], strides = [1, 1]} : vector<32x96xf32> to vector<32x32xf32>
    %cst_41 = arith.constant 0.353553385 : f32
    %81 = vector.broadcast %cst_41 : f32 to vector<32x32xf32>
    %82 = arith.mulf %80, %81 : vector<32x32xf32>
    %83 = vector.shape_cast %82 : vector<32x32xf32> to vector<2x16x32xf32>
    %84 = vector.extract_strided_slice %79 {offsets = [0, 32], sizes = [32, 32], strides = [1, 1]} : vector<32x96xf32> to vector<32x32xf32>
    %85 = vector.shape_cast %84 : vector<32x32xf32> to vector<2x16x32xf32>
    %86 = vector.extract_strided_slice %79 {offsets = [0, 64], sizes = [32, 32], strides = [1, 1]} : vector<32x96xf32> to vector<32x32xf32>
    %87 = vector.shape_cast %86 : vector<32x32xf32> to vector<2x16x32xf32>
    %88 = vector.extract_strided_slice %83 {offsets = [0, 0, 0], sizes = [2, 16, 8], strides = [1, 1, 1]} : vector<2x16x32xf32> to vector<2x16x8xf32>
    %89 = vector.extract_strided_slice %85 {offsets = [0, 0, 0], sizes = [2, 16, 8], strides = [1, 1, 1]} : vector<2x16x32xf32> to vector<2x16x8xf32>
    "tpu.trace_start"() <{level = 10 : i32, message = "bqd,bkd->bqk"}> : () -> ()
    %cst_42 = arith.constant dense<0.000000e+00> : vector<2x16x16xf32>
    %90 = tpu.matmul %88, %89, %cst_42 {dimension_numbers = #tpu.dot_dimension_numbers<[2], [2], [1], [1], [0, 0, 0, 1, 1, 1], [0], [0]>} : vector<2x16x8xf32>, vector<2x16x8xf32>, vector<2x16x16xf32> -> vector<2x16x16xf32>
    "tpu.trace_stop"() : () -> ()
    %91 = vector.broadcast %5 : vector<2x1x16xf32> to vector<2x16x16xf32>
    %92 = arith.subf %90, %91 : vector<2x16x16xf32>
    %cst_43 = arith.constant dense<0xFF800000> : vector<2x16xf32>
    %93 = vector.multi_reduction <maximumf>, %92, %cst_43 [2] : vector<2x16x16xf32> to vector<2x16xf32>
    %94 = vector.shape_cast %93 : vector<2x16xf32> to vector<2x16x1xf32>
    %95 = vector.broadcast %94 : vector<2x16x1xf32> to vector<2x16x16xf32>
    %96 = arith.subf %92, %95 : vector<2x16x16xf32>
    %97 = math.exp %96 : vector<2x16x16xf32>
    %cst_44 = arith.constant dense<0.000000e+00> : vector<2x16xf32>
    %98 = vector.multi_reduction <add>, %97, %cst_44 [2] : vector<2x16x16xf32> to vector<2x16xf32>
    %99 = vector.shape_cast %98 : vector<2x16xf32> to vector<2x16x1xf32>
    %100 = vector.broadcast %99 : vector<2x16x1xf32> to vector<2x16x16xf32>
    %101 = arith.divf %97, %100 : vector<2x16x16xf32>
    %102 = vector.extract_strided_slice %87 {offsets = [0, 0, 0], sizes = [2, 16, 8], strides = [1, 1, 1]} : vector<2x16x32xf32> to vector<2x16x8xf32>
    "tpu.trace_start"() <{level = 10 : i32, message = "bqk,bkd->bqd"}> : () -> ()
    %cst_45 = arith.constant dense<0.000000e+00> : vector<2x16x8xf32>
    %103 = tpu.matmul %101, %102, %cst_45 {dimension_numbers = #tpu.dot_dimension_numbers<[2], [1], [1], [2], [0, 0, 0, 1, 1, 2], [0], [0]>} : vector<2x16x16xf32>, vector<2x16x8xf32>, vector<2x16x8xf32> -> vector<2x16x8xf32>
    "tpu.trace_stop"() : () -> ()
    %104 = vector.extract_strided_slice %83 {offsets = [0, 0, 8], sizes = [2, 16, 8], strides = [1, 1, 1]} : vector<2x16x32xf32> to vector<2x16x8xf32>
    %105 = vector.extract_strided_slice %85 {offsets = [0, 0, 8], sizes = [2, 16, 8], strides = [1, 1, 1]} : vector<2x16x32xf32> to vector<2x16x8xf32>
    "tpu.trace_start"() <{level = 10 : i32, message = "bqd,bkd->bqk"}> : () -> ()
    %cst_46 = arith.constant dense<0.000000e+00> : vector<2x16x16xf32>
    %106 = tpu.matmul %104, %105, %cst_46 {dimension_numbers = #tpu.dot_dimension_numbers<[2], [2], [1], [1], [0, 0, 0, 1, 1, 1], [0], [0]>} : vector<2x16x8xf32>, vector<2x16x8xf32>, vector<2x16x16xf32> -> vector<2x16x16xf32>
    "tpu.trace_stop"() : () -> ()
    %107 = vector.broadcast %5 : vector<2x1x16xf32> to vector<2x16x16xf32>
    %108 = arith.subf %106, %107 : vector<2x16x16xf32>
    %cst_47 = arith.constant dense<0xFF800000> : vector<2x16xf32>
    %109 = vector.multi_reduction <maximumf>, %108, %cst_47 [2] : vector<2x16x16xf32> to vector<2x16xf32>
    %110 = vector.shape_cast %109 : vector<2x16xf32> to vector<2x16x1xf32>
    %111 = vector.broadcast %110 : vector<2x16x1xf32> to vector<2x16x16xf32>
    %112 = arith.subf %108, %111 : vector<2x16x16xf32>
    %113 = math.exp %112 : vector<2x16x16xf32>
    %cst_48 = arith.constant dense<0.000000e+00> : vector<2x16xf32>
    %114 = vector.multi_reduction <add>, %113, %cst_48 [2] : vector<2x16x16xf32> to vector<2x16xf32>
    %115 = vector.shape_cast %114 : vector<2x16xf32> to vector<2x16x1xf32>
    %116 = vector.broadcast %115 : vector<2x16x1xf32> to vector<2x16x16xf32>
    %117 = arith.divf %113, %116 : vector<2x16x16xf32>
    %118 = vector.extract_strided_slice %87 {offsets = [0, 0, 8], sizes = [2, 16, 8], strides = [1, 1, 1]} : vector<2x16x32xf32> to vector<2x16x8xf32>
    "tpu.trace_start"() <{level = 10 : i32, message = "bqk,bkd->bqd"}> : () -> ()
    %cst_49 = arith.constant dense<0.000000e+00> : vector<2x16x8xf32>
    %119 = tpu.matmul %117, %118, %cst_49 {dimension_numbers = #tpu.dot_dimension_numbers<[2], [1], [1], [2], [0, 0, 0, 1, 1, 2], [0], [0]>} : vector<2x16x16xf32>, vector<2x16x8xf32>, vector<2x16x8xf32> -> vector<2x16x8xf32>
    "tpu.trace_stop"() : () -> ()
    %120 = vector.extract_strided_slice %83 {offsets = [0, 0, 16], sizes = [2, 16, 8], strides = [1, 1, 1]} : vector<2x16x32xf32> to vector<2x16x8xf32>
    %121 = vector.extract_strided_slice %85 {offsets = [0, 0, 16], sizes = [2, 16, 8], strides = [1, 1, 1]} : vector<2x16x32xf32> to vector<2x16x8xf32>
    "tpu.trace_start"() <{level = 10 : i32, message = "bqd,bkd->bqk"}> : () -> ()
    %cst_50 = arith.constant dense<0.000000e+00> : vector<2x16x16xf32>
    %122 = tpu.matmul %120, %121, %cst_50 {dimension_numbers = #tpu.dot_dimension_numbers<[2], [2], [1], [1], [0, 0, 0, 1, 1, 1], [0], [0]>} : vector<2x16x8xf32>, vector<2x16x8xf32>, vector<2x16x16xf32> -> vector<2x16x16xf32>
    "tpu.trace_stop"() : () -> ()
    %123 = vector.broadcast %5 : vector<2x1x16xf32> to vector<2x16x16xf32>
    %124 = arith.subf %122, %123 : vector<2x16x16xf32>
    %cst_51 = arith.constant dense<0xFF800000> : vector<2x16xf32>
    %125 = vector.multi_reduction <maximumf>, %124, %cst_51 [2] : vector<2x16x16xf32> to vector<2x16xf32>
    %126 = vector.shape_cast %125 : vector<2x16xf32> to vector<2x16x1xf32>
    %127 = vector.broadcast %126 : vector<2x16x1xf32> to vector<2x16x16xf32>
    %128 = arith.subf %124, %127 : vector<2x16x16xf32>
    %129 = math.exp %128 : vector<2x16x16xf32>
    %cst_52 = arith.constant dense<0.000000e+00> : vector<2x16xf32>
    %130 = vector.multi_reduction <add>, %129, %cst_52 [2] : vector<2x16x16xf32> to vector<2x16xf32>
    %131 = vector.shape_cast %130 : vector<2x16xf32> to vector<2x16x1xf32>
    %132 = vector.broadcast %131 : vector<2x16x1xf32> to vector<2x16x16xf32>
    %133 = arith.divf %129, %132 : vector<2x16x16xf32>
    %134 = vector.extract_strided_slice %87 {offsets = [0, 0, 16], sizes = [2, 16, 8], strides = [1, 1, 1]} : vector<2x16x32xf32> to vector<2x16x8xf32>
    "tpu.trace_start"() <{level = 10 : i32, message = "bqk,bkd->bqd"}> : () -> ()
    %cst_53 = arith.constant dense<0.000000e+00> : vector<2x16x8xf32>
    %135 = tpu.matmul %133, %134, %cst_53 {dimension_numbers = #tpu.dot_dimension_numbers<[2], [1], [1], [2], [0, 0, 0, 1, 1, 2], [0], [0]>} : vector<2x16x16xf32>, vector<2x16x8xf32>, vector<2x16x8xf32> -> vector<2x16x8xf32>
    "tpu.trace_stop"() : () -> ()
    %136 = vector.extract_strided_slice %83 {offsets = [0, 0, 24], sizes = [2, 16, 8], strides = [1, 1, 1]} : vector<2x16x32xf32> to vector<2x16x8xf32>
    %137 = vector.extract_strided_slice %85 {offsets = [0, 0, 24], sizes = [2, 16, 8], strides = [1, 1, 1]} : vector<2x16x32xf32> to vector<2x16x8xf32>
    "tpu.trace_start"() <{level = 10 : i32, message = "bqd,bkd->bqk"}> : () -> ()
    %cst_54 = arith.constant dense<0.000000e+00> : vector<2x16x16xf32>
    %138 = tpu.matmul %136, %137, %cst_54 {dimension_numbers = #tpu.dot_dimension_numbers<[2], [2], [1], [1], [0, 0, 0, 1, 1, 1], [0], [0]>} : vector<2x16x8xf32>, vector<2x16x8xf32>, vector<2x16x16xf32> -> vector<2x16x16xf32>
    "tpu.trace_stop"() : () -> ()
    %139 = vector.broadcast %5 : vector<2x1x16xf32> to vector<2x16x16xf32>
    %140 = arith.subf %138, %139 : vector<2x16x16xf32>
    %cst_55 = arith.constant dense<0xFF800000> : vector<2x16xf32>
    %141 = vector.multi_reduction <maximumf>, %140, %cst_55 [2] : vector<2x16x16xf32> to vector<2x16xf32>
    %142 = vector.shape_cast %141 : vector<2x16xf32> to vector<2x16x1xf32>
    %143 = vector.broadcast %142 : vector<2x16x1xf32> to vector<2x16x16xf32>
    %144 = arith.subf %140, %143 : vector<2x16x16xf32>
    %145 = math.exp %144 : vector<2x16x16xf32>
    %cst_56 = arith.constant dense<0.000000e+00> : vector<2x16xf32>
    %146 = vector.multi_reduction <add>, %145, %cst_56 [2] : vector<2x16x16xf32> to vector<2x16xf32>
    %147 = vector.shape_cast %146 : vector<2x16xf32> to vector<2x16x1xf32>
    %148 = vector.broadcast %147 : vector<2x16x1xf32> to vector<2x16x16xf32>
    %149 = arith.divf %145, %148 : vector<2x16x16xf32>
    %150 = vector.extract_strided_slice %87 {offsets = [0, 0, 24], sizes = [2, 16, 8], strides = [1, 1, 1]} : vector<2x16x32xf32> to vector<2x16x8xf32>
    "tpu.trace_start"() <{level = 10 : i32, message = "bqk,bkd->bqd"}> : () -> ()
    %cst_57 = arith.constant dense<0.000000e+00> : vector<2x16x8xf32>
    %151 = tpu.matmul %149, %150, %cst_57 {dimension_numbers = #tpu.dot_dimension_numbers<[2], [1], [1], [2], [0, 0, 0, 1, 1, 2], [0], [0]>} : vector<2x16x16xf32>, vector<2x16x8xf32>, vector<2x16x8xf32> -> vector<2x16x8xf32>
    "tpu.trace_stop"() : () -> ()
    %152 = tpu.concatenate %103, %119, %135, %151 in 2 : vector<2x16x8xf32>, vector<2x16x8xf32>, vector<2x16x8xf32>, vector<2x16x8xf32> -> vector<2x16x32xf32>
    %153 = vector.shape_cast %152 : vector<2x16x32xf32> to vector<32x32xf32>
    %c0_58 = arith.constant 0 : index
    %c0_59 = arith.constant 0 : index
    %154 = vector.load %arg12[%c0_58, %c0_59] : memref<32x32xf32, #tpu.memory_space<vmem>>, vector<32x32xf32>
    %cst_60 = arith.constant dense<0.000000e+00> : vector<32x32xf32>
    %155 = tpu.matmul %153, %154, %cst_60 {dimension_numbers = #tpu.dot_dimension_numbers<[1], [0], [0], [1], [0, 0, 1, 1], [], []>} : vector<32x32xf32>, vector<32x32xf32>, vector<32x32xf32> -> vector<32x32xf32>
    %156 = arith.addf %50, %155 : vector<32x32xf32>
    %c0_61 = arith.constant 0 : index
    %c0_62 = arith.constant 0 : index
    %157 = vector.load %arg13[%c0_61, %c0_62] : memref<1x32xf32, #tpu.memory_space<vmem>>, vector<1x32xf32>
    %158 = vector.broadcast %157 : vector<1x32xf32> to vector<32x32xf32>
    %159 = arith.addf %156, %158 : vector<32x32xf32>
    %c0_63 = arith.constant 0 : index
    %c0_64 = arith.constant 0 : index
    %160 = vector.load %arg14[%c0_63, %c0_64] : memref<1x32xf32, #tpu.memory_space<vmem>>, vector<1x32xf32>
    %c0_65 = arith.constant 0 : index
    %c0_66 = arith.constant 0 : index
    %161 = vector.load %arg15[%c0_65, %c0_66] : memref<1x32xf32, #tpu.memory_space<vmem>>, vector<1x32xf32>
    %cst_67 = arith.constant dense<0.000000e+00> : vector<32xf32>
    %162 = vector.multi_reduction <add>, %159, %cst_67 [1] : vector<32x32xf32> to vector<32xf32>
    %163 = vector.shape_cast %162 : vector<32xf32> to vector<32x1xf32>
    %cst_68 = arith.constant 3.200000e+01 : f32
    %164 = vector.broadcast %cst_68 : f32 to vector<32x1xf32>
    %165 = arith.divf %163, %164 : vector<32x1xf32>
    %166 = vector.broadcast %165 : vector<32x1xf32> to vector<32x32xf32>
    %167 = arith.subf %159, %166 : vector<32x32xf32>
    %168 = arith.mulf %167, %167 : vector<32x32xf32>
    %cst_69 = arith.constant dense<0.000000e+00> : vector<32xf32>
    %169 = vector.multi_reduction <add>, %168, %cst_69 [1] : vector<32x32xf32> to vector<32xf32>
    %170 = vector.shape_cast %169 : vector<32xf32> to vector<32x1xf32>
    %cst_70 = arith.constant 3.200000e+01 : f32
    %171 = vector.broadcast %cst_70 : f32 to vector<32x1xf32>
    %172 = arith.divf %170, %171 : vector<32x1xf32>
    %173 = vector.broadcast %165 : vector<32x1xf32> to vector<32x32xf32>
    %174 = arith.subf %159, %173 : vector<32x32xf32>
    %cst_71 = arith.constant 9.99999974E-6 : f32
    %175 = vector.broadcast %cst_71 : f32 to vector<32x1xf32>
    %176 = arith.addf %172, %175 : vector<32x1xf32>
    %177 = math.rsqrt %176 : vector<32x1xf32>
    %178 = vector.broadcast %177 : vector<32x1xf32> to vector<32x32xf32>
    %179 = arith.mulf %174, %178 : vector<32x32xf32>
    %180 = vector.broadcast %160 : vector<1x32xf32> to vector<32x32xf32>
    %181 = arith.mulf %179, %180 : vector<32x32xf32>
    %182 = vector.broadcast %161 : vector<1x32xf32> to vector<32x32xf32>
    %183 = arith.addf %181, %182 : vector<32x32xf32>
    %c0_72 = arith.constant 0 : index
    %c0_73 = arith.constant 0 : index
    %184 = vector.load %arg16[%c0_72, %c0_73] : memref<32x64xf32, #tpu.memory_space<vmem>>, vector<32x64xf32>
    %cst_74 = arith.constant dense<0.000000e+00> : vector<32x64xf32>
    %185 = tpu.matmul %183, %184, %cst_74 {dimension_numbers = #tpu.dot_dimension_numbers<[1], [0], [0], [1], [0, 0, 1, 1], [], []>} : vector<32x32xf32>, vector<32x64xf32>, vector<32x64xf32> -> vector<32x64xf32>
    %c0_75 = arith.constant 0 : index
    %c0_76 = arith.constant 0 : index
    %186 = vector.load %arg17[%c0_75, %c0_76] : memref<1x64xf32, #tpu.memory_space<vmem>>, vector<1x64xf32>
    %187 = vector.broadcast %186 : vector<1x64xf32> to vector<32x64xf32>
    %188 = arith.addf %185, %187 : vector<32x64xf32>
    %189 = vector.extract_strided_slice %188 {offsets = [0, 0], sizes = [32, 32], strides = [1, 1]} : vector<32x64xf32> to vector<32x32xf32>
    %190 = vector.extract_strided_slice %188 {offsets = [0, 32], sizes = [32, 32], strides = [1, 1]} : vector<32x64xf32> to vector<32x32xf32>
    %cst_77 = arith.constant 0.000000e+00 : f32
    %191 = vector.broadcast %cst_77 : f32 to vector<32x32xf32>
    %192 = arith.subf %191, %190 : vector<32x32xf32>
    %193 = math.exp %192 : vector<32x32xf32>
    %cst_78 = arith.constant 1.000000e+00 : f32
    %194 = vector.broadcast %cst_78 : f32 to vector<32x32xf32>
    %195 = arith.addf %194, %193 : vector<32x32xf32>
    %cst_79 = arith.constant 1.000000e+00 : f32
    %196 = vector.broadcast %cst_79 : f32 to vector<32x32xf32>
    %197 = arith.divf %196, %195 : vector<32x32xf32>
    %198 = arith.mulf %189, %197 : vector<32x32xf32>
    %199 = vector.shape_cast %198 : vector<32x32xf32> to vector<2x16x32xf32>
    %cst_80 = arith.constant 0.000000e+00 : f32
    %200 = vector.broadcast %cst_80 : f32 to vector<2x3x32xf32>
    %201 = tpu.concatenate %200, %199, %200 in 1 : vector<2x3x32xf32>, vector<2x16x32xf32>, vector<2x3x32xf32> -> vector<2x22x32xf32>
    %c0_81 = arith.constant 0 : index
    %c0_82 = arith.constant 0 : index
    %c0_83 = arith.constant 0 : index
    %202 = vector.load %arg63[%c0_81, %c0_82, %c0_83] : memref<2x22x32xf32, #tpu.memory_space<vmem>>, vector<2x22x32xf32>
    tpu.vector_store %arg63[%c0_81, %c0_82, %c0_83], %201 {strides = array<i32>} : memref<2x22x32xf32, #tpu.memory_space<vmem>>, vector<2x22x32xf32>,
    %c0_84 = arith.constant 0 : index
    %c0_85 = arith.constant 0 : index
    %c0_86 = arith.constant 0 : index
    %203 = vector.load %arg18[%c0_84, %c0_85, %c0_86] : memref<7x1x32xf32, #tpu.memory_space<vmem>>, vector<7x1x32xf32>
    %cst_87 = arith.constant 0.000000e+00 : f32
    %204 = vector.broadcast %cst_87 : f32 to vector<2x16x32xf32>
    %c0_88 = arith.constant 0 : index
    %c0_89 = arith.constant 0 : index
    %c0_90 = arith.constant 0 : index
    %205 = vector.load %arg63[%c0_88, %c0_89, %c0_90] : memref<2x22x32xf32, #tpu.memory_space<vmem>>, vector<2x16x32xf32>
    %206 = vector.extract_strided_slice %203 {offsets = [0, 0, 0], sizes = [1, 1, 32], strides = [1, 1, 1]} : vector<7x1x32xf32> to vector<1x1x32xf32>
    %207 = vector.shape_cast %206 : vector<1x1x32xf32> to vector<1x32xf32>
    %208 = vector.shape_cast %207 : vector<1x32xf32> to vector<1x1x32xf32>
    %209 = vector.broadcast %208 : vector<1x1x32xf32> to vector<2x16x32xf32>
    %210 = arith.mulf %205, %209 : vector<2x16x32xf32>
    %211 = arith.addf %204, %210 : vector<2x16x32xf32>
    %c0_91 = arith.constant 0 : index
    %c1 = arith.constant 1 : index
    %c0_92 = arith.constant 0 : index
    %212 = vector.load %arg63[%c0_91, %c1, %c0_92] : memref<2x22x32xf32, #tpu.memory_space<vmem>>, vector<2x16x32xf32>
    %213 = vector.extract_strided_slice %203 {offsets = [1, 0, 0], sizes = [1, 1, 32], strides = [1, 1, 1]} : vector<7x1x32xf32> to vector<1x1x32xf32>
    %214 = vector.shape_cast %213 : vector<1x1x32xf32> to vector<1x32xf32>
    %215 = vector.shape_cast %214 : vector<1x32xf32> to vector<1x1x32xf32>
    %216 = vector.broadcast %215 : vector<1x1x32xf32> to vector<2x16x32xf32>
    %217 = arith.mulf %212, %216 : vector<2x16x32xf32>
    %218 = arith.addf %211, %217 : vector<2x16x32xf32>
    %c0_93 = arith.constant 0 : index
    %c2 = arith.constant 2 : index
    %c0_94 = arith.constant 0 : index
    %219 = vector.load %arg63[%c0_93, %c2, %c0_94] : memref<2x22x32xf32, #tpu.memory_space<vmem>>, vector<2x16x32xf32>
    %220 = vector.extract_strided_slice %203 {offsets = [2, 0, 0], sizes = [1, 1, 32], strides = [1, 1, 1]} : vector<7x1x32xf32> to vector<1x1x32xf32>
    %221 = vector.shape_cast %220 : vector<1x1x32xf32> to vector<1x32xf32>
    %222 = vector.shape_cast %221 : vector<1x32xf32> to vector<1x1x32xf32>
    %223 = vector.broadcast %222 : vector<1x1x32xf32> to vector<2x16x32xf32>
    %224 = arith.mulf %219, %223 : vector<2x16x32xf32>
    %225 = arith.addf %218, %224 : vector<2x16x32xf32>
    %c0_95 = arith.constant 0 : index
    %c3 = arith.constant 3 : index
    %c0_96 = arith.constant 0 : index
    %226 = vector.load %arg63[%c0_95, %c3, %c0_96] : memref<2x22x32xf32, #tpu.memory_space<vmem>>, vector<2x16x32xf32>
    %227 = vector.extract_strided_slice %203 {offsets = [3, 0, 0], sizes = [1, 1, 32], strides = [1, 1, 1]} : vector<7x1x32xf32> to vector<1x1x32xf32>
    %228 = vector.shape_cast %227 : vector<1x1x32xf32> to vector<1x32xf32>
    %229 = vector.shape_cast %228 : vector<1x32xf32> to vector<1x1x32xf32>
    %230 = vector.broadcast %229 : vector<1x1x32xf32> to vector<2x16x32xf32>
    %231 = arith.mulf %226, %230 : vector<2x16x32xf32>
    %232 = arith.addf %225, %231 : vector<2x16x32xf32>
    %c0_97 = arith.constant 0 : index
    %c4 = arith.constant 4 : index
    %c0_98 = arith.constant 0 : index
    %233 = vector.load %arg63[%c0_97, %c4, %c0_98] : memref<2x22x32xf32, #tpu.memory_space<vmem>>, vector<2x16x32xf32>
    %234 = vector.extract_strided_slice %203 {offsets = [4, 0, 0], sizes = [1, 1, 32], strides = [1, 1, 1]} : vector<7x1x32xf32> to vector<1x1x32xf32>
    %235 = vector.shape_cast %234 : vector<1x1x32xf32> to vector<1x32xf32>
    %236 = vector.shape_cast %235 : vector<1x32xf32> to vector<1x1x32xf32>
    %237 = vector.broadcast %236 : vector<1x1x32xf32> to vector<2x16x32xf32>
    %238 = arith.mulf %233, %237 : vector<2x16x32xf32>
    %239 = arith.addf %232, %238 : vector<2x16x32xf32>
    %c0_99 = arith.constant 0 : index
    %c5 = arith.constant 5 : index
    %c0_100 = arith.constant 0 : index
    %240 = vector.load %arg63[%c0_99, %c5, %c0_100] : memref<2x22x32xf32, #tpu.memory_space<vmem>>, vector<2x16x32xf32>
    %241 = vector.extract_strided_slice %203 {offsets = [5, 0, 0], sizes = [1, 1, 32], strides = [1, 1, 1]} : vector<7x1x32xf32> to vector<1x1x32xf32>
    %242 = vector.shape_cast %241 : vector<1x1x32xf32> to vector<1x32xf32>
    %243 = vector.shape_cast %242 : vector<1x32xf32> to vector<1x1x32xf32>
    %244 = vector.broadcast %243 : vector<1x1x32xf32> to vector<2x16x32xf32>
    %245 = arith.mulf %240, %244 : vector<2x16x32xf32>
    %246 = arith.addf %239, %245 : vector<2x16x32xf32>
    %c0_101 = arith.constant 0 : index
    %c6 = arith.constant 6 : index
    %c0_102 = arith.constant 0 : index
    %247 = vector.load %arg63[%c0_101, %c6, %c0_102] : memref<2x22x32xf32, #tpu.memory_space<vmem>>, vector<2x16x32xf32>
    %248 = vector.extract_strided_slice %203 {offsets = [6, 0, 0], sizes = [1, 1, 32], strides = [1, 1, 1]} : vector<7x1x32xf32> to vector<1x1x32xf32>
    %249 = vector.shape_cast %248 : vector<1x1x32xf32> to vector<1x32xf32>
    %250 = vector.shape_cast %249 : vector<1x32xf32> to vector<1x1x32xf32>
    %251 = vector.broadcast %250 : vector<1x1x32xf32> to vector<2x16x32xf32>
    %252 = arith.mulf %247, %251 : vector<2x16x32xf32>
    %253 = arith.addf %246, %252 : vector<2x16x32xf32>
    %c0_103 = arith.constant 0 : index
    %c0_104 = arith.constant 0 : index
    %254 = vector.load %arg19[%c0_103, %c0_104] : memref<1x32xf32, #tpu.memory_space<vmem>>, vector<1x32xf32>
    %255 = vector.shape_cast %254 : vector<1x32xf32> to vector<1x1x32xf32>
    %256 = vector.broadcast %255 : vector<1x1x32xf32> to vector<2x16x32xf32>
    %257 = arith.addf %253, %256 : vector<2x16x32xf32>
    %258 = vector.shape_cast %257 : vector<2x16x32xf32> to vector<32x32xf32>
    %cst_105 = arith.constant dense<0.000000e+00> : vector<32xf32>
    %259 = vector.multi_reduction <add>, %258, %cst_105 [0] : vector<32x32xf32> to vector<32xf32>
    %260 = vector.shape_cast %259 : vector<32xf32> to vector<1x32xf32>
    %cst_106 = arith.constant 3.200000e+01 : f32
    %261 = vector.broadcast %cst_106 : f32 to vector<1x32xf32>
    %262 = arith.divf %260, %261 : vector<1x32xf32>
    %263 = vector.broadcast %262 : vector<1x32xf32> to vector<32x32xf32>
    %264 = arith.subf %258, %263 : vector<32x32xf32>
    %265 = arith.mulf %264, %264 : vector<32x32xf32>
    %cst_107 = arith.constant dense<0.000000e+00> : vector<32xf32>
    %266 = vector.multi_reduction <add>, %265, %cst_107 [0] : vector<32x32xf32> to vector<32xf32>
    %267 = vector.shape_cast %266 : vector<32xf32> to vector<1x32xf32>
    %cst_108 = arith.constant 3.200000e+01 : f32
    %268 = vector.broadcast %cst_108 : f32 to vector<1x32xf32>
    %269 = arith.divf %267, %268 : vector<1x32xf32>
    %270 = vector.broadcast %262 : vector<1x32xf32> to vector<32x32xf32>
    %271 = arith.subf %258, %270 : vector<32x32xf32>
    %cst_109 = arith.constant 9.99999974E-6 : f32
    %272 = vector.broadcast %cst_109 : f32 to vector<1x32xf32>
    %273 = arith.addf %269, %272 : vector<1x32xf32>
    %274 = math.rsqrt %273 : vector<1x32xf32>
    %275 = vector.broadcast %274 : vector<1x32xf32> to vector<32x32xf32>
    %276 = arith.mulf %271, %275 : vector<32x32xf32>
    %c0_110 = arith.constant 0 : index
    %c0_111 = arith.constant 0 : index
    %277 = vector.load %arg20[%c0_110, %c0_111] : memref<1x32xf32, #tpu.memory_space<vmem>>, vector<1x32xf32>
    %278 = vector.broadcast %277 : vector<1x32xf32> to vector<32x32xf32>
    %279 = arith.mulf %276, %278 : vector<32x32xf32>
    %c0_112 = arith.constant 0 : index
    %c0_113 = arith.constant 0 : index
    %280 = vector.load %arg21[%c0_112, %c0_113] : memref<1x32xf32, #tpu.memory_space<vmem>>, vector<1x32xf32>
    %281 = vector.broadcast %280 : vector<1x32xf32> to vector<32x32xf32>
    %282 = arith.addf %279, %281 : vector<32x32xf32>
    %cst_114 = arith.constant 0.000000e+00 : f32
    %283 = vector.broadcast %cst_114 : f32 to vector<32x32xf32>
    %284 = arith.subf %283, %282 : vector<32x32xf32>
    %285 = math.exp %284 : vector<32x32xf32>
    %cst_115 = arith.constant 1.000000e+00 : f32
    %286 = vector.broadcast %cst_115 : f32 to vector<32x32xf32>
    %287 = arith.addf %286, %285 : vector<32x32xf32>
    %cst_116 = arith.constant 1.000000e+00 : f32
    %288 = vector.broadcast %cst_116 : f32 to vector<32x32xf32>
    %289 = arith.divf %288, %287 : vector<32x32xf32>
    %290 = arith.mulf %282, %289 : vector<32x32xf32>
    %c0_117 = arith.constant 0 : index
    %c0_118 = arith.constant 0 : index
    %291 = vector.load %arg22[%c0_117, %c0_118] : memref<32x32xf32, #tpu.memory_space<vmem>>, vector<32x32xf32>
    %cst_119 = arith.constant dense<0.000000e+00> : vector<32x32xf32>
    %292 = tpu.matmul %290, %291, %cst_119 {dimension_numbers = #tpu.dot_dimension_numbers<[1], [0], [0], [1], [0, 0, 1, 1], [], []>} : vector<32x32xf32>, vector<32x32xf32>, vector<32x32xf32> -> vector<32x32xf32>
    %293 = arith.addf %159, %292 : vector<32x32xf32>
    %c0_120 = arith.constant 0 : index
    %c0_121 = arith.constant 0 : index
    %294 = vector.load %arg23[%c0_120, %c0_121] : memref<1x32xf32, #tpu.memory_space<vmem>>, vector<1x32xf32>
    %295 = vector.broadcast %294 : vector<1x32xf32> to vector<32x32xf32>
    %296 = arith.addf %293, %295 : vector<32x32xf32>
    %c0_122 = arith.constant 0 : index
    %c0_123 = arith.constant 0 : index
    %297 = vector.load %arg24[%c0_122, %c0_123] : memref<1x32xf32, #tpu.memory_space<vmem>>, vector<1x32xf32>
    %c0_124 = arith.constant 0 : index
    %c0_125 = arith.constant 0 : index
    %298 = vector.load %arg25[%c0_124, %c0_125] : memref<1x32xf32, #tpu.memory_space<vmem>>, vector<1x32xf32>
    %cst_126 = arith.constant dense<0.000000e+00> : vector<32xf32>
    %299 = vector.multi_reduction <add>, %296, %cst_126 [1] : vector<32x32xf32> to vector<32xf32>
    %300 = vector.shape_cast %299 : vector<32xf32> to vector<32x1xf32>
    %cst_127 = arith.constant 3.200000e+01 : f32
    %301 = vector.broadcast %cst_127 : f32 to vector<32x1xf32>
    %302 = arith.divf %300, %301 : vector<32x1xf32>
    %303 = vector.broadcast %302 : vector<32x1xf32> to vector<32x32xf32>
    %304 = arith.subf %296, %303 : vector<32x32xf32>
    %305 = arith.mulf %304, %304 : vector<32x32xf32>
    %cst_128 = arith.constant dense<0.000000e+00> : vector<32xf32>
    %306 = vector.multi_reduction <add>, %305, %cst_128 [1] : vector<32x32xf32> to vector<32xf32>
    %307 = vector.shape_cast %306 : vector<32xf32> to vector<32x1xf32>
    %cst_129 = arith.constant 3.200000e+01 : f32
    %308 = vector.broadcast %cst_129 : f32 to vector<32x1xf32>
    %309 = arith.divf %307, %308 : vector<32x1xf32>
    %310 = vector.broadcast %302 : vector<32x1xf32> to vector<32x32xf32>
    %311 = arith.subf %296, %310 : vector<32x32xf32>
    %cst_130 = arith.constant 9.99999974E-6 : f32
    %312 = vector.broadcast %cst_130 : f32 to vector<32x1xf32>
    %313 = arith.addf %309, %312 : vector<32x1xf32>
    %314 = math.rsqrt %313 : vector<32x1xf32>
    %315 = vector.broadcast %314 : vector<32x1xf32> to vector<32x32xf32>
    %316 = arith.mulf %311, %315 : vector<32x32xf32>
    %317 = vector.broadcast %297 : vector<1x32xf32> to vector<32x32xf32>
    %318 = arith.mulf %316, %317 : vector<32x32xf32>
    %319 = vector.broadcast %298 : vector<1x32xf32> to vector<32x32xf32>
    %320 = arith.addf %318, %319 : vector<32x32xf32>
    %c0_131 = arith.constant 0 : index
    %c0_132 = arith.constant 0 : index
    %321 = vector.load %arg26[%c0_131, %c0_132] : memref<32x64xf32, #tpu.memory_space<vmem>>, vector<32x64xf32>
    %cst_133 = arith.constant dense<0.000000e+00> : vector<32x64xf32>
    %322 = tpu.matmul %320, %321, %cst_133 {dimension_numbers = #tpu.dot_dimension_numbers<[1], [0], [0], [1], [0, 0, 1, 1], [], []>} : vector<32x32xf32>, vector<32x64xf32>, vector<32x64xf32> -> vector<32x64xf32>
    %c0_134 = arith.constant 0 : index
    %c0_135 = arith.constant 0 : index
    %323 = vector.load %arg27[%c0_134, %c0_135] : memref<1x64xf32, #tpu.memory_space<vmem>>, vector<1x64xf32>
    %324 = vector.broadcast %323 : vector<1x64xf32> to vector<32x64xf32>
    %325 = arith.addf %322, %324 : vector<32x64xf32>
    %cst_136 = arith.constant 0.000000e+00 : f32
    %326 = vector.broadcast %cst_136 : f32 to vector<32x64xf32>
    %327 = arith.subf %326, %325 : vector<32x64xf32>
    %328 = math.exp %327 : vector<32x64xf32>
    %cst_137 = arith.constant 1.000000e+00 : f32
    %329 = vector.broadcast %cst_137 : f32 to vector<32x64xf32>
    %330 = arith.addf %329, %328 : vector<32x64xf32>
    %cst_138 = arith.constant 1.000000e+00 : f32
    %331 = vector.broadcast %cst_138 : f32 to vector<32x64xf32>
    %332 = arith.divf %331, %330 : vector<32x64xf32>
    %333 = arith.mulf %325, %332 : vector<32x64xf32>
    %c0_139 = arith.constant 0 : index
    %c0_140 = arith.constant 0 : index
    %334 = vector.load %arg28[%c0_139, %c0_140] : memref<64x32xf32, #tpu.memory_space<vmem>>, vector<64x32xf32>
    %cst_141 = arith.constant dense<0.000000e+00> : vector<32x32xf32>
    %335 = tpu.matmul %333, %334, %cst_141 {dimension_numbers = #tpu.dot_dimension_numbers<[1], [0], [0], [1], [0, 0, 1, 1], [], []>} : vector<32x64xf32>, vector<64x32xf32>, vector<32x32xf32> -> vector<32x32xf32>
    %c0_142 = arith.constant 0 : index
    %c0_143 = arith.constant 0 : index
    %336 = vector.load %arg29[%c0_142, %c0_143] : memref<1x32xf32, #tpu.memory_space<vmem>>, vector<1x32xf32>
    %337 = vector.broadcast %336 : vector<1x32xf32> to vector<32x32xf32>
    %338 = arith.addf %335, %337 : vector<32x32xf32>
    %cst_144 = arith.constant 5.000000e-01 : f32
    %339 = vector.broadcast %cst_144 : f32 to vector<32x32xf32>
    %340 = arith.mulf %339, %338 : vector<32x32xf32>
    %341 = arith.addf %340, %296 : vector<32x32xf32>
    %c0_145 = arith.constant 0 : index
    %c0_146 = arith.constant 0 : index
    %342 = vector.load %arg30[%c0_145, %c0_146] : memref<1x32xf32, #tpu.memory_space<vmem>>, vector<1x32xf32>
    %c0_147 = arith.constant 0 : index
    %c0_148 = arith.constant 0 : index
    %343 = vector.load %arg31[%c0_147, %c0_148] : memref<1x32xf32, #tpu.memory_space<vmem>>, vector<1x32xf32>
    %cst_149 = arith.constant dense<0.000000e+00> : vector<32xf32>
    %344 = vector.multi_reduction <add>, %341, %cst_149 [1] : vector<32x32xf32> to vector<32xf32>
    %345 = vector.shape_cast %344 : vector<32xf32> to vector<32x1xf32>
    %cst_150 = arith.constant 3.200000e+01 : f32
    %346 = vector.broadcast %cst_150 : f32 to vector<32x1xf32>
    %347 = arith.divf %345, %346 : vector<32x1xf32>
    %348 = vector.broadcast %347 : vector<32x1xf32> to vector<32x32xf32>
    %349 = arith.subf %341, %348 : vector<32x32xf32>
    %350 = arith.mulf %349, %349 : vector<32x32xf32>
    %cst_151 = arith.constant dense<0.000000e+00> : vector<32xf32>
    %351 = vector.multi_reduction <add>, %350, %cst_151 [1] : vector<32x32xf32> to vector<32xf32>
    %352 = vector.shape_cast %351 : vector<32xf32> to vector<32x1xf32>
    %cst_152 = arith.constant 3.200000e+01 : f32
    %353 = vector.broadcast %cst_152 : f32 to vector<32x1xf32>
    %354 = arith.divf %352, %353 : vector<32x1xf32>
    %355 = vector.broadcast %347 : vector<32x1xf32> to vector<32x32xf32>
    %356 = arith.subf %341, %355 : vector<32x32xf32>
    %cst_153 = arith.constant 9.99999974E-6 : f32
    %357 = vector.broadcast %cst_153 : f32 to vector<32x1xf32>
    %358 = arith.addf %354, %357 : vector<32x1xf32>
    %359 = math.rsqrt %358 : vector<32x1xf32>
    %360 = vector.broadcast %359 : vector<32x1xf32> to vector<32x32xf32>
    %361 = arith.mulf %356, %360 : vector<32x32xf32>
    %362 = vector.broadcast %342 : vector<1x32xf32> to vector<32x32xf32>
    %363 = arith.mulf %361, %362 : vector<32x32xf32>
    %364 = vector.broadcast %343 : vector<1x32xf32> to vector<32x32xf32>
    %365 = arith.addf %363, %364 : vector<32x32xf32>
    %c0_154 = arith.constant 0 : index
    %c0_155 = arith.constant 0 : index
    %366 = vector.load %arg32[%c0_154, %c0_155] : memref<1x32xf32, #tpu.memory_space<vmem>>, vector<1x32xf32>
    %c0_156 = arith.constant 0 : index
    %c0_157 = arith.constant 0 : index
    %367 = vector.load %arg33[%c0_156, %c0_157] : memref<1x32xf32, #tpu.memory_space<vmem>>, vector<1x32xf32>
    %cst_158 = arith.constant dense<0.000000e+00> : vector<32xf32>
    %368 = vector.multi_reduction <add>, %365, %cst_158 [1] : vector<32x32xf32> to vector<32xf32>
    %369 = vector.shape_cast %368 : vector<32xf32> to vector<32x1xf32>
    %cst_159 = arith.constant 3.200000e+01 : f32
    %370 = vector.broadcast %cst_159 : f32 to vector<32x1xf32>
    %371 = arith.divf %369, %370 : vector<32x1xf32>
    %372 = vector.broadcast %371 : vector<32x1xf32> to vector<32x32xf32>
    %373 = arith.subf %365, %372 : vector<32x32xf32>
    %374 = arith.mulf %373, %373 : vector<32x32xf32>
    %cst_160 = arith.constant dense<0.000000e+00> : vector<32xf32>
    %375 = vector.multi_reduction <add>, %374, %cst_160 [1] : vector<32x32xf32> to vector<32xf32>
    %376 = vector.shape_cast %375 : vector<32xf32> to vector<32x1xf32>
    %cst_161 = arith.constant 3.200000e+01 : f32
    %377 = vector.broadcast %cst_161 : f32 to vector<32x1xf32>
    %378 = arith.divf %376, %377 : vector<32x1xf32>
    %379 = vector.broadcast %371 : vector<32x1xf32> to vector<32x32xf32>
    %380 = arith.subf %365, %379 : vector<32x32xf32>
    %cst_162 = arith.constant 9.99999974E-6 : f32
    %381 = vector.broadcast %cst_162 : f32 to vector<32x1xf32>
    %382 = arith.addf %378, %381 : vector<32x1xf32>
    %383 = math.rsqrt %382 : vector<32x1xf32>
    %384 = vector.broadcast %383 : vector<32x1xf32> to vector<32x32xf32>
    %385 = arith.mulf %380, %384 : vector<32x32xf32>
    %386 = vector.broadcast %366 : vector<1x32xf32> to vector<32x32xf32>
    %387 = arith.mulf %385, %386 : vector<32x32xf32>
    %388 = vector.broadcast %367 : vector<1x32xf32> to vector<32x32xf32>
    %389 = arith.addf %387, %388 : vector<32x32xf32>
    %c0_163 = arith.constant 0 : index
    %c0_164 = arith.constant 0 : index
    %390 = vector.load %arg34[%c0_163, %c0_164] : memref<32x64xf32, #tpu.memory_space<vmem>>, vector<32x64xf32>
    %cst_165 = arith.constant dense<0.000000e+00> : vector<32x64xf32>
    %391 = tpu.matmul %389, %390, %cst_165 {dimension_numbers = #tpu.dot_dimension_numbers<[1], [0], [0], [1], [0, 0, 1, 1], [], []>} : vector<32x32xf32>, vector<32x64xf32>, vector<32x64xf32> -> vector<32x64xf32>
    %c0_166 = arith.constant 0 : index
    %c0_167 = arith.constant 0 : index
    %392 = vector.load %arg35[%c0_166, %c0_167] : memref<1x64xf32, #tpu.memory_space<vmem>>, vector<1x64xf32>
    %393 = vector.broadcast %392 : vector<1x64xf32> to vector<32x64xf32>
    %394 = arith.addf %391, %393 : vector<32x64xf32>
    %cst_168 = arith.constant 0.000000e+00 : f32
    %395 = vector.broadcast %cst_168 : f32 to vector<32x64xf32>
    %396 = arith.subf %395, %394 : vector<32x64xf32>
    %397 = math.exp %396 : vector<32x64xf32>
    %cst_169 = arith.constant 1.000000e+00 : f32
    %398 = vector.broadcast %cst_169 : f32 to vector<32x64xf32>
    %399 = arith.addf %398, %397 : vector<32x64xf32>
    %cst_170 = arith.constant 1.000000e+00 : f32
    %400 = vector.broadcast %cst_170 : f32 to vector<32x64xf32>
    %401 = arith.divf %400, %399 : vector<32x64xf32>
    %402 = arith.mulf %394, %401 : vector<32x64xf32>
    %c0_171 = arith.constant 0 : index
    %c0_172 = arith.constant 0 : index
    %403 = vector.load %arg36[%c0_171, %c0_172] : memref<64x32xf32, #tpu.memory_space<vmem>>, vector<64x32xf32>
    %cst_173 = arith.constant dense<0.000000e+00> : vector<32x32xf32>
    %404 = tpu.matmul %402, %403, %cst_173 {dimension_numbers = #tpu.dot_dimension_numbers<[1], [0], [0], [1], [0, 0, 1, 1], [], []>} : vector<32x64xf32>, vector<64x32xf32>, vector<32x32xf32> -> vector<32x32xf32>
    %c0_174 = arith.constant 0 : index
    %c0_175 = arith.constant 0 : index
    %405 = vector.load %arg37[%c0_174, %c0_175] : memref<1x32xf32, #tpu.memory_space<vmem>>, vector<1x32xf32>
    %406 = vector.broadcast %405 : vector<1x32xf32> to vector<32x32xf32>
    %407 = arith.addf %404, %406 : vector<32x32xf32>
    %cst_176 = arith.constant 5.000000e-01 : f32
    %408 = vector.broadcast %cst_176 : f32 to vector<32x32xf32>
    %409 = arith.mulf %408, %407 : vector<32x32xf32>
    %410 = arith.addf %409, %365 : vector<32x32xf32>
    %c0_177 = arith.constant 0 : index
    %c0_178 = arith.constant 0 : index
    %411 = vector.load %arg38[%c0_177, %c0_178] : memref<1x32xf32, #tpu.memory_space<vmem>>, vector<1x32xf32>
    %c0_179 = arith.constant 0 : index
    %c0_180 = arith.constant 0 : index
    %412 = vector.load %arg39[%c0_179, %c0_180] : memref<1x32xf32, #tpu.memory_space<vmem>>, vector<1x32xf32>
    %cst_181 = arith.constant dense<0.000000e+00> : vector<32xf32>
    %413 = vector.multi_reduction <add>, %410, %cst_181 [1] : vector<32x32xf32> to vector<32xf32>
    %414 = vector.shape_cast %413 : vector<32xf32> to vector<32x1xf32>
    %cst_182 = arith.constant 3.200000e+01 : f32
    %415 = vector.broadcast %cst_182 : f32 to vector<32x1xf32>
    %416 = arith.divf %414, %415 : vector<32x1xf32>
    %417 = vector.broadcast %416 : vector<32x1xf32> to vector<32x32xf32>
    %418 = arith.subf %410, %417 : vector<32x32xf32>
    %419 = arith.mulf %418, %418 : vector<32x32xf32>
    %cst_183 = arith.constant dense<0.000000e+00> : vector<32xf32>
    %420 = vector.multi_reduction <add>, %419, %cst_183 [1] : vector<32x32xf32> to vector<32xf32>
    %421 = vector.shape_cast %420 : vector<32xf32> to vector<32x1xf32>
    %cst_184 = arith.constant 3.200000e+01 : f32
    %422 = vector.broadcast %cst_184 : f32 to vector<32x1xf32>
    %423 = arith.divf %421, %422 : vector<32x1xf32>
    %424 = vector.broadcast %416 : vector<32x1xf32> to vector<32x32xf32>
    %425 = arith.subf %410, %424 : vector<32x32xf32>
    %cst_185 = arith.constant 9.99999974E-6 : f32
    %426 = vector.broadcast %cst_185 : f32 to vector<32x1xf32>
    %427 = arith.addf %423, %426 : vector<32x1xf32>
    %428 = math.rsqrt %427 : vector<32x1xf32>
    %429 = vector.broadcast %428 : vector<32x1xf32> to vector<32x32xf32>
    %430 = arith.mulf %425, %429 : vector<32x32xf32>
    %431 = vector.broadcast %411 : vector<1x32xf32> to vector<32x32xf32>
    %432 = arith.mulf %430, %431 : vector<32x32xf32>
    %433 = vector.broadcast %412 : vector<1x32xf32> to vector<32x32xf32>
    %434 = arith.addf %432, %433 : vector<32x32xf32>
    %c0_186 = arith.constant 0 : index
    %c0_187 = arith.constant 0 : index
    %435 = vector.load %arg40[%c0_186, %c0_187] : memref<32x96xf32, #tpu.memory_space<vmem>>, vector<32x96xf32>
    %cst_188 = arith.constant dense<0.000000e+00> : vector<32x96xf32>
    %436 = tpu.matmul %434, %435, %cst_188 {dimension_numbers = #tpu.dot_dimension_numbers<[1], [0], [0], [1], [0, 0, 1, 1], [], []>} : vector<32x32xf32>, vector<32x96xf32>, vector<32x96xf32> -> vector<32x96xf32>
    %c0_189 = arith.constant 0 : index
    %c0_190 = arith.constant 0 : index
    %437 = vector.load %arg41[%c0_189, %c0_190] : memref<1x96xf32, #tpu.memory_space<vmem>>, vector<1x96xf32>
    %438 = vector.broadcast %437 : vector<1x96xf32> to vector<32x96xf32>
    %439 = arith.addf %436, %438 : vector<32x96xf32>
    %440 = vector.extract_strided_slice %439 {offsets = [0, 0], sizes = [32, 32], strides = [1, 1]} : vector<32x96xf32> to vector<32x32xf32>
    %cst_191 = arith.constant 0.353553385 : f32
    %441 = vector.broadcast %cst_191 : f32 to vector<32x32xf32>
    %442 = arith.mulf %440, %441 : vector<32x32xf32>
    %443 = vector.shape_cast %442 : vector<32x32xf32> to vector<2x16x32xf32>
    %444 = vector.extract_strided_slice %439 {offsets = [0, 32], sizes = [32, 32], strides = [1, 1]} : vector<32x96xf32> to vector<32x32xf32>
    %445 = vector.shape_cast %444 : vector<32x32xf32> to vector<2x16x32xf32>
    %446 = vector.extract_strided_slice %439 {offsets = [0, 64], sizes = [32, 32], strides = [1, 1]} : vector<32x96xf32> to vector<32x32xf32>
    %447 = vector.shape_cast %446 : vector<32x32xf32> to vector<2x16x32xf32>
    %448 = vector.extract_strided_slice %443 {offsets = [0, 0, 0], sizes = [2, 16, 8], strides = [1, 1, 1]} : vector<2x16x32xf32> to vector<2x16x8xf32>
    %449 = vector.extract_strided_slice %445 {offsets = [0, 0, 0], sizes = [2, 16, 8], strides = [1, 1, 1]} : vector<2x16x32xf32> to vector<2x16x8xf32>
    "tpu.trace_start"() <{level = 10 : i32, message = "bqd,bkd->bqk"}> : () -> ()
    %cst_192 = arith.constant dense<0.000000e+00> : vector<2x16x16xf32>
    %450 = tpu.matmul %448, %449, %cst_192 {dimension_numbers = #tpu.dot_dimension_numbers<[2], [2], [1], [1], [0, 0, 0, 1, 1, 1], [0], [0]>} : vector<2x16x8xf32>, vector<2x16x8xf32>, vector<2x16x16xf32> -> vector<2x16x16xf32>
    "tpu.trace_stop"() : () -> ()
    %451 = vector.broadcast %5 : vector<2x1x16xf32> to vector<2x16x16xf32>
    %452 = arith.subf %450, %451 : vector<2x16x16xf32>
    %cst_193 = arith.constant dense<0xFF800000> : vector<2x16xf32>
    %453 = vector.multi_reduction <maximumf>, %452, %cst_193 [2] : vector<2x16x16xf32> to vector<2x16xf32>
    %454 = vector.shape_cast %453 : vector<2x16xf32> to vector<2x16x1xf32>
    %455 = vector.broadcast %454 : vector<2x16x1xf32> to vector<2x16x16xf32>
    %456 = arith.subf %452, %455 : vector<2x16x16xf32>
    %457 = math.exp %456 : vector<2x16x16xf32>
    %cst_194 = arith.constant dense<0.000000e+00> : vector<2x16xf32>
    %458 = vector.multi_reduction <add>, %457, %cst_194 [2] : vector<2x16x16xf32> to vector<2x16xf32>
    %459 = vector.shape_cast %458 : vector<2x16xf32> to vector<2x16x1xf32>
    %460 = vector.broadcast %459 : vector<2x16x1xf32> to vector<2x16x16xf32>
    %461 = arith.divf %457, %460 : vector<2x16x16xf32>
    %462 = vector.extract_strided_slice %447 {offsets = [0, 0, 0], sizes = [2, 16, 8], strides = [1, 1, 1]} : vector<2x16x32xf32> to vector<2x16x8xf32>
    "tpu.trace_start"() <{level = 10 : i32, message = "bqk,bkd->bqd"}> : () -> ()
    %cst_195 = arith.constant dense<0.000000e+00> : vector<2x16x8xf32>
    %463 = tpu.matmul %461, %462, %cst_195 {dimension_numbers = #tpu.dot_dimension_numbers<[2], [1], [1], [2], [0, 0, 0, 1, 1, 2], [0], [0]>} : vector<2x16x16xf32>, vector<2x16x8xf32>, vector<2x16x8xf32> -> vector<2x16x8xf32>
    "tpu.trace_stop"() : () -> ()
    %464 = vector.extract_strided_slice %443 {offsets = [0, 0, 8], sizes = [2, 16, 8], strides = [1, 1, 1]} : vector<2x16x32xf32> to vector<2x16x8xf32>
    %465 = vector.extract_strided_slice %445 {offsets = [0, 0, 8], sizes = [2, 16, 8], strides = [1, 1, 1]} : vector<2x16x32xf32> to vector<2x16x8xf32>
    "tpu.trace_start"() <{level = 10 : i32, message = "bqd,bkd->bqk"}> : () -> ()
    %cst_196 = arith.constant dense<0.000000e+00> : vector<2x16x16xf32>
    %466 = tpu.matmul %464, %465, %cst_196 {dimension_numbers = #tpu.dot_dimension_numbers<[2], [2], [1], [1], [0, 0, 0, 1, 1, 1], [0], [0]>} : vector<2x16x8xf32>, vector<2x16x8xf32>, vector<2x16x16xf32> -> vector<2x16x16xf32>
    "tpu.trace_stop"() : () -> ()
    %467 = vector.broadcast %5 : vector<2x1x16xf32> to vector<2x16x16xf32>
    %468 = arith.subf %466, %467 : vector<2x16x16xf32>
    %cst_197 = arith.constant dense<0xFF800000> : vector<2x16xf32>
    %469 = vector.multi_reduction <maximumf>, %468, %cst_197 [2] : vector<2x16x16xf32> to vector<2x16xf32>
    %470 = vector.shape_cast %469 : vector<2x16xf32> to vector<2x16x1xf32>
    %471 = vector.broadcast %470 : vector<2x16x1xf32> to vector<2x16x16xf32>
    %472 = arith.subf %468, %471 : vector<2x16x16xf32>
    %473 = math.exp %472 : vector<2x16x16xf32>
    %cst_198 = arith.constant dense<0.000000e+00> : vector<2x16xf32>
    %474 = vector.multi_reduction <add>, %473, %cst_198 [2] : vector<2x16x16xf32> to vector<2x16xf32>
    %475 = vector.shape_cast %474 : vector<2x16xf32> to vector<2x16x1xf32>
    %476 = vector.broadcast %475 : vector<2x16x1xf32> to vector<2x16x16xf32>
    %477 = arith.divf %473, %476 : vector<2x16x16xf32>
    %478 = vector.extract_strided_slice %447 {offsets = [0, 0, 8], sizes = [2, 16, 8], strides = [1, 1, 1]} : vector<2x16x32xf32> to vector<2x16x8xf32>
    "tpu.trace_start"() <{level = 10 : i32, message = "bqk,bkd->bqd"}> : () -> ()
    %cst_199 = arith.constant dense<0.000000e+00> : vector<2x16x8xf32>
    %479 = tpu.matmul %477, %478, %cst_199 {dimension_numbers = #tpu.dot_dimension_numbers<[2], [1], [1], [2], [0, 0, 0, 1, 1, 2], [0], [0]>} : vector<2x16x16xf32>, vector<2x16x8xf32>, vector<2x16x8xf32> -> vector<2x16x8xf32>
    "tpu.trace_stop"() : () -> ()
    %480 = vector.extract_strided_slice %443 {offsets = [0, 0, 16], sizes = [2, 16, 8], strides = [1, 1, 1]} : vector<2x16x32xf32> to vector<2x16x8xf32>
    %481 = vector.extract_strided_slice %445 {offsets = [0, 0, 16], sizes = [2, 16, 8], strides = [1, 1, 1]} : vector<2x16x32xf32> to vector<2x16x8xf32>
    "tpu.trace_start"() <{level = 10 : i32, message = "bqd,bkd->bqk"}> : () -> ()
    %cst_200 = arith.constant dense<0.000000e+00> : vector<2x16x16xf32>
    %482 = tpu.matmul %480, %481, %cst_200 {dimension_numbers = #tpu.dot_dimension_numbers<[2], [2], [1], [1], [0, 0, 0, 1, 1, 1], [0], [0]>} : vector<2x16x8xf32>, vector<2x16x8xf32>, vector<2x16x16xf32> -> vector<2x16x16xf32>
    "tpu.trace_stop"() : () -> ()
    %483 = vector.broadcast %5 : vector<2x1x16xf32> to vector<2x16x16xf32>
    %484 = arith.subf %482, %483 : vector<2x16x16xf32>
    %cst_201 = arith.constant dense<0xFF800000> : vector<2x16xf32>
    %485 = vector.multi_reduction <maximumf>, %484, %cst_201 [2] : vector<2x16x16xf32> to vector<2x16xf32>
    %486 = vector.shape_cast %485 : vector<2x16xf32> to vector<2x16x1xf32>
    %487 = vector.broadcast %486 : vector<2x16x1xf32> to vector<2x16x16xf32>
    %488 = arith.subf %484, %487 : vector<2x16x16xf32>
    %489 = math.exp %488 : vector<2x16x16xf32>
    %cst_202 = arith.constant dense<0.000000e+00> : vector<2x16xf32>
    %490 = vector.multi_reduction <add>, %489, %cst_202 [2] : vector<2x16x16xf32> to vector<2x16xf32>
    %491 = vector.shape_cast %490 : vector<2x16xf32> to vector<2x16x1xf32>
    %492 = vector.broadcast %491 : vector<2x16x1xf32> to vector<2x16x16xf32>
    %493 = arith.divf %489, %492 : vector<2x16x16xf32>
    %494 = vector.extract_strided_slice %447 {offsets = [0, 0, 16], sizes = [2, 16, 8], strides = [1, 1, 1]} : vector<2x16x32xf32> to vector<2x16x8xf32>
    "tpu.trace_start"() <{level = 10 : i32, message = "bqk,bkd->bqd"}> : () -> ()
    %cst_203 = arith.constant dense<0.000000e+00> : vector<2x16x8xf32>
    %495 = tpu.matmul %493, %494, %cst_203 {dimension_numbers = #tpu.dot_dimension_numbers<[2], [1], [1], [2], [0, 0, 0, 1, 1, 2], [0], [0]>} : vector<2x16x16xf32>, vector<2x16x8xf32>, vector<2x16x8xf32> -> vector<2x16x8xf32>
    "tpu.trace_stop"() : () -> ()
    %496 = vector.extract_strided_slice %443 {offsets = [0, 0, 24], sizes = [2, 16, 8], strides = [1, 1, 1]} : vector<2x16x32xf32> to vector<2x16x8xf32>
    %497 = vector.extract_strided_slice %445 {offsets = [0, 0, 24], sizes = [2, 16, 8], strides = [1, 1, 1]} : vector<2x16x32xf32> to vector<2x16x8xf32>
    "tpu.trace_start"() <{level = 10 : i32, message = "bqd,bkd->bqk"}> : () -> ()
    %cst_204 = arith.constant dense<0.000000e+00> : vector<2x16x16xf32>
    %498 = tpu.matmul %496, %497, %cst_204 {dimension_numbers = #tpu.dot_dimension_numbers<[2], [2], [1], [1], [0, 0, 0, 1, 1, 1], [0], [0]>} : vector<2x16x8xf32>, vector<2x16x8xf32>, vector<2x16x16xf32> -> vector<2x16x16xf32>
    "tpu.trace_stop"() : () -> ()
    %499 = vector.broadcast %5 : vector<2x1x16xf32> to vector<2x16x16xf32>
    %500 = arith.subf %498, %499 : vector<2x16x16xf32>
    %cst_205 = arith.constant dense<0xFF800000> : vector<2x16xf32>
    %501 = vector.multi_reduction <maximumf>, %500, %cst_205 [2] : vector<2x16x16xf32> to vector<2x16xf32>
    %502 = vector.shape_cast %501 : vector<2x16xf32> to vector<2x16x1xf32>
    %503 = vector.broadcast %502 : vector<2x16x1xf32> to vector<2x16x16xf32>
    %504 = arith.subf %500, %503 : vector<2x16x16xf32>
    %505 = math.exp %504 : vector<2x16x16xf32>
    %cst_206 = arith.constant dense<0.000000e+00> : vector<2x16xf32>
    %506 = vector.multi_reduction <add>, %505, %cst_206 [2] : vector<2x16x16xf32> to vector<2x16xf32>
    %507 = vector.shape_cast %506 : vector<2x16xf32> to vector<2x16x1xf32>
    %508 = vector.broadcast %507 : vector<2x16x1xf32> to vector<2x16x16xf32>
    %509 = arith.divf %505, %508 : vector<2x16x16xf32>
    %510 = vector.extract_strided_slice %447 {offsets = [0, 0, 24], sizes = [2, 16, 8], strides = [1, 1, 1]} : vector<2x16x32xf32> to vector<2x16x8xf32>
    "tpu.trace_start"() <{level = 10 : i32, message = "bqk,bkd->bqd"}> : () -> ()
    %cst_207 = arith.constant dense<0.000000e+00> : vector<2x16x8xf32>
    %511 = tpu.matmul %509, %510, %cst_207 {dimension_numbers = #tpu.dot_dimension_numbers<[2], [1], [1], [2], [0, 0, 0, 1, 1, 2], [0], [0]>} : vector<2x16x16xf32>, vector<2x16x8xf32>, vector<2x16x8xf32> -> vector<2x16x8xf32>
    "tpu.trace_stop"() : () -> ()
    %512 = tpu.concatenate %463, %479, %495, %511 in 2 : vector<2x16x8xf32>, vector<2x16x8xf32>, vector<2x16x8xf32>, vector<2x16x8xf32> -> vector<2x16x32xf32>
    %513 = vector.shape_cast %512 : vector<2x16x32xf32> to vector<32x32xf32>
    %c0_208 = arith.constant 0 : index
    %c0_209 = arith.constant 0 : index
    %514 = vector.load %arg42[%c0_208, %c0_209] : memref<32x32xf32, #tpu.memory_space<vmem>>, vector<32x32xf32>
    %cst_210 = arith.constant dense<0.000000e+00> : vector<32x32xf32>
    %515 = tpu.matmul %513, %514, %cst_210 {dimension_numbers = #tpu.dot_dimension_numbers<[1], [0], [0], [1], [0, 0, 1, 1], [], []>} : vector<32x32xf32>, vector<32x32xf32>, vector<32x32xf32> -> vector<32x32xf32>
    %516 = arith.addf %410, %515 : vector<32x32xf32>
    %c0_211 = arith.constant 0 : index
    %c0_212 = arith.constant 0 : index
    %517 = vector.load %arg43[%c0_211, %c0_212] : memref<1x32xf32, #tpu.memory_space<vmem>>, vector<1x32xf32>
    %518 = vector.broadcast %517 : vector<1x32xf32> to vector<32x32xf32>
    %519 = arith.addf %516, %518 : vector<32x32xf32>
    %c0_213 = arith.constant 0 : index
    %c0_214 = arith.constant 0 : index
    %520 = vector.load %arg44[%c0_213, %c0_214] : memref<1x32xf32, #tpu.memory_space<vmem>>, vector<1x32xf32>
    %c0_215 = arith.constant 0 : index
    %c0_216 = arith.constant 0 : index
    %521 = vector.load %arg45[%c0_215, %c0_216] : memref<1x32xf32, #tpu.memory_space<vmem>>, vector<1x32xf32>
    %cst_217 = arith.constant dense<0.000000e+00> : vector<32xf32>
    %522 = vector.multi_reduction <add>, %519, %cst_217 [1] : vector<32x32xf32> to vector<32xf32>
    %523 = vector.shape_cast %522 : vector<32xf32> to vector<32x1xf32>
    %cst_218 = arith.constant 3.200000e+01 : f32
    %524 = vector.broadcast %cst_218 : f32 to vector<32x1xf32>
    %525 = arith.divf %523, %524 : vector<32x1xf32>
    %526 = vector.broadcast %525 : vector<32x1xf32> to vector<32x32xf32>
    %527 = arith.subf %519, %526 : vector<32x32xf32>
    %528 = arith.mulf %527, %527 : vector<32x32xf32>
    %cst_219 = arith.constant dense<0.000000e+00> : vector<32xf32>
    %529 = vector.multi_reduction <add>, %528, %cst_219 [1] : vector<32x32xf32> to vector<32xf32>
    %530 = vector.shape_cast %529 : vector<32xf32> to vector<32x1xf32>
    %cst_220 = arith.constant 3.200000e+01 : f32
    %531 = vector.broadcast %cst_220 : f32 to vector<32x1xf32>
    %532 = arith.divf %530, %531 : vector<32x1xf32>
    %533 = vector.broadcast %525 : vector<32x1xf32> to vector<32x32xf32>
    %534 = arith.subf %519, %533 : vector<32x32xf32>
    %cst_221 = arith.constant 9.99999974E-6 : f32
    %535 = vector.broadcast %cst_221 : f32 to vector<32x1xf32>
    %536 = arith.addf %532, %535 : vector<32x1xf32>
    %537 = math.rsqrt %536 : vector<32x1xf32>
    %538 = vector.broadcast %537 : vector<32x1xf32> to vector<32x32xf32>
    %539 = arith.mulf %534, %538 : vector<32x32xf32>
    %540 = vector.broadcast %520 : vector<1x32xf32> to vector<32x32xf32>
    %541 = arith.mulf %539, %540 : vector<32x32xf32>
    %542 = vector.broadcast %521 : vector<1x32xf32> to vector<32x32xf32>
    %543 = arith.addf %541, %542 : vector<32x32xf32>
    %c0_222 = arith.constant 0 : index
    %c0_223 = arith.constant 0 : index
    %544 = vector.load %arg46[%c0_222, %c0_223] : memref<32x64xf32, #tpu.memory_space<vmem>>, vector<32x64xf32>
    %cst_224 = arith.constant dense<0.000000e+00> : vector<32x64xf32>
    %545 = tpu.matmul %543, %544, %cst_224 {dimension_numbers = #tpu.dot_dimension_numbers<[1], [0], [0], [1], [0, 0, 1, 1], [], []>} : vector<32x32xf32>, vector<32x64xf32>, vector<32x64xf32> -> vector<32x64xf32>
    %c0_225 = arith.constant 0 : index
    %c0_226 = arith.constant 0 : index
    %546 = vector.load %arg47[%c0_225, %c0_226] : memref<1x64xf32, #tpu.memory_space<vmem>>, vector<1x64xf32>
    %547 = vector.broadcast %546 : vector<1x64xf32> to vector<32x64xf32>
    %548 = arith.addf %545, %547 : vector<32x64xf32>
    %549 = vector.extract_strided_slice %548 {offsets = [0, 0], sizes = [32, 32], strides = [1, 1]} : vector<32x64xf32> to vector<32x32xf32>
    %550 = vector.extract_strided_slice %548 {offsets = [0, 32], sizes = [32, 32], strides = [1, 1]} : vector<32x64xf32> to vector<32x32xf32>
    %cst_227 = arith.constant 0.000000e+00 : f32
    %551 = vector.broadcast %cst_227 : f32 to vector<32x32xf32>
    %552 = arith.subf %551, %550 : vector<32x32xf32>
    %553 = math.exp %552 : vector<32x32xf32>
    %cst_228 = arith.constant 1.000000e+00 : f32
    %554 = vector.broadcast %cst_228 : f32 to vector<32x32xf32>
    %555 = arith.addf %554, %553 : vector<32x32xf32>
    %cst_229 = arith.constant 1.000000e+00 : f32
    %556 = vector.broadcast %cst_229 : f32 to vector<32x32xf32>
    %557 = arith.divf %556, %555 : vector<32x32xf32>
    %558 = arith.mulf %549, %557 : vector<32x32xf32>
    %559 = vector.shape_cast %558 : vector<32x32xf32> to vector<2x16x32xf32>
    %cst_230 = arith.constant 0.000000e+00 : f32
    %560 = vector.broadcast %cst_230 : f32 to vector<2x3x32xf32>
    %561 = tpu.concatenate %560, %559, %560 in 1 : vector<2x3x32xf32>, vector<2x16x32xf32>, vector<2x3x32xf32> -> vector<2x22x32xf32>
    %c0_231 = arith.constant 0 : index
    %c0_232 = arith.constant 0 : index
    %c0_233 = arith.constant 0 : index
    %562 = vector.load %arg63[%c0_231, %c0_232, %c0_233] : memref<2x22x32xf32, #tpu.memory_space<vmem>>, vector<2x22x32xf32>
    tpu.vector_store %arg63[%c0_231, %c0_232, %c0_233], %561 {strides = array<i32>} : memref<2x22x32xf32, #tpu.memory_space<vmem>>, vector<2x22x32xf32>,
    %c0_234 = arith.constant 0 : index
    %c0_235 = arith.constant 0 : index
    %c0_236 = arith.constant 0 : index
    %563 = vector.load %arg48[%c0_234, %c0_235, %c0_236] : memref<7x1x32xf32, #tpu.memory_space<vmem>>, vector<7x1x32xf32>
    %cst_237 = arith.constant 0.000000e+00 : f32
    %564 = vector.broadcast %cst_237 : f32 to vector<2x16x32xf32>
    %c0_238 = arith.constant 0 : index
    %c0_239 = arith.constant 0 : index
    %c0_240 = arith.constant 0 : index
    %565 = vector.load %arg63[%c0_238, %c0_239, %c0_240] : memref<2x22x32xf32, #tpu.memory_space<vmem>>, vector<2x16x32xf32>
    %566 = vector.extract_strided_slice %563 {offsets = [0, 0, 0], sizes = [1, 1, 32], strides = [1, 1, 1]} : vector<7x1x32xf32> to vector<1x1x32xf32>
    %567 = vector.shape_cast %566 : vector<1x1x32xf32> to vector<1x32xf32>
    %568 = vector.shape_cast %567 : vector<1x32xf32> to vector<1x1x32xf32>
    %569 = vector.broadcast %568 : vector<1x1x32xf32> to vector<2x16x32xf32>
    %570 = arith.mulf %565, %569 : vector<2x16x32xf32>
    %571 = arith.addf %564, %570 : vector<2x16x32xf32>
    %c0_241 = arith.constant 0 : index
    %c1_242 = arith.constant 1 : index
    %c0_243 = arith.constant 0 : index
    %572 = vector.load %arg63[%c0_241, %c1_242, %c0_243] : memref<2x22x32xf32, #tpu.memory_space<vmem>>, vector<2x16x32xf32>
    %573 = vector.extract_strided_slice %563 {offsets = [1, 0, 0], sizes = [1, 1, 32], strides = [1, 1, 1]} : vector<7x1x32xf32> to vector<1x1x32xf32>
    %574 = vector.shape_cast %573 : vector<1x1x32xf32> to vector<1x32xf32>
    %575 = vector.shape_cast %574 : vector<1x32xf32> to vector<1x1x32xf32>
    %576 = vector.broadcast %575 : vector<1x1x32xf32> to vector<2x16x32xf32>
    %577 = arith.mulf %572, %576 : vector<2x16x32xf32>
    %578 = arith.addf %571, %577 : vector<2x16x32xf32>
    %c0_244 = arith.constant 0 : index
    %c2_245 = arith.constant 2 : index
    %c0_246 = arith.constant 0 : index
    %579 = vector.load %arg63[%c0_244, %c2_245, %c0_246] : memref<2x22x32xf32, #tpu.memory_space<vmem>>, vector<2x16x32xf32>
    %580 = vector.extract_strided_slice %563 {offsets = [2, 0, 0], sizes = [1, 1, 32], strides = [1, 1, 1]} : vector<7x1x32xf32> to vector<1x1x32xf32>
    %581 = vector.shape_cast %580 : vector<1x1x32xf32> to vector<1x32xf32>
    %582 = vector.shape_cast %581 : vector<1x32xf32> to vector<1x1x32xf32>
    %583 = vector.broadcast %582 : vector<1x1x32xf32> to vector<2x16x32xf32>
    %584 = arith.mulf %579, %583 : vector<2x16x32xf32>
    %585 = arith.addf %578, %584 : vector<2x16x32xf32>
    %c0_247 = arith.constant 0 : index
    %c3_248 = arith.constant 3 : index
    %c0_249 = arith.constant 0 : index
    %586 = vector.load %arg63[%c0_247, %c3_248, %c0_249] : memref<2x22x32xf32, #tpu.memory_space<vmem>>, vector<2x16x32xf32>
    %587 = vector.extract_strided_slice %563 {offsets = [3, 0, 0], sizes = [1, 1, 32], strides = [1, 1, 1]} : vector<7x1x32xf32> to vector<1x1x32xf32>
    %588 = vector.shape_cast %587 : vector<1x1x32xf32> to vector<1x32xf32>
    %589 = vector.shape_cast %588 : vector<1x32xf32> to vector<1x1x32xf32>
    %590 = vector.broadcast %589 : vector<1x1x32xf32> to vector<2x16x32xf32>
    %591 = arith.mulf %586, %590 : vector<2x16x32xf32>
    %592 = arith.addf %585, %591 : vector<2x16x32xf32>
    %c0_250 = arith.constant 0 : index
    %c4_251 = arith.constant 4 : index
    %c0_252 = arith.constant 0 : index
    %593 = vector.load %arg63[%c0_250, %c4_251, %c0_252] : memref<2x22x32xf32, #tpu.memory_space<vmem>>, vector<2x16x32xf32>
    %594 = vector.extract_strided_slice %563 {offsets = [4, 0, 0], sizes = [1, 1, 32], strides = [1, 1, 1]} : vector<7x1x32xf32> to vector<1x1x32xf32>
    %595 = vector.shape_cast %594 : vector<1x1x32xf32> to vector<1x32xf32>
    %596 = vector.shape_cast %595 : vector<1x32xf32> to vector<1x1x32xf32>
    %597 = vector.broadcast %596 : vector<1x1x32xf32> to vector<2x16x32xf32>
    %598 = arith.mulf %593, %597 : vector<2x16x32xf32>
    %599 = arith.addf %592, %598 : vector<2x16x32xf32>
    %c0_253 = arith.constant 0 : index
    %c5_254 = arith.constant 5 : index
    %c0_255 = arith.constant 0 : index
    %600 = vector.load %arg63[%c0_253, %c5_254, %c0_255] : memref<2x22x32xf32, #tpu.memory_space<vmem>>, vector<2x16x32xf32>
    %601 = vector.extract_strided_slice %563 {offsets = [5, 0, 0], sizes = [1, 1, 32], strides = [1, 1, 1]} : vector<7x1x32xf32> to vector<1x1x32xf32>
    %602 = vector.shape_cast %601 : vector<1x1x32xf32> to vector<1x32xf32>
    %603 = vector.shape_cast %602 : vector<1x32xf32> to vector<1x1x32xf32>
    %604 = vector.broadcast %603 : vector<1x1x32xf32> to vector<2x16x32xf32>
    %605 = arith.mulf %600, %604 : vector<2x16x32xf32>
    %606 = arith.addf %599, %605 : vector<2x16x32xf32>
    %c0_256 = arith.constant 0 : index
    %c6_257 = arith.constant 6 : index
    %c0_258 = arith.constant 0 : index
    %607 = vector.load %arg63[%c0_256, %c6_257, %c0_258] : memref<2x22x32xf32, #tpu.memory_space<vmem>>, vector<2x16x32xf32>
    %608 = vector.extract_strided_slice %563 {offsets = [6, 0, 0], sizes = [1, 1, 32], strides = [1, 1, 1]} : vector<7x1x32xf32> to vector<1x1x32xf32>
    %609 = vector.shape_cast %608 : vector<1x1x32xf32> to vector<1x32xf32>
    %610 = vector.shape_cast %609 : vector<1x32xf32> to vector<1x1x32xf32>
    %611 = vector.broadcast %610 : vector<1x1x32xf32> to vector<2x16x32xf32>
    %612 = arith.mulf %607, %611 : vector<2x16x32xf32>
    %613 = arith.addf %606, %612 : vector<2x16x32xf32>
    %c0_259 = arith.constant 0 : index
    %c0_260 = arith.constant 0 : index
    %614 = vector.load %arg49[%c0_259, %c0_260] : memref<1x32xf32, #tpu.memory_space<vmem>>, vector<1x32xf32>
    %615 = vector.shape_cast %614 : vector<1x32xf32> to vector<1x1x32xf32>
    %616 = vector.broadcast %615 : vector<1x1x32xf32> to vector<2x16x32xf32>
    %617 = arith.addf %613, %616 : vector<2x16x32xf32>
    %618 = vector.shape_cast %617 : vector<2x16x32xf32> to vector<32x32xf32>
    %cst_261 = arith.constant dense<0.000000e+00> : vector<32xf32>
    %619 = vector.multi_reduction <add>, %618, %cst_261 [0] : vector<32x32xf32> to vector<32xf32>
    %620 = vector.shape_cast %619 : vector<32xf32> to vector<1x32xf32>
    %cst_262 = arith.constant 3.200000e+01 : f32
    %621 = vector.broadcast %cst_262 : f32 to vector<1x32xf32>
    %622 = arith.divf %620, %621 : vector<1x32xf32>
    %623 = vector.broadcast %622 : vector<1x32xf32> to vector<32x32xf32>
    %624 = arith.subf %618, %623 : vector<32x32xf32>
    %625 = arith.mulf %624, %624 : vector<32x32xf32>
    %cst_263 = arith.constant dense<0.000000e+00> : vector<32xf32>
    %626 = vector.multi_reduction <add>, %625, %cst_263 [0] : vector<32x32xf32> to vector<32xf32>
    %627 = vector.shape_cast %626 : vector<32xf32> to vector<1x32xf32>
    %cst_264 = arith.constant 3.200000e+01 : f32
    %628 = vector.broadcast %cst_264 : f32 to vector<1x32xf32>
    %629 = arith.divf %627, %628 : vector<1x32xf32>
    %630 = vector.broadcast %622 : vector<1x32xf32> to vector<32x32xf32>
    %631 = arith.subf %618, %630 : vector<32x32xf32>
    %cst_265 = arith.constant 9.99999974E-6 : f32
    %632 = vector.broadcast %cst_265 : f32 to vector<1x32xf32>
    %633 = arith.addf %629, %632 : vector<1x32xf32>
    %634 = math.rsqrt %633 : vector<1x32xf32>
    %635 = vector.broadcast %634 : vector<1x32xf32> to vector<32x32xf32>
    %636 = arith.mulf %631, %635 : vector<32x32xf32>
    %c0_266 = arith.constant 0 : index
    %c0_267 = arith.constant 0 : index
    %637 = vector.load %arg50[%c0_266, %c0_267] : memref<1x32xf32, #tpu.memory_space<vmem>>, vector<1x32xf32>
    %638 = vector.broadcast %637 : vector<1x32xf32> to vector<32x32xf32>
    %639 = arith.mulf %636, %638 : vector<32x32xf32>
    %c0_268 = arith.constant 0 : index
    %c0_269 = arith.constant 0 : index
    %640 = vector.load %arg51[%c0_268, %c0_269] : memref<1x32xf32, #tpu.memory_space<vmem>>, vector<1x32xf32>
    %641 = vector.broadcast %640 : vector<1x32xf32> to vector<32x32xf32>
    %642 = arith.addf %639, %641 : vector<32x32xf32>
    %cst_270 = arith.constant 0.000000e+00 : f32
    %643 = vector.broadcast %cst_270 : f32 to vector<32x32xf32>
    %644 = arith.subf %643, %642 : vector<32x32xf32>
    %645 = math.exp %644 : vector<32x32xf32>
    %cst_271 = arith.constant 1.000000e+00 : f32
    %646 = vector.broadcast %cst_271 : f32 to vector<32x32xf32>
    %647 = arith.addf %646, %645 : vector<32x32xf32>
    %cst_272 = arith.constant 1.000000e+00 : f32
    %648 = vector.broadcast %cst_272 : f32 to vector<32x32xf32>
    %649 = arith.divf %648, %647 : vector<32x32xf32>
    %650 = arith.mulf %642, %649 : vector<32x32xf32>
    %c0_273 = arith.constant 0 : index
    %c0_274 = arith.constant 0 : index
    %651 = vector.load %arg52[%c0_273, %c0_274] : memref<32x32xf32, #tpu.memory_space<vmem>>, vector<32x32xf32>
    %cst_275 = arith.constant dense<0.000000e+00> : vector<32x32xf32>
    %652 = tpu.matmul %650, %651, %cst_275 {dimension_numbers = #tpu.dot_dimension_numbers<[1], [0], [0], [1], [0, 0, 1, 1], [], []>} : vector<32x32xf32>, vector<32x32xf32>, vector<32x32xf32> -> vector<32x32xf32>
    %653 = arith.addf %519, %652 : vector<32x32xf32>
    %c0_276 = arith.constant 0 : index
    %c0_277 = arith.constant 0 : index
    %654 = vector.load %arg53[%c0_276, %c0_277] : memref<1x32xf32, #tpu.memory_space<vmem>>, vector<1x32xf32>
    %655 = vector.broadcast %654 : vector<1x32xf32> to vector<32x32xf32>
    %656 = arith.addf %653, %655 : vector<32x32xf32>
    %c0_278 = arith.constant 0 : index
    %c0_279 = arith.constant 0 : index
    %657 = vector.load %arg54[%c0_278, %c0_279] : memref<1x32xf32, #tpu.memory_space<vmem>>, vector<1x32xf32>
    %c0_280 = arith.constant 0 : index
    %c0_281 = arith.constant 0 : index
    %658 = vector.load %arg55[%c0_280, %c0_281] : memref<1x32xf32, #tpu.memory_space<vmem>>, vector<1x32xf32>
    %cst_282 = arith.constant dense<0.000000e+00> : vector<32xf32>
    %659 = vector.multi_reduction <add>, %656, %cst_282 [1] : vector<32x32xf32> to vector<32xf32>
    %660 = vector.shape_cast %659 : vector<32xf32> to vector<32x1xf32>
    %cst_283 = arith.constant 3.200000e+01 : f32
    %661 = vector.broadcast %cst_283 : f32 to vector<32x1xf32>
    %662 = arith.divf %660, %661 : vector<32x1xf32>
    %663 = vector.broadcast %662 : vector<32x1xf32> to vector<32x32xf32>
    %664 = arith.subf %656, %663 : vector<32x32xf32>
    %665 = arith.mulf %664, %664 : vector<32x32xf32>
    %cst_284 = arith.constant dense<0.000000e+00> : vector<32xf32>
    %666 = vector.multi_reduction <add>, %665, %cst_284 [1] : vector<32x32xf32> to vector<32xf32>
    %667 = vector.shape_cast %666 : vector<32xf32> to vector<32x1xf32>
    %cst_285 = arith.constant 3.200000e+01 : f32
    %668 = vector.broadcast %cst_285 : f32 to vector<32x1xf32>
    %669 = arith.divf %667, %668 : vector<32x1xf32>
    %670 = vector.broadcast %662 : vector<32x1xf32> to vector<32x32xf32>
    %671 = arith.subf %656, %670 : vector<32x32xf32>
    %cst_286 = arith.constant 9.99999974E-6 : f32
    %672 = vector.broadcast %cst_286 : f32 to vector<32x1xf32>
    %673 = arith.addf %669, %672 : vector<32x1xf32>
    %674 = math.rsqrt %673 : vector<32x1xf32>
    %675 = vector.broadcast %674 : vector<32x1xf32> to vector<32x32xf32>
    %676 = arith.mulf %671, %675 : vector<32x32xf32>
    %677 = vector.broadcast %657 : vector<1x32xf32> to vector<32x32xf32>
    %678 = arith.mulf %676, %677 : vector<32x32xf32>
    %679 = vector.broadcast %658 : vector<1x32xf32> to vector<32x32xf32>
    %680 = arith.addf %678, %679 : vector<32x32xf32>
    %c0_287 = arith.constant 0 : index
    %c0_288 = arith.constant 0 : index
    %681 = vector.load %arg56[%c0_287, %c0_288] : memref<32x64xf32, #tpu.memory_space<vmem>>, vector<32x64xf32>
    %cst_289 = arith.constant dense<0.000000e+00> : vector<32x64xf32>
    %682 = tpu.matmul %680, %681, %cst_289 {dimension_numbers = #tpu.dot_dimension_numbers<[1], [0], [0], [1], [0, 0, 1, 1], [], []>} : vector<32x32xf32>, vector<32x64xf32>, vector<32x64xf32> -> vector<32x64xf32>
    %c0_290 = arith.constant 0 : index
    %c0_291 = arith.constant 0 : index
    %683 = vector.load %arg57[%c0_290, %c0_291] : memref<1x64xf32, #tpu.memory_space<vmem>>, vector<1x64xf32>
    %684 = vector.broadcast %683 : vector<1x64xf32> to vector<32x64xf32>
    %685 = arith.addf %682, %684 : vector<32x64xf32>
    %cst_292 = arith.constant 0.000000e+00 : f32
    %686 = vector.broadcast %cst_292 : f32 to vector<32x64xf32>
    %687 = arith.subf %686, %685 : vector<32x64xf32>
    %688 = math.exp %687 : vector<32x64xf32>
    %cst_293 = arith.constant 1.000000e+00 : f32
    %689 = vector.broadcast %cst_293 : f32 to vector<32x64xf32>
    %690 = arith.addf %689, %688 : vector<32x64xf32>
    %cst_294 = arith.constant 1.000000e+00 : f32
    %691 = vector.broadcast %cst_294 : f32 to vector<32x64xf32>
    %692 = arith.divf %691, %690 : vector<32x64xf32>
    %693 = arith.mulf %685, %692 : vector<32x64xf32>
    %c0_295 = arith.constant 0 : index
    %c0_296 = arith.constant 0 : index
    %694 = vector.load %arg58[%c0_295, %c0_296] : memref<64x32xf32, #tpu.memory_space<vmem>>, vector<64x32xf32>
    %cst_297 = arith.constant dense<0.000000e+00> : vector<32x32xf32>
    %695 = tpu.matmul %693, %694, %cst_297 {dimension_numbers = #tpu.dot_dimension_numbers<[1], [0], [0], [1], [0, 0, 1, 1], [], []>} : vector<32x64xf32>, vector<64x32xf32>, vector<32x32xf32> -> vector<32x32xf32>
    %c0_298 = arith.constant 0 : index
    %c0_299 = arith.constant 0 : index
    %696 = vector.load %arg59[%c0_298, %c0_299] : memref<1x32xf32, #tpu.memory_space<vmem>>, vector<1x32xf32>
    %697 = vector.broadcast %696 : vector<1x32xf32> to vector<32x32xf32>
    %698 = arith.addf %695, %697 : vector<32x32xf32>
    %cst_300 = arith.constant 5.000000e-01 : f32
    %699 = vector.broadcast %cst_300 : f32 to vector<32x32xf32>
    %700 = arith.mulf %699, %698 : vector<32x32xf32>
    %701 = arith.addf %700, %656 : vector<32x32xf32>
    %c0_301 = arith.constant 0 : index
    %c0_302 = arith.constant 0 : index
    %702 = vector.load %arg60[%c0_301, %c0_302] : memref<1x32xf32, #tpu.memory_space<vmem>>, vector<1x32xf32>
    %c0_303 = arith.constant 0 : index
    %c0_304 = arith.constant 0 : index
    %703 = vector.load %arg61[%c0_303, %c0_304] : memref<1x32xf32, #tpu.memory_space<vmem>>, vector<1x32xf32>
    %cst_305 = arith.constant dense<0.000000e+00> : vector<32xf32>
    %704 = vector.multi_reduction <add>, %701, %cst_305 [1] : vector<32x32xf32> to vector<32xf32>
    %705 = vector.shape_cast %704 : vector<32xf32> to vector<32x1xf32>
    %cst_306 = arith.constant 3.200000e+01 : f32
    %706 = vector.broadcast %cst_306 : f32 to vector<32x1xf32>
    %707 = arith.divf %705, %706 : vector<32x1xf32>
    %708 = vector.broadcast %707 : vector<32x1xf32> to vector<32x32xf32>
    %709 = arith.subf %701, %708 : vector<32x32xf32>
    %710 = arith.mulf %709, %709 : vector<32x32xf32>
    %cst_307 = arith.constant dense<0.000000e+00> : vector<32xf32>
    %711 = vector.multi_reduction <add>, %710, %cst_307 [1] : vector<32x32xf32> to vector<32xf32>
    %712 = vector.shape_cast %711 : vector<32xf32> to vector<32x1xf32>
    %cst_308 = arith.constant 3.200000e+01 : f32
    %713 = vector.broadcast %cst_308 : f32 to vector<32x1xf32>
    %714 = arith.divf %712, %713 : vector<32x1xf32>
    %715 = vector.broadcast %707 : vector<32x1xf32> to vector<32x32xf32>
    %716 = arith.subf %701, %715 : vector<32x32xf32>
    %cst_309 = arith.constant 9.99999974E-6 : f32
    %717 = vector.broadcast %cst_309 : f32 to vector<32x1xf32>
    %718 = arith.addf %714, %717 : vector<32x1xf32>
    %719 = math.rsqrt %718 : vector<32x1xf32>
    %720 = vector.broadcast %719 : vector<32x1xf32> to vector<32x32xf32>
    %721 = arith.mulf %716, %720 : vector<32x32xf32>
    %722 = vector.broadcast %702 : vector<1x32xf32> to vector<32x32xf32>
    %723 = arith.mulf %721, %722 : vector<32x32xf32>
    %724 = vector.broadcast %703 : vector<1x32xf32> to vector<32x32xf32>
    %725 = arith.addf %723, %724 : vector<32x32xf32>
    %726 = vector.shape_cast %725 : vector<32x32xf32> to vector<2x16x32xf32>
    %c0_310 = arith.constant 0 : index
    %c0_311 = arith.constant 0 : index
    %c0_312 = arith.constant 0 : index
    %727 = vector.load %arg62[%c0_310, %c0_311, %c0_312] : memref<2x16x32xf32, #tpu.memory_space<vmem>>, vector<2x16x32xf32>
    tpu.vector_store %arg62[%c0_310, %c0_311, %c0_312], %726 {strides = array<i32>} : memref<2x16x32xf32, #tpu.memory_space<vmem>>, vector<2x16x32xf32>,
    return
  }
}

</mosaic_0001>

<bundles_post_ra>
// kernel: conformer_forward.1
= control target key start
LH: loop header
LB: loop body
LE: loop exit
PB: predicated region body
PF: predicated region fallthrough
CT: control target
= control target key end

     0   :  { %s9632_s6 = smov 1   ;;  %s9633_s10 = smov 2   ;;  %s11138_s0 = inlined_call_operand.smem [shape: u32[63], index: -1, kind: input, shape index: {}] }
   0x1   :  { %s9755_s5 = sld [smem:[%s11138_s0]]   ;;  %s9634_s14 = smov 3  }
   0x2   :  { %s9760_s9 = sld [smem:[%s11138_s0 + %s9632_s6]]   ;;  %s9635_s18 = smov 4  }
   0x3   :  { %s9765_s13 = sld [smem:[%s11138_s0 + %s9633_s10]]   ;;  %s9636_s22 = smov 5  }
   0x4   :  { %s9770_s17 = sld [smem:[%s11138_s0 + %s9634_s14]]   ;;  %s9637_s26 = smov 6  }
   0x5   :  { %s9775_s21 = sld [smem:[%s11138_s0 + %s9635_s18]]   ;;  %s9638_s30 = smov 7  }
   0x6   :  { %s9780_s25 = sld [smem:[%s11138_s0 + %s9636_s22]]   ;;  %s9639_s4 = smov 8  }
   0x7   :  { %11154 = sst [smem:[#allocation77_spill]] %s9755_s5  ;;  %s9640_s10 = smov 9  }
   0x8   :  { %11155 = sst [smem:[#allocation78_spill]] %s9760_s9  ;;  %s9641_s15 = smov 10  }
   0x9   :  { %11156 = sst [smem:[#allocation79_spill]] %s9765_s13  ;;  %s9642_s20 = smov 11  }
   0xa   :  { %11157 = sst [smem:[#allocation80_spill]] %s9770_s17  ;;  %s9644_s1 = smov 13  }
   0xb   :  { %11158 = sst [smem:[#allocation81_spill]] %s9775_s21  ;;  %s9645_s7 = smov 14  }
   0xc   :  { %11159 = sst [smem:[#allocation82_spill]] %s9780_s25  ;;  %s9647_s22 = smov 16  }
   0xd   :  { %s9785_s29 = sld [smem:[%s11138_s0 + %s9637_s26]]   ;;  %s9643_s26 = smov 12  }
   0xe   :  { %s9790_s3 = sld [smem:[%s11138_s0 + %s9638_s30]]   ;;  %s9648_s28 = smov 17  }
   0xf   :  { %s9795_s8 = sld [smem:[%s11138_s0 + %s9639_s4]]  }
  0x10   :  { %s9800_s14 = sld [smem:[%s11138_s0 + %s9640_s10]]  }
  0x11   :  { %s9805_s19 = sld [smem:[%s11138_s0 + %s9641_s15]]   ;;  %s9646_s15 = smov 15  }
  0x12   :  { %s9810_s24 = sld [smem:[%s11138_s0 + %s9642_s20]]  }
  0x13   :  { %11160 = sst [smem:[#allocation83_spill]] %s9785_s29 }
  0x14   :  { %s9815_s30 = sld [smem:[%s11138_s0 + %s9643_s26]]  }
  0x15   :  { %11161 = sst [smem:[#allocation84_spill]] %s9795_s8 }
  0x16   :  { %11162 = sst [smem:[#allocation85_spill]] %s9800_s14 }
  0x17   :  { %11163 = sst [smem:[#allocation86_spill]] %s9805_s19 }
  0x18   :  { %11164 = sst [smem:[#allocation87_spill]] %s9810_s24 }
  0x19   :  { %s9820_s6 = sld [smem:[%s11138_s0 + %s9644_s1]]  }
  0x1a   :  { %11165 = sst [smem:[#allocation88_spill]] %s9815_s30 }
  0x1b   :  { %s9825_s12 = sld [smem:[%s11138_s0 + %s9645_s7]]   ;;  %s9649_s7 = smov 18  }
  0x1c   :  { %s9830_s20 = sld [smem:[%s11138_s0 + %s9646_s15]]   ;;  %s9650_s15 = smov 19  }
  0x1d   :  { %s9835_s27 = sld [smem:[%s11138_s0 + %s9647_s22]]   ;;  %s9651_s22 = smov 20  }
  0x1e   :  { %s9840_s4 = sld [smem:[%s11138_s0 + %s9648_s28]]   ;;  %s9652_s28 = smov 21  }
  0x1f   :  { %11166 = sst [smem:[#allocation89_spill]] %s9820_s6 }
  0x20   :  { %s9860_s6 = sld [smem:[%s11138_s0 + %s9652_s28]]   ;;  %s9656_s28 = smov 25  }
  0x21   :  { %11167 = sst [smem:[#allocation90_spill]] %s9825_s12 }
  0x22   :  { %11168 = sst [smem:[#allocation91_spill]] %s9830_s20 }
  0x23   :  { %11169 = sst [smem:[#allocation92_spill]] %s9835_s27 }
  0x24   :  { %11170 = sst [smem:[#allocation93_spill]] %s9840_s4 }
  0x25   :  { %s9845_s12 = sld [smem:[%s11138_s0 + %s9649_s7]]   ;;  %s9653_s7 = smov 22  }
  0x26   :  { %s9850_s20 = sld [smem:[%s11138_s0 + %s9650_s15]]   ;;  %s9654_s15 = smov 23  }
  0x27   :  { %s9855_s27 = sld [smem:[%s11138_s0 + %s9651_s22]]   ;;  %s9655_s22 = smov 24  }
  0x28   :  { %11174 = sst [smem:[#allocation97_spill]] %s9860_s6 }
  0x29   :  { %s9880_s6 = sld [smem:[%s11138_s0 + %s9656_s28]]   ;;  %s9660_s28 = smov 29  }
  0x2a   :  { %s9900_s24 = sld [smem:[%s11138_s0 + %s9660_s28]]   ;;  %s9664_s28 = smov 33  }
  0x2b   :  { %11171 = sst [smem:[#allocation94_spill]] %s9845_s12 }
  0x2c   :  { %11172 = sst [smem:[#allocation95_spill]] %s9850_s20 }
  0x2d   :  { %11173 = sst [smem:[#allocation96_spill]] %s9855_s27 }
  0x2e   :  { %s9865_s12 = sld [smem:[%s11138_s0 + %s9653_s7]]   ;;  %s9657_s7 = smov 26  }
  0x2f   :  { %s9870_s20 = sld [smem:[%s11138_s0 + %s9654_s15]]   ;;  %s9658_s15 = smov 27  }
  0x30   :  { %s9875_s27 = sld [smem:[%s11138_s0 + %s9655_s22]]   ;;  %s9659_s22 = smov 28  }
  0x31   :  { %s9890_s30 = sld [smem:[%s11138_s0 + %s9658_s15]]   ;;  %s9662_s15 = smov 31  }
  0x32   :  { %s9895_s9 = sld [smem:[%s11138_s0 + %s9659_s22]]   ;;  %s9663_s22 = smov 32  }
  0x33   :  { %s9910_s14 = sld [smem:[%s11138_s0 + %s9662_s15]]   ;;  %s9666_s15 = smov 35  }
  0x34   :  { %11175 = sst [smem:[#allocation98_spill]] %s9865_s12 }
  0x35   :  { %s9885_s12 = sld [smem:[%s11138_s0 + %s9657_s7]]   ;;  %s9661_s7 = smov 30  }
  0x36   :  { %11176 = sst [smem:[#allocation99_spill]] %s9875_s27 }
  0x37   :  { %11178 = sst [smem:[#allocation101_spill]] %s9890_s30 }
  0x38   :  { %11179 = sst [smem:[#allocation102_spill]] %s9895_s9 }
  0x39   :  { %s9915_s9 = sld [smem:[%s11138_s0 + %s9663_s22]]   ;;  %s9667_s22 = smov 36  }
  0x3a   :  { %s9920_s8 = sld [smem:[%s11138_s0 + %s9664_s28]]   ;;  %s9668_s28 = smov 37  }
  0x3b   :  { %11177 = sst [smem:[#allocation100_spill]] %s9885_s12 }
  0x3c   :  { %s9905_s12 = sld [smem:[%s11138_s0 + %s9661_s7]]   ;;  %s9665_s7 = smov 34  }
  0x3d   :  { %s9925_s19 = sld [smem:[%s11138_s0 + %s9665_s7]]   ;;  %s9669_s7 = smov 38  }
  0x3e   :  { %s9930_s29 = sld [smem:[%s11138_s0 + %s9666_s15]]   ;;  %s9670_s15 = smov 39  }
  0x3f   :  { %11181 = sst [smem:[#allocation104_spill]] %s9915_s9 }
  0x40   :  { %s9935_s17 = sld [smem:[%s11138_s0 + %s9667_s22]]   ;;  %s9671_s22 = smov 40  }
  0x41   :  { %s9940_s13 = sld [smem:[%s11138_s0 + %s9668_s28]]   ;;  %s9672_s28 = smov 41  }
  0x42   :  { %11180 = sst [smem:[#allocation103_spill]] %s9905_s12 }
  0x43   :  { %11182 = sst [smem:[#allocation105_spill]] %s9925_s19 }
  0x44   :  { %11183 = sst [smem:[#allocation106_spill]] %s9930_s29 }
  0x45   :  { %s9945_s19 = sld [smem:[%s11138_s0 + %s9669_s7]]   ;;  %s9673_s7 = smov 42  }
  0x46   :  { %11184 = sst [smem:[#allocation107_spill]] %s9935_s17 }
  0x47   :  { %s9950_s21 = sld [smem:[%s11138_s0 + %s9670_s15]]   ;;  %s9674_s15 = smov 43  }
  0x48   :  { %s9955_s17 = sld [smem:[%s11138_s0 + %s9671_s22]]   ;;  %s9675_s22 = smov 44  }
  0x49   :  { %s9960_s5 = sld [smem:[%s11138_s0 + %s9672_s28]]   ;;  %s9676_s28 = smov 45  }
  0x4a   :  { %s9970_s29 = sld [smem:[%s11138_s0 + %s9674_s15]]   ;;  %s9678_s15 = smov 47  }
  0x4b   :  { %11185 = sst [smem:[#allocation108_spill]] %s9945_s19 }
  0x4c   :  { %s9965_s19 = sld [smem:[%s11138_s0 + %s9673_s7]]   ;;  %s9677_s7 = smov 46  }
  0x4d   :  { %s9990_s9 = sld [smem:[%s11138_s0 + %s9678_s15]]   ;;  %s9682_s15 = smov 51  }
  0x4e   :  { %11186 = sst [smem:[#allocation109_spill]] %s9955_s17 }
  0x4f   :  { %11187 = sst [smem:[#allocation110_spill]] %s9960_s5 }
  0x50   :  { %s9975_s17 = sld [smem:[%s11138_s0 + %s9675_s22]]   ;;  %s9679_s22 = smov 48  }
  0x51   :  { %s9980_s5 = sld [smem:[%s11138_s0 + %s9676_s28]]   ;;  %s9680_s28 = smov 49  }
  0x52   :  { %11188 = sst [smem:[#allocation111_spill]] %s9965_s19 }
  0x53   :  { %s9985_s19 = sld [smem:[%s11138_s0 + %s9677_s7]]   ;;  %s9681_s7 = smov 50  }
  0x54   :  { %s10000_s12 = sld [smem:[%s11138_s0 + %s9680_s28]]   ;;  %s9684_s28 = smov 53  }
  0x55   :  { %s10010_s30 = sld [smem:[%s11138_s0 + %s9682_s15]]   ;;  %s9686_s15 = smov 55  }
  0x56   :  { %11189 = sst [smem:[#allocation112_spill]] %s9975_s17 }
  0x57   :  { %s9995_s17 = sld [smem:[%s11138_s0 + %s9679_s22]]   ;;  %s9683_s22 = smov 52  }
  0x58   :  { %s10020_s27 = sld [smem:[%s11138_s0 + %s9684_s28]]   ;;  %s9688_s28 = smov 57  }
  0x59   :  { %11190 = sst [smem:[#allocation113_spill]] %s9985_s19 }
  0x5a   :  { %s10005_s19 = sld [smem:[%s11138_s0 + %s9681_s7]]   ;;  %s9685_s7 = smov 54  }
  0x5b   :  { %s10030_s4 = sld [smem:[%s11138_s0 + %s9686_s15]]   ;;  %s9690_s15 = smov 59  }
  0x5c   :  { %s10040_s25 = sld [smem:[%s11138_s0 + %s9688_s28]]   ;;  %s9692_s28 = smov 61  }
  0x5d   :  { %11191 = sst [smem:[#allocation114_spill]] %s9995_s17 }
  0x5e   :  { %s10015_s17 = sld [smem:[%s11138_s0 + %s9683_s22]]   ;;  %s9687_s22 = smov 56  }
  0x60   :  { %11192 = sst [smem:[#allocation115_spill]] %s10005_s19 }
  0x61   :  { %s10025_s19 = sld [smem:[%s11138_s0 + %s9685_s7]]   ;;  %s9689_s7 = smov 58  }
  0x62   :  { %11195 = sst [smem:[#allocation118_spill]] %s10030_s4 }
  0x63   :  { %11197 = sst [smem:[#allocation120_spill]] %s10040_s25 }
  0x64   :  { %11193 = sst [smem:[#allocation116_spill]] %s10015_s17 }
  0x65   :  { %s10035_s17 = sld [smem:[%s11138_s0 + %s9687_s22]]   ;;  %s9691_s22 = smov 60  }
  0x66   :  { %s10050_s4 = sld [smem:[%s11138_s0 + %s9690_s15]]  }
  0x67   :  { %11194 = sst [smem:[#allocation117_spill]] %s10025_s19 }
  0x68   :  { %s10045_s19 = sld [smem:[%s11138_s0 + %s9689_s7]]   ;;  %s9693_s7 = smov 62  }
  0x69   :  { %s10060_s25 = sld [smem:[%s11138_s0 + %s9692_s28]]  }
  0x6b   :  { %11196 = sst [smem:[#allocation119_spill]] %s10035_s17 }
  0x6c   :  { %s10055_s17 = sld [smem:[%s11138_s0 + %s9691_s22]]  }
  0x6e   :  { %11198 = sst [smem:[#allocation121_spill]] %s10045_s19 }
  0x6f   :  { %s10065_s19 = sld [smem:[%s11138_s0 + %s9693_s7]]  }
  0x70   :  { %130 = vsyncpa [#allocation4], 0 }
  0x71   :  { %131 = vsyncpa [#allocation7], 0 }
  0x72   :  { %132 = vsyncpa [#allocation10], 0 }
  0x73   :  { %133 = vsyncpa [#allocation13], 0 }
  0x74   :  { %134 = vsyncpa [#allocation16], 0 }
  0x75   :  { %135 = vsyncpa [#allocation19], 0 }
  0x76   :  { %136 = vsyncpa [#allocation22], 0 }
  0x77   :  { %137 = vsyncpa [#allocation25], 0 }
  0x78   :  { %138 = vsyncpa [#allocation28], 0 }
  0x79   :  { %139 = vsyncpa [#allocation31], 0 }
  0x7a   :  { %140 = vsyncpa [#allocation34], 0 }
  0x7b   :  { %141 = vsyncpa [#allocation37], 0 }
  0x7c   :  { %142 = vsyncpa [#allocation40], 0 }
  0x7d   :  { %143 = vsyncpa [#allocation43], 0 }
  0x7e   :  { %144 = vsyncpa [#allocation46], 0 }
  0x7f   :  { %145 = vsyncpa [#allocation49], 0 }
  0x80   :  { %146 = vsyncpa [#allocation52], 0 }
  0x81   :  { %147 = vsyncpa [#allocation55], 0 }
  0x82   :  { %148 = vsyncpa [#allocation5], 0  ;;  %s9694_s0 = smov [#allocation6]   ;;  %s9695_s16 = smov [#allocation9]  }
  0x83   :  { %s177_s15 = sshll.u32 %s9694_s0, 4  ;;  %s225_s18 = sshll.u32 %s9695_s16, 4  ;;  %s178_s15 = int_to_ptr.vmem [resolvable:$true] %s177_s15  ;;  %s226_s18 = int_to_ptr.vmem [resolvable:$true] %s225_s18 }
  0x84   :  { %s8882_s22 = scalar_lea.vmem %s178_s15, 16  ;;  %s8886_s23 = scalar_lea.vmem %s178_s15, 32 }
  0x85   :  { %p8883_p0 = scmp.ne.s32.totalorder %s178_s15, %s8882_s22  ;;  %p8887_p1 = scmp.lt.s32.totalorder %s178_s15, %s178_s15 }
  0x86   :  { %p8888_p2 = scmp.lt.s32.totalorder %s8886_s23, %s8882_s22 }
  0x88   :  { %p8889_p3 = por %p8888_p2, %p8887_p1 }
  0x8a   :  { %p8890_p4 = pnand %p8889_p3, %p8883_p0 }
  0x8c   :  { %8893 = shalt.err (!%p8890_p4)
}
  0x8d   :  { %180 = dma.hbm_to_vmem [thread:$0]  %s9790_s3, 16, %s178_s15, [#allocation7]  }
  0x8e   :  { %s8902_s26 = scalar_lea.vmem %s226_s18, 16  ;;  %s8906_s28 = scalar_lea.vmem %s226_s18, 32 }
  0x8f   :  { %p8903_p5 = scmp.ne.s32.totalorder %s226_s18, %s8902_s26  ;;  %p8907_p6 = scmp.lt.s32.totalorder %s226_s18, %s226_s18 }
  0x90   :  { %p8908_p7 = scmp.lt.s32.totalorder %s8906_s28, %s8902_s26 }
  0x92   :  { %p8909_p8 = por %p8908_p7, %p8907_p6 }
  0x94   :  { %p8910_p9 = pnand %p8909_p8, %p8903_p5 }
  0x96   :  { %8913 = shalt.err (!%p8910_p9)
}
  0x97   :  { %228 = dma.hbm_to_vmem [thread:$0]  %s9870_s20, 16, %s226_s18, [#allocation10]  }
  0x98   :  { %s9696_s1 = smov [#allocation12]   ;;  %s9697_s7 = smov [#allocation15]  }
  0x99   :  { %s245_s2 = sshll.u32 %s9696_s1, 4  ;;  %s269_s10 = sshll.u32 %s9697_s7, 4  ;;  %s246_s2 = int_to_ptr.vmem [resolvable:$true] %s245_s2  ;;  %s270_s10 = int_to_ptr.vmem [resolvable:$true] %s269_s10 }
  0x9a   :  { %s8922_s11 = scalar_lea.vmem %s246_s2, 16  ;;  %s8926_s0 = scalar_lea.vmem %s246_s2, 32 }
  0x9b   :  { %p8923_p10 = scmp.ne.s32.totalorder %s246_s2, %s8922_s11  ;;  %p8927_p11 = scmp.lt.s32.totalorder %s246_s2, %s246_s2 }
  0x9c   :  { %p8928_p12 = scmp.lt.s32.totalorder %s8926_s0, %s8922_s11 }
  0x9e   :  { %p8929_p13 = por %p8928_p12, %p8927_p11 }
  0xa0   :  { %p8930_p0 = pnand %p8929_p13, %p8923_p10 }
  0xa2   :  { %8933 = shalt.err (!%p8930_p0)
}
  0xa3   :  { %248 = dma.hbm_to_vmem [thread:$0]  %s9880_s6, 16, %s246_s2, [#allocation13]  }
  0xa4   :  { %s8942_s3 = scalar_lea.vmem %s270_s10, 16  ;;  %s8946_s15 = scalar_lea.vmem %s270_s10, 32 }
  0xa5   :  { %p8943_p1 = scmp.ne.s32.totalorder %s270_s10, %s8942_s3  ;;  %p8947_p2 = scmp.lt.s32.totalorder %s270_s10, %s270_s10 }
  0xa6   :  { %p8948_p3 = scmp.lt.s32.totalorder %s8946_s15, %s8942_s3 }
  0xa8   :  { %p8949_p4 = por %p8948_p3, %p8947_p2 }
  0xaa   :  { %p8950_p5 = pnand %p8949_p4, %p8943_p1 }
  0xac   :  { %8953 = shalt.err (!%p8950_p5)
}
  0xad   :  { %272 = dma.hbm_to_vmem [thread:$0]  %s9900_s24, 16, %s270_s10, [#allocation16]  }
  0xae   :  { %s9698_s20 = smov [#allocation18]   ;;  %s9699_s18 = smov [#allocation21]  }
  0xaf   :  { %s289_s16 = sshll.u32 %s9698_s20, 4  ;;  %s309_s22 = sshll.u32 %s9699_s18, 4  ;;  %s290_s16 = int_to_ptr.vmem [resolvable:$true] %s289_s16  ;;  %s310_s22 = int_to_ptr.vmem [resolvable:$true] %s309_s22 }
  0xb0   :  { %s8962_s23 = scalar_lea.vmem %s290_s16, 16  ;;  %s8966_s26 = scalar_lea.vmem %s290_s16, 32 }
  0xb1   :  { %p8963_p6 = scmp.ne.s32.totalorder %s290_s16, %s8962_s23  ;;  %p8967_p7 = scmp.lt.s32.totalorder %s290_s16, %s290_s16 }
  0xb2   :  { %p8968_p8 = scmp.lt.s32.totalorder %s8966_s26, %s8962_s23 }
  0xb4   :  { %p8969_p9 = por %p8968_p8, %p8967_p7 }
  0xb6   :  { %p8970_p10 = pnand %p8969_p9, %p8963_p6 }
  0xb8   :  { %8973 = shalt.err (!%p8970_p10)
}
  0xb9   :  { %292 = dma.hbm_to_vmem [thread:$0]  %s9910_s14, 16, %s290_s16, [#allocation19]  }
  0xba   :  { %s8982_s6 = scalar_lea.vmem %s310_s22, 16  ;;  %s8986_s28 = scalar_lea.vmem %s310_s22, 32 }
  0xbb   :  { %p8983_p11 = scmp.ne.s32.totalorder %s310_s22, %s8982_s6  ;;  %p8987_p12 = scmp.lt.s32.totalorder %s310_s22, %s310_s22 }
  0xbc   :  { %p8988_p13 = scmp.lt.s32.totalorder %s8986_s28, %s8982_s6 }
  0xbe   :  { %p8989_p0 = por %p8988_p13, %p8987_p12 }
  0xc0   :  { %p8990_p1 = pnand %p8989_p0, %p8983_p11 }
  0xc2   :  { %8993 = shalt.err (!%p8990_p1)
}
  0xc3   :  { %312 = dma.hbm_to_vmem [thread:$0]  %s9920_s8, 16, %s310_s22, [#allocation22]  }
  0xc4   :  { %s9700_s24 = smov [#allocation24]   ;;  %s9701_s2 = smov [#allocation27]  }
  0xc5   :  { %s333_s1 = sshll.u32 %s9700_s24, 4  ;;  %s353_s7 = sshll.u32 %s9701_s2, 4  ;;  %s334_s1 = int_to_ptr.vmem [resolvable:$true] %s333_s1  ;;  %s354_s7 = int_to_ptr.vmem [resolvable:$true] %s353_s7 }
  0xc6   :  { %s9002_s10 = scalar_lea.vmem %s334_s1, 16  ;;  %s9006_s11 = scalar_lea.vmem %s334_s1, 32 }
  0xc7   :  { %p9003_p2 = scmp.ne.s32.totalorder %s334_s1, %s9002_s10  ;;  %p9007_p3 = scmp.lt.s32.totalorder %s334_s1, %s334_s1 }
  0xc8   :  { %p9008_p4 = scmp.lt.s32.totalorder %s9006_s11, %s9002_s10 }
  0xca   :  { %p9009_p5 = por %p9008_p4, %p9007_p3 }
  0xcc   :  { %p9010_p6 = pnand %p9009_p5, %p9003_p2 }
  0xce   :  { %9013 = shalt.err (!%p9010_p6)
}
  0xcf   :  { %336 = dma.hbm_to_vmem [thread:$0]  %s9940_s13, 16, %s334_s1, [#allocation25]  }
  0xd0   :  { %s9022_s14 = scalar_lea.vmem %s354_s7, 16  ;;  %s9026_s0 = scalar_lea.vmem %s354_s7, 32 }
  0xd1   :  { %p9023_p7 = scmp.ne.s32.totalorder %s354_s7, %s9022_s14  ;;  %p9027_p8 = scmp.lt.s32.totalorder %s354_s7, %s354_s7 }
  0xd2   :  { %p9028_p9 = scmp.lt.s32.totalorder %s9026_s0, %s9022_s14 }
  0xd4   :  { %p9029_p10 = por %p9028_p9, %p9027_p8 }
  0xd6   :  { %p9030_p11 = pnand %p9029_p10, %p9023_p7 }
  0xd8   :  { %9033 = shalt.err (!%p9030_p11)
}
  0xd9   :  { %356 = dma.hbm_to_vmem [thread:$0]  %s9950_s21, 16, %s354_s7, [#allocation28]  }
  0xda   :  { %s9702_s8 = smov [#allocation30]   ;;  %s9703_s15 = smov [#allocation33]  }
  0xdb   :  { %s377_s3 = sshll.u32 %s9702_s8, 4  ;;  %s397_s20 = sshll.u32 %s9703_s15, 4  ;;  %s378_s3 = int_to_ptr.vmem [resolvable:$true] %s377_s3  ;;  %s398_s20 = int_to_ptr.vmem [resolvable:$true] %s397_s20 }
  0xdc   :  { %s9042_s16 = scalar_lea.vmem %s378_s3, 16  ;;  %s9046_s18 = scalar_lea.vmem %s378_s3, 32 }
  0xdd   :  { %p9043_p12 = scmp.ne.s32.totalorder %s378_s3, %s9042_s16  ;;  %p9047_p13 = scmp.lt.s32.totalorder %s378_s3, %s378_s3 }
  0xde   :  { %p9048_p0 = scmp.lt.s32.totalorder %s9046_s18, %s9042_s16 }
  0xe0   :  { %p9049_p1 = por %p9048_p0, %p9047_p13 }
  0xe2   :  { %p9050_p2 = pnand %p9049_p1, %p9043_p12 }
  0xe4   :  { %9053 = shalt.err (!%p9050_p2)
}
  0xe5   :  { %380 = dma.hbm_to_vmem [thread:$0]  %s9970_s29, 16, %s378_s3, [#allocation31]  }
  0xe6   :  { %s9062_s13 = scalar_lea.vmem %s398_s20, 16  ;;  %s9066_s22 = scalar_lea.vmem %s398_s20, 32 }
  0xe7   :  { %p9063_p3 = scmp.ne.s32.totalorder %s398_s20, %s9062_s13  ;;  %p9067_p4 = scmp.lt.s32.totalorder %s398_s20, %s398_s20 }
  0xe8   :  { %p9068_p5 = scmp.lt.s32.totalorder %s9066_s22, %s9062_s13 }
  0xea   :  { %p9069_p6 = por %p9068_p5, %p9067_p4 }
  0xec   :  { %p9070_p7 = pnand %p9069_p6, %p9063_p3 }
  0xee   :  { %9073 = shalt.err (!%p9070_p7)
}
  0xef   :  { %400 = dma.hbm_to_vmem [thread:$0]  %s9980_s5, 16, %s398_s20, [#allocation34]  }
  0xf0   :  { %s9704_s21 = smov [#allocation36]   ;;  %s9705_s26 = smov [#allocation39]  }
  0xf1   :  { %s419_s23 = sshll.u32 %s9704_s21, 4  ;;  %s441_s6 = sshll.u32 %s9705_s26, 4  ;;  %s420_s23 = int_to_ptr.vmem [resolvable:$true] %s419_s23  ;;  %s442_s6 = int_to_ptr.vmem [resolvable:$true] %s441_s6 }
  0xf2   :  { %s9082_s28 = scalar_lea.vmem %s420_s23, 16  ;;  %s9086_s24 = scalar_lea.vmem %s420_s23, 32 }
  0xf3   :  { %p9083_p8 = scmp.ne.s32.totalorder %s420_s23, %s9082_s28  ;;  %p9087_p9 = scmp.lt.s32.totalorder %s420_s23, %s420_s23 }
  0xf4   :  { %p9088_p10 = scmp.lt.s32.totalorder %s9086_s24, %s9082_s28 }
  0xf6   :  { %p9089_p11 = por %p9088_p10, %p9087_p9 }
  0xf8   :  { %p9090_p12 = pnand %p9089_p11, %p9083_p8 }
  0xfa   :  { %9093 = shalt.err (!%p9090_p12)
}
  0xfb   :  { %422 = dma.hbm_to_vmem [thread:$0]  %s9990_s9, 16, %s420_s23, [#allocation37]  }
  0xfc   :  { %s9102_s29 = scalar_lea.vmem %s442_s6, 16  ;;  %s9106_s1 = scalar_lea.vmem %s442_s6, 32 }
  0xfd   :  { %p9103_p13 = scmp.ne.s32.totalorder %s442_s6, %s9102_s29  ;;  %p9107_p0 = scmp.lt.s32.totalorder %s442_s6, %s442_s6 }
  0xfe   :  { %p9108_p1 = scmp.lt.s32.totalorder %s9106_s1, %s9102_s29 }
 0x100   :  { %p9109_p2 = por %p9108_p1, %p9107_p0 }
 0x102   :  { %p9110_p3 = pnand %p9109_p2, %p9103_p13 }
 0x104   :  { %9113 = shalt.err (!%p9110_p3)
}
 0x105   :  { %444 = dma.hbm_to_vmem [thread:$0]  %s10000_s12, 16, %s442_s6, [#allocation40]  }
 0x106   :  { %s9706_s5 = smov [#allocation42]   ;;  %s9707_s7 = smov [#allocation45]  }
 0x107   :  { %s461_s2 = sshll.u32 %s9706_s5, 4  ;;  %s483_s10 = sshll.u32 %s9707_s7, 4  ;;  %s462_s2 = int_to_ptr.vmem [resolvable:$true] %s461_s2  ;;  %s484_s10 = int_to_ptr.vmem [resolvable:$true] %s483_s10 }
 0x108   :  { %s9122_s11 = scalar_lea.vmem %s462_s2, 16  ;;  %s9126_s14 = scalar_lea.vmem %s462_s2, 32 }
 0x109   :  { %p9123_p4 = scmp.ne.s32.totalorder %s462_s2, %s9122_s11  ;;  %p9127_p5 = scmp.lt.s32.totalorder %s462_s2, %s462_s2 }
 0x10a   :  { %p9128_p6 = scmp.lt.s32.totalorder %s9126_s14, %s9122_s11 }
 0x10c   :  { %p9129_p7 = por %p9128_p6, %p9127_p5 }
 0x10e   :  { %p9130_p8 = pnand %p9129_p7, %p9123_p4 }
 0x110   :  { %9133 = shalt.err (!%p9130_p8)
}
 0x111   :  { %464 = dma.hbm_to_vmem [thread:$0]  %s10010_s30, 16, %s462_s2, [#allocation43]  }
 0x112   :  { %s9142_s9 = scalar_lea.vmem %s484_s10, 16  ;;  %s9146_s0 = scalar_lea.vmem %s484_s10, 32 }
 0x113   :  { %p9143_p9 = scmp.ne.s32.totalorder %s484_s10, %s9142_s9  ;;  %p9147_p10 = scmp.lt.s32.totalorder %s484_s10, %s484_s10 }
 0x114   :  { %p9148_p11 = scmp.lt.s32.totalorder %s9146_s0, %s9142_s9 }
 0x116   :  { %p9149_p12 = por %p9148_p11, %p9147_p10 }
 0x118   :  { %p9150_p13 = pnand %p9149_p12, %p9143_p9 }
 0x11a   :  { %9153 = shalt.err (!%p9150_p13)
}
 0x11b   :  { %486 = dma.hbm_to_vmem [thread:$0]  %s10020_s27, 16, %s484_s10, [#allocation46]  }
 0x11c   :  { %s9708_s12 = smov [#allocation48]   ;;  %s9709_s3 = smov [#allocation51]  }
 0x11d   :  { %s503_s8 = sshll.u32 %s9708_s12, 4  ;;  %s525_s15 = sshll.u32 %s9709_s3, 4  ;;  %s504_s8 = int_to_ptr.vmem [resolvable:$true] %s503_s8  ;;  %s526_s15 = int_to_ptr.vmem [resolvable:$true] %s525_s15 }
 0x11e   :  { %s9162_s20 = scalar_lea.vmem %s504_s8, 16  ;;  %s9166_s16 = scalar_lea.vmem %s504_s8, 32 }
 0x11f   :  { %p9163_p0 = scmp.ne.s32.totalorder %s504_s8, %s9162_s20  ;;  %p9167_p1 = scmp.lt.s32.totalorder %s504_s8, %s504_s8 }
 0x120   :  { %p9168_p2 = scmp.lt.s32.totalorder %s9166_s16, %s9162_s20 }
 0x122   :  { %p9169_p3 = por %p9168_p2, %p9167_p1 }
 0x124   :  { %p9170_p4 = pnand %p9169_p3, %p9163_p0 }
 0x126   :  { %9173 = shalt.err (!%p9170_p4)
}
 0x127   :  { %s11199_s30 = sld [smem:[#allocation118_spill]]  ;;  %s9182_s18 = scalar_lea.vmem %s526_s15, 16 }
 0x128   :  { %p9183_p5 = scmp.ne.s32.totalorder %s526_s15, %s9182_s18  ;;  %s9186_s13 = scalar_lea.vmem %s526_s15, 32 }
 0x129   :  { %p9187_p6 = scmp.lt.s32.totalorder %s526_s15, %s526_s15  ;;  %p9188_p7 = scmp.lt.s32.totalorder %s9186_s13, %s9182_s18 }
 0x12b   :  { %p9189_p8 = por %p9188_p7, %p9187_p6 }
 0x12d   :  { %506 = dma.hbm_to_vmem [thread:$0]  %s11199_s30, 16, %s504_s8, [#allocation49]  }
 0x12e   :  { %p9190_p9 = pnand %p9189_p8, %p9183_p5 }
 0x130   :  { %9193 = shalt.err (!%p9190_p9)
}
 0x131   :  { %s11200_s27 = sld [smem:[#allocation120_spill]]  ;;  %s9710_s22 = smov [#allocation54]  }
 0x132   :  { %s547_s21 = sshll.u32 %s9710_s22, 4  ;;  %s9711_s23 = smov [#allocation3]   ;;  %s548_s21 = int_to_ptr.vmem [resolvable:$true] %s547_s21 }
 0x133   :  { %s165_s26 = sshll.u32 %s9711_s23, 4  ;;  %s9202_s6 = scalar_lea.vmem %s548_s21, 16  ;;  %s166_s26 = int_to_ptr.vmem [resolvable:$true] %s165_s26 }
 0x134   :  { %p9203_p10 = scmp.ne.s32.totalorder %s548_s21, %s9202_s6  ;;  %s9206_s28 = scalar_lea.vmem %s548_s21, 32 }
 0x135   :  { %p9207_p11 = scmp.lt.s32.totalorder %s548_s21, %s548_s21  ;;  %p9208_p12 = scmp.lt.s32.totalorder %s9206_s28, %s9202_s6 }
 0x137   :  { %528 = dma.hbm_to_vmem [thread:$0]  %s11200_s27, 16, %s526_s15, [#allocation52]  }
 0x138   :  { %p9209_p13 = por %p9208_p12, %p9207_p11 }
 0x13a   :  { %p9210_p0 = pnand %p9209_p13, %p9203_p10 }
 0x13c   :  { %9213 = shalt.err (!%p9210_p0)
}
 0x13d   :  { %550 = dma.hbm_to_vmem [thread:$0]  %s10055_s17, 16, %s548_s21, [#allocation55]  }
 0x13e   :  { %s9222_s24 = scalar_lea.vmem %s166_s26, 16  ;;  %s9226_s29 = scalar_lea.vmem %s166_s26, 32 }
 0x13f   :  { %p9223_p1 = scmp.ne.s32.totalorder %s166_s26, %s9222_s24  ;;  %p9227_p2 = scmp.lt.s32.totalorder %s166_s26, %s166_s26 }
 0x140   :  { %p9228_p3 = scmp.lt.s32.totalorder %s9226_s29, %s9222_s24 }
 0x142   :  { %p9229_p4 = por %p9228_p3, %p9227_p2 }
 0x144   :  { %p9230_p5 = pnand %p9229_p4, %p9223_p1 }
 0x146   :  { %9233 = shalt.err (!%p9230_p5)
}
 0x147   :  { %s11201_s1 = sld [smem:[#allocation82_spill]]  ;;  %s9712_s5 = smov [#allocation8]  }
 0x148   :  { %s205_s2 = sshll.u32 %s9712_s5, 4  ;;  %s9713_s7 = smov [#allocation11]   ;;  %s206_s2 = int_to_ptr.vmem [resolvable:$true] %s205_s2 }
 0x149   :  { %s235_s10 = sshll.u32 %s9713_s7, 4  ;;  %s9242_s11 = scalar_lea.vmem %s206_s2, 16  ;;  %s236_s10 = int_to_ptr.vmem [resolvable:$true] %s235_s10 }
 0x14a   :  { %p9243_p6 = scmp.ne.s32.totalorder %s206_s2, %s9242_s11  ;;  %s9246_s14 = scalar_lea.vmem %s206_s2, 32 }
 0x14b   :  { %p9247_p7 = scmp.lt.s32.totalorder %s206_s2, %s206_s2  ;;  %p9248_p8 = scmp.lt.s32.totalorder %s9246_s14, %s9242_s11 }
 0x14d   :  { %168 = dma.hbm_to_vmem [thread:$0]  %s11201_s1, 16, %s166_s26, [#allocation4]  }
 0x14e   :  { %p9249_p9 = por %p9248_p8, %p9247_p7 }
 0x150   :  { %p9250_p10 = pnand %p9249_p9, %p9243_p6 }
 0x152   :  { %9253 = shalt.err (!%p9250_p10)
}
 0x153   :  { %s11202_s17 = sld [smem:[#allocation93_spill]]  ;;  %s9262_s9 = scalar_lea.vmem %s236_s10, 16 }
 0x154   :  { %p9263_p11 = scmp.ne.s32.totalorder %s236_s10, %s9262_s9  ;;  %s9266_s0 = scalar_lea.vmem %s236_s10, 32 }
 0x155   :  { %p9267_p12 = scmp.lt.s32.totalorder %s236_s10, %s236_s10  ;;  %p9268_p13 = scmp.lt.s32.totalorder %s9266_s0, %s9262_s9 }
 0x157   :  { %p9269_p0 = por %p9268_p13, %p9267_p12 }
 0x159   :  { %208 = dma.hbm_to_vmem [thread:$0]  %s11202_s17, 16, %s206_s2, [#allocation7]  }
 0x15a   :  { %p9270_p1 = pnand %p9269_p0, %p9263_p11 }
 0x15c   :  { %9273 = shalt.err (!%p9270_p1)
}
 0x15d   :  { %s11203_s12 = sld [smem:[#allocation99_spill]]  ;;  %s9714_s8 = smov [#allocation14]  }
 0x15e   :  { %s257_s3 = sshll.u32 %s9714_s8, 4  ;;  %s9715_s15 = smov [#allocation17]   ;;  %s258_s3 = int_to_ptr.vmem [resolvable:$true] %s257_s3 }
 0x15f   :  { %s279_s20 = sshll.u32 %s9715_s15, 4  ;;  %s9282_s16 = scalar_lea.vmem %s258_s3, 16  ;;  %s280_s20 = int_to_ptr.vmem [resolvable:$true] %s279_s20 }
 0x160   :  { %p9283_p2 = scmp.ne.s32.totalorder %s258_s3, %s9282_s16  ;;  %s9286_s30 = scalar_lea.vmem %s258_s3, 32 }
 0x161   :  { %p9287_p3 = scmp.lt.s32.totalorder %s258_s3, %s258_s3  ;;  %p9288_p4 = scmp.lt.s32.totalorder %s9286_s30, %s9282_s16 }
 0x163   :  { %238 = dma.hbm_to_vmem [thread:$0]  %s11203_s12, 16, %s236_s10, [#allocation10]  }
 0x164   :  { %p9289_p5 = por %p9288_p4, %p9287_p3 }
 0x166   :  { %p9290_p6 = pnand %p9289_p5, %p9283_p2 }
 0x168   :  { %9293 = shalt.err (!%p9290_p6)
}
 0x169   :  { %s11204_s18 = sld [smem:[#allocation101_spill]]  ;;  %s9302_s13 = scalar_lea.vmem %s280_s20, 16 }
 0x16a   :  { %p9303_p7 = scmp.ne.s32.totalorder %s280_s20, %s9302_s13  ;;  %s9306_s27 = scalar_lea.vmem %s280_s20, 32 }
 0x16b   :  { %p9307_p8 = scmp.lt.s32.totalorder %s280_s20, %s280_s20  ;;  %p9308_p9 = scmp.lt.s32.totalorder %s9306_s27, %s9302_s13 }
 0x16d   :  { %p9309_p10 = por %p9308_p9, %p9307_p8 }
 0x16f   :  { %260 = dma.hbm_to_vmem [thread:$0]  %s11204_s18, 16, %s258_s3, [#allocation13]  }
 0x170   :  { %p9310_p11 = pnand %p9309_p10, %p9303_p7 }
 0x172   :  { %9313 = shalt.err (!%p9310_p11)
}
 0x173   :  { %s11205_s22 = sld [smem:[#allocation103_spill]]  ;;  %s9716_s21 = smov [#allocation20]  }
 0x174   :  { %s299_s23 = sshll.u32 %s9716_s21, 4  ;;  %s9717_s26 = smov [#allocation23]   ;;  %s300_s23 = int_to_ptr.vmem [resolvable:$true] %s299_s23 }
 0x175   :  { %s321_s6 = sshll.u32 %s9717_s26, 4  ;;  %s9322_s28 = scalar_lea.vmem %s300_s23, 16  ;;  %s322_s6 = int_to_ptr.vmem [resolvable:$true] %s321_s6 }
 0x176   :  { %p9323_p12 = scmp.ne.s32.totalorder %s300_s23, %s9322_s28  ;;  %s9326_s24 = scalar_lea.vmem %s300_s23, 32 }
 0x177   :  { %p9327_p13 = scmp.lt.s32.totalorder %s300_s23, %s300_s23  ;;  %p9328_p0 = scmp.lt.s32.totalorder %s9326_s24, %s9322_s28 }
 0x179   :  { %282 = dma.hbm_to_vmem [thread:$0]  %s11205_s22, 16, %s280_s20, [#allocation16]  }
 0x17a   :  { %p9329_p1 = por %p9328_p0, %p9327_p13 }
 0x17c   :  { %p9330_p2 = pnand %p9329_p1, %p9323_p12 }
 0x17e   :  { %9333 = shalt.err (!%p9330_p2)
}
 0x17f   :  { %s11206_s29 = sld [smem:[#allocation104_spill]]  ;;  %s9342_s1 = scalar_lea.vmem %s322_s6, 16 }
 0x180   :  { %p9343_p3 = scmp.ne.s32.totalorder %s322_s6, %s9342_s1  ;;  %s9346_s5 = scalar_lea.vmem %s322_s6, 32 }
 0x181   :  { %p9347_p4 = scmp.lt.s32.totalorder %s322_s6, %s322_s6  ;;  %p9348_p5 = scmp.lt.s32.totalorder %s9346_s5, %s9342_s1 }
 0x183   :  { %p9349_p6 = por %p9348_p5, %p9347_p4 }
 0x185   :  { %302 = dma.hbm_to_vmem [thread:$0]  %s11206_s29, 16, %s300_s23, [#allocation19]  }
 0x186   :  { %p9350_p7 = pnand %p9349_p6, %p9343_p3 }
 0x188   :  { %9353 = shalt.err (!%p9350_p7)
}
 0x189   :  { %s11207_s2 = sld [smem:[#allocation106_spill]]  ;;  %s9718_s7 = smov [#allocation26]  }
 0x18a   :  { %s343_s10 = sshll.u32 %s9718_s7, 4  ;;  %s9719_s11 = smov [#allocation29]   ;;  %s344_s10 = int_to_ptr.vmem [resolvable:$true] %s343_s10 }
 0x18b   :  { %s365_s14 = sshll.u32 %s9719_s11, 4  ;;  %s9362_s17 = scalar_lea.vmem %s344_s10, 16  ;;  %s366_s14 = int_to_ptr.vmem [resolvable:$true] %s365_s14 }
 0x18c   :  { %p9363_p8 = scmp.ne.s32.totalorder %s344_s10, %s9362_s17  ;;  %s9366_s9 = scalar_lea.vmem %s344_s10, 32 }
 0x18d   :  { %p9367_p9 = scmp.lt.s32.totalorder %s344_s10, %s344_s10  ;;  %p9368_p10 = scmp.lt.s32.totalorder %s9366_s9, %s9362_s17 }
 0x18f   :  { %324 = dma.hbm_to_vmem [thread:$0]  %s11207_s2, 16, %s322_s6, [#allocation22]  }
 0x190   :  { %p9369_p11 = por %p9368_p10, %p9367_p9 }
 0x192   :  { %p9370_p12 = pnand %p9369_p11, %p9363_p8 }
 0x194   :  { %9373 = shalt.err (!%p9370_p12)
}
 0x195   :  { %s11208_s0 = sld [smem:[#allocation108_spill]]  ;;  %s9382_s12 = scalar_lea.vmem %s366_s14, 16 }
 0x196   :  { %p9383_p13 = scmp.ne.s32.totalorder %s366_s14, %s9382_s12  ;;  %s9386_s8 = scalar_lea.vmem %s366_s14, 32 }
 0x197   :  { %p9387_p0 = scmp.lt.s32.totalorder %s366_s14, %s366_s14  ;;  %p9388_p1 = scmp.lt.s32.totalorder %s9386_s8, %s9382_s12 }
 0x199   :  { %p9389_p2 = por %p9388_p1, %p9387_p0 }
 0x19b   :  { %346 = dma.hbm_to_vmem [thread:$0]  %s11208_s0, 16, %s344_s10, [#allocation25]  }
 0x19c   :  { %p9390_p3 = pnand %p9389_p2, %p9383_p13 }
 0x19e   :  { %9393 = shalt.err (!%p9390_p3)
}
 0x19f   :  { %s11209_s3 = sld [smem:[#allocation110_spill]]  ;;  %s9720_s15 = smov [#allocation32]  }
 0x1a0   :  { %s387_s20 = sshll.u32 %s9720_s15, 4  ;;  %s9721_s16 = smov [#allocation35]   ;;  %s388_s20 = int_to_ptr.vmem [resolvable:$true] %s387_s20 }
 0x1a1   :  { %s406_s30 = sshll.u32 %s9721_s16, 4  ;;  %s9402_s18 = scalar_lea.vmem %s388_s20, 16  ;;  %s407_s30 = int_to_ptr.vmem [resolvable:$true] %s406_s30 }
 0x1a2   :  { %p9403_p4 = scmp.ne.s32.totalorder %s388_s20, %s9402_s18  ;;  %s9406_s13 = scalar_lea.vmem %s388_s20, 32 }
 0x1a3   :  { %p9407_p5 = scmp.lt.s32.totalorder %s388_s20, %s388_s20  ;;  %p9408_p6 = scmp.lt.s32.totalorder %s9406_s13, %s9402_s18 }
 0x1a5   :  { %368 = dma.hbm_to_vmem [thread:$0]  %s11209_s3, 16, %s366_s14, [#allocation28]  }
 0x1a6   :  { %p9409_p7 = por %p9408_p6, %p9407_p5 }
 0x1a8   :  { %p9410_p8 = pnand %p9409_p7, %p9403_p4 }
 0x1aa   :  { %9413 = shalt.err (!%p9410_p8)
}
 0x1ab   :  { %s11210_s27 = sld [smem:[#allocation112_spill]]  ;;  %s9422_s22 = scalar_lea.vmem %s407_s30, 512 }
 0x1ac   :  { %p9423_p9 = scmp.ne.s32.totalorder %s407_s30, %s9422_s22  ;;  %p9427_p10 = scmp.lt.s32.totalorder %s407_s30, %s407_s30 }
 0x1ad   :  { %p9428_p11 = scmp.lt.s32.totalorder %s9422_s22, %s9422_s22 }
 0x1af   :  { %p9429_p12 = por %p9428_p11, %p9427_p10 }
 0x1b1   :  { %390 = dma.hbm_to_vmem [thread:$0]  %s11210_s27, 16, %s388_s20, [#allocation31]  }
 0x1b2   :  { %p9430_p13 = pnand %p9429_p12, %p9423_p9 }
 0x1b4   :  { %9433 = shalt.err (!%p9430_p13)
}
 0x1b5   :  { %s9722_s21 = smov 128   ;;  %s11211_s23 = sld [smem:[#allocation113_spill]] }
 0x1b6   :  { %s9723_s26 = smov 8   ;;  %s9724_s6 = smov [#allocation38]  }
 0x1b7   :  { %s428_s28 = sshll.u32 %s9724_s6, 4  ;;  %s429_s28 = int_to_ptr.vmem [resolvable:$true] %s428_s28 }
 0x1b8   :  { %s9442_s24 = scalar_lea.vmem %s429_s28, 112  ;;  %s9446_s29 = scalar_lea.vmem %s429_s28, 128 }
 0x1b9   :  { %p9443_p0 = scmp.ne.s32.totalorder %s429_s28, %s9442_s24  ;;  %p9447_p1 = scmp.lt.s32.totalorder %s429_s28, %s429_s28 }
 0x1ba   :  { %p9448_p2 = scmp.lt.s32.totalorder %s9446_s29, %s9442_s24 }
 0x1bb   :  { %412 = dma.hbm_to_vmem [thread:$0]  %s11211_s23, 512, %s407_s30, [#allocation34], %s9722_s21, %s9722_s21, %s9723_s26  }
 0x1bc   :  { %p9449_p3 = por %p9448_p2, %p9447_p1 }
 0x1be   :  { %p9450_p4 = pnand %p9449_p3, %p9443_p0 }
 0x1c0   :  { %9453 = shalt.err (!%p9450_p4)
}
 0x1c1   :  { %s9725_s1 = smov 16   ;;  %s11212_s5 = sld [smem:[#allocation114_spill]] }
 0x1c2   :  { %s9726_s2 = smov 1   ;;  %s9727_s7 = smov [#allocation41]  }
 0x1c3   :  { %s451_s10 = sshll.u32 %s9727_s7, 4  ;;  %s9728_s11 = smov [#allocation44]   ;;  %s452_s10 = int_to_ptr.vmem [resolvable:$true] %s451_s10 }
 0x1c4   :  { %s470_s14 = sshll.u32 %s9728_s11, 4  ;;  %s9462_s17 = scalar_lea.vmem %s452_s10, 16  ;;  %s471_s14 = int_to_ptr.vmem [resolvable:$true] %s470_s14 }
 0x1c5   :  { %p9463_p5 = scmp.ne.s32.totalorder %s452_s10, %s9462_s17  ;;  %s9466_s9 = scalar_lea.vmem %s452_s10, 32 }
 0x1c6   :  { %p9467_p6 = scmp.lt.s32.totalorder %s452_s10, %s452_s10  ;;  %p9468_p7 = scmp.lt.s32.totalorder %s9466_s9, %s9462_s17 }
 0x1c7   :  { %434 = dma.hbm_to_vmem [thread:$0]  %s11212_s5, 112, %s429_s28, [#allocation37], %s9725_s1, %s9725_s1, %s9726_s2  }
 0x1c8   :  { %p9469_p8 = por %p9468_p7, %p9467_p6 }
 0x1ca   :  { %p9470_p9 = pnand %p9469_p8, %p9463_p5 }
 0x1cc   :  { %9473 = shalt.err (!%p9470_p9)
}
 0x1cd   :  { %s11213_s0 = sld [smem:[#allocation115_spill]]  ;;  %s9482_s12 = scalar_lea.vmem %s471_s14, 512 }
 0x1ce   :  { %p9483_p10 = scmp.ne.s32.totalorder %s471_s14, %s9482_s12  ;;  %p9487_p11 = scmp.lt.s32.totalorder %s471_s14, %s471_s14 }
 0x1cf   :  { %p9488_p12 = scmp.lt.s32.totalorder %s9482_s12, %s9482_s12 }
 0x1d1   :  { %p9489_p13 = por %p9488_p12, %p9487_p11 }
 0x1d3   :  { %454 = dma.hbm_to_vmem [thread:$0]  %s11213_s0, 16, %s452_s10, [#allocation40]  }
 0x1d4   :  { %p9490_p0 = pnand %p9489_p13, %p9483_p10 }
 0x1d6   :  { %9493 = shalt.err (!%p9490_p0)
}
 0x1d7   :  { %s11214_s8 = sld [smem:[#allocation116_spill]]  ;;  %s9729_s3 = smov [#allocation47]  }
 0x1d8   :  { %s493_s15 = sshll.u32 %s9729_s3, 4  ;;  %s9730_s20 = smov [#allocation50]   ;;  %s494_s15 = int_to_ptr.vmem [resolvable:$true] %s493_s15 }
 0x1d9   :  { %s512_s16 = sshll.u32 %s9730_s20, 4  ;;  %s9502_s30 = scalar_lea.vmem %s494_s15, 16  ;;  %s513_s16 = int_to_ptr.vmem [resolvable:$true] %s512_s16 }
 0x1da   :  { %p9503_p1 = scmp.ne.s32.totalorder %s494_s15, %s9502_s30  ;;  %s9506_s18 = scalar_lea.vmem %s494_s15, 32 }
 0x1db   :  { %p9507_p2 = scmp.lt.s32.totalorder %s494_s15, %s494_s15  ;;  %p9508_p3 = scmp.lt.s32.totalorder %s9506_s18, %s9502_s30 }
 0x1dd   :  { %476 = dma.hbm_to_vmem [thread:$0]  %s11214_s8, 512, %s471_s14, [#allocation43], %s9722_s21, %s9722_s21, %s9723_s26  }
 0x1de   :  { %p9509_p4 = por %p9508_p3, %p9507_p2 }
 0x1e0   :  { %p9510_p5 = pnand %p9509_p4, %p9503_p1 }
 0x1e2   :  { %9513 = shalt.err (!%p9510_p5)
}
 0x1e3   :  { %s11215_s13 = sld [smem:[#allocation117_spill]]  ;;  %s9522_s27 = scalar_lea.vmem %s513_s16, 512 }
 0x1e4   :  { %p9523_p6 = scmp.ne.s32.totalorder %s513_s16, %s9522_s27  ;;  %p9527_p7 = scmp.lt.s32.totalorder %s513_s16, %s513_s16 }
 0x1e5   :  { %p9528_p8 = scmp.lt.s32.totalorder %s9522_s27, %s9522_s27 }
 0x1e7   :  { %p9529_p9 = por %p9528_p8, %p9527_p7 }
 0x1e9   :  { %496 = dma.hbm_to_vmem [thread:$0]  %s11215_s13, 16, %s494_s15, [#allocation46]  }
 0x1ea   :  { %p9530_p10 = pnand %p9529_p9, %p9523_p6 }
 0x1ec   :  { %9533 = shalt.err (!%p9530_p10)
}
 0x1ed   :  { %s11216_s22 = sld [smem:[#allocation119_spill]]  ;;  %s9731_s23 = smov [#allocation53]  }
 0x1ee   :  { %s537_s6 = sshll.u32 %s9731_s23, 4  ;;  %s9732_s28 = smov [#allocation56]   ;;  %s538_s6 = int_to_ptr.vmem [resolvable:$true] %s537_s6 }
 0x1ef   :  { %s557_s24 = sshll.u32 %s9732_s28, 4  ;;  %s9542_s29 = scalar_lea.vmem %s538_s6, 16  ;;  %s558_s24 = int_to_ptr.vmem [resolvable:$true] %s557_s24 }
 0x1f0   :  { %p9543_p11 = scmp.ne.s32.totalorder %s538_s6, %s9542_s29  ;;  %s9546_s5 = scalar_lea.vmem %s538_s6, 32 }
 0x1f1   :  { %p9547_p12 = scmp.lt.s32.totalorder %s538_s6, %s538_s6  ;;  %p9548_p13 = scmp.lt.s32.totalorder %s9546_s5, %s9542_s29 }
 0x1f3   :  { %518 = dma.hbm_to_vmem [thread:$0]  %s11216_s22, 512, %s513_s16, [#allocation49], %s9722_s21, %s9722_s21, %s9723_s26  }
 0x1f4   :  { %p9549_p0 = por %p9548_p13, %p9547_p12 }
 0x1f6   :  { %p9550_p1 = pnand %p9549_p0, %p9543_p11 }
 0x1f8   :  { %9553 = shalt.err (!%p9550_p1)
}
 0x1f9   :  { %540 = dma.hbm_to_vmem [thread:$0]  %s10050_s4, 16, %s538_s6, [#allocation52]  }
 0x1fa   :  { %s9562_s2 = scalar_lea.vmem %s558_s24, 16  ;;  %s9566_s7 = scalar_lea.vmem %s558_s24, 32 }
 0x1fb   :  { %p9563_p2 = scmp.ne.s32.totalorder %s558_s24, %s9562_s2  ;;  %p9567_p3 = scmp.lt.s32.totalorder %s558_s24, %s558_s24 }
 0x1fc   :  { %p9568_p4 = scmp.lt.s32.totalorder %s9566_s7, %s9562_s2 }
 0x1fe   :  { %p9569_p5 = por %p9568_p4, %p9567_p3 }
 0x200   :  { %p9570_p6 = pnand %p9569_p5, %p9563_p2 }
 0x202   :  { %9573 = shalt.err (!%p9570_p6)
}
 0x203   :  { %560 = dma.hbm_to_vmem [thread:$0]  %s10060_s25, 16, %s558_s24, [#allocation55]  }
 0x204   :  { %9594 = dma.done.wait [#allocation4], 16  }
 0x205   :  { %9595 = vsyncadd [#allocation4], 4294967280 }
 0x206   :  { %9596 = dma.done.wait [#allocation7], 32  }
 0x207   :  { %9597 = vsyncadd [#allocation7], 4294967264 }
 0x208   :  { %9598 = dma.done.wait [#allocation10], 32  }
 0x209   :  { %9599 = vsyncadd [#allocation10], 4294967264 }
 0x20a   :  { %9600 = dma.done.wait [#allocation13], 32  }
 0x20b   :  { %9601 = vsyncadd [#allocation13], 4294967264 }
 0x20c   :  { %9602 = dma.done.wait [#allocation16], 32  }
 0x20d   :  { %9603 = vsyncadd [#allocation16], 4294967264 }
 0x20e   :  { %9604 = dma.done.wait [#allocation19], 32  }
 0x20f   :  { %9605 = vsyncadd [#allocation19], 4294967264 }
 0x210   :  { %9606 = dma.done.wait [#allocation22], 32  }
 0x211   :  { %9607 = vsyncadd [#allocation22], 4294967264 }
 0x212   :  { %9608 = dma.done.wait [#allocation25], 32  }
 0x213   :  { %9609 = vsyncadd [#allocation25], 4294967264 }
 0x214   :  { %9610 = dma.done.wait [#allocation28], 32  }
 0x215   :  { %9611 = vsyncadd [#allocation28], 4294967264 }
 0x216   :  { %9612 = dma.done.wait [#allocation31], 32  }
 0x217   :  { %9613 = vsyncadd [#allocation31], 4294967264 }
 0x218   :  { %9614 = dma.done.wait [#allocation34], 528  }
 0x219   :  { %9615 = vsyncadd [#allocation34], 4294966768 }
 0x21a   :  { %9616 = dma.done.wait [#allocation37], 128  }
 0x21b   :  { %9617 = vsyncadd [#allocation37], 4294967168 }
 0x21c   :  { %9618 = dma.done.wait [#allocation40], 32  }
 0x21d   :  { %9619 = vsyncadd [#allocation40], 4294967264 }
 0x21e   :  { %9620 = dma.done.wait [#allocation43], 528  }
 0x21f   :  { %9621 = vsyncadd [#allocation43], 4294966768 }
 0x220   :  { %9622 = dma.done.wait [#allocation46], 32  }
 0x221   :  { %9623 = vsyncadd [#allocation46], 4294967264 }
 0x222   :  { %9624 = dma.done.wait [#allocation49], 528  }
 0x223   :  { %9625 = vsyncadd [#allocation49], 4294966768 }
 0x224   :  { %9626 = dma.done.wait [#allocation52], 32  }
 0x225   :  { %9627 = vsyncadd [#allocation52], 4294967264 }
 0x226   :  { %9628 = dma.done.wait [#allocation55], 32  }
 0x227   :  { %9629 = vsyncadd [#allocation55], 4294967264  ;;  %s11217_s25 = sld [smem:[#allocation77_spill]]  ;;  %vm700_vm0 = vcmask 261120   ;;  %vm925_vm1 = vcmask 523264   ;;  %s9733_s8 = smov 96  }
 0x228   :  { %s11218_s4 = sld [smem:[#allocation81_spill]]  ;;  %vm1223_vm2 = vcmask 64512   ;;  %vm1416_vm3 = vcmask 130048   ;;  %s9735_s15 = smov 64   ;;  %vm2903_vm4 = vcmask 195584   ;;  %vm3254_vm5 = vcmask 1042432  }
 0x229   :  { %s11219_s10 = sld [smem:[#allocation79_spill]]  ;;  %s9736_s20 = smov 88   ;;  %vm3273_vm6 = vcmask 259072  }
 0x22a   :  { %s11220_s11 = sld [smem:[#allocation80_spill]]  ;;  %s9737_s16 = smov 120  }
 0x22b   :  { %s11221_s14 = sld [smem:[#allocation83_spill]]  ;;  %s9738_s30 = smov 56  }
 0x22c   :  { %s11222_s17 = sld [smem:[#allocation86_spill]]  ;;  %s9739_s18 = smov 80  }
 0x22d   :  { %v10114_v0 = vld [vmem:[%s11217_s25] sm:$0xff]  ;;  %v10117_v1 = vld [vmem:[%s11217_s25 + $0x10] sm:$0xff]  ;;  %v10120_v2 = vld [vmem:[%s11217_s25 + $0x8] sm:$0xff]  ;;  %s11223_s9 = sld [smem:[#allocation84_spill]]  ;;  %s9740_s13 = smov 112  }
 0x22e   :  { %v701_v3 = vsel %vm700_vm0, %v10114_v0, 0.0  ;;  %v707_v4 = vsel %vm700_vm0, %v10117_v1, 0.0  ;;  %v10127_v5 = vld [vmem:[%s11217_s25 + $0x18] sm:$0xff]  ;;  %v704_v6 = vsel %vm700_vm0, %v10120_v2, 0.0  ;;  %v776_v29 = vld [vmem:[%s11218_s4 + $0x10] sm:$0xff]  ;;  %v775_v30 = vld [vmem:[%s11218_s4 + $0x8] sm:$0xff] }
 0x22f   :  { %702 = vadd.xlane.f32.xlu0 %v701_v3  ;;  %708 = vadd.xlane.f32.xlu1 %v707_v4  ;;  %v710_v7 = vsel %vm700_vm0, %v10127_v5, 0.0  ;;  %v777_v28 = vld [vmem:[%s11218_s4 + $0x18] sm:$0xff]  ;;  %v774_v31 = vld [vmem:[%s11218_s4] sm:$0xff]  ;;  %s11224_s0 = sld [smem:[#allocation85_spill]]  ;;  %s9741_s27 = smov 48  }
 0x230   :  { %7939 = vmatprep.subr.mxu1 %v777_v28  ;;  %v7451_v45 = vld [vmem:[%s11219_s10] ss:$0 sm:$0xff]  ;;  %s11225_s12 = sld [smem:[#allocation87_spill]]  ;;  %s9742_s22 = smov 72  }
 0x231   :  { %7940 = vmatpush3.msra.mxu1 %v777_v28  ;;  %v7452_v47 = vld [vmem:[%s11220_s11] ss:$0 sm:$0xff]  ;;  %v917_v62 = vld [vmem:[%s11221_s14 + $0x38] sm:$0xff]  ;;  %v916_v63 = vld [vmem:[%s11221_s14 + $0x30] sm:$0xff]  ;;  %s11226_s3 = sld [smem:[#allocation78_spill]]  ;;  %s9743_s23 = smov 104  }
 0x232   :  { %7941 = vmatprep.subr.mxu1 %v776_v29  ;;  %v915_v3 = vld [vmem:[%s11221_s14 + $0x28] sm:$0xff]  ;;  %v914_v4 = vld [vmem:[%s11221_s14 + $0x20] sm:$0xff]  ;;  %s9744_s6 = smov 40   ;;  %s11227_s28 = sld [smem:[#allocation88_spill]] }
 0x233   :  { %705 = vadd.xlane.f32.xlu0 %v704_v6  ;;  %711 = vadd.xlane.f32.xlu1 %v710_v7  ;;  %v913_v6 = vld [vmem:[%s11221_s14 + $0x18] sm:$0xff]  ;;  %v912_v7 = vld [vmem:[%s11221_s14 + $0x10] sm:$0xff]  ;;  %s9745_s24 = smov 24   ;;  %s11228_s29 = sld [smem:[#allocation89_spill]] }
 0x234   :  { %7942 = vmatpush3.msra.mxu1 %v776_v29  ;;  %s11229_s5 = sld [smem:[#allocation92_spill]] }
 0x235   :  { %7943 = vmatprep.subr.mxu1 %v775_v30  ;;  %s11230_s2 = sld [smem:[#allocation90_spill]] }
 0x236   :  { %7944 = vmatpush3.msra.mxu1 %v775_v30  ;;  %s11231_s7 = sld [smem:[#allocation91_spill]] }
 0x237   :  { %7945 = vmatprep.subr.mxu1 %v774_v31  ;;  %s11232_s25 = sld [smem:[#allocation98_spill]] }
 0x238   :  { %7946 = vmatpush3.msra.mxu1 %v774_v31  ;;  %s11233_s4 = sld [smem:[#allocation94_spill]] }
 0x239   :  { %7953 = vmatprep.subr.mxu1 %v917_v62  ;;  %s11234_s10 = sld [smem:[#allocation95_spill]] }
 0x23a   :  { %s11235_s11 = sld [smem:[#allocation96_spill]] }
 0x2b8   :  { %v703_v8 = vpop.xlane.xlu0 %702  ;;  %v709_v9 = vpop.xlane.xlu1 %708 }
 0x2b9   :  { %v714_v10 = vmul.f32 0.03125, %v703_v8  ;;  %v716_v11 = vmul.f32 0.03125, %v709_v9  ;;  %v911_v8 = vld [vmem:[%s11221_s14 + $0x8] sm:$0xff]  ;;  %v910_v9 = vld [vmem:[%s11221_s14] sm:$0xff]  ;;  %s11236_s14 = sld [smem:[#allocation97_spill]] }
 0x2bb   :  { %v718_v12 = vsub.f32 %v10114_v0, %v714_v10  ;;  %v720_v13 = vsub.f32 %v10117_v1, %v716_v11  ;;  %v7453_v10 = vld [vmem:[#allocation3] ss:$0 sm:$0xff] }
 0x2bc   :  { %v706_v14 = vpop.xlane.xlu0 %705  ;;  %v712_v15 = vpop.xlane.xlu1 %711 }
 0x2bd   :  { %v715_v16 = vmul.f32 0.03125, %v706_v14  ;;  %v717_v17 = vmul.f32 0.03125, %v712_v15  ;;  %v722_v18 = vmul.f32 %v718_v12, %v718_v12  ;;  %v724_v19 = vmul.f32 %v720_v13, %v720_v13 }
 0x2bf   :  { %v719_v20 = vsub.f32 %v10120_v2, %v715_v16  ;;  %v721_v21 = vsub.f32 %v10127_v5, %v717_v17  ;;  %v726_v22 = vsel %vm700_vm0, %v722_v18, 0.0  ;;  %v732_v23 = vsel %vm700_vm0, %v724_v19, 0.0 }
 0x2c0   :  { %727 = vadd.xlane.f32.xlu0 %v726_v22 }
 0x2c1   :  { %v723_v24 = vmul.f32 %v719_v20, %v719_v20  ;;  %v725_v25 = vmul.f32 %v721_v21, %v721_v21 }
 0x2c3   :  { %v729_v26 = vsel %vm700_vm0, %v723_v24, 0.0  ;;  %v735_v27 = vsel %vm700_vm0, %v725_v25, 0.0 }
 0x2c4   :  { %733 = vadd.xlane.f32.xlu0 %v732_v23  ;;  %730 = vadd.xlane.f32.xlu1 %v729_v26 }
 0x2c8   :  { %736 = vadd.xlane.f32.xlu1 %v735_v27 }
 0x349   :  { %v728_v32 = vpop.xlane.xlu0 %727 }
 0x34a   :  { %v738_v33 = vmul.f32 0.03125, %v728_v32 }
 0x34c   :  { %v742_v34 = vadd.f32 1e-05, %v738_v33 }
 0x34d   :  { %v731_v35 = vpop.xlane.xlu1 %730  ;;  %v734_v36 = vpop.xlane.xlu0 %733 }
 0x34e   :  { %8534 = vrsqrt.f32 %v742_v34  ;;  %v739_v37 = vmul.f32 0.03125, %v731_v35  ;;  %v740_v38 = vmul.f32 0.03125, %v734_v36 }
 0x350   :  { %v743_v39 = vadd.f32 1e-05, %v739_v37  ;;  %v744_v40 = vadd.f32 1e-05, %v740_v38 }
 0x351   :  { %v737_v41 = vpop.xlane.xlu1 %736 }
 0x352   :  { %8536 = vrsqrt.f32 %v743_v39  ;;  %v741_v42 = vmul.f32 0.03125, %v737_v41 }
 0x353   :  { %8538 = vrsqrt.f32 %v744_v40 }
 0x354   :  { %v745_v43 = vadd.f32 1e-05, %v741_v42 }
 0x356   :  { %8540 = vrsqrt.f32 %v745_v43  ;;  %v7458_v43 = vld [vmem:[#allocation6] ss:$0 sm:$0xff] }
 0x35b   :  { %v8535_v44 = vpop.eup %8534 }
 0x35c   :  { %v750_v46 = vmul.f32 %v8535_v44, %v718_v12 }
 0x35e   :  { %v760_v48 = vmul.f32 %v7451_v45, %v750_v46 }
 0x35f   :  { %v8537_v49 = vpop.eup %8536 }
 0x360   :  { %v8539_v50 = vpop.eup %8538  ;;  %v770_v51 = vadd.f32 %v7452_v47, %v760_v48  ;;  %v751_v52 = vmul.f32 %v8537_v49, %v719_v20 }
 0x361   :  { %v752_v53 = vmul.f32 %v8539_v50, %v720_v13 }
 0x362   :  { %7947 = vmatprep.mubr.msk.f32.mxu1 %vm700_vm0, %v770_v51  ;;  %v761_v54 = vmul.f32 %v7451_v45, %v751_v52 }
 0x363   :  { %v8541_v55 = vpop.eup %8540  ;;  %v762_v56 = vmul.f32 %v7451_v45, %v752_v53 }
 0x364   :  { %v771_v57 = vadd.f32 %v7452_v47, %v761_v54  ;;  %v753_v58 = vmul.f32 %v8541_v55, %v721_v21 }
 0x365   :  { %v772_v59 = vadd.f32 %v7452_v47, %v762_v56 }
 0x366   :  { %7948 = vmatmul.mubr.msk.f32.vlgmr.msra.gmra.mxu1 %vm700_vm0, %v771_v57  ;;  %v763_v60 = vmul.f32 %v7451_v45, %v753_v58 }
 0x367   :  { %7950 = vmatprep.mubr.msk.f32.mxu1 %vm700_vm0, %v772_v59  ;;  %7954 = vmatpush3.msra.mxu1 %v917_v62 }
 0x368   :  { %v773_v61 = vadd.f32 %v7452_v47, %v763_v60  ;;  %7955 = vmatprep.subr.mxu1 %v916_v63 }
 0x369   :  { %7956 = vmatpush3.msra.mxu1 %v916_v63 }
 0x36a   :  { %7951 = vmatmul.mubr.msk.f32.gmra.mxu1 %vm700_vm0, %v773_v61  ;;  %7957 = vmatprep.subr.mxu1 %v915_v3 }
 0x36b   :  { %7958 = vmatpush3.msra.mxu1 %v915_v3 }
 0x36c   :  { %7959 = vmatprep.subr.mxu1 %v914_v4 }
 0x36d   :  { %7960 = vmatpush3.msra.mxu1 %v914_v4 }
 0x36e   :  { %7961 = vmatprep.subr.mxu1 %v913_v6 }
 0x36f   :  { %7962 = vmatpush3.msra.mxu1 %v913_v6 }
 0x370   :  { %7963 = vmatprep.subr.mxu1 %v912_v7 }
 0x371   :  { %7964 = vmatpush3.msra.mxu1 %v912_v7 }
 0x372   :  { %7965 = vmatprep.subr.mxu1 %v911_v8 }
 0x373   :  { %7966 = vmatpush3.msra.mxu1 %v911_v8 }
 0x374   :  { %7967 = vmatprep.subr.mxu1 %v910_v9 }
 0x375   :  { %7968 = vmatpush3.msra.mxu1 %v910_v9 }
 0x426   :  { %v7949_v11 = vpop.f32.mrf.mxu1 }
 0x427   :  { %v869_v12 = vadd.f32 %v7949_v11, %v7453_v10 }
 0x428   :  { %v863_v13 = vpop.f32.mrf.mxu1 }
 0x429   :  { %v883_v14 = vsub.f32 0.0, %v869_v12  ;;  %v864_v15 = vadd.f32 %v7453_v10, %v863_v13 }
 0x42a   :  { %v7952_v16 = vpop.f32.mrf.mxu1 }
 0x42b   :  { %v888_v17 = vmul.f32 1.442695, %v883_v14  ;;  %v882_v18 = vsub.f32 0.0, %v864_v15  ;;  %v879_v19 = vadd.f32 %v7952_v16, %v7453_v10 }
 0x42c   :  { %v873_v20 = vpop.f32.mrf.mxu1 }
 0x42d   :  { %8542 = vpow2.f32 %v888_v17  ;;  %v886_v21 = vmul.f32 1.442695, %v882_v18  ;;  %v885_v22 = vsub.f32 0.0, %v879_v19  ;;  %v874_v23 = vadd.f32 %v7453_v10, %v873_v20  ;;  %v1108_v20 = vld [vmem:[%s11222_s17 + $0x18] sm:$0xff] }
 0x42e   :  { %7975 = vmatprep.subr.mxu0 %v1108_v20 }
 0x42f   :  { %8544 = vpow2.f32 %v886_v21  ;;  %v892_v24 = vmul.f32 1.442695, %v885_v22  ;;  %v884_v25 = vsub.f32 0.0, %v874_v23  ;;  %v1107_v21 = vld [vmem:[%s11222_s17 + $0x10] sm:$0xff]  ;;  %7976 = vmatpush3.msra.mxu0 %v1108_v20  ;;  %v1106_v22 = vld [vmem:[%s11222_s17 + $0x8] sm:$0xff] }
 0x430   :  { %7977 = vmatprep.subr.mxu0 %v1107_v21 }
 0x431   :  { %8546 = vpow2.f32 %v892_v24  ;;  %v890_v26 = vmul.f32 1.442695, %v884_v25  ;;  %7978 = vmatpush3.msra.mxu0 %v1107_v21 }
 0x432   :  { %7979 = vmatprep.subr.mxu0 %v1106_v22 }
 0x433   :  { %8548 = vpow2.f32 %v890_v26  ;;  %7980 = vmatpush3.msra.mxu0 %v1106_v22 }
 0x43a   :  { %v8543_v27 = vpop.eup %8542 }
 0x43b   :  { %v895_v28 = vadd.f32 1.0, %v8543_v27 }
 0x43c   :  { %v8545_v29 = vpop.eup %8544 }
 0x43d   :  { %v894_v30 = vadd.f32 1.0, %v8545_v29  ;;  %8550 = vrcp.f32 %v895_v28 }
 0x43e   :  { %v8547_v31 = vpop.eup %8546 }
 0x43f   :  { %8552 = vrcp.f32 %v894_v30  ;;  %v897_v32 = vadd.f32 1.0, %v8547_v31 }
 0x440   :  { %v8549_v33 = vpop.eup %8548 }
 0x441   :  { %v896_v34 = vadd.f32 1.0, %v8549_v33  ;;  %8554 = vrcp.f32 %v897_v32 }
 0x443   :  { %8556 = vrcp.f32 %v896_v34 }
 0x44a   :  { %v8551_v35 = vpop.eup %8550 }
 0x44b   :  { %v907_v38 = vmul.f32 %v8551_v35, %v869_v12 }
 0x44c   :  { %v8553_v36 = vpop.eup %8552 }
 0x44d   :  { %v906_v37 = vmul.f32 %v8553_v36, %v864_v15 }
 0x44e   :  { %v8555_v39 = vpop.eup %8554 }
 0x44f   :  { %7969 = vmatprep.mubr.msk.f32.mxu1 %vm925_vm1, %v906_v37  ;;  %v909_v42 = vmul.f32 %v8555_v39, %v879_v19  ;;  %v7463_v37 = vld [vmem:[%s11223_s9] ss:$0 sm:$0xff]  ;;  %s11238_s9 = sld [smem:[#allocation102_spill]] }
 0x450   :  { %v8557_v40 = vpop.eup %8556  ;;  %7970 = vmatmul.mubr.msk.f32.vlgmr.msra.gmra.mxu1 %vm925_vm1, %v907_v38 }
 0x451   :  { %v908_v41 = vmul.f32 %v8557_v40, %v874_v23  ;;  %v1105_v23 = vld [vmem:[%s11222_s17] sm:$0xff]  ;;  %s11237_s17 = sld [smem:[#allocation100_spill]] }
 0x452   :  { %7981 = vmatprep.subr.mxu0 %v1105_v23 }
 0x453   :  { %7972 = vmatprep.mubr.msk.f32.mxu1 %vm925_vm1, %v908_v41  ;;  %7982 = vmatpush3.msra.mxu0 %v1105_v23 }
 0x454   :  { %7973 = vmatmul.mubr.msk.f32.gmra.mxu1 %vm925_vm1, %v909_v42 }
 0x510   :  { %v7971_v44 = vpop.f32.mrf.mxu1 }
 0x511   :  { %v1010_v45 = vadd.f32 %v7971_v44, %v7458_v43 }
 0x512   :  { %v1004_v46 = vpop.f32.mrf.mxu1 }
 0x513   :  { %v1024_v47 = vmul.f32 0.5, %v1010_v45  ;;  %v1005_v48 = vadd.f32 %v7458_v43, %v1004_v46 }
 0x514   :  { %v7974_v49 = vpop.f32.mrf.mxu1 }
 0x515   :  { %v10164_v50 = vadd.f32 %v1024_v47, %v10120_v2  ;;  %v1023_v51 = vmul.f32 0.5, %v1005_v48  ;;  %v1020_v52 = vadd.f32 %v7974_v49, %v7458_v43 }
 0x516   :  { %v1014_v53 = vpop.f32.mrf.mxu1 }
 0x517   :  { %v10167_v54 = vadd.f32 %v1023_v51, %v10114_v0  ;;  %v1026_v55 = vmul.f32 0.5, %v1020_v52  ;;  %v1015_v56 = vadd.f32 %v7458_v43, %v1014_v53  ;;  %v1036_v57 = vsel %vm700_vm0, %v10164_v50, 0.0  ;;  %v7464_v43 = vld [vmem:[%s11224_s0] ss:$0 sm:$0xff]  ;;  %s11239_s0 = sld [smem:[#allocation105_spill]] }
 0x518   :  { %1037 = vadd.xlane.f32.xlu1 %v1036_v57 }
 0x519   :  { %v10172_v58 = vadd.f32 %v1026_v55, %v10127_v5  ;;  %v1025_v59 = vmul.f32 0.5, %v1015_v56  ;;  %v1033_v2 = vsel %vm700_vm0, %v10167_v54, 0.0  ;;  %v7465_v56 = vld [vmem:[%s11225_s12] ss:$0 sm:$0xff]  ;;  %s11240_s12 = sld [smem:[#allocation107_spill]] }
 0x51a   :  { %1034 = vadd.xlane.f32.xlu0 %v1033_v2 }
 0x51b   :  { %v10177_v60 = vadd.f32 %v1025_v59, %v10117_v1  ;;  %v1042_v0 = vsel %vm700_vm0, %v10172_v58, 0.0 }
 0x51c   :  { %1043 = vadd.xlane.f32.xlu1 %v1042_v0 }
 0x51d   :  { %v1039_v61 = vsel %vm700_vm0, %v10177_v60, 0.0 }
 0x51e   :  { %1040 = vadd.xlane.f32.xlu0 %v1039_v61 }
 0x5a1   :  { %v1038_v62 = vpop.xlane.xlu1 %1037 }
 0x5a2   :  { %v1046_v63 = vmul.f32 0.03125, %v1038_v62 }
 0x5a3   :  { %v1035_v5 = vpop.xlane.xlu0 %1034 }
 0x5a4   :  { %v1050_v3 = vsub.f32 %v10164_v50, %v1046_v63  ;;  %v1045_v4 = vmul.f32 0.03125, %v1035_v5 }
 0x5a5   :  { %v1044_v6 = vpop.xlane.xlu1 %1043 }
 0x5a6   :  { %v1049_v7 = vsub.f32 %v10167_v54, %v1045_v4  ;;  %v1048_v8 = vmul.f32 0.03125, %v1044_v6  ;;  %v1054_v1 = vmul.f32 %v1050_v3, %v1050_v3 }
 0x5a7   :  { %v1041_v9 = vpop.xlane.xlu0 %1040 }
 0x5a8   :  { %v1052_v10 = vsub.f32 %v10172_v58, %v1048_v8  ;;  %v1047_v11 = vmul.f32 0.03125, %v1041_v9  ;;  %v1060_v12 = vsel %vm700_vm0, %v1054_v1, 0.0  ;;  %v1053_v13 = vmul.f32 %v1049_v7, %v1049_v7 }
 0x5a9   :  { %1061 = vadd.xlane.f32.xlu1 %v1060_v12 }
 0x5aa   :  { %v1051_v14 = vsub.f32 %v10177_v60, %v1047_v11  ;;  %v1057_v15 = vsel %vm700_vm0, %v1053_v13, 0.0  ;;  %v1056_v16 = vmul.f32 %v1052_v10, %v1052_v10  ;;  %v9734_v11 = vmov 1966171168  }
 0x5ab   :  { %1058 = vadd.xlane.f32.xlu0 %v1057_v15  ;;  %v681_v12 = vunpack.c.l.s4 %v9734_v11  ;;  %v683_v13 = vlaneseq }
 0x5ac   :  { %v1066_v17 = vsel %vm700_vm0, %v1056_v16, 0.0  ;;  %v1055_v18 = vmul.f32 %v1051_v14, %v1051_v14 }
 0x5ad   :  { %1067 = vadd.xlane.f32.xlu1 %v1066_v17  ;;  %v684_v15 = vshrl.u32 %v683_v13, 7  ;;  %v7450_v17 = vld.sshfl [vmem:[%s11226_s3] sm:$0x11 pattern:$0x75316420]  ;;  %s11241_s3 = sld [smem:[#allocation109_spill]] }
 0x5ae   :  { %v1063_v19 = vsel %vm700_vm0, %v1055_v18, 0.0  ;;  %v679_v21 = vcombine.high %v7450_v17, %v7450_v17 }
 0x5af   :  { %1064 = vadd.xlane.f32.xlu0 %v1063_v19  ;;  %v1404_v20 = vsub.s32 0, %v684_v15 }
 0x632   :  { %v1062_v24 = vpop.xlane.xlu1 %1061 }
 0x633   :  { %v1070_v25 = vmul.f32 0.03125, %v1062_v24 }
 0x634   :  { %v1059_v26 = vpop.xlane.xlu0 %1058 }
 0x635   :  { %v1074_v27 = vadd.f32 1e-05, %v1070_v25  ;;  %v1069_v28 = vmul.f32 0.03125, %v1059_v26 }
 0x636   :  { %v1068_v29 = vpop.xlane.xlu1 %1067 }
 0x637   :  { %8558 = vrsqrt.f32 %v1074_v27  ;;  %v1073_v30 = vadd.f32 1e-05, %v1069_v28  ;;  %v1072_v31 = vmul.f32 0.03125, %v1068_v29 }
 0x638   :  { %v1065_v32 = vpop.xlane.xlu0 %1064 }
 0x639   :  { %8560 = vrsqrt.f32 %v1073_v30  ;;  %v1076_v33 = vadd.f32 1e-05, %v1072_v31  ;;  %v1071_v34 = vmul.f32 0.03125, %v1065_v32 }
 0x63b   :  { %8562 = vrsqrt.f32 %v1076_v33  ;;  %v1075_v35 = vadd.f32 1e-05, %v1071_v34 }
 0x63d   :  { %8564 = vrsqrt.f32 %v1075_v35 }
 0x644   :  { %v8559_v36 = vpop.eup %8558 }
 0x645   :  { %v1082_v38 = vmul.f32 %v8559_v36, %v1050_v3 }
 0x646   :  { %v8561_v39 = vpop.eup %8560 }
 0x647   :  { %v1081_v40 = vmul.f32 %v8561_v39, %v1049_v7  ;;  %v1092_v42 = vmul.f32 %v7463_v37, %v1082_v38 }
 0x648   :  { %v8563_v41 = vpop.eup %8562 }
 0x649   :  { %v1091_v44 = vmul.f32 %v7463_v37, %v1081_v40  ;;  %v1084_v45 = vmul.f32 %v8563_v41, %v1052_v10  ;;  %v1102_v49 = vadd.f32 %v7464_v43, %v1092_v42 }
 0x64a   :  { %v8565_v46 = vpop.eup %8564 }
 0x64b   :  { %v1101_v47 = vadd.f32 %v7464_v43, %v1091_v44  ;;  %v1083_v48 = vmul.f32 %v8565_v46, %v1051_v14  ;;  %v1094_v51 = vmul.f32 %v7463_v37, %v1084_v45  ;;  %v682_v14 = vunpack.c.0.s8 %v681_v12 }
 0x64d   :  { %7983 = vmatprep.mubr.msk.f32.mxu0 %vm700_vm0, %v1101_v47  ;;  %v1093_v52 = vmul.f32 %v7463_v37, %v1083_v48  ;;  %v1104_v55 = vadd.f32 %v7464_v43, %v1094_v51  ;;  %v685_v16 = vsub.s32 %v682_v14, %v684_v15 }
 0x64e   :  { %7984 = vmatmul.mubr.msk.f32.vlgmr.msra.gmra.mxu0 %vm700_vm0, %v1102_v49 }
 0x64f   :  { %v1103_v53 = vadd.f32 %v7464_v43, %v1093_v52  ;;  %v686_v18 = vrot.slane %v7450_v17, %v685_v16  ;;  %v693_v23 = vrot.slane %v679_v21, %v685_v16 }
 0x651   :  { %7986 = vmatprep.mubr.msk.f32.mxu0 %vm700_vm0, %v1103_v53  ;;  %v696_v19 = vmul.f32 1e+30, %v686_v18  ;;  %v697_v29 = vmul.f32 1e+30, %v693_v23 }
 0x652   :  { %7987 = vmatmul.mubr.msk.f32.gmra.mxu0 %vm700_vm0, %v1104_v55 }
 0x653   :  { %v10247_v22 = vrot.slane %v696_v19, %v1404_v20  ;;  %v10253_v32 = vrot.slane %v697_v29, %v1404_v20 }
 0x70e   :  { %v7985_v57 = vpop.f32.mrf.mxu0 }
 0x70f   :  { %v10202_v59 = vadd.f32 %v7985_v57, %v7465_v56 }
 0x710   :  { %v1194_v2 = vpop.f32.mrf.mxu0 }
 0x711   :  { %v10204_v0 = vadd.f32 %v7465_v56, %v1194_v2  ;;  %1221 = vrot.lane.b32.xlu0 %v10202_v59, %s9733_s8  ;;  %v10234_v1 = vmul.f32 0.35355338, %v10202_v59 }
 0x712   :  { %v7988_v61 = vpop.f32.mrf.mxu0 }
 0x713   :  { %1219 = vrot.lane.b32.xlu1 %v10204_v0, %s9733_s8  ;;  %v10211_v62 = vmul.f32 0.35355338, %v10204_v0  ;;  %v10213_v5 = vadd.f32 %v7988_v61, %v7465_v56 }
 0x714   :  { %v1204_v63 = vpop.f32.mrf.mxu0 }
 0x715   :  { %v10215_v3 = vadd.f32 %v7465_v56, %v1204_v63  ;;  %7993 = vmatprep.mubr.msk.f32.mxu0 %vm1223_vm2, %v10211_v62  ;;  %v10242_v10 = vmul.f32 0.35355338, %v10213_v5 }
 0x717   :  { %1313 = vrot.lane.b32.xlu1 %v10213_v5, %s9733_s8  ;;  %v10222_v4 = vmul.f32 0.35355338, %v10215_v3 }
 0x719   :  { %8000 = vmatprep.mubr.msk.f32.mxu1 %vm1223_vm2, %v10222_v4 }
 0x71b   :  { %1311 = vrot.lane.b32.xlu1 %v10215_v3, %s9733_s8 }
 0x783   :  { %v1222_v6 = vpop.permute.xlu0 %1221 }
 0x784   :  { %7989 = vmatprep.subr.msk.mxu0 %vm1223_vm2, %v1222_v6 }
 0x785   :  { %v1220_v7 = vpop.permute.xlu1 %1219  ;;  %7990 = vmatpush3.xpose.msk.msra.mxu0 %vm1223_vm2, %v1222_v6 }
 0x786   :  { %7991 = vmatprep.subr.msk.mxu0 %vm1223_vm2, %v1220_v7 }
 0x789   :  { %v1314_v8 = vpop.permute.xlu1 %1313  ;;  %7992 = vmatpush3.xpose.msk.msra.mxu0 %vm1223_vm2, %v1220_v7 }
 0x78a   :  { %7996 = vmatprep.subr.msk.mxu1 %vm1223_vm2, %v1314_v8 }
 0x78b   :  { %7997 = vmatpush3.xpose.msk.msra.mxu1 %vm1223_vm2, %v1314_v8 }
 0x78c   :  { %7994 = vmatmul.mubr.msk.f32.vlgmr.msra.gmra.mxu0 %vm1223_vm2, %v10234_v1 }
 0x78d   :  { %v1312_v9 = vpop.permute.xlu1 %1311 }
 0x78e   :  { %7998 = vmatprep.subr.msk.mxu1 %vm1223_vm2, %v1312_v9 }
 0x78f   :  { %7999 = vmatpush3.xpose.msk.msra.mxu1 %vm1223_vm2, %v1312_v9 }
 0x792   :  { %8001 = vmatmul.mubr.msk.f32.vlgmr.msra.gmra.mxu1 %vm1223_vm2, %v10242_v10 }
 0x84c   :  { %v7995_v24 = vpop.f32.mrf.mxu0 }
 0x84d   :  { %v1413_v25 = vsub.f32 %v7995_v24, %v10247_v22 }
 0x84e   :  { %v1300_v26 = vpop.f32.mrf.mxu0 }
 0x84f   :  { %v1412_v27 = vsub.f32 %v1300_v26, %v10247_v22  ;;  %v1420_v28 = vsel %vm1416_vm3, %v1413_v25, -inf }
 0x850   :  { %1421 = vmax.xlane.f32.xlu1 %v1420_v28 }
 0x851   :  { %v1417_v30 = vsel %vm1416_vm3, %v1412_v27, -inf }
 0x852   :  { %v8002_v31 = vpop.f32.mrf.mxu1  ;;  %1418 = vmax.xlane.f32.xlu0 %v1417_v30 }
 0x853   :  { %v1415_v35 = vsub.f32 %v8002_v31, %v10253_v32 }
 0x854   :  { %v1391_v33 = vpop.f32.mrf.mxu1 }
 0x855   :  { %v1414_v34 = vsub.f32 %v1391_v33, %v10253_v32  ;;  %v1426_v37 = vsel %vm1416_vm3, %v1415_v35, -inf }
 0x857   :  { %v1423_v36 = vsel %vm1416_vm3, %v1414_v34, -inf }
 0x858   :  { %1424 = vmax.xlane.f32.xlu0 %v1423_v36 }
 0x85c   :  { %1427 = vmax.xlane.f32.xlu0 %v1426_v37 }
 0x861   :  { %1461 = vrot.lane.b32.xlu1 %v10204_v0, %s9735_s15 }
 0x865   :  { %1550 = vrot.lane.b32.xlu1 %v10213_v5, %s9735_s15 }
 0x869   :  { %1641 = vrot.lane.b32.xlu1 %v10202_v59, %s9736_s20 }
 0x86d   :  { %1639 = vrot.lane.b32.xlu1 %v10204_v0, %s9736_s20 }
 0x871   :  { %1635 = vrot.lane.b32.xlu1 %v10211_v62, %s9737_s16 }
 0x872   :  { %1463 = vrot.lane.b32.xlu0 %v10202_v59, %s9735_s15 }
 0x876   :  { %1548 = vrot.lane.b32.xlu0 %v10215_v3, %s9735_s15 }
 0x87a   :  { %1732 = vrot.lane.b32.xlu0 %v10213_v5, %s9736_s20 }
 0x8d9   :  { %v1422_v38 = vpop.xlane.xlu1 %1421 }
 0x8da   :  { %v1430_v39 = vsub.f32 %v1413_v25, %v1422_v38 }
 0x8db   :  { %v1419_v40 = vpop.xlane.xlu0 %1418 }
 0x8dc   :  { %v1435_v41 = vmul.f32 1.442695, %v1430_v39  ;;  %v1429_v42 = vsub.f32 %v1412_v27, %v1419_v40 }
 0x8dd   :  { %v1462_v43 = vpop.permute.xlu1 %1461 }
 0x8de   :  { %8566 = vpow2.f32 %v1435_v41  ;;  %v1433_v44 = vmul.f32 1.442695, %v1429_v42 }
 0x8e0   :  { %8568 = vpow2.f32 %v1433_v44 }
 0x8e1   :  { %v1551_v45 = vpop.permute.xlu1 %1550  ;;  %v1425_v46 = vpop.xlane.xlu0 %1424 }
 0x8e2   :  { %v1431_v47 = vsub.f32 %v1414_v34, %v1425_v46  ;;  %8010 = vmatprep.subr.mxu1 %v1551_v45 }
 0x8e3   :  { %8011 = vmatpush3.msra.mxu1 %v1551_v45 }
 0x8e4   :  { %v1437_v48 = vmul.f32 1.442695, %v1431_v47 }
 0x8e5   :  { %v1428_v49 = vpop.xlane.xlu0 %1427  ;;  %v1642_v2 = vpop.permute.xlu1 %1641 }
 0x8e6   :  { %8570 = vpow2.f32 %v1437_v48  ;;  %v1432_v51 = vsub.f32 %v1415_v35, %v1428_v49 }
 0x8e8   :  { %v1439_v52 = vmul.f32 1.442695, %v1432_v51 }
 0x8e9   :  { %v1464_v53 = vpop.permute.xlu0 %1463  ;;  %v1640_v12 = vpop.permute.xlu1 %1639 }
 0x8ea   :  { %8572 = vpow2.f32 %v1439_v52  ;;  %8003 = vmatprep.subr.mxu0 %v1464_v53 }
 0x8eb   :  { %v8567_v55 = vpop.eup %8566  ;;  %8004 = vmatpush3.msra.mxu0 %v1464_v53 }
 0x8ec   :  { %8005 = vmatprep.subr.mxu0 %v1462_v43  ;;  %v1444_v56 = vsel %vm1416_vm3, %v8567_v55, 0.0 }
 0x8ed   :  { %v8569_v57 = vpop.eup %8568  ;;  %1445 = vadd.xlane.f32.xlu1 %v1444_v56  ;;  %8006 = vmatpush3.msra.mxu0 %v1462_v43  ;;  %v1549_v61 = vpop.permute.xlu0 %1548 }
 0x8ee   :  { %8012 = vmatprep.subr.mxu1 %v1549_v61  ;;  %8017 = vmatprep.subr.msk.mxu0 %vm1223_vm2, %v1642_v2  ;;  %v1441_v63 = vsel %vm1416_vm3, %v8569_v57, 0.0  ;;  %v1636_v13 = vpop.permute.xlu1 %1635 }
 0x8ef   :  { %1442 = vadd.xlane.f32.xlu0 %v1441_v63  ;;  %8013 = vmatpush3.msra.mxu1 %v1549_v61 }
 0x8f1   :  { %v1733_v6 = vpop.permute.xlu0 %1732 }
 0x8f2   :  { %8024 = vmatprep.subr.msk.mxu1 %vm1223_vm2, %v1733_v6 }
 0x8f3   :  { %v8571_v7 = vpop.eup %8570 }
 0x8f4   :  { %v1447_v8 = vsel %vm1416_vm3, %v8571_v7, 0.0 }
 0x8f5   :  { %1448 = vadd.xlane.f32.xlu0 %v1447_v8 }
 0x8f7   :  { %v8573_v9 = vpop.eup %8572 }
 0x8f8   :  { %v1450_v11 = vsel %vm1416_vm3, %v8573_v9, 0.0 }
 0x8f9   :  { %1451 = vadd.xlane.f32.xlu1 %v1450_v11 }
 0x90a   :  { %1730 = vrot.lane.b32.xlu1 %v10215_v3, %s9736_s20 }
 0x90b   :  { %1637 = vrot.lane.b32.xlu0 %v10234_v1, %s9737_s16 }
 0x90e   :  { %1728 = vrot.lane.b32.xlu1 %v10242_v10, %s9737_s16 }
 0x90f   :  { %1726 = vrot.lane.b32.xlu0 %v10222_v4, %s9737_s16 }
 0x976   :  { %v1446_v14 = vpop.xlane.xlu1 %1445 }
 0x977   :  { %8574 = vrcp.f32 %v1446_v14 }
 0x978   :  { %v1443_v15 = vpop.xlane.xlu0 %1442 }
 0x979   :  { %8576 = vrcp.f32 %v1443_v15 }
 0x97e   :  { %v1449_v16 = vpop.xlane.xlu0 %1448 }
 0x97f   :  { %8578 = vrcp.f32 %v1449_v16 }
 0x982   :  { %v1452_v17 = vpop.xlane.xlu1 %1451  ;;  %v1638_v24 = vpop.permute.xlu0 %1637 }
 0x983   :  { %8580 = vrcp.f32 %v1452_v17 }
 0x984   :  { %v8575_v18 = vpop.eup %8574 }
 0x985   :  { %v1456_v21 = vmul.f32 %v8575_v18, %v8567_v55 }
 0x986   :  { %v8577_v19 = vpop.eup %8576  ;;  %v1727_v28 = vpop.permute.xlu0 %1726 }
 0x987   :  { %v1454_v20 = vmul.f32 %v8577_v19, %v8569_v57  ;;  %v1731_v29 = vpop.permute.xlu1 %1730 }
 0x989   :  { %8007 = vmatprep.mubr.msk.f32.mxu0 %vm1416_vm3, %v1454_v20 }
 0x98a   :  { %8008 = vmatmul.mubr.msk.f32.vlgmr.msra.gmra.mxu0 %vm1416_vm3, %v1456_v21 }
 0x98b   :  { %8018 = vmatpush3.xpose.msk.msra.mxu0 %vm1223_vm2, %v1642_v2  ;;  %8021 = vmatprep.mubr.msk.f32.mxu0 %vm1223_vm2, %v1636_v13  ;;  %v1729_v30 = vpop.permute.xlu1 %1728 }
 0x98c   :  { %v8579_v23 = vpop.eup %8578  ;;  %8019 = vmatprep.subr.msk.mxu0 %vm1223_vm2, %v1640_v12 }
 0x98d   :  { %v1458_v25 = vmul.f32 %v8579_v23, %v8571_v7 }
 0x98f   :  { %8020 = vmatpush3.xpose.msk.msra.mxu0 %vm1223_vm2, %v1640_v12  ;;  %8014 = vmatprep.mubr.msk.f32.mxu1 %vm1416_vm3, %v1458_v25 }
 0x990   :  { %v8581_v26 = vpop.eup %8580 }
 0x991   :  { %v1460_v27 = vmul.f32 %v8581_v26, %v8573_v9 }
 0x992   :  { %8022 = vmatmul.mubr.msk.f32.vlgmr.msra.gmra.mxu0 %vm1223_vm2, %v1638_v24 }
 0x993   :  { %8015 = vmatmul.mubr.msk.f32.vlgmr.msra.gmra.mxu1 %vm1416_vm3, %v1460_v27 }
 0x994   :  { %8025 = vmatpush3.xpose.msk.msra.mxu1 %vm1223_vm2, %v1733_v6  ;;  %8028 = vmatprep.mubr.msk.f32.mxu1 %vm1223_vm2, %v1727_v28 }
 0x995   :  { %8026 = vmatprep.subr.msk.mxu1 %vm1223_vm2, %v1731_v29 }
 0x998   :  { %8027 = vmatpush3.xpose.msk.msra.mxu1 %vm1223_vm2, %v1731_v29 }
 0x99b   :  { %8029 = vmatmul.mubr.msk.f32.vlgmr.msra.gmra.mxu1 %vm1223_vm2, %v1729_v30 }
 0xa4a   :  { %v10303_v31 = vpop.f32.mrf.mxu0 }
 0xa4c   :  { %v10305_v33 = vpop.f32.mrf.mxu0 }
 0xa52   :  { %v8023_v34 = vpop.f32.mrf.mxu0 }
 0xa53   :  { %v1818_v35 = vsub.f32 %v8023_v34, %v10247_v22  ;;  %v10308_v37 = vpop.f32.mrf.mxu1 }
 0xa54   :  { %v1717_v36 = vpop.f32.mrf.mxu0 }
 0xa55   :  { %v1817_v38 = vsub.f32 %v1717_v36, %v10247_v22  ;;  %v1824_v39 = vsel %vm1416_vm3, %v1818_v35, -inf  ;;  %v10313_v41 = vpop.f32.mrf.mxu1 }
 0xa56   :  { %1825 = vmax.xlane.f32.xlu1 %v1824_v39 }
 0xa57   :  { %v1821_v40 = vsel %vm1416_vm3, %v1817_v38, -inf }
 0xa58   :  { %1822 = vmax.xlane.f32.xlu0 %v1821_v40 }
 0xa5b   :  { %v8030_v42 = vpop.f32.mrf.mxu1 }
 0xa5c   :  { %v1820_v45 = vsub.f32 %v8030_v42, %v10253_v32 }
 0xa5d   :  { %v1808_v43 = vpop.f32.mrf.mxu1 }
 0xa5e   :  { %v1819_v44 = vsub.f32 %v1808_v43, %v10253_v32  ;;  %v1830_v47 = vsel %vm1416_vm3, %v1820_v45, -inf }
 0xa60   :  { %v1827_v46 = vsel %vm1416_vm3, %v1819_v44, -inf }
 0xa61   :  { %1828 = vmax.xlane.f32.xlu0 %v1827_v46 }
 0xa65   :  { %1831 = vmax.xlane.f32.xlu0 %v1830_v47 }
 0xa67   :  { %1865 = vrot.lane.b32.xlu1 %v10204_v0, %s9738_s30 }
 0xa6b   :  { %1954 = vrot.lane.b32.xlu1 %v10213_v5, %s9738_s30 }
 0xa6f   :  { %2045 = vrot.lane.b32.xlu1 %v10202_v59, %s9739_s18 }
 0xa73   :  { %2043 = vrot.lane.b32.xlu1 %v10204_v0, %s9739_s18 }
 0xa77   :  { %2039 = vrot.lane.b32.xlu1 %v10211_v62, %s9740_s13 }
 0xa7b   :  { %1867 = vrot.lane.b32.xlu0 %v10202_v59, %s9738_s30 }
 0xa7f   :  { %1952 = vrot.lane.b32.xlu0 %v10215_v3, %s9738_s30 }
 0xa83   :  { %2136 = vrot.lane.b32.xlu0 %v10213_v5, %s9739_s18 }
 0xadf   :  { %v1826_v48 = vpop.xlane.xlu1 %1825 }
 0xae0   :  { %v1834_v49 = vsub.f32 %v1818_v35, %v1826_v48 }
 0xae1   :  { %v1823_v51 = vpop.xlane.xlu0 %1822 }
 0xae2   :  { %v1839_v52 = vmul.f32 1.442695, %v1834_v49  ;;  %v1833_v53 = vsub.f32 %v1817_v38, %v1823_v51 }
 0xae3   :  { %v1866_v55 = vpop.permute.xlu1 %1865 }
 0xae4   :  { %8582 = vpow2.f32 %v1839_v52  ;;  %v1837_v56 = vmul.f32 1.442695, %v1833_v53 }
 0xae6   :  { %8584 = vpow2.f32 %v1837_v56 }
 0xae7   :  { %v1955_v57 = vpop.permute.xlu1 %1954 }
 0xae8   :  { %8038 = vmatprep.subr.mxu1 %v1955_v57 }
 0xae9   :  { %8039 = vmatpush3.msra.mxu1 %v1955_v57 }
 0xaea   :  { %v1829_v2 = vpop.xlane.xlu0 %1828 }
 0xaeb   :  { %v1835_v61 = vsub.f32 %v1819_v44, %v1829_v2  ;;  %v2046_v15 = vpop.permute.xlu1 %2045 }
 0xaed   :  { %v1841_v63 = vmul.f32 1.442695, %v1835_v61 }
 0xaee   :  { %v1832_v6 = vpop.xlane.xlu0 %1831 }
 0xaef   :  { %8586 = vpow2.f32 %v1841_v63  ;;  %v1836_v7 = vsub.f32 %v1820_v45, %v1832_v6  ;;  %v2044_v23 = vpop.permute.xlu1 %2043 }
 0xaf1   :  { %v8583_v8 = vpop.eup %8582  ;;  %v1843_v9 = vmul.f32 1.442695, %v1836_v7 }
 0xaf2   :  { %v1868_v11 = vpop.permute.xlu0 %1867  ;;  %v1848_v12 = vsel %vm1416_vm3, %v8583_v8, 0.0 }
 0xaf3   :  { %v8585_v13 = vpop.eup %8584  ;;  %8588 = vpow2.f32 %v1843_v9  ;;  %1849 = vadd.xlane.f32.xlu1 %v1848_v12  ;;  %8031 = vmatprep.subr.mxu0 %v1868_v11  ;;  %v2040_v24 = vpop.permute.xlu1 %2039 }
 0xaf4   :  { %8032 = vmatpush3.msra.mxu0 %v1868_v11  ;;  %v1845_v14 = vsel %vm1416_vm3, %v8585_v13, 0.0 }
 0xaf5   :  { %1846 = vadd.xlane.f32.xlu0 %v1845_v14  ;;  %8033 = vmatprep.subr.mxu0 %v1866_v55 }
 0xaf6   :  { %8034 = vmatpush3.msra.mxu0 %v1866_v55  ;;  %v1953_v16 = vpop.permute.xlu0 %1952 }
 0xaf7   :  { %8040 = vmatprep.subr.mxu1 %v1953_v16  ;;  %8045 = vmatprep.subr.msk.mxu0 %vm1223_vm2, %v2046_v15 }
 0xaf8   :  { %8041 = vmatpush3.msra.mxu1 %v1953_v16 }
 0xafa   :  { %v2137_v17 = vpop.permute.xlu0 %2136 }
 0xafb   :  { %8052 = vmatprep.subr.msk.mxu1 %vm1223_vm2, %v2137_v17 }
 0xafc   :  { %v8587_v18 = vpop.eup %8586 }
 0xafd   :  { %v1851_v19 = vsel %vm1416_vm3, %v8587_v18, 0.0 }
 0xafe   :  { %1852 = vadd.xlane.f32.xlu0 %v1851_v19 }
 0xb00   :  { %v8589_v20 = vpop.eup %8588 }
 0xb01   :  { %v1854_v21 = vsel %vm1416_vm3, %v8589_v20, 0.0 }
 0xb02   :  { %1855 = vadd.xlane.f32.xlu1 %v1854_v21 }
 0xb13   :  { %2134 = vrot.lane.b32.xlu1 %v10215_v3, %s9739_s18 }
 0xb14   :  { %2041 = vrot.lane.b32.xlu0 %v10234_v1, %s9740_s13 }
 0xb17   :  { %2132 = vrot.lane.b32.xlu1 %v10242_v10, %s9740_s13 }
 0xb18   :  { %2130 = vrot.lane.b32.xlu0 %v10222_v4, %s9740_s13 }
 0xb7c   :  { %v1850_v25 = vpop.xlane.xlu1 %1849 }
 0xb7d   :  { %8590 = vrcp.f32 %v1850_v25 }
 0xb7e   :  { %v1847_v26 = vpop.xlane.xlu0 %1846 }
 0xb7f   :  { %8592 = vrcp.f32 %v1847_v26 }
 0xb87   :  { %v1853_v27 = vpop.xlane.xlu0 %1852 }
 0xb88   :  { %8594 = vrcp.f32 %v1853_v27 }
 0xb8a   :  { %v8591_v28 = vpop.eup %8590 }
 0xb8b   :  { %v1856_v29 = vpop.xlane.xlu1 %1855  ;;  %v1860_v35 = vmul.f32 %v8591_v28, %v8583_v8  ;;  %v2042_v38 = vpop.permute.xlu0 %2041 }
 0xb8c   :  { %v8593_v30 = vpop.eup %8592  ;;  %8596 = vrcp.f32 %v1856_v29 }
 0xb8d   :  { %v1858_v34 = vmul.f32 %v8593_v30, %v8585_v13 }
 0xb8f   :  { %8035 = vmatprep.mubr.msk.f32.mxu0 %vm1416_vm3, %v1858_v34  ;;  %v2131_v43 = vpop.permute.xlu0 %2130  ;;  %v2135_v44 = vpop.permute.xlu1 %2134 }
 0xb90   :  { %8036 = vmatmul.mubr.msk.f32.vlgmr.msra.gmra.mxu0 %vm1416_vm3, %v1860_v35 }
 0xb91   :  { %8046 = vmatpush3.xpose.msk.msra.mxu0 %vm1223_vm2, %v2046_v15  ;;  %8049 = vmatprep.mubr.msk.f32.mxu0 %vm1223_vm2, %v2040_v24 }
 0xb92   :  { %8047 = vmatprep.subr.msk.mxu0 %vm1223_vm2, %v2044_v23 }
 0xb93   :  { %v2133_v45 = vpop.permute.xlu1 %2132 }
 0xb95   :  { %v8595_v36 = vpop.eup %8594  ;;  %8048 = vmatpush3.xpose.msk.msra.mxu0 %vm1223_vm2, %v2044_v23 }
 0xb96   :  { %v1862_v39 = vmul.f32 %v8595_v36, %v8587_v18 }
 0xb98   :  { %8050 = vmatmul.mubr.msk.f32.vlgmr.msra.gmra.mxu0 %vm1223_vm2, %v2042_v38  ;;  %8042 = vmatprep.mubr.msk.f32.mxu1 %vm1416_vm3, %v1862_v39 }
 0xb99   :  { %v8597_v40 = vpop.eup %8596 }
 0xb9a   :  { %v1864_v42 = vmul.f32 %v8597_v40, %v8589_v20 }
 0xb9c   :  { %8043 = vmatmul.mubr.msk.f32.vlgmr.msra.gmra.mxu1 %vm1416_vm3, %v1864_v42 }
 0xb9d   :  { %8053 = vmatpush3.xpose.msk.msra.mxu1 %vm1223_vm2, %v2137_v17  ;;  %8056 = vmatprep.mubr.msk.f32.mxu1 %vm1223_vm2, %v2131_v43 }
 0xb9e   :  { %8054 = vmatprep.subr.msk.mxu1 %vm1223_vm2, %v2135_v44 }
 0xba1   :  { %8055 = vmatpush3.xpose.msk.msra.mxu1 %vm1223_vm2, %v2135_v44 }
 0xba4   :  { %8057 = vmatmul.mubr.msk.f32.vlgmr.msra.gmra.mxu1 %vm1223_vm2, %v2133_v45 }
 0xc50   :  { %v10363_v46 = vpop.f32.mrf.mxu0 }
 0xc52   :  { %v10365_v47 = vpop.f32.mrf.mxu0 }
 0xc58   :  { %v8051_v48 = vpop.f32.mrf.mxu0 }
 0xc59   :  { %v2222_v49 = vsub.f32 %v8051_v48, %v10247_v22 }
 0xc5a   :  { %v2121_v51 = vpop.f32.mrf.mxu0 }
 0xc5b   :  { %v2221_v52 = vsub.f32 %v2121_v51, %v10247_v22  ;;  %v2228_v53 = vsel %vm1416_vm3, %v2222_v49, -inf }
 0xc5c   :  { %2229 = vmax.xlane.f32.xlu1 %v2228_v53  ;;  %v10371_v56 = vpop.f32.mrf.mxu1 }
 0xc5d   :  { %v2225_v55 = vsel %vm1416_vm3, %v2221_v52, -inf }
 0xc5e   :  { %2226 = vmax.xlane.f32.xlu0 %v2225_v55  ;;  %v10373_v57 = vpop.f32.mrf.mxu1 }
 0xc64   :  { %v8058_v2 = vpop.f32.mrf.mxu1 }
 0xc65   :  { %v2224_v6 = vsub.f32 %v8058_v2, %v10253_v32 }
 0xc66   :  { %v2212_v61 = vpop.f32.mrf.mxu1 }
 0xc67   :  { %v2223_v63 = vsub.f32 %v2212_v61, %v10253_v32  ;;  %v2234_v8 = vsel %vm1416_vm3, %v2224_v6, -inf }
 0xc69   :  { %v2231_v7 = vsel %vm1416_vm3, %v2223_v63, -inf }
 0xc6a   :  { %2232 = vmax.xlane.f32.xlu0 %v2231_v7 }
 0xc6d   :  { %2269 = vrot.lane.b32.xlu1 %v10204_v0, %s9741_s27 }
 0xc6e   :  { %2235 = vmax.xlane.f32.xlu0 %v2234_v8 }
 0xc71   :  { %2358 = vrot.lane.b32.xlu1 %v10213_v5, %s9741_s27 }
 0xc75   :  { %2449 = vrot.lane.b32.xlu1 %v10202_v59, %s9742_s22 }
 0xc79   :  { %2447 = vrot.lane.b32.xlu1 %v10204_v0, %s9742_s22 }
 0xc7d   :  { %2443 = vrot.lane.b32.xlu1 %v10211_v62, %s9743_s23 }
 0xc84   :  { %2271 = vrot.lane.b32.xlu0 %v10202_v59, %s9741_s27 }
 0xc88   :  { %2356 = vrot.lane.b32.xlu0 %v10215_v3, %s9741_s27 }
 0xc8c   :  { %2540 = vrot.lane.b32.xlu0 %v10213_v5, %s9742_s22 }
 0xce5   :  { %v2230_v9 = vpop.xlane.xlu1 %2229 }
 0xce6   :  { %v2238_v11 = vsub.f32 %v2222_v49, %v2230_v9 }
 0xce7   :  { %v2227_v12 = vpop.xlane.xlu0 %2226 }
 0xce8   :  { %v2243_v13 = vmul.f32 1.442695, %v2238_v11  ;;  %v2237_v14 = vsub.f32 %v2221_v52, %v2227_v12 }
 0xce9   :  { %v2270_v15 = vpop.permute.xlu1 %2269 }
 0xcea   :  { %8598 = vpow2.f32 %v2243_v13  ;;  %v2241_v16 = vmul.f32 1.442695, %v2237_v14 }
 0xcec   :  { %8600 = vpow2.f32 %v2241_v16 }
 0xced   :  { %v2359_v17 = vpop.permute.xlu1 %2358 }
 0xcee   :  { %8066 = vmatprep.subr.mxu1 %v2359_v17 }
 0xcef   :  { %8067 = vmatpush3.msra.mxu1 %v2359_v17 }
 0xcf1   :  { %v2450_v29 = vpop.permute.xlu1 %2449 }
 0xcf3   :  { %v2233_v62 = vpop.xlane.xlu0 %2232 }
 0xcf4   :  { %v2239_v18 = vsub.f32 %v2223_v63, %v2233_v62 }
 0xcf5   :  { %v2448_v40 = vpop.permute.xlu1 %2447 }
 0xcf6   :  { %v2245_v19 = vmul.f32 1.442695, %v2239_v18 }
 0xcf7   :  { %v8599_v20 = vpop.eup %8598  ;;  %v2236_v21 = vpop.xlane.xlu0 %2235 }
 0xcf8   :  { %8602 = vpow2.f32 %v2245_v19  ;;  %v2240_v23 = vsub.f32 %v2224_v6, %v2236_v21  ;;  %v2252_v24 = vsel %vm1416_vm3, %v8599_v20, 0.0 }
 0xcf9   :  { %v8601_v25 = vpop.eup %8600  ;;  %2253 = vadd.xlane.f32.xlu1 %v2252_v24  ;;  %v2444_v42 = vpop.permute.xlu1 %2443 }
 0xcfa   :  { %v2247_v26 = vmul.f32 1.442695, %v2240_v23  ;;  %v2249_v27 = vsel %vm1416_vm3, %v8601_v25, 0.0 }
 0xcfb   :  { %2250 = vadd.xlane.f32.xlu0 %v2249_v27  ;;  %v2272_v28 = vpop.permute.xlu0 %2271 }
 0xcfc   :  { %8604 = vpow2.f32 %v2247_v26  ;;  %8059 = vmatprep.subr.mxu0 %v2272_v28 }
 0xcfd   :  { %8060 = vmatpush3.msra.mxu0 %v2272_v28 }
 0xcfe   :  { %8061 = vmatprep.subr.mxu0 %v2270_v15 }
 0xcff   :  { %8062 = vmatpush3.msra.mxu0 %v2270_v15  ;;  %v2357_v30 = vpop.permute.xlu0 %2356 }
 0xd00   :  { %8068 = vmatprep.subr.mxu1 %v2357_v30  ;;  %8073 = vmatprep.subr.msk.mxu0 %vm1223_vm2, %v2450_v29 }
 0xd01   :  { %8069 = vmatpush3.msra.mxu1 %v2357_v30 }
 0xd03   :  { %v2541_v34 = vpop.permute.xlu0 %2540 }
 0xd04   :  { %8080 = vmatprep.subr.msk.mxu1 %vm1223_vm2, %v2541_v34 }
 0xd05   :  { %v8603_v35 = vpop.eup %8602 }
 0xd06   :  { %v2255_v36 = vsel %vm1416_vm3, %v8603_v35, 0.0 }
 0xd07   :  { %2256 = vadd.xlane.f32.xlu0 %v2255_v36 }
 0xd09   :  { %v8605_v38 = vpop.eup %8604 }
 0xd0a   :  { %v2258_v39 = vsel %vm1416_vm3, %v8605_v38, 0.0 }
 0xd0b   :  { %2259 = vadd.xlane.f32.xlu1 %v2258_v39 }
 0xd1c   :  { %2538 = vrot.lane.b32.xlu1 %v10215_v3, %s9742_s22 }
 0xd1d   :  { %2445 = vrot.lane.b32.xlu0 %v10234_v1, %s9743_s23 }
 0xd20   :  { %2536 = vrot.lane.b32.xlu1 %v10242_v10, %s9743_s23 }
 0xd21   :  { %2534 = vrot.lane.b32.xlu0 %v10222_v4, %s9743_s23 }
 0xd82   :  { %v2254_v43 = vpop.xlane.xlu1 %2253 }
 0xd83   :  { %8606 = vrcp.f32 %v2254_v43 }
 0xd84   :  { %v2251_v44 = vpop.xlane.xlu0 %2250 }
 0xd85   :  { %8608 = vrcp.f32 %v2251_v44 }
 0xd90   :  { %v2257_v45 = vpop.xlane.xlu0 %2256  ;;  %v8607_v48 = vpop.eup %8606 }
 0xd91   :  { %8610 = vrcp.f32 %v2257_v45  ;;  %v2264_v53 = vmul.f32 %v8607_v48, %v8599_v20 }
 0xd92   :  { %v8609_v49 = vpop.eup %8608 }
 0xd93   :  { %v2262_v51 = vmul.f32 %v8609_v49, %v8601_v25 }
 0xd94   :  { %v2260_v52 = vpop.xlane.xlu1 %2259  ;;  %v2446_v4 = vpop.permute.xlu0 %2445 }
 0xd95   :  { %8612 = vrcp.f32 %v2260_v52  ;;  %8063 = vmatprep.mubr.msk.f32.mxu0 %vm1416_vm3, %v2262_v51 }
 0xd96   :  { %8064 = vmatmul.mubr.msk.f32.vlgmr.msra.gmra.mxu0 %vm1416_vm3, %v2264_v53 }
 0xd97   :  { %8074 = vmatpush3.xpose.msk.msra.mxu0 %vm1223_vm2, %v2450_v29  ;;  %8077 = vmatprep.mubr.msk.f32.mxu0 %vm1223_vm2, %v2444_v42 }
 0xd98   :  { %8075 = vmatprep.subr.msk.mxu0 %vm1223_vm2, %v2448_v40  ;;  %v2535_v61 = vpop.permute.xlu0 %2534  ;;  %v2539_v63 = vpop.permute.xlu1 %2538 }
 0xd9b   :  { %8076 = vmatpush3.xpose.msk.msra.mxu0 %vm1223_vm2, %v2448_v40 }
 0xd9c   :  { %v2537_v6 = vpop.permute.xlu1 %2536 }
 0xd9e   :  { %v8611_v1 = vpop.eup %8610  ;;  %8078 = vmatmul.mubr.msk.f32.vlgmr.msra.gmra.mxu0 %vm1223_vm2, %v2446_v4 }
 0xd9f   :  { %v2266_v10 = vmul.f32 %v8611_v1, %v8603_v35 }
 0xda1   :  { %8070 = vmatprep.mubr.msk.f32.mxu1 %vm1416_vm3, %v2266_v10 }
 0xda2   :  { %v8613_v55 = vpop.eup %8612 }
 0xda3   :  { %v2268_v2 = vmul.f32 %v8613_v55, %v8605_v38 }
 0xda5   :  { %8071 = vmatmul.mubr.msk.f32.vlgmr.msra.gmra.mxu1 %vm1416_vm3, %v2268_v2 }
 0xda6   :  { %8081 = vmatpush3.xpose.msk.msra.mxu1 %vm1223_vm2, %v2541_v34  ;;  %8084 = vmatprep.mubr.msk.f32.mxu1 %vm1223_vm2, %v2535_v61 }
 0xda7   :  { %8082 = vmatprep.subr.msk.mxu1 %vm1223_vm2, %v2539_v63 }
 0xdaa   :  { %8083 = vmatpush3.xpose.msk.msra.mxu1 %vm1223_vm2, %v2539_v63  ;;  %v2911_v63 = vld [vmem:[%s11227_s28 + $0x18] sm:$0xff] }
 0xdad   :  { %8085 = vmatmul.mubr.msk.f32.vlgmr.msra.gmra.mxu1 %vm1223_vm2, %v2537_v6  ;;  %v2910_v6 = vld [vmem:[%s11227_s28 + $0x10] sm:$0xff] }
 0xe56   :  { %v8065_v7 = vpop.f32.mrf.mxu0 }
 0xe58   :  { %v2347_v8 = vpop.f32.mrf.mxu0 }
 0xe5e   :  { %v8079_v9 = vpop.f32.mrf.mxu0 }
 0xe5f   :  { %v2626_v11 = vsub.f32 %v8079_v9, %v10247_v22 }
 0xe60   :  { %v2525_v12 = vpop.f32.mrf.mxu0 }
 0xe61   :  { %v2625_v13 = vsub.f32 %v2525_v12, %v10247_v22  ;;  %v2632_v14 = vsel %vm1416_vm3, %v2626_v11, -inf }
 0xe62   :  { %2633 = vmax.xlane.f32.xlu1 %v2632_v14 }
 0xe63   :  { %v2629_v15 = vsel %vm1416_vm3, %v2625_v13, -inf }
 0xe64   :  { %2630 = vmax.xlane.f32.xlu0 %v2629_v15 }
 0xe65   :  { %v8072_v16 = vpop.f32.mrf.mxu1 }
 0xe67   :  { %v2434_v17 = vpop.f32.mrf.mxu1 }
 0xe6d   :  { %v8086_v62 = vpop.f32.mrf.mxu1 }
 0xe6e   :  { %v2628_v20 = vsub.f32 %v8086_v62, %v10253_v32 }
 0xe6f   :  { %v2616_v18 = vpop.f32.mrf.mxu1 }
 0xe70   :  { %v2627_v19 = vsub.f32 %v2616_v18, %v10253_v32  ;;  %v2638_v23 = vsel %vm1416_vm3, %v2628_v20, -inf }
 0xe72   :  { %v2635_v21 = vsel %vm1416_vm3, %v2627_v19, -inf }
 0xe73   :  { %2636 = vmax.xlane.f32.xlu0 %v2635_v21 }
 0xe77   :  { %2639 = vmax.xlane.f32.xlu0 %v2638_v23 }
 0xeeb   :  { %v2634_v24 = vpop.xlane.xlu1 %2633 }
 0xeec   :  { %v2642_v25 = vsub.f32 %v2626_v11, %v2634_v24 }
 0xeed   :  { %v2631_v26 = vpop.xlane.xlu0 %2630 }
 0xeee   :  { %v2647_v27 = vmul.f32 1.442695, %v2642_v25  ;;  %v2641_v28 = vsub.f32 %v2625_v13, %v2631_v26 }
 0xef0   :  { %8614 = vpow2.f32 %v2647_v27  ;;  %v2645_v29 = vmul.f32 1.442695, %v2641_v28 }
 0xef2   :  { %8616 = vpow2.f32 %v2645_v29 }
 0xefc   :  { %v2637_v30 = vpop.xlane.xlu0 %2636 }
 0xefd   :  { %v8615_v34 = vpop.eup %8614  ;;  %v2643_v35 = vsub.f32 %v2627_v19, %v2637_v30 }
 0xefe   :  { %v2656_v36 = vsel %vm1416_vm3, %v8615_v34, 0.0 }
 0xeff   :  { %v8617_v38 = vpop.eup %8616  ;;  %v2649_v39 = vmul.f32 1.442695, %v2643_v35  ;;  %2657 = vadd.xlane.f32.xlu1 %v2656_v36 }
 0xf00   :  { %v2640_v40 = vpop.xlane.xlu0 %2639  ;;  %v2653_v42 = vsel %vm1416_vm3, %v8617_v38, 0.0 }
 0xf01   :  { %8618 = vpow2.f32 %v2649_v39  ;;  %v2644_v43 = vsub.f32 %v2628_v20, %v2640_v40  ;;  %2654 = vadd.xlane.f32.xlu0 %v2653_v42  ;;  %v7522_v42 = vld [vmem:[%s11228_s29] ss:$0 sm:$0xff] }
 0xf03   :  { %v2651_v44 = vmul.f32 1.442695, %v2644_v43 }
 0xf05   :  { %8620 = vpow2.f32 %v2651_v44 }
 0xf0e   :  { %v8619_v45 = vpop.eup %8618 }
 0xf0f   :  { %v2659_v48 = vsel %vm1416_vm3, %v8619_v45, 0.0 }
 0xf10   :  { %2660 = vadd.xlane.f32.xlu0 %v2659_v48 }
 0xf12   :  { %v8621_v49 = vpop.eup %8620 }
 0xf13   :  { %v2662_v51 = vsel %vm1416_vm3, %v8621_v49, 0.0 }
 0xf14   :  { %2663 = vadd.xlane.f32.xlu1 %v2662_v51 }
 0xf25   :  { %2673 = vrot.lane.b32.xlu1 %v10204_v0, %s9744_s6 }
 0xf26   :  { %2675 = vrot.lane.b32.xlu0 %v10202_v59, %s9744_s6 }
 0xf29   :  { %2762 = vrot.lane.b32.xlu1 %v10213_v5, %s9744_s6 }
 0xf2a   :  { %2851 = vrot.lane.b32.xlu0 %v10365_v47, %s9723_s26 }
 0xf2d   :  { %2760 = vrot.lane.b32.xlu1 %v10215_v3, %s9744_s6 }
 0xf2e   :  { %2867 = vrot.lane.b32.xlu0 %v2347_v8, %s9725_s1  ;;  %v2908_v8 = vld [vmem:[%s11227_s28] sm:$0xff] }
 0xf31   :  { %2853 = vrot.lane.b32.xlu1 %v10363_v46, %s9723_s26 }
 0xf32   :  { %2855 = vrot.lane.b32.xlu0 %v10373_v57, %s9723_s26 }
 0xf35   :  { %2869 = vrot.lane.b32.xlu1 %v8065_v7, %s9725_s1  ;;  %v2909_v7 = vld [vmem:[%s11227_s28 + $0x8] sm:$0xff] }
 0xf36   :  { %2871 = vrot.lane.b32.xlu0 %v2434_v17, %s9725_s1 }
 0xf39   :  { %2857 = vrot.lane.b32.xlu1 %v10371_v56, %s9723_s26 }
 0xf3d   :  { %2873 = vrot.lane.b32.xlu1 %v8072_v16, %s9725_s1 }
 0xf88   :  { %v2658_v0 = vpop.xlane.xlu1 %2657 }
 0xf8a   :  { %v2655_v59 = vpop.xlane.xlu0 %2654 }
 0xf8b   :  { %8622 = vrcp.f32 %v2655_v59 }
 0xf8c   :  { %8624 = vrcp.f32 %v2658_v0 }
 0xf98   :  { %v8623_v5 = vpop.eup %8622 }
 0xf99   :  { %v2661_v3 = vpop.xlane.xlu0 %2660  ;;  %v2666_v47 = vmul.f32 %v8623_v5, %v8617_v38  ;;  %v8625_v52 = vpop.eup %8624 }
 0xf9a   :  { %8626 = vrcp.f32 %v2661_v3  ;;  %v2668_v56 = vmul.f32 %v8625_v52, %v8615_v34 }
 0xf9b   :  { %8091 = vmatprep.mubr.msk.f32.mxu0 %vm1416_vm3, %v2666_v47 }
 0xf9d   :  { %v2664_v46 = vpop.xlane.xlu1 %2663  ;;  %v2676_v57 = vpop.permute.xlu0 %2675 }
 0xf9e   :  { %8628 = vrcp.f32 %v2664_v46  ;;  %8087 = vmatprep.subr.mxu0 %v2676_v57 }
 0xf9f   :  { %8088 = vmatpush3.msra.mxu0 %v2676_v57 }
 0xfa1   :  { %v2674_v53 = vpop.permute.xlu1 %2673  ;;  %v2852_v15 = vpop.permute.xlu0 %2851 }
 0xfa2   :  { %8089 = vmatprep.subr.mxu0 %v2674_v53  ;;  %v2895_v21 = vsel %vm1223_vm2, %v10305_v33, %v2852_v15  ;;  %v3099_v15 = vld [vmem:[%s11229_s5 + $0x8] sm:$0xff] }
 0xfa3   :  { %8090 = vmatpush3.msra.mxu0 %v2674_v53 }
 0xfa4   :  { %8092 = vmatmul.mubr.msk.f32.vlgmr.msra.gmra.mxu0 %vm1416_vm3, %v2668_v56  ;;  %8101 = vmatprep.subr.mxu0 %v2911_v63 }
 0xfa5   :  { %v2763_v4 = vpop.permute.xlu1 %2762  ;;  %8102 = vmatpush3.msra.mxu0 %v2911_v63  ;;  %v2868_v17 = vpop.permute.xlu0 %2867 }
 0xfa6   :  { %8094 = vmatprep.subr.mxu1 %v2763_v4  ;;  %8103 = vmatprep.subr.mxu0 %v2910_v6  ;;  %v2899_v24 = vsel %vm1416_vm3, %v2895_v21, %v2868_v17 }
 0xfa7   :  { %v8627_v1 = vpop.eup %8626  ;;  %8095 = vmatpush3.msra.mxu1 %v2763_v4  ;;  %8104 = vmatpush3.msra.mxu0 %v2910_v6 }
 0xfa8   :  { %v2670_v10 = vmul.f32 %v8627_v1, %v8619_v45  ;;  %8105 = vmatprep.subr.mxu0 %v2909_v7 }
 0xfa9   :  { %v2761_v55 = vpop.permute.xlu1 %2760  ;;  %8106 = vmatpush3.msra.mxu0 %v2909_v7  ;;  %v2856_v18 = vpop.permute.xlu0 %2855 }
 0xfaa   :  { %8096 = vmatprep.subr.mxu1 %v2761_v55  ;;  %8098 = vmatprep.mubr.msk.f32.mxu1 %vm1416_vm3, %v2670_v10  ;;  %v2897_v33 = vsel %vm1223_vm2, %v10313_v41, %v2856_v18 }
 0xfab   :  { %v8629_v2 = vpop.eup %8628  ;;  %8097 = vmatpush3.msra.mxu1 %v2761_v55  ;;  %8107 = vmatprep.subr.mxu0 %v2908_v8 }
 0xfac   :  { %v2672_v61 = vmul.f32 %v8629_v2, %v8621_v49  ;;  %8108 = vmatpush3.msra.mxu0 %v2908_v8 }
 0xfad   :  { %v2854_v14 = vpop.permute.xlu1 %2853  ;;  %v2872_v20 = vpop.permute.xlu0 %2871 }
 0xfae   :  { %8099 = vmatmul.mubr.msk.f32.vlgmr.msra.gmra.mxu1 %vm1416_vm3, %v2672_v61  ;;  %v2896_v25 = vsel %vm1223_vm2, %v10303_v31, %v2854_v14  ;;  %v2901_v34 = vsel %vm1416_vm3, %v2897_v33, %v2872_v20  ;;  %v3100_v14 = vld [vmem:[%s11229_s5 + $0x10] sm:$0xff]  ;;  %v7523_v33 = vld [vmem:[%s11230_s2] ss:$0 sm:$0xff] }
 0xfb1   :  { %v2870_v16 = vpop.permute.xlu1 %2869 }
 0xfb2   :  { %v2900_v27 = vsel %vm1416_vm3, %v2896_v25, %v2870_v16  ;;  %v3098_v16 = vld [vmem:[%s11229_s5] sm:$0xff] }
 0xfb5   :  { %v2858_v62 = vpop.permute.xlu1 %2857 }
 0xfb6   :  { %v2898_v31 = vsel %vm1223_vm2, %v10308_v37, %v2858_v62 }
 0xfb9   :  { %v2874_v19 = vpop.permute.xlu1 %2873 }
 0xfba   :  { %v2902_v36 = vsel %vm1416_vm3, %v2898_v31, %v2874_v19 }
0x1064   :  { %v8093_v9 = vpop.f32.mrf.mxu0 }
0x1065   :  { %2885 = vrot.lane.b32.xlu1 %v8093_v9, %s9745_s24 }
0x1066   :  { %v2751_v11 = vpop.f32.mrf.mxu0 }
0x1067   :  { %2883 = vrot.lane.b32.xlu0 %v2751_v11, %s9745_s24 }
0x106e   :  { %v8100_v12 = vpop.f32.mrf.mxu1 }
0x106f   :  { %2889 = vrot.lane.b32.xlu1 %v8100_v12, %s9745_s24 }
0x1070   :  { %v2838_v13 = vpop.f32.mrf.mxu1 }
0x1071   :  { %2887 = vrot.lane.b32.xlu0 %v2838_v13, %s9745_s24  ;;  %v3101_v13 = vld [vmem:[%s11229_s5 + $0x18] sm:$0xff] }
0x1072   :  { %8115 = vmatprep.subr.mxu1 %v3101_v13 }
0x1073   :  { %8116 = vmatpush3.msra.mxu1 %v3101_v13 }
0x1074   :  { %8117 = vmatprep.subr.mxu1 %v3100_v14 }
0x1075   :  { %8118 = vmatpush3.msra.mxu1 %v3100_v14 }
0x1076   :  { %8119 = vmatprep.subr.mxu1 %v3099_v15 }
0x1077   :  { %8120 = vmatpush3.msra.mxu1 %v3099_v15 }
0x1078   :  { %8121 = vmatprep.subr.mxu1 %v3098_v16 }
0x1079   :  { %8122 = vmatpush3.msra.mxu1 %v3098_v16 }
0x10d7   :  { %v2886_v23 = vpop.permute.xlu1 %2885 }
0x10d8   :  { %v2905_v29 = vsel %vm2903_vm4, %v2900_v27, %v2886_v23 }
0x10d9   :  { %v2884_v26 = vpop.permute.xlu0 %2883 }
0x10da   :  { %v2904_v28 = vsel %vm2903_vm4, %v2899_v24, %v2884_v26 }
0x10db   :  { %8109 = vmatprep.mubr.msk.f32.mxu0 %vm700_vm0, %v2904_v28 }
0x10dc   :  { %8110 = vmatmul.mubr.msk.f32.vlgmr.msra.gmra.mxu0 %vm700_vm0, %v2905_v29 }
0x10e1   :  { %v2890_v30 = vpop.permute.xlu1 %2889 }
0x10e2   :  { %v2907_v39 = vsel %vm2903_vm4, %v2902_v36, %v2890_v30  ;;  %v7524_v36 = vld [vmem:[%s11231_s7] ss:$0 sm:$0xff] }
0x10e3   :  { %v2888_v35 = vpop.permute.xlu0 %2887 }
0x10e4   :  { %v2906_v38 = vsel %vm2903_vm4, %v2901_v34, %v2888_v35 }
0x10e5   :  { %8112 = vmatprep.mubr.msk.f32.mxu0 %vm700_vm0, %v2906_v38 }
0x10e6   :  { %8113 = vmatmul.mubr.msk.f32.gmra.mxu0 %vm700_vm0, %v2907_v39 }
0x119c   :  { %v8111_v40 = vpop.f32.mrf.mxu0 }
0x119d   :  { %v3010_v41 = vadd.f32 %v8111_v40, %v10164_v50 }
0x119e   :  { %v2990_v43 = vpop.f32.mrf.mxu0 }
0x119f   :  { %v10489_v44 = vadd.f32 %v7522_v42, %v3010_v41  ;;  %v3009_v37 = vadd.f32 %v2990_v43, %v10167_v54 }
0x11a1   :  { %v10492_v45 = vadd.f32 %v7522_v42, %v3009_v37  ;;  %v3029_v48 = vsel %vm700_vm0, %v10489_v44, 0.0 }
0x11a2   :  { %3030 = vadd.xlane.f32.xlu1 %v3029_v48 }
0x11a3   :  { %v3026_v49 = vsel %vm700_vm0, %v10492_v45, 0.0 }
0x11a4   :  { %3027 = vadd.xlane.f32.xlu0 %v3026_v49 }
0x11a6   :  { %v8114_v51 = vpop.f32.mrf.mxu0 }
0x11a7   :  { %v3012_v0 = vadd.f32 %v8114_v51, %v10172_v58 }
0x11a8   :  { %v3000_v59 = vpop.f32.mrf.mxu0 }
0x11a9   :  { %v3011_v50 = vadd.f32 %v3000_v59, %v10177_v60  ;;  %v10502_v3 = vadd.f32 %v7522_v42, %v3012_v0  ;;  %v7525_v0 = vld [vmem:[#allocation8] ss:$0 sm:$0xff] }
0x11ab   :  { %v10500_v5 = vadd.f32 %v7522_v42, %v3011_v50  ;;  %v3035_v47 = vsel %vm700_vm0, %v10502_v3, 0.0 }
0x11ad   :  { %v3032_v54 = vsel %vm700_vm0, %v10500_v5, 0.0 }
0x11ae   :  { %3033 = vadd.xlane.f32.xlu0 %v3032_v54 }
0x11b2   :  { %3036 = vadd.xlane.f32.xlu0 %v3035_v47 }
0x122b   :  { %v3031_v46 = vpop.xlane.xlu1 %3030 }
0x122c   :  { %v3039_v57 = vmul.f32 0.03125, %v3031_v46 }
0x122d   :  { %v3028_v52 = vpop.xlane.xlu0 %3027 }
0x122e   :  { %v3043_v53 = vsub.f32 %v10489_v44, %v3039_v57  ;;  %v3038_v58 = vmul.f32 0.03125, %v3028_v52 }
0x1230   :  { %v3042_v60 = vsub.f32 %v10492_v45, %v3038_v58  ;;  %v3047_v56 = vmul.f32 %v3043_v53, %v3043_v53 }
0x1232   :  { %v3053_v4 = vsel %vm700_vm0, %v3047_v56, 0.0  ;;  %v3046_v1 = vmul.f32 %v3042_v60, %v3042_v60 }
0x1233   :  { %3054 = vadd.xlane.f32.xlu1 %v3053_v4 }
0x1234   :  { %v3050_v10 = vsel %vm700_vm0, %v3046_v1, 0.0 }
0x1235   :  { %3051 = vadd.xlane.f32.xlu0 %v3050_v10 }
0x1237   :  { %v3034_v55 = vpop.xlane.xlu0 %3033 }
0x1238   :  { %v3040_v2 = vmul.f32 0.03125, %v3034_v55 }
0x123a   :  { %v3044_v61 = vsub.f32 %v10500_v5, %v3040_v2 }
0x123b   :  { %v3037_v63 = vpop.xlane.xlu0 %3036 }
0x123c   :  { %v3041_v6 = vmul.f32 0.03125, %v3037_v63  ;;  %v3048_v7 = vmul.f32 %v3044_v61, %v3044_v61 }
0x123e   :  { %v3045_v8 = vsub.f32 %v10502_v3, %v3041_v6  ;;  %v3056_v9 = vsel %vm700_vm0, %v3048_v7, 0.0 }
0x123f   :  { %3057 = vadd.xlane.f32.xlu0 %v3056_v9 }
0x1240   :  { %v3049_v11 = vmul.f32 %v3045_v8, %v3045_v8 }
0x1242   :  { %v3059_v12 = vsel %vm700_vm0, %v3049_v11, 0.0 }
0x1243   :  { %3060 = vadd.xlane.f32.xlu1 %v3059_v12 }
0x12bc   :  { %v3055_v17 = vpop.xlane.xlu1 %3054 }
0x12bd   :  { %v3063_v62 = vmul.f32 0.03125, %v3055_v17 }
0x12be   :  { %v3052_v18 = vpop.xlane.xlu0 %3051 }
0x12bf   :  { %v3067_v19 = vadd.f32 1e-05, %v3063_v62  ;;  %v3062_v20 = vmul.f32 0.03125, %v3052_v18  ;;  %v3517_v62 = vld [vmem:[%s11232_s25 + $0x18] sm:$0xff]  ;;  %v3516_v18 = vld [vmem:[%s11232_s25 + $0x10] sm:$0xff] }
0x12c0   :  { %8129 = vmatprep.subr.mxu0 %v3517_v62 }
0x12c1   :  { %8630 = vrsqrt.f32 %v3067_v19  ;;  %v3066_v21 = vadd.f32 1e-05, %v3062_v20  ;;  %8130 = vmatpush3.msra.mxu0 %v3517_v62  ;;  %v3515_v19 = vld [vmem:[%s11232_s25 + $0x8] sm:$0xff]  ;;  %v3514_v20 = vld [vmem:[%s11232_s25] sm:$0xff] }
0x12c2   :  { %8131 = vmatprep.subr.mxu0 %v3516_v18 }
0x12c3   :  { %8632 = vrsqrt.f32 %v3066_v21  ;;  %8132 = vmatpush3.msra.mxu0 %v3516_v18 }
0x12c4   :  { %8133 = vmatprep.subr.mxu0 %v3515_v19 }
0x12c5   :  { %8134 = vmatpush3.msra.mxu0 %v3515_v19  ;;  %v7536_v19 = vld [vmem:[%s11233_s4 + $0x6] ss:$0 sm:$0xff] }
0x12c6   :  { %8135 = vmatprep.subr.mxu0 %v3514_v20 }
0x12c7   :  { %8136 = vmatpush3.msra.mxu0 %v3514_v20 }
0x12c8   :  { %v3058_v23 = vpop.xlane.xlu0 %3057 }
0x12c9   :  { %v3064_v24 = vmul.f32 0.03125, %v3058_v23 }
0x12cb   :  { %v3068_v25 = vadd.f32 1e-05, %v3064_v24 }
0x12cc   :  { %v3061_v26 = vpop.xlane.xlu1 %3060 }
0x12cd   :  { %8634 = vrsqrt.f32 %v3068_v25  ;;  %v3065_v27 = vmul.f32 0.03125, %v3061_v26 }
0x12ce   :  { %v8631_v28 = vpop.eup %8630 }
0x12cf   :  { %v3069_v29 = vadd.f32 1e-05, %v3065_v27  ;;  %v3075_v30 = vmul.f32 %v8631_v28, %v3043_v53 }
0x12d0   :  { %v8633_v34 = vpop.eup %8632 }
0x12d1   :  { %8636 = vrsqrt.f32 %v3069_v29  ;;  %v3074_v31 = vmul.f32 %v8633_v34, %v3042_v60  ;;  %v3085_v35 = vmul.f32 %v7523_v33, %v3075_v30  ;;  %v10544_v30 = vld [vmem:[%s11233_s4] ss:$0 sm:$0xff]  ;;  %v7531_v34 = vld [vmem:[%s11233_s4 + $0x1] ss:$0 sm:$0xff] }
0x12d3   :  { %v3084_v38 = vmul.f32 %v7523_v33, %v3074_v31  ;;  %v3095_v40 = vadd.f32 %v7524_v36, %v3085_v35  ;;  %v10548_v31 = vld [vmem:[%s11233_s4 + $0x2] ss:$0 sm:$0xff] }
0x12d5   :  { %v3094_v39 = vadd.f32 %v7524_v36, %v3084_v38 }
0x12d7   :  { %8123 = vmatprep.mubr.msk.f32.mxu1 %vm700_vm0, %v3094_v39 }
0x12d8   :  { %8124 = vmatmul.mubr.msk.f32.vlgmr.msra.gmra.mxu1 %vm700_vm0, %v3095_v40 }
0x12da   :  { %v8635_v42 = vpop.eup %8634 }
0x12db   :  { %v3076_v41 = vmul.f32 %v8635_v42, %v3044_v61 }
0x12dd   :  { %v3086_v43 = vmul.f32 %v7523_v33, %v3076_v41 }
0x12de   :  { %v8637_v37 = vpop.eup %8636 }
0x12df   :  { %v3096_v48 = vadd.f32 %v7524_v36, %v3086_v43  ;;  %v3077_v49 = vmul.f32 %v8637_v37, %v3045_v8 }
0x12e1   :  { %8126 = vmatprep.mubr.msk.f32.mxu1 %vm700_vm0, %v3096_v48  ;;  %v3087_v51 = vmul.f32 %v7523_v33, %v3077_v49 }
0x12e3   :  { %v3097_v59 = vadd.f32 %v7524_v36, %v3087_v51 }
0x12e5   :  { %8127 = vmatmul.mubr.msk.f32.gmra.mxu1 %vm700_vm0, %v3097_v59 }
0x1398   :  { %v8125_v50 = vpop.f32.mrf.mxu1 }
0x1399   :  { %v3193_v54 = vadd.f32 %v8125_v50, %v7525_v0 }
0x139a   :  { %v3187_v47 = vpop.f32.mrf.mxu1 }
0x139b   :  { %v3207_v46 = vsub.f32 0.0, %v3193_v54  ;;  %v3188_v57 = vadd.f32 %v7525_v0, %v3187_v47  ;;  %v7533_v47 = vld [vmem:[%s11233_s4 + $0x3] ss:$0 sm:$0xff] }
0x139d   :  { %v3212_v52 = vmul.f32 1.442695, %v3207_v46  ;;  %v3206_v53 = vsub.f32 0.0, %v3188_v57 }
0x139f   :  { %8638 = vpow2.f32 %v3212_v52  ;;  %v3210_v58 = vmul.f32 1.442695, %v3206_v53 }
0x13a1   :  { %8640 = vpow2.f32 %v3210_v58 }
0x13a5   :  { %v8128_v60 = vpop.f32.mrf.mxu1 }
0x13a6   :  { %v10526_v56 = vadd.f32 %v8128_v60, %v7525_v0 }
0x13a7   :  { %v3197_v4 = vpop.f32.mrf.mxu1 }
0x13a8   :  { %v3209_v1 = vsub.f32 0.0, %v10526_v56  ;;  %v3198_v10 = vadd.f32 %v7525_v0, %v3197_v4 }
0x13aa   :  { %v3216_v55 = vmul.f32 1.442695, %v3209_v1  ;;  %v3208_v2 = vsub.f32 0.0, %v3198_v10 }
0x13ac   :  { %v8639_v61 = vpop.eup %8638  ;;  %v3214_v63 = vmul.f32 1.442695, %v3208_v2  ;;  %8642 = vpow2.f32 %v3216_v55  ;;  %v7534_v2 = vld [vmem:[%s11233_s4 + $0x4] ss:$0 sm:$0xff] }
0x13ad   :  { %v3219_v6 = vadd.f32 1.0, %v8639_v61 }
0x13ae   :  { %v8641_v7 = vpop.eup %8640  ;;  %8644 = vpow2.f32 %v3214_v63 }
0x13af   :  { %8646 = vrcp.f32 %v3219_v6  ;;  %v3218_v8 = vadd.f32 1.0, %v8641_v7 }
0x13b1   :  { %8648 = vrcp.f32 %v3218_v8 }
0x13b9   :  { %v8643_v9 = vpop.eup %8642 }
0x13ba   :  { %v3221_v15 = vadd.f32 1.0, %v8643_v9 }
0x13bb   :  { %v8645_v11 = vpop.eup %8644 }
0x13bc   :  { %v8647_v12 = vpop.eup %8646  ;;  %v3220_v13 = vadd.f32 1.0, %v8645_v11 }
0x13bd   :  { %3236 = vrot.lane.b32.xlu1 %v8647_v12, %s9733_s8  ;;  %v7535_v12 = vld [vmem:[%s11233_s4 + $0x5] ss:$0 sm:$0xff] }
0x13be   :  { %v8649_v14 = vpop.eup %8648  ;;  %8650 = vrcp.f32 %v3220_v13 }
0x13bf   :  { %3234 = vrot.lane.b32.xlu0 %v8649_v14, %s9733_s8  ;;  %8652 = vrcp.f32 %v3221_v15 }
0x13cb   :  { %v8651_v16 = vpop.eup %8650 }
0x13cc   :  { %3238 = vrot.lane.b32.xlu1 %v8651_v16, %s9733_s8  ;;  %v8653_v17 = vpop.eup %8652 }
0x13d0   :  { %3240 = vrot.lane.b32.xlu1 %v8653_v17, %s9733_s8 }
0x142f   :  { %v3237_v21 = vpop.permute.xlu1 %3236 }
0x1430   :  { %v3247_v23 = vmul.f32 %v3237_v21, %v3193_v54 }
0x1431   :  { %v3235_v24 = vpop.permute.xlu0 %3234 }
0x1432   :  { %v3256_v25 = vrot.slane %v3247_v23, 5  ;;  %v3246_v26 = vmul.f32 %v3235_v24, %v3188_v57 }
0x1434   :  { %v3269_v27 = vsel %vm3254_vm5, %v3256_v25, 0.0  ;;  %v3255_v28 = vrot.slane %v3246_v26, 5 }
0x1435   :  { %3274 = vst.msk [vmem:[#allocation2 + $0x10] sm:$0x3f] %vm3273_vm6, %v3269_v27 }
0x1436   :  { %v3257_v29 = vsel %vm3254_vm5, %v3255_v28, %v3256_v25  ;;  %v3267_v33 = vsel %vm3254_vm5, 0.0, %v3255_v28 }
0x1437   :  { %3271 = vst.msk [vmem:[#allocation2] sm:$0xff] %vm700_vm0, %v3267_v33  ;;  %3272 = vst.msk [vmem:[#allocation2 + $0x8] sm:$0xff] %vm700_vm0, %v3257_v29 }
0x143e   :  { %v3239_v35 = vpop.permute.xlu1 %3238  ;;  %v3285_v36 = vld [vmem:[#allocation2] sm:$0xff]  ;;  %v3286_v38 = vld [vmem:[#allocation2 + $0x8] sm:$0xff] }
0x143f   :  { %v3303_v39 = vld [vmem:[#allocation2 + $0x1] sm:$0xff]  ;;  %v3248_v40 = vmul.f32 %v3239_v35, %v3198_v10  ;;  %v3295_v42 = vmul.f32 %v10544_v30, %v3285_v36  ;;  %v3296_v41 = vmul.f32 %v10544_v30, %v3286_v38  ;;  %v3304_v43 = vld [vmem:[#allocation2 + $0x9] sm:$0xff] }
0x1440   :  { %v3313_v37 = vmul.f32 %v7531_v34, %v3303_v39  ;;  %v3321_v48 = vld [vmem:[#allocation2 + $0x2] sm:$0xff]  ;;  %v3322_v49 = vld [vmem:[#allocation2 + $0xa] sm:$0xff]  ;;  %v3314_v51 = vmul.f32 %v7531_v34, %v3304_v43 }
0x1441   :  { %v3258_v59 = vrot.slane %v3248_v40, 5  ;;  %v3331_v50 = vmul.f32 %v10548_v31, %v3321_v48  ;;  %v3332_v57 = vmul.f32 %v10548_v31, %v3322_v49  ;;  %v3339_v52 = vld [vmem:[#allocation2 + $0x3] sm:$0xff]  ;;  %v3340_v4 = vld [vmem:[#allocation2 + $0xb] sm:$0xff] }
0x1442   :  { %v3317_v0 = vadd.f32 %v3313_v37, %v3295_v42  ;;  %v3241_v54 = vpop.permute.xlu1 %3240  ;;  %v3318_v46 = vadd.f32 %v3314_v51, %v3296_v41  ;;  %v3349_v55 = vmul.f32 %v7533_v47, %v3339_v52  ;;  %v3350_v61 = vmul.f32 %v7533_v47, %v3340_v4  ;;  %v3357_v63 = vld [vmem:[#allocation2 + $0x4] sm:$0xff]  ;;  %v3358_v9 = vld [vmem:[#allocation2 + $0xc] sm:$0xff] }
0x1443   :  { %v3268_v53 = vsel %vm3254_vm5, 0.0, %v3258_v59  ;;  %v3249_v58 = vmul.f32 %v3241_v54, %v10526_v56  ;;  %v3367_v11 = vmul.f32 %v7534_v2, %v3357_v63  ;;  %v3368_v13 = vmul.f32 %v7534_v2, %v3358_v9  ;;  %v3375_v14 = vld [vmem:[#allocation2 + $0x5] sm:$0xff]  ;;  %v3376_v16 = vld [vmem:[#allocation2 + $0xd] sm:$0xff] }
0x1444   :  { %v3335_v60 = vadd.f32 %v3331_v50, %v3317_v0  ;;  %3275 = vst.msk [vmem:[#allocation2 + $0x18] sm:$0xff] %vm700_vm0, %v3268_v53  ;;  %v3336_v1 = vadd.f32 %v3332_v57, %v3318_v46  ;;  %v3385_v18 = vmul.f32 %v7535_v12, %v3375_v14  ;;  %v3386_v20 = vmul.f32 %v7535_v12, %v3376_v16  ;;  %v3393_v21 = vld [vmem:[#allocation2 + $0x6] sm:$0xff]  ;;  %v3394_v26 = vld [vmem:[#allocation2 + $0xe] sm:$0xff]  ;;  %v7537_v53 = vld [vmem:[%s11234_s10] ss:$0 sm:$0xff] }
0x1445   :  { %v3259_v10 = vrot.slane %v3249_v58, 5  ;;  %v3403_v37 = vmul.f32 %v7536_v19, %v3393_v21  ;;  %v3404_v48 = vmul.f32 %v7536_v19, %v3394_v26 }
0x1446   :  { %v3353_v8 = vadd.f32 %v3349_v55, %v3335_v60  ;;  %v3354_v56 = vadd.f32 %v3350_v61, %v3336_v1 }
0x1447   :  { %v3260_v6 = vsel %vm3254_vm5, %v3258_v59, %v3259_v10  ;;  %v3270_v7 = vsel %vm3254_vm5, %v3259_v10, 0.0 }
0x1448   :  { %3276 = vst.msk [vmem:[#allocation2 + $0x20] sm:$0xff] %vm700_vm0, %v3260_v6  ;;  %v3371_v15 = vadd.f32 %v3367_v11, %v3353_v8  ;;  %v3372_v17 = vadd.f32 %v3368_v13, %v3354_v56 }
0x1449   :  { %3277 = vst.msk [vmem:[#allocation2 + $0x28] sm:$0x3f] %vm3273_vm6, %v3270_v7 }
0x144a   :  { %v3389_v25 = vadd.f32 %v3385_v18, %v3371_v15  ;;  %v3390_v38 = vadd.f32 %v3386_v20, %v3372_v17 }
0x144b   :  { %v3287_v62 = vld [vmem:[#allocation2 + $0x18] sm:$0xff] }
0x144c   :  { %v3297_v29 = vmul.f32 %v10544_v30, %v3287_v62  ;;  %v3408_v46 = vadd.f32 %v3404_v48, %v3390_v38 }
0x144e   :  { %v3419_v7 = vadd.f32 %v7537_v53, %v3408_v46 }
0x144f   :  { %v3305_v23 = vld [vmem:[#allocation2 + $0x19] sm:$0xff] }
0x1450   :  { %v3306_v24 = vld [vmem:[#allocation2 + $0x21] sm:$0xff]  ;;  %v3315_v33 = vmul.f32 %v7531_v34, %v3305_v23  ;;  %v3423_v16 = vsel %vm700_vm0, %v3419_v7, 0.0 }
0x1451   :  { %v3324_v27 = vld [vmem:[#allocation2 + $0x22] sm:$0xff]  ;;  %v3316_v35 = vmul.f32 %v7531_v34, %v3306_v24  ;;  %v3323_v36 = vld [vmem:[#allocation2 + $0x1a] sm:$0xff]  ;;  %v3407_v34 = vadd.f32 %v3403_v37, %v3389_v25 }
0x1452   :  { %v3288_v28 = vld [vmem:[#allocation2 + $0x20] sm:$0xff]  ;;  %v3319_v42 = vadd.f32 %v3315_v33, %v3297_v29  ;;  %v3333_v41 = vmul.f32 %v10548_v31, %v3323_v36  ;;  %v3334_v51 = vmul.f32 %v10548_v31, %v3324_v27 }
0x1453   :  { %v3298_v39 = vmul.f32 %v10544_v30, %v3288_v28  ;;  %v3341_v40 = vld [vmem:[#allocation2 + $0x1b] sm:$0xff]  ;;  %v3342_v43 = vld [vmem:[#allocation2 + $0x23] sm:$0xff]  ;;  %v3418_v31 = vadd.f32 %v7537_v53, %v3407_v34 }
0x1454   :  { %v3359_v59 = vld [vmem:[#allocation2 + $0x1c] sm:$0xff]  ;;  %v3337_v0 = vadd.f32 %v3333_v41, %v3319_v42  ;;  %v3351_v50 = vmul.f32 %v7533_v47, %v3341_v40  ;;  %v3360_v54 = vld [vmem:[#allocation2 + $0x24] sm:$0xff]  ;;  %v3352_v52 = vmul.f32 %v7533_v47, %v3342_v43 }
0x1455   :  { %v3320_v49 = vadd.f32 %v3316_v35, %v3298_v39  ;;  %v3377_v30 = vld [vmem:[#allocation2 + $0x1d] sm:$0xff]  ;;  %v3369_v60 = vmul.f32 %v7534_v2, %v3359_v59  ;;  %v3378_v4 = vld [vmem:[#allocation2 + $0x25] sm:$0xff]  ;;  %v3370_v10 = vmul.f32 %v7534_v2, %v3360_v54  ;;  %v3422_v15 = vsel %vm700_vm0, %v3418_v31, 0.0 }
0x1456   :  { %v3355_v58 = vadd.f32 %v3351_v50, %v3337_v0  ;;  %v3395_v55 = vld [vmem:[#allocation2 + $0x1e] sm:$0xff]  ;;  %v3387_v63 = vmul.f32 %v7535_v12, %v3377_v30  ;;  %v3396_v6 = vld [vmem:[#allocation2 + $0x26] sm:$0xff]  ;;  %v3388_v9 = vmul.f32 %v7535_v12, %v3378_v4  ;;  %v3424_v18 = vadd.f32 %v3423_v16, %v3422_v15 }
0x1457   :  { %v3338_v57 = vadd.f32 %v3334_v51, %v3320_v49  ;;  %v3405_v11 = vmul.f32 %v7536_v19, %v3395_v55  ;;  %v3406_v14 = vmul.f32 %v7536_v19, %v3396_v6 }
0x1458   :  { %v3373_v61 = vadd.f32 %v3369_v60, %v3355_v58  ;;  %v7538_v60 = vld [vmem:[%s11235_s11] ss:$0 sm:$0xff] }
0x1459   :  { %v3356_v1 = vadd.f32 %v3352_v52, %v3338_v57 }
0x145a   :  { %v3391_v56 = vadd.f32 %v3387_v63, %v3373_v61  ;;  %v7539_v61 = vld [vmem:[%s11236_s14] ss:$0 sm:$0xff] }
0x145b   :  { %v3374_v8 = vadd.f32 %v3370_v10, %v3356_v1 }
0x145c   :  { %v3409_v47 = vadd.f32 %v3405_v11, %v3391_v56 }
0x145d   :  { %v3392_v13 = vadd.f32 %v3388_v9, %v3374_v8 }
0x145e   :  { %v3420_v62 = vadd.f32 %v7537_v53, %v3409_v47 }
0x145f   :  { %v3410_v17 = vadd.f32 %v3406_v14, %v3392_v13 }
0x1460   :  { %v3425_v20 = vsel %vm700_vm0, %v3420_v62, 0.0 }
0x1461   :  { %v3421_v2 = vadd.f32 %v7537_v53, %v3410_v17  ;;  %v3426_v21 = vadd.f32 %v3425_v20, %v3424_v18 }
0x1463   :  { %v3427_v23 = vsel %vm700_vm0, %v3421_v2, 0.0 }
0x1464   :  { %v3428_v24 = vadd.f32 %v3427_v23, %v3426_v21 }
0x1466   :  { %v3429_v12 = vrot.slane %v3428_v24, 4 }
0x1468   :  { %v3430_v25 = vadd.f32 %v3429_v12, %v3428_v24 }
0x146a   :  { %v3431_v26 = vrot.slane %v3430_v25, 2 }
0x146c   :  { %v3432_v27 = vadd.f32 %v3431_v26, %v3430_v25 }
0x146e   :  { %v3433_v19 = vrot.slane %v3432_v27, 1 }
0x1470   :  { %v3434_v28 = vadd.f32 %v3433_v19, %v3432_v27 }
0x1472   :  { %v3435_v29 = vmul.f32 0.03125, %v3434_v28 }
0x1474   :  { %v3436_v33 = vsub.f32 %v3418_v31, %v3435_v29  ;;  %v3437_v35 = vsub.f32 %v3419_v7, %v3435_v29  ;;  %v3438_v36 = vsub.f32 %v3420_v62, %v3435_v29  ;;  %v3439_v38 = vsub.f32 %v3421_v2, %v3435_v29 }
0x1476   :  { %v3440_v39 = vmul.f32 %v3436_v33, %v3436_v33  ;;  %v3441_v40 = vmul.f32 %v3437_v35, %v3437_v35  ;;  %v3442_v42 = vmul.f32 %v3438_v36, %v3438_v36  ;;  %v3443_v41 = vmul.f32 %v3439_v38, %v3439_v38 }
0x1478   :  { %v3444_v43 = vsel %vm700_vm0, %v3440_v39, 0.0  ;;  %v3445_v37 = vsel %vm700_vm0, %v3441_v40, 0.0  ;;  %v3447_v49 = vsel %vm700_vm0, %v3442_v42, 0.0  ;;  %v3449_v59 = vsel %vm700_vm0, %v3443_v41, 0.0  ;;  %v7544_v40 = vld [vmem:[#allocation9] ss:$0 sm:$0xff] }
0x1479   :  { %v3446_v48 = vadd.f32 %v3445_v37, %v3444_v43 }
0x147b   :  { %v3448_v51 = vadd.f32 %v3447_v49, %v3446_v48 }
0x147d   :  { %v3450_v0 = vadd.f32 %v3449_v59, %v3448_v51 }
0x147f   :  { %v3451_v50 = vrot.slane %v3450_v0, 4 }
0x1481   :  { %v3452_v54 = vadd.f32 %v3451_v50, %v3450_v0 }
0x1483   :  { %v3453_v34 = vrot.slane %v3452_v54, 2 }
0x1485   :  { %v3454_v46 = vadd.f32 %v3453_v34, %v3452_v54 }
0x1487   :  { %v3455_v57 = vrot.slane %v3454_v46, 1 }
0x1489   :  { %v3456_v52 = vadd.f32 %v3455_v57, %v3454_v46 }
0x148b   :  { %v3457_v30 = vmul.f32 0.03125, %v3456_v52 }
0x148d   :  { %v3458_v53 = vadd.f32 1e-05, %v3457_v30 }
0x148f   :  { %8654 = vrsqrt.f32 %v3458_v53 }
0x149c   :  { %v8655_v58 = vpop.eup %8654 }
0x149d   :  { %v3460_v4 = vmul.f32 %v8655_v58, %v3436_v33  ;;  %v3461_v1 = vmul.f32 %v8655_v58, %v3437_v35  ;;  %v3462_v10 = vmul.f32 %v8655_v58, %v3438_v36  ;;  %v3463_v55 = vmul.f32 %v8655_v58, %v3439_v38 }
0x149f   :  { %v3471_v63 = vmul.f32 %v7538_v60, %v3460_v4  ;;  %v3472_v6 = vmul.f32 %v7538_v60, %v3461_v1  ;;  %v3473_v31 = vmul.f32 %v7538_v60, %v3462_v10  ;;  %v3474_v7 = vmul.f32 %v7538_v60, %v3463_v55 }
0x14a1   :  { %v3482_v8 = vadd.f32 %v7539_v61, %v3471_v63  ;;  %v3483_v9 = vadd.f32 %v7539_v61, %v3472_v6  ;;  %v3484_v56 = vadd.f32 %v7539_v61, %v3473_v31  ;;  %v3485_v11 = vadd.f32 %v7539_v61, %v3474_v7 }
0x14a3   :  { %v3486_v13 = vsub.f32 0.0, %v3482_v8  ;;  %v3487_v14 = vsub.f32 0.0, %v3483_v9  ;;  %v3488_v47 = vsub.f32 0.0, %v3484_v56  ;;  %v3489_v15 = vsub.f32 0.0, %v3485_v11 }
0x14a5   :  { %v3490_v16 = vmul.f32 1.442695, %v3486_v13  ;;  %v3492_v17 = vmul.f32 1.442695, %v3487_v14  ;;  %v3494_v62 = vmul.f32 1.442695, %v3488_v47 }
0x14a6   :  { %v3496_v2 = vmul.f32 1.442695, %v3489_v15  ;;  %v3706_v13 = vld [vmem:[%s11237_s17 + $0x10] sm:$0xff]  ;;  %v3705_v14 = vld [vmem:[%s11237_s17 + $0x8] sm:$0xff]  ;;  %v3704_v47 = vld [vmem:[%s11237_s17] sm:$0xff] }
0x14a7   :  { %8656 = vpow2.f32 %v3490_v16 }
0x14a8   :  { %8658 = vpow2.f32 %v3492_v17 }
0x14a9   :  { %8660 = vpow2.f32 %v3494_v62 }
0x14aa   :  { %8662 = vpow2.f32 %v3496_v2 }
0x14b4   :  { %v8657_v18 = vpop.eup %8656 }
0x14b5   :  { %v8659_v20 = vpop.eup %8658  ;;  %v3498_v21 = vadd.f32 1.0, %v8657_v18 }
0x14b6   :  { %v8661_v23 = vpop.eup %8660  ;;  %v3499_v24 = vadd.f32 1.0, %v8659_v20 }
0x14b7   :  { %v8663_v12 = vpop.eup %8662  ;;  %8664 = vrcp.f32 %v3498_v21  ;;  %v3500_v25 = vadd.f32 1.0, %v8661_v23 }
0x14b8   :  { %8666 = vrcp.f32 %v3499_v24  ;;  %v3501_v26 = vadd.f32 1.0, %v8663_v12 }
0x14b9   :  { %8668 = vrcp.f32 %v3500_v25 }
0x14ba   :  { %8670 = vrcp.f32 %v3501_v26 }
0x14c4   :  { %v8665_v27 = vpop.eup %8664 }
0x14c5   :  { %v8667_v19 = vpop.eup %8666  ;;  %v3510_v28 = vmul.f32 %v8665_v27, %v3482_v8 }
0x14c6   :  { %v8669_v29 = vpop.eup %8668  ;;  %v3511_v33 = vmul.f32 %v8667_v19, %v3483_v9  ;;  %v7545_v19 = vld [vmem:[#allocation11] ss:$0 sm:$0xff] }
0x14c7   :  { %v8671_v35 = vpop.eup %8670  ;;  %8137 = vmatprep.mubr.msk.f32.mxu0 %vm700_vm0, %v3510_v28  ;;  %v3512_v36 = vmul.f32 %v8669_v29, %v3484_v56 }
0x14c8   :  { %8138 = vmatmul.mubr.msk.f32.vlgmr.msra.gmra.mxu0 %vm700_vm0, %v3511_v33  ;;  %v3513_v38 = vmul.f32 %v8671_v35, %v3485_v11  ;;  %v3707_v11 = vld [vmem:[%s11237_s17 + $0x18] sm:$0xff] }
0x14c9   :  { %8140 = vmatprep.mubr.msk.f32.mxu0 %vm700_vm0, %v3512_v36  ;;  %8143 = vmatprep.subr.mxu1 %v3707_v11  ;;  %v7546_v35 = vld [vmem:[#allocation12] ss:$0 sm:$0xff] }
0x14ca   :  { %8144 = vmatpush3.msra.mxu1 %v3707_v11 }
0x14cb   :  { %8145 = vmatprep.subr.mxu1 %v3706_v13 }
0x14cc   :  { %8141 = vmatmul.mubr.msk.f32.gmra.mxu0 %vm700_vm0, %v3513_v38  ;;  %8146 = vmatpush3.msra.mxu1 %v3706_v13 }
0x14cd   :  { %8147 = vmatprep.subr.mxu1 %v3705_v14 }
0x14ce   :  { %8148 = vmatpush3.msra.mxu1 %v3705_v14 }
0x14cf   :  { %8149 = vmatprep.subr.mxu1 %v3704_v47 }
0x14d0   :  { %8150 = vmatpush3.msra.mxu1 %v3704_v47 }
0x1588   :  { %v8139_v39 = vpop.f32.mrf.mxu0 }
0x1589   :  { %v3616_v42 = vadd.f32 %v8139_v39, %v10489_v44 }
0x158a   :  { %v3596_v41 = vpop.f32.mrf.mxu0 }
0x158b   :  { %v10585_v43 = vadd.f32 %v7544_v40, %v3616_v42  ;;  %v3615_v37 = vadd.f32 %v3596_v41, %v10492_v45 }
0x158c   :  { %v8142_v48 = vpop.f32.mrf.mxu0 }
0x158d   :  { %v10588_v49 = vadd.f32 %v7544_v40, %v3615_v37  ;;  %v3635_v51 = vsel %vm700_vm0, %v10585_v43, 0.0  ;;  %v3618_v0 = vadd.f32 %v8142_v48, %v10502_v3 }
0x158e   :  { %3636 = vadd.xlane.f32.xlu1 %v3635_v51  ;;  %v3606_v59 = vpop.f32.mrf.mxu0 }
0x158f   :  { %v3617_v50 = vadd.f32 %v3606_v59, %v10500_v5  ;;  %v3632_v44 = vsel %vm700_vm0, %v10588_v49, 0.0  ;;  %v10598_v34 = vadd.f32 %v7544_v40, %v3618_v0 }
0x1590   :  { %3633 = vadd.xlane.f32.xlu0 %v3632_v44  ;;  %v3846_v44 = vld [vmem:[%s11238_s9 + $0x30] sm:$0xff] }
0x1591   :  { %v10596_v54 = vadd.f32 %v7544_v40, %v3617_v50  ;;  %v3641_v46 = vsel %vm700_vm0, %v10598_v34, 0.0  ;;  %v3847_v50 = vld [vmem:[%s11238_s9 + $0x38] sm:$0xff] }
0x1592   :  { %8157 = vmatprep.subr.mxu0 %v3847_v50 }
0x1593   :  { %v3638_v45 = vsel %vm700_vm0, %v10596_v54, 0.0  ;;  %8158 = vmatpush3.msra.mxu0 %v3847_v50 }
0x1594   :  { %3639 = vadd.xlane.f32.xlu0 %v3638_v45  ;;  %8159 = vmatprep.subr.mxu0 %v3846_v44  ;;  %v3845_v45 = vld [vmem:[%s11238_s9 + $0x28] sm:$0xff] }
0x1595   :  { %8160 = vmatpush3.msra.mxu0 %v3846_v44 }
0x1596   :  { %8161 = vmatprep.subr.mxu0 %v3845_v45 }
0x1597   :  { %8162 = vmatpush3.msra.mxu0 %v3845_v45 }
0x1598   :  { %3642 = vadd.xlane.f32.xlu0 %v3641_v46  ;;  %v3844_v46 = vld [vmem:[%s11238_s9 + $0x20] sm:$0xff] }
0x1599   :  { %8163 = vmatprep.subr.mxu0 %v3844_v46 }
0x159a   :  { %8164 = vmatpush3.msra.mxu0 %v3844_v46 }
0x1617   :  { %v3637_v57 = vpop.xlane.xlu1 %3636 }
0x1618   :  { %v3645_v3 = vmul.f32 0.03125, %v3637_v57  ;;  %v3843_v57 = vld [vmem:[%s11238_s9 + $0x18] sm:$0xff] }
0x1619   :  { %v3634_v52 = vpop.xlane.xlu0 %3633  ;;  %8165 = vmatprep.subr.mxu0 %v3843_v57 }
0x161a   :  { %v3649_v5 = vsub.f32 %v10585_v43, %v3645_v3  ;;  %v3644_v30 = vmul.f32 0.03125, %v3634_v52  ;;  %8166 = vmatpush3.msra.mxu0 %v3843_v57  ;;  %v3842_v3 = vld [vmem:[%s11238_s9 + $0x10] sm:$0xff]  ;;  %v3841_v52 = vld [vmem:[%s11238_s9 + $0x8] sm:$0xff] }
0x161b   :  { %8167 = vmatprep.subr.mxu0 %v3842_v3 }
0x161c   :  { %v3648_v53 = vsub.f32 %v10588_v49, %v3644_v30  ;;  %v3653_v58 = vmul.f32 %v3649_v5, %v3649_v5  ;;  %8168 = vmatpush3.msra.mxu0 %v3842_v3  ;;  %v7547_v30 = vld [vmem:[#allocation14] ss:$0 sm:$0xff] }
0x161d   :  { %v3640_v60 = vpop.xlane.xlu0 %3639  ;;  %8169 = vmatprep.subr.mxu0 %v3841_v52 }
0x161e   :  { %v3646_v4 = vmul.f32 0.03125, %v3640_v60  ;;  %v3659_v1 = vsel %vm700_vm0, %v3653_v58, 0.0  ;;  %v3652_v10 = vmul.f32 %v3648_v53, %v3648_v53  ;;  %8170 = vmatpush3.msra.mxu0 %v3841_v52 }
0x161f   :  { %3660 = vadd.xlane.f32.xlu1 %v3659_v1 }
0x1620   :  { %v3650_v55 = vsub.f32 %v10596_v54, %v3646_v4  ;;  %v3656_v61 = vsel %vm700_vm0, %v3652_v10, 0.0 }
0x1621   :  { %3657 = vadd.xlane.f32.xlu0 %v3656_v61  ;;  %v3643_v63 = vpop.xlane.xlu0 %3642 }
0x1622   :  { %v3647_v6 = vmul.f32 0.03125, %v3643_v63  ;;  %v3654_v31 = vmul.f32 %v3650_v55, %v3650_v55 }
0x1624   :  { %v3651_v7 = vsub.f32 %v10598_v34, %v3647_v6  ;;  %v3662_v8 = vsel %vm700_vm0, %v3654_v31, 0.0 }
0x1625   :  { %3663 = vadd.xlane.f32.xlu0 %v3662_v8 }
0x1626   :  { %v3655_v9 = vmul.f32 %v3651_v7, %v3651_v7 }
0x1628   :  { %v3665_v56 = vsel %vm700_vm0, %v3655_v9, 0.0 }
0x1629   :  { %3666 = vadd.xlane.f32.xlu1 %v3665_v56 }
0x16a8   :  { %v3661_v15 = vpop.xlane.xlu1 %3660 }
0x16a9   :  { %v3669_v16 = vmul.f32 0.03125, %v3661_v15 }
0x16aa   :  { %v3658_v17 = vpop.xlane.xlu0 %3657 }
0x16ab   :  { %v3673_v62 = vadd.f32 1e-05, %v3669_v16  ;;  %v3668_v2 = vmul.f32 0.03125, %v3658_v17 }
0x16ad   :  { %8672 = vrsqrt.f32 %v3673_v62  ;;  %v3672_v18 = vadd.f32 1e-05, %v3668_v2 }
0x16ae   :  { %v3664_v20 = vpop.xlane.xlu0 %3663 }
0x16af   :  { %8674 = vrsqrt.f32 %v3672_v18  ;;  %v3670_v21 = vmul.f32 0.03125, %v3664_v20 }
0x16b1   :  { %v3674_v23 = vadd.f32 1e-05, %v3670_v21 }
0x16b2   :  { %v3667_v24 = vpop.xlane.xlu1 %3666 }
0x16b3   :  { %8676 = vrsqrt.f32 %v3674_v23  ;;  %v3671_v12 = vmul.f32 0.03125, %v3667_v24 }
0x16b5   :  { %v3675_v25 = vadd.f32 1e-05, %v3671_v12 }
0x16b7   :  { %8678 = vrsqrt.f32 %v3675_v25 }
0x16ba   :  { %v8673_v26 = vpop.eup %8672 }
0x16bb   :  { %v3681_v27 = vmul.f32 %v8673_v26, %v3649_v5  ;;  %v3840_v5 = vld [vmem:[%s11238_s9] sm:$0xff] }
0x16bc   :  { %v8675_v28 = vpop.eup %8674  ;;  %8171 = vmatprep.subr.mxu0 %v3840_v5 }
0x16bd   :  { %v3680_v29 = vmul.f32 %v8675_v28, %v3648_v53  ;;  %v3691_v33 = vmul.f32 %v7545_v19, %v3681_v27  ;;  %8172 = vmatpush3.msra.mxu0 %v3840_v5  ;;  %v7552_v27 = vld [vmem:[#allocation15] ss:$0 sm:$0xff] }
0x16bf   :  { %v3690_v36 = vmul.f32 %v7545_v19, %v3680_v29  ;;  %v3701_v42 = vadd.f32 %v7546_v35, %v3691_v33 }
0x16c0   :  { %v8677_v38 = vpop.eup %8676 }
0x16c1   :  { %v3700_v39 = vadd.f32 %v7546_v35, %v3690_v36  ;;  %v3682_v40 = vmul.f32 %v8677_v38, %v3650_v55 }
0x16c3   :  { %8151 = vmatprep.mubr.msk.f32.mxu1 %vm700_vm0, %v3700_v39  ;;  %v3692_v41 = vmul.f32 %v7545_v19, %v3682_v40 }
0x16c4   :  { %v8679_v37 = vpop.eup %8678  ;;  %8152 = vmatmul.mubr.msk.f32.vlgmr.msra.gmra.mxu1 %vm700_vm0, %v3701_v42 }
0x16c5   :  { %v3702_v48 = vadd.f32 %v7546_v35, %v3692_v41  ;;  %v3683_v51 = vmul.f32 %v8679_v37, %v3651_v7 }
0x16c7   :  { %8154 = vmatprep.mubr.msk.f32.mxu1 %vm700_vm0, %v3702_v48  ;;  %v3693_v59 = vmul.f32 %v7545_v19, %v3683_v51 }
0x16c9   :  { %v3703_v0 = vadd.f32 %v7546_v35, %v3693_v59 }
0x16cb   :  { %8155 = vmatmul.mubr.msk.f32.gmra.mxu1 %vm700_vm0, %v3703_v0 }
0x1784   :  { %v8153_v53 = vpop.f32.mrf.mxu1 }
0x1785   :  { %v3799_v58 = vadd.f32 %v8153_v53, %v7547_v30 }
0x1786   :  { %v3793_v60 = vpop.f32.mrf.mxu1 }
0x1787   :  { %v3813_v4 = vsub.f32 0.0, %v3799_v58  ;;  %v3794_v1 = vadd.f32 %v7547_v30, %v3793_v60 }
0x1789   :  { %v3818_v10 = vmul.f32 1.442695, %v3813_v4  ;;  %v3812_v55 = vsub.f32 0.0, %v3794_v1 }
0x178b   :  { %8680 = vpow2.f32 %v3818_v10  ;;  %v3816_v61 = vmul.f32 1.442695, %v3812_v55  ;;  %v8156_v63 = vpop.f32.mrf.mxu1 }
0x178c   :  { %v3809_v6 = vadd.f32 %v8156_v63, %v7547_v30 }
0x178d   :  { %8682 = vpow2.f32 %v3816_v61  ;;  %v3803_v31 = vpop.f32.mrf.mxu1 }
0x178e   :  { %v3815_v7 = vsub.f32 0.0, %v3809_v6  ;;  %v3804_v8 = vadd.f32 %v7547_v30, %v3803_v31 }
0x1790   :  { %v3822_v9 = vmul.f32 1.442695, %v3815_v7  ;;  %v3814_v56 = vsub.f32 0.0, %v3804_v8 }
0x1792   :  { %8684 = vpow2.f32 %v3822_v9  ;;  %v3820_v11 = vmul.f32 1.442695, %v3814_v56 }
0x1794   :  { %8686 = vpow2.f32 %v3820_v11 }
0x1798   :  { %v8681_v13 = vpop.eup %8680 }
0x1799   :  { %v3825_v14 = vadd.f32 1.0, %v8681_v13 }
0x179a   :  { %v8683_v47 = vpop.eup %8682 }
0x179b   :  { %v3824_v15 = vadd.f32 1.0, %v8683_v47  ;;  %8688 = vrcp.f32 %v3825_v14 }
0x179d   :  { %8690 = vrcp.f32 %v3824_v15 }
0x179f   :  { %v8685_v16 = vpop.eup %8684 }
0x17a0   :  { %v3827_v17 = vadd.f32 1.0, %v8685_v16 }
0x17a1   :  { %v8687_v62 = vpop.eup %8686 }
0x17a2   :  { %v3826_v2 = vadd.f32 1.0, %v8687_v62  ;;  %8692 = vrcp.f32 %v3827_v17 }
0x17a4   :  { %8694 = vrcp.f32 %v3826_v2 }
0x17a8   :  { %v8689_v18 = vpop.eup %8688 }
0x17a9   :  { %v3837_v23 = vmul.f32 %v8689_v18, %v3799_v58  ;;  %v7557_v18 = vld [vmem:[#allocation17] ss:$0 sm:$0xff] }
0x17aa   :  { %v8691_v20 = vpop.eup %8690 }
0x17ab   :  { %v3836_v21 = vmul.f32 %v8691_v20, %v3794_v1 }
0x17ad   :  { %8173 = vmatprep.mubr.msk.f32.mxu0 %vm925_vm1, %v3836_v21 }
0x17ae   :  { %8174 = vmatmul.mubr.msk.f32.vlgmr.msra.gmra.mxu0 %vm925_vm1, %v3837_v23  ;;  %v7558_v23 = vld [vmem:[#allocation18] ss:$0 sm:$0xff] }
0x17af   :  { %v8693_v24 = vpop.eup %8692 }
0x17b0   :  { %v3839_v26 = vmul.f32 %v8693_v24, %v3809_v6 }
0x17b1   :  { %v8695_v12 = vpop.eup %8694 }
0x17b2   :  { %v3838_v25 = vmul.f32 %v8695_v12, %v3804_v8 }
0x17b4   :  { %8176 = vmatprep.mubr.msk.f32.mxu0 %vm925_vm1, %v3838_v25 }
0x17b5   :  { %8177 = vmatmul.mubr.msk.f32.gmra.mxu0 %vm925_vm1, %v3839_v26 }
0x186e   :  { %v8175_v19 = vpop.f32.mrf.mxu0 }
0x186f   :  { %v3939_v28 = vadd.f32 %v8175_v19, %v7552_v27 }
0x1870   :  { %v3933_v29 = vpop.f32.mrf.mxu0 }
0x1871   :  { %v3953_v33 = vmul.f32 0.5, %v3939_v28  ;;  %v3934_v35 = vadd.f32 %v7552_v27, %v3933_v29 }
0x1873   :  { %v3957_v36 = vadd.f32 %v3953_v33, %v10585_v43  ;;  %v3952_v38 = vmul.f32 0.5, %v3934_v35 }
0x1875   :  { %v3956_v39 = vadd.f32 %v3952_v38, %v10588_v49  ;;  %v8178_v40 = vpop.f32.mrf.mxu0  ;;  %v3965_v42 = vsel %vm700_vm0, %v3957_v36, 0.0 }
0x1876   :  { %v3949_v41 = vadd.f32 %v8178_v40, %v7552_v27  ;;  %3966 = vadd.xlane.f32.xlu1 %v3965_v42 }
0x1877   :  { %v3943_v37 = vpop.f32.mrf.mxu0  ;;  %v3962_v48 = vsel %vm700_vm0, %v3956_v39, 0.0 }
0x1878   :  { %v3955_v51 = vmul.f32 0.5, %v3949_v41  ;;  %v3944_v59 = vadd.f32 %v7552_v27, %v3943_v37  ;;  %3963 = vadd.xlane.f32.xlu0 %v3962_v48 }
0x187a   :  { %v3959_v0 = vadd.f32 %v3955_v51, %v10598_v34  ;;  %v3954_v50 = vmul.f32 0.5, %v3944_v59 }
0x187c   :  { %v3958_v44 = vadd.f32 %v3954_v50, %v10596_v54  ;;  %v3971_v43 = vsel %vm700_vm0, %v3959_v0, 0.0 }
0x187d   :  { %3972 = vadd.xlane.f32.xlu1 %v3971_v43 }
0x187e   :  { %v3968_v49 = vsel %vm700_vm0, %v3958_v44, 0.0 }
0x187f   :  { %3969 = vadd.xlane.f32.xlu0 %v3968_v49 }
0x18ff   :  { %v3967_v45 = vpop.xlane.xlu1 %3966 }
0x1900   :  { %v3975_v46 = vmul.f32 0.03125, %v3967_v45 }
0x1901   :  { %v3964_v57 = vpop.xlane.xlu0 %3963 }
0x1902   :  { %v3979_v3 = vsub.f32 %v3957_v36, %v3975_v46  ;;  %v3974_v52 = vmul.f32 0.03125, %v3964_v57 }
0x1904   :  { %v3978_v5 = vsub.f32 %v3956_v39, %v3974_v52  ;;  %v3983_v30 = vmul.f32 %v3979_v3, %v3979_v3 }
0x1906   :  { %v3973_v53 = vpop.xlane.xlu1 %3972  ;;  %v3989_v58 = vsel %vm700_vm0, %v3983_v30, 0.0  ;;  %v3982_v34 = vmul.f32 %v3978_v5, %v3978_v5 }
0x1907   :  { %v3977_v60 = vmul.f32 0.03125, %v3973_v53  ;;  %3990 = vadd.xlane.f32.xlu1 %v3989_v58 }
0x1908   :  { %v3970_v54 = vpop.xlane.xlu0 %3969  ;;  %v3986_v4 = vsel %vm700_vm0, %v3982_v34, 0.0 }
0x1909   :  { %v3981_v1 = vsub.f32 %v3959_v0, %v3977_v60  ;;  %v3976_v10 = vmul.f32 0.03125, %v3970_v54  ;;  %3987 = vadd.xlane.f32.xlu0 %v3986_v4  ;;  %v4111_v4 = vld [vmem:[%s11239_s0 + $0x18] sm:$0xff] }
0x190a   :  { %8179 = vmatprep.subr.mxu1 %v4111_v4 }
0x190b   :  { %v3980_v55 = vsub.f32 %v3958_v44, %v3976_v10  ;;  %v3985_v61 = vmul.f32 %v3981_v1, %v3981_v1  ;;  %8180 = vmatpush3.msra.mxu1 %v4111_v4  ;;  %v4109_v10 = vld [vmem:[%s11239_s0 + $0x8] sm:$0xff] }
0x190d   :  { %v3995_v63 = vsel %vm700_vm0, %v3985_v61, 0.0  ;;  %v3984_v6 = vmul.f32 %v3980_v55, %v3980_v55 }
0x190e   :  { %3996 = vadd.xlane.f32.xlu1 %v3995_v63 }
0x190f   :  { %v3992_v31 = vsel %vm700_vm0, %v3984_v6, 0.0 }
0x1910   :  { %3993 = vadd.xlane.f32.xlu0 %v3992_v31 }
0x1990   :  { %v3991_v7 = vpop.xlane.xlu1 %3990 }
0x1991   :  { %v3999_v8 = vmul.f32 0.03125, %v3991_v7 }
0x1992   :  { %v3988_v9 = vpop.xlane.xlu0 %3987 }
0x1993   :  { %v4003_v56 = vadd.f32 1e-05, %v3999_v8  ;;  %v3998_v11 = vmul.f32 0.03125, %v3988_v9 }
0x1995   :  { %8696 = vrsqrt.f32 %v4003_v56  ;;  %v4002_v13 = vadd.f32 1e-05, %v3998_v11 }
0x1997   :  { %8698 = vrsqrt.f32 %v4002_v13  ;;  %v3997_v14 = vpop.xlane.xlu1 %3996 }
0x1998   :  { %v4001_v47 = vmul.f32 0.03125, %v3997_v14 }
0x1999   :  { %v3994_v15 = vpop.xlane.xlu0 %3993 }
0x199a   :  { %v4005_v16 = vadd.f32 1e-05, %v4001_v47  ;;  %v4000_v17 = vmul.f32 0.03125, %v3994_v15 }
0x199c   :  { %8700 = vrsqrt.f32 %v4005_v16  ;;  %v4004_v62 = vadd.f32 1e-05, %v4000_v17  ;;  %v7559_v17 = vld [vmem:[#allocation20] ss:$0 sm:$0xff] }
0x199e   :  { %8702 = vrsqrt.f32 %v4004_v62 }
0x19a2   :  { %v8697_v2 = vpop.eup %8696 }
0x19a3   :  { %v4011_v20 = vmul.f32 %v8697_v2, %v3979_v3 }
0x19a4   :  { %v8699_v21 = vpop.eup %8698 }
0x19a5   :  { %v4021_v24 = vmul.f32 %v7557_v18, %v4011_v20  ;;  %v4010_v12 = vmul.f32 %v8699_v21, %v3978_v5  ;;  %v7560_v20 = vld [vmem:[#allocation21] ss:$0 sm:$0xff] }
0x19a7   :  { %v10644_v25 = vadd.f32 %v7558_v23, %v4021_v24  ;;  %v4020_v26 = vmul.f32 %v7557_v18, %v4010_v12 }
0x19a9   :  { %v8701_v27 = vpop.eup %8700  ;;  %v4039_v19 = vsel %vm700_vm0, %v10644_v25, 0.0  ;;  %v10648_v28 = vadd.f32 %v7558_v23, %v4020_v26 }
0x19aa   :  { %4040 = vadd.xlane.f32.xlu1 %v4039_v19  ;;  %v4013_v29 = vmul.f32 %v8701_v27, %v3981_v1  ;;  %v4110_v1 = vld [vmem:[%s11239_s0 + $0x10] sm:$0xff] }
0x19ab   :  { %v8703_v33 = vpop.eup %8702  ;;  %v4036_v35 = vsel %vm700_vm0, %v10648_v28, 0.0  ;;  %8181 = vmatprep.subr.mxu1 %v4110_v1 }
0x19ac   :  { %4037 = vadd.xlane.f32.xlu0 %v4036_v35  ;;  %v4023_v36 = vmul.f32 %v7557_v18, %v4013_v29  ;;  %v4012_v38 = vmul.f32 %v8703_v33, %v3980_v55  ;;  %8182 = vmatpush3.msra.mxu1 %v4110_v1  ;;  %v4108_v55 = vld [vmem:[%s11239_s0] sm:$0xff] }
0x19ad   :  { %8183 = vmatprep.subr.mxu1 %v4109_v10 }
0x19ae   :  { %v10652_v39 = vadd.f32 %v7558_v23, %v4023_v36  ;;  %v4022_v40 = vmul.f32 %v7557_v18, %v4012_v38  ;;  %8184 = vmatpush3.msra.mxu1 %v4109_v10  ;;  %v4251_v38 = vld [vmem:[%s11240_s12 + $0x38] sm:$0xff] }
0x19af   :  { %8185 = vmatprep.subr.mxu1 %v4108_v55 }
0x19b0   :  { %v4045_v42 = vsel %vm700_vm0, %v10652_v39, 0.0  ;;  %v10656_v41 = vadd.f32 %v7558_v23, %v4022_v40  ;;  %8186 = vmatpush3.msra.mxu1 %v4108_v55  ;;  %v4250_v40 = vld [vmem:[%s11240_s12 + $0x30] sm:$0xff] }
0x19b1   :  { %4046 = vadd.xlane.f32.xlu1 %v4045_v42  ;;  %8193 = vmatprep.subr.mxu1 %v4251_v38  ;;  %v4249_v42 = vld [vmem:[%s11240_s12 + $0x28] sm:$0xff] }
0x19b2   :  { %v4042_v37 = vsel %vm700_vm0, %v10656_v41, 0.0 }
0x19b3   :  { %4043 = vadd.xlane.f32.xlu0 %v4042_v37  ;;  %v4248_v37 = vld [vmem:[%s11240_s12 + $0x20] sm:$0xff] }
0x1a33   :  { %v4041_v48 = vpop.xlane.xlu1 %4040 }
0x1a34   :  { %v4049_v51 = vmul.f32 0.03125, %v4041_v48  ;;  %v4247_v48 = vld [vmem:[%s11240_s12 + $0x18] sm:$0xff] }
0x1a35   :  { %v4038_v59 = vpop.xlane.xlu0 %4037 }
0x1a36   :  { %v4053_v0 = vsub.f32 %v10644_v25, %v4049_v51  ;;  %v4048_v50 = vmul.f32 0.03125, %v4038_v59  ;;  %v4246_v51 = vld [vmem:[%s11240_s12 + $0x10] sm:$0xff]  ;;  %v4245_v59 = vld [vmem:[%s11240_s12 + $0x8] sm:$0xff] }
0x1a38   :  { %v4052_v44 = vsub.f32 %v10648_v28, %v4048_v50  ;;  %v4057_v43 = vmul.f32 %v4053_v0, %v4053_v0  ;;  %v7561_v50 = vld [vmem:[#allocation23] ss:$0 sm:$0xff] }
0x1a3a   :  { %v4047_v49 = vpop.xlane.xlu1 %4046  ;;  %v4063_v45 = vsel %vm700_vm0, %v4057_v43, 0.0  ;;  %v4056_v46 = vmul.f32 %v4052_v44, %v4052_v44 }
0x1a3b   :  { %v4051_v57 = vmul.f32 0.03125, %v4047_v49  ;;  %4064 = vadd.xlane.f32.xlu1 %v4063_v45 }
0x1a3c   :  { %v4044_v3 = vpop.xlane.xlu0 %4043  ;;  %v4060_v52 = vsel %vm700_vm0, %v4056_v46, 0.0 }
0x1a3d   :  { %v4055_v5 = vsub.f32 %v10652_v39, %v4051_v57  ;;  %v4050_v30 = vmul.f32 0.03125, %v4044_v3  ;;  %4061 = vadd.xlane.f32.xlu0 %v4060_v52 }
0x1a3f   :  { %v4054_v53 = vsub.f32 %v10656_v41, %v4050_v30  ;;  %v4059_v58 = vmul.f32 %v4055_v5, %v4055_v5 }
0x1a41   :  { %v4069_v34 = vsel %vm700_vm0, %v4059_v58, 0.0  ;;  %v4058_v60 = vmul.f32 %v4054_v53, %v4054_v53 }
0x1a42   :  { %4070 = vadd.xlane.f32.xlu1 %v4069_v34 }
0x1a43   :  { %v4066_v54 = vsel %vm700_vm0, %v4058_v60, 0.0 }
0x1a44   :  { %4067 = vadd.xlane.f32.xlu0 %v4066_v54 }
0x1ac4   :  { %v4065_v61 = vpop.xlane.xlu1 %4064 }
0x1ac5   :  { %v4073_v63 = vmul.f32 0.03125, %v4065_v61 }
0x1ac6   :  { %v4062_v6 = vpop.xlane.xlu0 %4061 }
0x1ac7   :  { %v4077_v31 = vadd.f32 1e-05, %v4073_v63  ;;  %v4072_v7 = vmul.f32 0.03125, %v4062_v6 }
0x1ac9   :  { %8704 = vrsqrt.f32 %v4077_v31  ;;  %v4076_v8 = vadd.f32 1e-05, %v4072_v7 }
0x1acb   :  { %8706 = vrsqrt.f32 %v4076_v8  ;;  %v4071_v9 = vpop.xlane.xlu1 %4070 }
0x1acc   :  { %v4075_v56 = vmul.f32 0.03125, %v4071_v9 }
0x1acd   :  { %v4068_v11 = vpop.xlane.xlu0 %4067 }
0x1ace   :  { %v4079_v13 = vadd.f32 1e-05, %v4075_v56  ;;  %v4074_v14 = vmul.f32 0.03125, %v4068_v11 }
0x1ad0   :  { %8708 = vrsqrt.f32 %v4079_v13  ;;  %v4078_v47 = vadd.f32 1e-05, %v4074_v14 }
0x1ad2   :  { %8710 = vrsqrt.f32 %v4078_v47 }
0x1ad6   :  { %v8705_v15 = vpop.eup %8704 }
0x1ad7   :  { %v4085_v16 = vmul.f32 %v8705_v15, %v4053_v0  ;;  %v4244_v0 = vld [vmem:[%s11240_s12] sm:$0xff] }
0x1ad8   :  { %v8707_v62 = vpop.eup %8706 }
0x1ad9   :  { %v4084_v2 = vmul.f32 %v8707_v62, %v4052_v44  ;;  %v4095_v18 = vmul.f32 %v7559_v17, %v4085_v16  ;;  %v7566_v16 = vld [vmem:[#allocation24] ss:$0 sm:$0xff] }
0x1adb   :  { %v4094_v21 = vmul.f32 %v7559_v17, %v4084_v2  ;;  %v4105_v12 = vadd.f32 %v7560_v20, %v4095_v18 }
0x1add   :  { %v8709_v23 = vpop.eup %8708  ;;  %v4104_v24 = vadd.f32 %v7560_v20, %v4094_v21 }
0x1ade   :  { %v4087_v26 = vmul.f32 %v8709_v23, %v4055_v5 }
0x1adf   :  { %v8711_v27 = vpop.eup %8710  ;;  %8187 = vmatprep.mubr.msk.f32.mxu1 %vm700_vm0, %v4104_v24 }
0x1ae0   :  { %8188 = vmatmul.mubr.msk.f32.vlgmr.msra.gmra.mxu1 %vm700_vm0, %v4105_v12  ;;  %v4086_v19 = vmul.f32 %v8711_v27, %v4054_v53  ;;  %v4097_v29 = vmul.f32 %v7559_v17, %v4087_v26 }
0x1ae1   :  { %8194 = vmatpush3.msra.mxu1 %v4251_v38 }
0x1ae2   :  { %v4096_v33 = vmul.f32 %v7559_v17, %v4086_v19  ;;  %v4107_v36 = vadd.f32 %v7560_v20, %v4097_v29  ;;  %8195 = vmatprep.subr.mxu1 %v4250_v40 }
0x1ae3   :  { %8196 = vmatpush3.msra.mxu1 %v4250_v40 }
0x1ae4   :  { %v4106_v35 = vadd.f32 %v7560_v20, %v4096_v33  ;;  %8197 = vmatprep.subr.mxu1 %v4249_v42 }
0x1ae5   :  { %8198 = vmatpush3.msra.mxu1 %v4249_v42 }
0x1ae6   :  { %8190 = vmatprep.mubr.msk.f32.mxu1 %vm700_vm0, %v4106_v35  ;;  %8199 = vmatprep.subr.mxu1 %v4248_v37 }
0x1ae7   :  { %8191 = vmatmul.mubr.msk.f32.gmra.mxu1 %vm700_vm0, %v4107_v36 }
0x1ae8   :  { %8200 = vmatpush3.msra.mxu1 %v4248_v37 }
0x1ae9   :  { %8201 = vmatprep.subr.mxu1 %v4247_v48 }
0x1aea   :  { %8202 = vmatpush3.msra.mxu1 %v4247_v48 }
0x1aeb   :  { %8203 = vmatprep.subr.mxu1 %v4246_v51 }
0x1aec   :  { %8204 = vmatpush3.msra.mxu1 %v4246_v51 }
0x1aed   :  { %8205 = vmatprep.subr.mxu1 %v4245_v59 }
0x1aee   :  { %8206 = vmatpush3.msra.mxu1 %v4245_v59 }
0x1aef   :  { %8207 = vmatprep.subr.mxu1 %v4244_v0 }
0x1af0   :  { %8208 = vmatpush3.msra.mxu1 %v4244_v0 }
0x1ba0   :  { %v8189_v44 = vpop.f32.mrf.mxu1 }
0x1ba1   :  { %v4203_v43 = vadd.f32 %v8189_v44, %v7561_v50 }
0x1ba2   :  { %v4197_v49 = vpop.f32.mrf.mxu1 }
0x1ba3   :  { %v4217_v45 = vsub.f32 0.0, %v4203_v43  ;;  %v4198_v46 = vadd.f32 %v7561_v50, %v4197_v49 }
0x1ba5   :  { %v4222_v57 = vmul.f32 1.442695, %v4217_v45  ;;  %v4216_v3 = vsub.f32 0.0, %v4198_v46 }
0x1ba7   :  { %8712 = vpow2.f32 %v4222_v57  ;;  %v4220_v52 = vmul.f32 1.442695, %v4216_v3  ;;  %v8192_v5 = vpop.f32.mrf.mxu1 }
0x1ba8   :  { %v4213_v30 = vadd.f32 %v8192_v5, %v7561_v50 }
0x1ba9   :  { %8714 = vpow2.f32 %v4220_v52  ;;  %v4207_v53 = vpop.f32.mrf.mxu1 }
0x1baa   :  { %v4219_v58 = vsub.f32 0.0, %v4213_v30  ;;  %v4208_v34 = vadd.f32 %v7561_v50, %v4207_v53 }
0x1bac   :  { %v4226_v60 = vmul.f32 1.442695, %v4219_v58  ;;  %v4218_v54 = vsub.f32 0.0, %v4208_v34  ;;  %v4441_v58 = vld [vmem:[%s11241_s3 + $0x18] sm:$0xff] }
0x1bad   :  { %8215 = vmatprep.subr.mxu0 %v4441_v58 }
0x1bae   :  { %8716 = vpow2.f32 %v4226_v60  ;;  %v4224_v4 = vmul.f32 1.442695, %v4218_v54  ;;  %8216 = vmatpush3.msra.mxu0 %v4441_v58  ;;  %v4439_v60 = vld [vmem:[%s11241_s3 + $0x8] sm:$0xff]  ;;  %v4438_v54 = vld [vmem:[%s11241_s3] sm:$0xff] }
0x1bb0   :  { %8718 = vpow2.f32 %v4224_v4 }
0x1bb4   :  { %v8713_v1 = vpop.eup %8712 }
0x1bb5   :  { %v4229_v10 = vadd.f32 1.0, %v8713_v1 }
0x1bb6   :  { %v8715_v55 = vpop.eup %8714 }
0x1bb7   :  { %v4228_v61 = vadd.f32 1.0, %v8715_v55  ;;  %8720 = vrcp.f32 %v4229_v10 }
0x1bb9   :  { %8722 = vrcp.f32 %v4228_v61 }
0x1bbb   :  { %v8717_v63 = vpop.eup %8716 }
0x1bbc   :  { %v4231_v6 = vadd.f32 1.0, %v8717_v63 }
0x1bbd   :  { %v8719_v31 = vpop.eup %8718 }
0x1bbe   :  { %v4230_v7 = vadd.f32 1.0, %v8719_v31  ;;  %8724 = vrcp.f32 %v4231_v6 }
0x1bc0   :  { %8726 = vrcp.f32 %v4230_v7 }
0x1bc4   :  { %v8721_v8 = vpop.eup %8720 }
0x1bc5   :  { %v4241_v11 = vmul.f32 %v8721_v8, %v4203_v43 }
0x1bc6   :  { %v8723_v9 = vpop.eup %8722 }
0x1bc7   :  { %v4240_v56 = vmul.f32 %v8723_v9, %v4198_v46 }
0x1bc9   :  { %8209 = vmatprep.mubr.msk.f32.mxu1 %vm925_vm1, %v4240_v56 }
0x1bca   :  { %8210 = vmatmul.mubr.msk.f32.vlgmr.msra.gmra.mxu1 %vm925_vm1, %v4241_v11 }
0x1bcb   :  { %v8725_v13 = vpop.eup %8724 }
0x1bcc   :  { %v4243_v15 = vmul.f32 %v8725_v13, %v4213_v30 }
0x1bcd   :  { %v8727_v14 = vpop.eup %8726 }
0x1bce   :  { %v4242_v47 = vmul.f32 %v8727_v14, %v4208_v34  ;;  %v4440_v34 = vld [vmem:[%s11241_s3 + $0x10] sm:$0xff]  ;;  %v7571_v14 = vld [vmem:[#allocation26] ss:$0 sm:$0xff] }
0x1bcf   :  { %8217 = vmatprep.subr.mxu0 %v4440_v34 }
0x1bd0   :  { %8212 = vmatprep.mubr.msk.f32.mxu1 %vm925_vm1, %v4242_v47  ;;  %8218 = vmatpush3.msra.mxu0 %v4440_v34 }
0x1bd1   :  { %8213 = vmatmul.mubr.msk.f32.gmra.mxu1 %vm925_vm1, %v4243_v15  ;;  %8219 = vmatprep.subr.mxu0 %v4439_v60 }
0x1bd2   :  { %8220 = vmatpush3.msra.mxu0 %v4439_v60 }
0x1bd3   :  { %8221 = vmatprep.subr.mxu0 %v4438_v54 }
0x1bd4   :  { %8222 = vmatpush3.msra.mxu0 %v4438_v54 }
0x1c8a   :  { %v8211_v17 = vpop.f32.mrf.mxu1 }
0x1c8b   :  { %v4343_v62 = vadd.f32 %v8211_v17, %v7566_v16  ;;  %v7572_v17 = vld [vmem:[#allocation27] ss:$0 sm:$0xff] }
0x1c8c   :  { %v4337_v2 = vpop.f32.mrf.mxu1 }
0x1c8d   :  { %v4357_v18 = vmul.f32 0.5, %v4343_v62  ;;  %v4338_v20 = vadd.f32 %v7566_v16, %v4337_v2 }
0x1c8f   :  { %v10689_v21 = vadd.f32 %v4357_v18, %v10644_v25  ;;  %v4356_v23 = vmul.f32 0.5, %v4338_v20 }
0x1c91   :  { %v10692_v24 = vadd.f32 %v4356_v23, %v10648_v28  ;;  %v8214_v12 = vpop.f32.mrf.mxu1  ;;  %v4369_v26 = vsel %vm700_vm0, %v10689_v21, 0.0 }
0x1c92   :  { %v4353_v27 = vadd.f32 %v8214_v12, %v7566_v16  ;;  %4370 = vadd.xlane.f32.xlu1 %v4369_v26 }
0x1c93   :  { %v4347_v19 = vpop.f32.mrf.mxu1  ;;  %v4366_v29 = vsel %vm700_vm0, %v10692_v24, 0.0 }
0x1c94   :  { %v4359_v33 = vmul.f32 0.5, %v4353_v27  ;;  %v4348_v35 = vadd.f32 %v7566_v16, %v4347_v19  ;;  %4367 = vadd.xlane.f32.xlu0 %v4366_v29 }
0x1c96   :  { %v10699_v25 = vadd.f32 %v4359_v33, %v10652_v39  ;;  %v4358_v36 = vmul.f32 0.5, %v4348_v35  ;;  %v7573_v35 = vld [vmem:[#allocation29] ss:$0 sm:$0xff] }
0x1c98   :  { %v10702_v28 = vadd.f32 %v4358_v36, %v10656_v41  ;;  %v4375_v38 = vsel %vm700_vm0, %v10699_v25, 0.0 }
0x1c99   :  { %4376 = vadd.xlane.f32.xlu1 %v4375_v38 }
0x1c9a   :  { %v4372_v40 = vsel %vm700_vm0, %v10702_v28, 0.0 }
0x1c9b   :  { %4373 = vadd.xlane.f32.xlu0 %v4372_v40 }
0x1d1b   :  { %v4371_v42 = vpop.xlane.xlu1 %4370 }
0x1d1c   :  { %v4379_v37 = vmul.f32 0.03125, %v4371_v42 }
0x1d1d   :  { %v4368_v48 = vpop.xlane.xlu0 %4367 }
0x1d1e   :  { %v4383_v51 = vsub.f32 %v10689_v21, %v4379_v37  ;;  %v4378_v59 = vmul.f32 0.03125, %v4368_v48 }
0x1d20   :  { %v4382_v39 = vsub.f32 %v10692_v24, %v4378_v59  ;;  %v4387_v0 = vmul.f32 %v4383_v51, %v4383_v51 }
0x1d22   :  { %v4377_v50 = vpop.xlane.xlu1 %4376  ;;  %v4393_v41 = vsel %vm700_vm0, %v4387_v0, 0.0  ;;  %v4386_v44 = vmul.f32 %v4382_v39, %v4382_v39 }
0x1d23   :  { %v4381_v43 = vmul.f32 0.03125, %v4377_v50  ;;  %4394 = vadd.xlane.f32.xlu1 %v4393_v41 }
0x1d24   :  { %v4374_v49 = vpop.xlane.xlu0 %4373  ;;  %v4390_v45 = vsel %vm700_vm0, %v4386_v44, 0.0 }
0x1d25   :  { %v4385_v46 = vsub.f32 %v10699_v25, %v4381_v43  ;;  %v4380_v57 = vmul.f32 0.03125, %v4374_v49  ;;  %4391 = vadd.xlane.f32.xlu0 %v4390_v45 }
0x1d27   :  { %v4384_v3 = vsub.f32 %v10702_v28, %v4380_v57  ;;  %v4389_v52 = vmul.f32 %v4385_v46, %v4385_v46 }
0x1d29   :  { %v4399_v5 = vsel %vm700_vm0, %v4389_v52, 0.0  ;;  %v4388_v30 = vmul.f32 %v4384_v3, %v4384_v3 }
0x1d2a   :  { %4400 = vadd.xlane.f32.xlu1 %v4399_v5 }
0x1d2b   :  { %v4396_v53 = vsel %vm700_vm0, %v4388_v30, 0.0 }
0x1d2c   :  { %4397 = vadd.xlane.f32.xlu0 %v4396_v53 }
0x1dac   :  { %v4395_v4 = vpop.xlane.xlu1 %4394 }
0x1dad   :  { %v4403_v1 = vmul.f32 0.03125, %v4395_v4 }
0x1dae   :  { %v4392_v10 = vpop.xlane.xlu0 %4391 }
0x1daf   :  { %v4407_v55 = vadd.f32 1e-05, %v4403_v1  ;;  %v4402_v61 = vmul.f32 0.03125, %v4392_v10 }
0x1db1   :  { %8728 = vrsqrt.f32 %v4407_v55  ;;  %v4406_v63 = vadd.f32 1e-05, %v4402_v61 }
0x1db3   :  { %8730 = vrsqrt.f32 %v4406_v63  ;;  %v4401_v6 = vpop.xlane.xlu1 %4400 }
0x1db4   :  { %v4405_v31 = vmul.f32 0.03125, %v4401_v6 }
0x1db5   :  { %v4398_v7 = vpop.xlane.xlu0 %4397 }
0x1db6   :  { %v4409_v8 = vadd.f32 1e-05, %v4405_v31  ;;  %v4404_v9 = vmul.f32 0.03125, %v4398_v7 }
0x1db8   :  { %8732 = vrsqrt.f32 %v4409_v8  ;;  %v4408_v56 = vadd.f32 1e-05, %v4404_v9 }
0x1dba   :  { %8734 = vrsqrt.f32 %v4408_v56 }
0x1dbe   :  { %v8729_v11 = vpop.eup %8728 }
0x1dbf   :  { %v4415_v13 = vmul.f32 %v8729_v11, %v4383_v51 }
0x1dc0   :  { %v8731_v47 = vpop.eup %8730 }
0x1dc1   :  { %v4414_v15 = vmul.f32 %v8731_v47, %v4382_v39  ;;  %v4425_v16 = vmul.f32 %v7571_v14, %v4415_v13 }
0x1dc3   :  { %v4424_v62 = vmul.f32 %v7571_v14, %v4414_v15  ;;  %v4435_v20 = vadd.f32 %v7572_v17, %v4425_v16 }
0x1dc5   :  { %v8733_v2 = vpop.eup %8732  ;;  %v4434_v18 = vadd.f32 %v7572_v17, %v4424_v62 }
0x1dc6   :  { %v4417_v23 = vmul.f32 %v8733_v2, %v4385_v46 }
0x1dc7   :  { %v8735_v12 = vpop.eup %8734  ;;  %8223 = vmatprep.mubr.msk.f32.mxu0 %vm700_vm0, %v4434_v18 }
0x1dc8   :  { %8224 = vmatmul.mubr.msk.f32.vlgmr.msra.gmra.mxu0 %vm700_vm0, %v4435_v20  ;;  %v4416_v26 = vmul.f32 %v8735_v12, %v4384_v3  ;;  %v4427_v27 = vmul.f32 %v7571_v14, %v4417_v23 }
0x1dca   :  { %v4426_v19 = vmul.f32 %v7571_v14, %v4416_v26  ;;  %v4437_v33 = vadd.f32 %v7572_v17, %v4427_v27 }
0x1dcc   :  { %v4436_v29 = vadd.f32 %v7572_v17, %v4426_v19 }
0x1dce   :  { %8226 = vmatprep.mubr.msk.f32.mxu0 %vm700_vm0, %v4436_v29 }
0x1dcf   :  { %8227 = vmatmul.mubr.msk.f32.gmra.mxu0 %vm700_vm0, %v4437_v33 }
0x1e88   :  { %v8225_v36 = vpop.f32.mrf.mxu0 }
0x1e89   :  { %v10724_v38 = vadd.f32 %v8225_v36, %v7573_v35 }
0x1e8a   :  { %v4527_v40 = vpop.f32.mrf.mxu0 }
0x1e8b   :  { %v10726_v42 = vadd.f32 %v7573_v35, %v4527_v40  ;;  %4554 = vrot.lane.b32.xlu0 %v10724_v38, %s9733_s8  ;;  %v10755_v43 = vmul.f32 0.35355338, %v10724_v38 }
0x1e8d   :  { %4552 = vrot.lane.b32.xlu1 %v10726_v42, %s9733_s8  ;;  %v10733_v37 = vmul.f32 0.35355338, %v10726_v42 }
0x1e8f   :  { %v8228_v48 = vpop.f32.mrf.mxu0  ;;  %8233 = vmatprep.mubr.msk.f32.mxu0 %vm1223_vm2, %v10733_v37 }
0x1e90   :  { %v10737_v51 = vadd.f32 %v8228_v48, %v7573_v35 }
0x1e91   :  { %v4537_v59 = vpop.f32.mrf.mxu0 }
0x1e92   :  { %v10739_v39 = vadd.f32 %v7573_v35, %v4537_v59  ;;  %4645 = vrot.lane.b32.xlu1 %v10737_v51, %s9733_s8  ;;  %v10764_v45 = vmul.f32 0.35355338, %v10737_v51 }
0x1e94   :  { %v10744_v0 = vmul.f32 0.35355338, %v10739_v39 }
0x1e96   :  { %4643 = vrot.lane.b32.xlu1 %v10739_v39, %s9733_s8  ;;  %8240 = vmatprep.mubr.msk.f32.mxu1 %vm1223_vm2, %v10744_v0 }
0x1efd   :  { %v4555_v50 = vpop.permute.xlu0 %4554 }
0x1efe   :  { %8229 = vmatprep.subr.msk.mxu0 %vm1223_vm2, %v4555_v50 }
0x1eff   :  { %v4553_v41 = vpop.permute.xlu1 %4552  ;;  %8230 = vmatpush3.xpose.msk.msra.mxu0 %vm1223_vm2, %v4555_v50 }
0x1f00   :  { %8231 = vmatprep.subr.msk.mxu0 %vm1223_vm2, %v4553_v41 }
0x1f03   :  { %8232 = vmatpush3.xpose.msk.msra.mxu0 %vm1223_vm2, %v4553_v41 }
0x1f04   :  { %v4646_v44 = vpop.permute.xlu1 %4645 }
0x1f05   :  { %8236 = vmatprep.subr.msk.mxu1 %vm1223_vm2, %v4646_v44 }
0x1f06   :  { %8234 = vmatmul.mubr.msk.f32.vlgmr.msra.gmra.mxu0 %vm1223_vm2, %v10755_v43  ;;  %8237 = vmatpush3.xpose.msk.msra.mxu1 %vm1223_vm2, %v4646_v44 }
0x1f08   :  { %v4644_v49 = vpop.permute.xlu1 %4643 }
0x1f09   :  { %8238 = vmatprep.subr.msk.mxu1 %vm1223_vm2, %v4644_v49 }
0x1f0a   :  { %8239 = vmatpush3.xpose.msk.msra.mxu1 %vm1223_vm2, %v4644_v49 }
0x1f0d   :  { %8241 = vmatmul.mubr.msk.f32.vlgmr.msra.gmra.mxu1 %vm1223_vm2, %v10764_v45 }
0x1fc6   :  { %v8235_v46 = vpop.f32.mrf.mxu0 }
0x1fc7   :  { %v4733_v57 = vsub.f32 %v8235_v46, %v10247_v22 }
0x1fc8   :  { %v4632_v3 = vpop.f32.mrf.mxu0 }
0x1fc9   :  { %v4732_v52 = vsub.f32 %v4632_v3, %v10247_v22  ;;  %v4739_v5 = vsel %vm1416_vm3, %v4733_v57, -inf }
0x1fca   :  { %4740 = vmax.xlane.f32.xlu1 %v4739_v5 }
0x1fcb   :  { %v4736_v30 = vsel %vm1416_vm3, %v4732_v52, -inf }
0x1fcc   :  { %4737 = vmax.xlane.f32.xlu0 %v4736_v30 }
0x1fcd   :  { %v8242_v53 = vpop.f32.mrf.mxu1 }
0x1fce   :  { %v4735_v60 = vsub.f32 %v8242_v53, %v10253_v32 }
0x1fcf   :  { %v4723_v58 = vpop.f32.mrf.mxu1 }
0x1fd0   :  { %v4734_v34 = vsub.f32 %v4723_v58, %v10253_v32  ;;  %v4745_v4 = vsel %vm1416_vm3, %v4735_v60, -inf }
0x1fd2   :  { %v4742_v54 = vsel %vm1416_vm3, %v4734_v34, -inf }
0x1fd3   :  { %4743 = vmax.xlane.f32.xlu0 %v4742_v54 }
0x1fd7   :  { %4746 = vmax.xlane.f32.xlu0 %v4745_v4 }
0x1fdb   :  { %4780 = vrot.lane.b32.xlu1 %v10726_v42, %s9735_s15 }
0x1fdf   :  { %4869 = vrot.lane.b32.xlu1 %v10737_v51, %s9735_s15 }
0x1fe3   :  { %4960 = vrot.lane.b32.xlu1 %v10724_v38, %s9736_s20 }
0x1fe7   :  { %4958 = vrot.lane.b32.xlu1 %v10726_v42, %s9736_s20 }
0x1feb   :  { %4954 = vrot.lane.b32.xlu1 %v10733_v37, %s9737_s16 }
0x1fed   :  { %4782 = vrot.lane.b32.xlu0 %v10724_v38, %s9735_s15 }
0x1ff1   :  { %4867 = vrot.lane.b32.xlu0 %v10739_v39, %s9735_s15  ;;  %s11242_s15 = sld [smem:[#allocation111_spill]] }
0x1ff5   :  { %5051 = vrot.lane.b32.xlu0 %v10737_v51, %s9736_s20 }
0x2053   :  { %v4741_v1 = vpop.xlane.xlu1 %4740 }
0x2054   :  { %v4749_v10 = vsub.f32 %v4733_v57, %v4741_v1 }
0x2055   :  { %v4738_v55 = vpop.xlane.xlu0 %4737 }
0x2056   :  { %v4754_v61 = vmul.f32 1.442695, %v4749_v10  ;;  %v4748_v63 = vsub.f32 %v4732_v52, %v4738_v55 }
0x2057   :  { %v4781_v6 = vpop.permute.xlu1 %4780 }
0x2058   :  { %8736 = vpow2.f32 %v4754_v61  ;;  %v4752_v31 = vmul.f32 1.442695, %v4748_v63 }
0x205a   :  { %8738 = vpow2.f32 %v4752_v31 }
0x205b   :  { %v4870_v7 = vpop.permute.xlu1 %4869 }
0x205c   :  { %8250 = vmatprep.subr.mxu1 %v4870_v7  ;;  %v4744_v8 = vpop.xlane.xlu0 %4743 }
0x205d   :  { %v4750_v9 = vsub.f32 %v4734_v34, %v4744_v8  ;;  %8251 = vmatpush3.msra.mxu1 %v4870_v7 }
0x205f   :  { %v4756_v56 = vmul.f32 1.442695, %v4750_v9  ;;  %v4961_v18 = vpop.permute.xlu1 %4960 }
0x2060   :  { %v4747_v11 = vpop.xlane.xlu0 %4746 }
0x2061   :  { %8740 = vpow2.f32 %v4756_v56  ;;  %v4751_v13 = vsub.f32 %v4735_v60, %v4747_v11 }
0x2063   :  { %v4758_v14 = vmul.f32 1.442695, %v4751_v13  ;;  %v4959_v19 = vpop.permute.xlu1 %4958 }
0x2064   :  { %v4783_v47 = vpop.permute.xlu0 %4782 }
0x2065   :  { %v8737_v15 = vpop.eup %8736  ;;  %8742 = vpow2.f32 %v4758_v14  ;;  %8243 = vmatprep.subr.mxu0 %v4783_v47 }
0x2066   :  { %8244 = vmatpush3.msra.mxu0 %v4783_v47  ;;  %v4763_v16 = vsel %vm1416_vm3, %v8737_v15, 0.0 }
0x2067   :  { %v8739_v17 = vpop.eup %8738  ;;  %4764 = vadd.xlane.f32.xlu1 %v4763_v16  ;;  %8245 = vmatprep.subr.mxu0 %v4781_v6  ;;  %v4955_v29 = vpop.permute.xlu1 %4954 }
0x2068   :  { %8246 = vmatpush3.msra.mxu0 %v4781_v6  ;;  %v4868_v62 = vpop.permute.xlu0 %4867  ;;  %v4760_v2 = vsel %vm1416_vm3, %v8739_v17, 0.0 }
0x2069   :  { %4761 = vadd.xlane.f32.xlu0 %v4760_v2  ;;  %8252 = vmatprep.subr.mxu1 %v4868_v62 }
0x206a   :  { %8257 = vmatprep.subr.msk.mxu0 %vm1223_vm2, %v4961_v18  ;;  %8253 = vmatpush3.msra.mxu1 %v4868_v62 }
0x206c   :  { %v5052_v20 = vpop.permute.xlu0 %5051 }
0x206d   :  { %8264 = vmatprep.subr.msk.mxu1 %vm1223_vm2, %v5052_v20 }
0x206e   :  { %v8741_v23 = vpop.eup %8740 }
0x206f   :  { %v4766_v12 = vsel %vm1416_vm3, %v8741_v23, 0.0 }
0x2070   :  { %4767 = vadd.xlane.f32.xlu0 %v4766_v12 }
0x2072   :  { %v8743_v26 = vpop.eup %8742 }
0x2073   :  { %v4769_v27 = vsel %vm1416_vm3, %v8743_v26, 0.0 }
0x2074   :  { %4770 = vadd.xlane.f32.xlu1 %v4769_v27 }
0x2085   :  { %5049 = vrot.lane.b32.xlu1 %v10739_v39, %s9736_s20 }
0x2086   :  { %4956 = vrot.lane.b32.xlu0 %v10755_v43, %s9737_s16 }
0x2089   :  { %5047 = vrot.lane.b32.xlu1 %v10764_v45, %s9737_s16 }
0x208a   :  { %5045 = vrot.lane.b32.xlu0 %v10744_v0, %s9737_s16 }
0x20f0   :  { %v4765_v33 = vpop.xlane.xlu1 %4764 }
0x20f1   :  { %8744 = vrcp.f32 %v4765_v33 }
0x20f2   :  { %v4762_v35 = vpop.xlane.xlu0 %4761 }
0x20f3   :  { %8746 = vrcp.f32 %v4762_v35 }
0x20f9   :  { %v4768_v36 = vpop.xlane.xlu0 %4767 }
0x20fa   :  { %8748 = vrcp.f32 %v4768_v36 }
0x20fd   :  { %v4771_v40 = vpop.xlane.xlu1 %4770  ;;  %v4957_v49 = vpop.permute.xlu0 %4956 }
0x20fe   :  { %8750 = vrcp.f32 %v4771_v40  ;;  %v8745_v48 = vpop.eup %8744 }
0x20ff   :  { %v4775_v41 = vmul.f32 %v8745_v48, %v8737_v15 }
0x2100   :  { %v8747_v59 = vpop.eup %8746 }
0x2101   :  { %v4773_v50 = vmul.f32 %v8747_v59, %v8739_v17  ;;  %v5046_v52 = vpop.permute.xlu0 %5045  ;;  %v5050_v5 = vpop.permute.xlu1 %5049 }
0x2103   :  { %8247 = vmatprep.mubr.msk.f32.mxu0 %vm1416_vm3, %v4773_v50 }
0x2104   :  { %8248 = vmatmul.mubr.msk.f32.vlgmr.msra.gmra.mxu0 %vm1416_vm3, %v4775_v41 }
0x2105   :  { %8258 = vmatpush3.xpose.msk.msra.mxu0 %vm1223_vm2, %v4961_v18  ;;  %8261 = vmatprep.mubr.msk.f32.mxu0 %vm1223_vm2, %v4955_v29  ;;  %v5048_v30 = vpop.permute.xlu1 %5047 }
0x2106   :  { %8259 = vmatprep.subr.msk.mxu0 %vm1223_vm2, %v4959_v19 }
0x2107   :  { %v8749_v44 = vpop.eup %8748 }
0x2108   :  { %v4777_v46 = vmul.f32 %v8749_v44, %v8741_v23 }
0x2109   :  { %8260 = vmatpush3.xpose.msk.msra.mxu0 %vm1223_vm2, %v4959_v19 }
0x210a   :  { %8254 = vmatprep.mubr.msk.f32.mxu1 %vm1416_vm3, %v4777_v46 }
0x210b   :  { %v8751_v57 = vpop.eup %8750 }
0x210c   :  { %8262 = vmatmul.mubr.msk.f32.vlgmr.msra.gmra.mxu0 %vm1223_vm2, %v4957_v49  ;;  %v4779_v3 = vmul.f32 %v8751_v57, %v8743_v26 }
0x210e   :  { %8255 = vmatmul.mubr.msk.f32.vlgmr.msra.gmra.mxu1 %vm1416_vm3, %v4779_v3 }
0x210f   :  { %8265 = vmatpush3.xpose.msk.msra.mxu1 %vm1223_vm2, %v5052_v20  ;;  %8268 = vmatprep.mubr.msk.f32.mxu1 %vm1223_vm2, %v5046_v52 }
0x2110   :  { %8266 = vmatprep.subr.msk.mxu1 %vm1223_vm2, %v5050_v5 }
0x2113   :  { %8267 = vmatpush3.xpose.msk.msra.mxu1 %vm1223_vm2, %v5050_v5 }
0x2116   :  { %8269 = vmatmul.mubr.msk.f32.vlgmr.msra.gmra.mxu1 %vm1223_vm2, %v5048_v30 }
0x21c4   :  { %v10820_v53 = vpop.f32.mrf.mxu0 }
0x21c6   :  { %v10822_v58 = vpop.f32.mrf.mxu0 }
0x21cc   :  { %v8263_v34 = vpop.f32.mrf.mxu0 }
0x21cd   :  { %v5137_v60 = vsub.f32 %v8263_v34, %v10247_v22 }
0x21ce   :  { %v5036_v54 = vpop.f32.mrf.mxu0  ;;  %v10827_v10 = vpop.f32.mrf.mxu1 }
0x21cf   :  { %v5136_v4 = vsub.f32 %v5036_v54, %v10247_v22  ;;  %v5143_v1 = vsel %vm1416_vm3, %v5137_v60, -inf }
0x21d0   :  { %5144 = vmax.xlane.f32.xlu1 %v5143_v1  ;;  %v10830_v61 = vpop.f32.mrf.mxu1 }
0x21d1   :  { %v5140_v55 = vsel %vm1416_vm3, %v5136_v4, -inf }
0x21d2   :  { %5141 = vmax.xlane.f32.xlu0 %v5140_v55 }
0x21d6   :  { %v8270_v63 = vpop.f32.mrf.mxu1 }
0x21d7   :  { %v5139_v7 = vsub.f32 %v8270_v63, %v10253_v32 }
0x21d8   :  { %v5127_v6 = vpop.f32.mrf.mxu1 }
0x21d9   :  { %v5138_v31 = vsub.f32 %v5127_v6, %v10253_v32  ;;  %v5149_v9 = vsel %vm1416_vm3, %v5139_v7, -inf }
0x21db   :  { %v5146_v8 = vsel %vm1416_vm3, %v5138_v31, -inf }
0x21dc   :  { %5147 = vmax.xlane.f32.xlu0 %v5146_v8 }
0x21e0   :  { %5150 = vmax.xlane.f32.xlu0 %v5149_v9 }
0x21e1   :  { %5184 = vrot.lane.b32.xlu1 %v10726_v42, %s9738_s30 }
0x21e5   :  { %5273 = vrot.lane.b32.xlu1 %v10737_v51, %s9738_s30 }
0x21e9   :  { %5364 = vrot.lane.b32.xlu1 %v10724_v38, %s9739_s18 }
0x21ed   :  { %5362 = vrot.lane.b32.xlu1 %v10726_v42, %s9739_s18 }
0x21f1   :  { %5358 = vrot.lane.b32.xlu1 %v10733_v37, %s9740_s13 }
0x21f6   :  { %5186 = vrot.lane.b32.xlu0 %v10724_v38, %s9738_s30 }
0x21fa   :  { %5271 = vrot.lane.b32.xlu0 %v10739_v39, %s9738_s30 }
0x21fe   :  { %5455 = vrot.lane.b32.xlu0 %v10737_v51, %s9739_s18 }
0x2259   :  { %v5145_v56 = vpop.xlane.xlu1 %5144 }
0x225a   :  { %v5153_v11 = vsub.f32 %v5137_v60, %v5145_v56 }
0x225b   :  { %v5142_v13 = vpop.xlane.xlu0 %5141 }
0x225c   :  { %v5158_v14 = vmul.f32 1.442695, %v5153_v11  ;;  %v5152_v47 = vsub.f32 %v5136_v4, %v5142_v13 }
0x225d   :  { %v5185_v15 = vpop.permute.xlu1 %5184 }
0x225e   :  { %8752 = vpow2.f32 %v5158_v14  ;;  %v5156_v16 = vmul.f32 1.442695, %v5152_v47 }
0x2260   :  { %8754 = vpow2.f32 %v5156_v16 }
0x2261   :  { %v5274_v17 = vpop.permute.xlu1 %5273 }
0x2262   :  { %8278 = vmatprep.subr.mxu1 %v5274_v17 }
0x2263   :  { %8279 = vmatpush3.msra.mxu1 %v5274_v17 }
0x2265   :  { %v5148_v62 = vpop.xlane.xlu0 %5147  ;;  %v5365_v35 = vpop.permute.xlu1 %5364 }
0x2266   :  { %v5154_v2 = vsub.f32 %v5138_v31, %v5148_v62 }
0x2268   :  { %v5160_v18 = vmul.f32 1.442695, %v5154_v2 }
0x2269   :  { %v5151_v20 = vpop.xlane.xlu0 %5150  ;;  %v5363_v44 = vpop.permute.xlu1 %5362 }
0x226a   :  { %8756 = vpow2.f32 %v5160_v18  ;;  %v5155_v23 = vsub.f32 %v5139_v7, %v5151_v20 }
0x226b   :  { %v8753_v12 = vpop.eup %8752 }
0x226c   :  { %v5162_v26 = vmul.f32 1.442695, %v5155_v23  ;;  %v5167_v27 = vsel %vm1416_vm3, %v8753_v12, 0.0 }
0x226d   :  { %v8755_v19 = vpop.eup %8754  ;;  %5168 = vadd.xlane.f32.xlu1 %v5167_v27  ;;  %v5187_v29 = vpop.permute.xlu0 %5186 }
0x226e   :  { %8758 = vpow2.f32 %v5162_v26  ;;  %8271 = vmatprep.subr.mxu0 %v5187_v29  ;;  %v5164_v33 = vsel %vm1416_vm3, %v8755_v19, 0.0  ;;  %v5359_v49 = vpop.permute.xlu1 %5358 }
0x226f   :  { %5165 = vadd.xlane.f32.xlu0 %v5164_v33  ;;  %8272 = vmatpush3.msra.mxu0 %v5187_v29 }
0x2270   :  { %8273 = vmatprep.subr.mxu0 %v5185_v15 }
0x2271   :  { %8274 = vmatpush3.msra.mxu0 %v5185_v15  ;;  %v5272_v36 = vpop.permute.xlu0 %5271 }
0x2272   :  { %8280 = vmatprep.subr.mxu1 %v5272_v36  ;;  %8285 = vmatprep.subr.msk.mxu0 %vm1223_vm2, %v5365_v35 }
0x2273   :  { %8281 = vmatpush3.msra.mxu1 %v5272_v36 }
0x2275   :  { %v5456_v40 = vpop.permute.xlu0 %5455 }
0x2276   :  { %8292 = vmatprep.subr.msk.mxu1 %vm1223_vm2, %v5456_v40 }
0x2277   :  { %v8757_v48 = vpop.eup %8756 }
0x2278   :  { %v5170_v59 = vsel %vm1416_vm3, %v8757_v48, 0.0 }
0x2279   :  { %5171 = vadd.xlane.f32.xlu0 %v5170_v59 }
0x227b   :  { %v8759_v50 = vpop.eup %8758 }
0x227c   :  { %v5173_v41 = vsel %vm1416_vm3, %v8759_v50, 0.0 }
0x227d   :  { %5174 = vadd.xlane.f32.xlu1 %v5173_v41 }
0x228e   :  { %5453 = vrot.lane.b32.xlu1 %v10739_v39, %s9739_s18 }
0x228f   :  { %5360 = vrot.lane.b32.xlu0 %v10755_v43, %s9740_s13 }
0x2292   :  { %5451 = vrot.lane.b32.xlu1 %v10764_v45, %s9740_s13 }
0x2293   :  { %5449 = vrot.lane.b32.xlu0 %v10744_v0, %s9740_s13 }
0x22f6   :  { %v5169_v46 = vpop.xlane.xlu1 %5168 }
0x22f7   :  { %8760 = vrcp.f32 %v5169_v46 }
0x22f8   :  { %v5166_v57 = vpop.xlane.xlu0 %5165 }
0x22f9   :  { %8762 = vrcp.f32 %v5166_v57 }
0x2302   :  { %v5172_v3 = vpop.xlane.xlu0 %5171 }
0x2303   :  { %8764 = vrcp.f32 %v5172_v3 }
0x2304   :  { %v8761_v52 = vpop.eup %8760 }
0x2305   :  { %v5179_v60 = vmul.f32 %v8761_v52, %v8753_v12 }
0x2306   :  { %v8763_v5 = vpop.eup %8762  ;;  %v5175_v30 = vpop.xlane.xlu1 %5174 }
0x2307   :  { %8766 = vrcp.f32 %v5175_v30  ;;  %v5177_v34 = vmul.f32 %v8763_v5, %v8755_v19  ;;  %v5361_v4 = vpop.permute.xlu0 %5360 }
0x2309   :  { %8275 = vmatprep.mubr.msk.f32.mxu0 %vm1416_vm3, %v5177_v34 }
0x230a   :  { %8276 = vmatmul.mubr.msk.f32.vlgmr.msra.gmra.mxu0 %vm1416_vm3, %v5179_v60  ;;  %v5454_v31 = vpop.permute.xlu1 %5453 }
0x230b   :  { %8286 = vmatpush3.xpose.msk.msra.mxu0 %vm1223_vm2, %v5365_v35  ;;  %8289 = vmatprep.mubr.msk.f32.mxu0 %vm1223_vm2, %v5359_v49  ;;  %v5450_v6 = vpop.permute.xlu0 %5449 }
0x230c   :  { %8287 = vmatprep.subr.msk.mxu0 %vm1223_vm2, %v5363_v44 }
0x230e   :  { %v5452_v7 = vpop.permute.xlu1 %5451 }
0x230f   :  { %8288 = vmatpush3.xpose.msk.msra.mxu0 %vm1223_vm2, %v5363_v44 }
0x2310   :  { %v8765_v54 = vpop.eup %8764 }
0x2311   :  { %v5181_v1 = vmul.f32 %v8765_v54, %v8757_v48 }
0x2312   :  { %8290 = vmatmul.mubr.msk.f32.vlgmr.msra.gmra.mxu0 %vm1223_vm2, %v5361_v4 }
0x2313   :  { %8282 = vmatprep.mubr.msk.f32.mxu1 %vm1416_vm3, %v5181_v1 }
0x2314   :  { %v8767_v55 = vpop.eup %8766 }
0x2315   :  { %v5183_v63 = vmul.f32 %v8767_v55, %v8759_v50 }
0x2317   :  { %8283 = vmatmul.mubr.msk.f32.vlgmr.msra.gmra.mxu1 %vm1416_vm3, %v5183_v63 }
0x2318   :  { %8293 = vmatpush3.xpose.msk.msra.mxu1 %vm1223_vm2, %v5456_v40  ;;  %8296 = vmatprep.mubr.msk.f32.mxu1 %vm1223_vm2, %v5450_v6 }
0x2319   :  { %8294 = vmatprep.subr.msk.mxu1 %vm1223_vm2, %v5454_v31 }
0x231c   :  { %8295 = vmatpush3.xpose.msk.msra.mxu1 %vm1223_vm2, %v5454_v31 }
0x231f   :  { %8297 = vmatmul.mubr.msk.f32.vlgmr.msra.gmra.mxu1 %vm1223_vm2, %v5452_v7 }
0x23ca   :  { %v10880_v8 = vpop.f32.mrf.mxu0 }
0x23cc   :  { %v10882_v9 = vpop.f32.mrf.mxu0 }
0x23d2   :  { %v8291_v56 = vpop.f32.mrf.mxu0 }
0x23d3   :  { %v5541_v11 = vsub.f32 %v8291_v56, %v10247_v22 }
0x23d4   :  { %v5440_v13 = vpop.f32.mrf.mxu0 }
0x23d5   :  { %v5540_v14 = vsub.f32 %v5440_v13, %v10247_v22  ;;  %v5547_v47 = vsel %vm1416_vm3, %v5541_v11, -inf }
0x23d6   :  { %5548 = vmax.xlane.f32.xlu1 %v5547_v47 }
0x23d7   :  { %v5544_v15 = vsel %vm1416_vm3, %v5540_v14, -inf  ;;  %v10888_v16 = vpop.f32.mrf.mxu1 }
0x23d8   :  { %5545 = vmax.xlane.f32.xlu0 %v5544_v15 }
0x23d9   :  { %v10890_v17 = vpop.f32.mrf.mxu1 }
0x23df   :  { %v8298_v62 = vpop.f32.mrf.mxu1 }
0x23e0   :  { %v5543_v20 = vsub.f32 %v8298_v62, %v10253_v32 }
0x23e1   :  { %v5531_v2 = vpop.f32.mrf.mxu1 }
0x23e2   :  { %v5542_v18 = vsub.f32 %v5531_v2, %v10253_v32  ;;  %v5553_v12 = vsel %vm1416_vm3, %v5543_v20, -inf }
0x23e4   :  { %v5550_v23 = vsel %vm1416_vm3, %v5542_v18, -inf }
0x23e5   :  { %5551 = vmax.xlane.f32.xlu0 %v5550_v23 }
0x23e7   :  { %5588 = vrot.lane.b32.xlu1 %v10726_v42, %s9741_s27 }
0x23e9   :  { %5554 = vmax.xlane.f32.xlu0 %v5553_v12 }
0x23eb   :  { %5677 = vrot.lane.b32.xlu1 %v10737_v51, %s9741_s27 }
0x23ef   :  { %5768 = vrot.lane.b32.xlu1 %v10724_v38, %s9742_s22 }
0x23f3   :  { %5766 = vrot.lane.b32.xlu1 %v10726_v42, %s9742_s22 }
0x23f7   :  { %5762 = vrot.lane.b32.xlu1 %v10733_v37, %s9743_s23 }
0x23ff   :  { %5590 = vrot.lane.b32.xlu0 %v10724_v38, %s9741_s27 }
0x2403   :  { %5675 = vrot.lane.b32.xlu0 %v10739_v39, %s9741_s27 }
0x2407   :  { %5859 = vrot.lane.b32.xlu0 %v10737_v51, %s9742_s22 }
0x245f   :  { %v5549_v26 = vpop.xlane.xlu1 %5548 }
0x2460   :  { %v5557_v27 = vsub.f32 %v5541_v11, %v5549_v26 }
0x2461   :  { %v5546_v19 = vpop.xlane.xlu0 %5545 }
0x2462   :  { %v5562_v29 = vmul.f32 1.442695, %v5557_v27  ;;  %v5556_v33 = vsub.f32 %v5540_v14, %v5546_v19 }
0x2463   :  { %v5589_v35 = vpop.permute.xlu1 %5588 }
0x2464   :  { %8768 = vpow2.f32 %v5562_v29  ;;  %v5560_v36 = vmul.f32 1.442695, %v5556_v33 }
0x2466   :  { %8770 = vpow2.f32 %v5560_v36 }
0x2467   :  { %v5678_v40 = vpop.permute.xlu1 %5677 }
0x2468   :  { %8306 = vmatprep.subr.mxu1 %v5678_v40 }
0x2469   :  { %8307 = vmatpush3.msra.mxu1 %v5678_v40 }
0x246b   :  { %v5769_v5 = vpop.permute.xlu1 %5768 }
0x246e   :  { %v5552_v37 = vpop.xlane.xlu0 %5551 }
0x246f   :  { %v5558_v48 = vsub.f32 %v5542_v18, %v5552_v37  ;;  %v5767_v55 = vpop.permute.xlu1 %5766 }
0x2471   :  { %v8769_v59 = vpop.eup %8768  ;;  %v5564_v50 = vmul.f32 1.442695, %v5558_v48 }
0x2472   :  { %v5555_v41 = vpop.xlane.xlu0 %5554  ;;  %v5571_v44 = vsel %vm1416_vm3, %v8769_v59, 0.0 }
0x2473   :  { %v8771_v49 = vpop.eup %8770  ;;  %8772 = vpow2.f32 %v5564_v50  ;;  %v5559_v46 = vsub.f32 %v5543_v20, %v5555_v41  ;;  %5572 = vadd.xlane.f32.xlu1 %v5571_v44  ;;  %v5763_v63 = vpop.permute.xlu1 %5762 }
0x2474   :  { %v5568_v57 = vsel %vm1416_vm3, %v8771_v49, 0.0 }
0x2475   :  { %v5566_v3 = vmul.f32 1.442695, %v5559_v46  ;;  %5569 = vadd.xlane.f32.xlu0 %v5568_v57 }
0x2476   :  { %v5591_v52 = vpop.permute.xlu0 %5590 }
0x2477   :  { %8774 = vpow2.f32 %v5566_v3  ;;  %8299 = vmatprep.subr.mxu0 %v5591_v52 }
0x2478   :  { %8300 = vmatpush3.msra.mxu0 %v5591_v52 }
0x2479   :  { %8301 = vmatprep.subr.mxu0 %v5589_v35 }
0x247a   :  { %8302 = vmatpush3.msra.mxu0 %v5589_v35  ;;  %v5676_v30 = vpop.permute.xlu0 %5675 }
0x247b   :  { %8308 = vmatprep.subr.mxu1 %v5676_v30  ;;  %8313 = vmatprep.subr.msk.mxu0 %vm1223_vm2, %v5769_v5 }
0x247c   :  { %8309 = vmatpush3.msra.mxu1 %v5676_v30 }
0x247e   :  { %v5860_v34 = vpop.permute.xlu0 %5859 }
0x247f   :  { %8320 = vmatprep.subr.msk.mxu1 %vm1223_vm2, %v5860_v34 }
0x2480   :  { %v8773_v60 = vpop.eup %8772 }
0x2481   :  { %v5574_v54 = vsel %vm1416_vm3, %v8773_v60, 0.0 }
0x2482   :  { %5575 = vadd.xlane.f32.xlu0 %v5574_v54 }
0x2484   :  { %v8775_v4 = vpop.eup %8774 }
0x2485   :  { %v5577_v1 = vsel %vm1416_vm3, %v8775_v4, 0.0 }
0x2486   :  { %5578 = vadd.xlane.f32.xlu1 %v5577_v1 }
0x2497   :  { %5857 = vrot.lane.b32.xlu1 %v10739_v39, %s9742_s22 }
0x2498   :  { %5764 = vrot.lane.b32.xlu0 %v10755_v43, %s9743_s23 }
0x249b   :  { %5855 = vrot.lane.b32.xlu1 %v10764_v45, %s9743_s23 }
0x249c   :  { %5853 = vrot.lane.b32.xlu0 %v10744_v0, %s9743_s23 }
0x24fc   :  { %v5573_v6 = vpop.xlane.xlu1 %5572 }
0x24fd   :  { %8776 = vrcp.f32 %v5573_v6 }
0x24fe   :  { %v5570_v31 = vpop.xlane.xlu0 %5569 }
0x24ff   :  { %8778 = vrcp.f32 %v5570_v31 }
0x250a   :  { %v8777_v7 = vpop.eup %8776 }
0x250b   :  { %v5576_v56 = vpop.xlane.xlu0 %5575  ;;  %v5583_v14 = vmul.f32 %v8777_v7, %v8769_v59 }
0x250c   :  { %v8779_v11 = vpop.eup %8778  ;;  %8780 = vrcp.f32 %v5576_v56 }
0x250d   :  { %v5581_v13 = vmul.f32 %v8779_v11, %v8771_v49 }
0x250f   :  { %v5579_v47 = vpop.xlane.xlu1 %5578  ;;  %8303 = vmatprep.mubr.msk.f32.mxu0 %vm1416_vm3, %v5581_v13  ;;  %v5765_v0 = vpop.permute.xlu0 %5764 }
0x2510   :  { %8782 = vrcp.f32 %v5579_v47  ;;  %8304 = vmatmul.mubr.msk.f32.vlgmr.msra.gmra.mxu0 %vm1416_vm3, %v5583_v14 }
0x2511   :  { %8314 = vmatpush3.xpose.msk.msra.mxu0 %vm1223_vm2, %v5769_v5  ;;  %8317 = vmatprep.mubr.msk.f32.mxu0 %vm1223_vm2, %v5763_v63 }
0x2512   :  { %8315 = vmatprep.subr.msk.mxu0 %vm1223_vm2, %v5767_v55 }
0x2513   :  { %v5854_v2 = vpop.permute.xlu0 %5853  ;;  %v5858_v18 = vpop.permute.xlu1 %5857 }
0x2515   :  { %8316 = vmatpush3.xpose.msk.msra.mxu0 %vm1223_vm2, %v5767_v55 }
0x2517   :  { %v5856_v20 = vpop.permute.xlu1 %5855 }
0x2518   :  { %8318 = vmatmul.mubr.msk.f32.vlgmr.msra.gmra.mxu0 %vm1223_vm2, %v5765_v0 }
0x2519   :  { %v8781_v43 = vpop.eup %8780 }
0x251a   :  { %v5585_v45 = vmul.f32 %v8781_v43, %v8773_v60 }
0x251c   :  { %8310 = vmatprep.mubr.msk.f32.mxu1 %vm1416_vm3, %v5585_v45 }
0x251d   :  { %v8783_v15 = vpop.eup %8782 }
0x251e   :  { %v5587_v62 = vmul.f32 %v8783_v15, %v8775_v4 }
0x2520   :  { %8311 = vmatmul.mubr.msk.f32.vlgmr.msra.gmra.mxu1 %vm1416_vm3, %v5587_v62  ;;  %v6229_v62 = vld [vmem:[%s11242_s15 + $0x18] sm:$0xff] }
0x2521   :  { %8321 = vmatpush3.xpose.msk.msra.mxu1 %vm1223_vm2, %v5860_v34  ;;  %8324 = vmatprep.mubr.msk.f32.mxu1 %vm1223_vm2, %v5854_v2  ;;  %v6228_v2 = vld [vmem:[%s11242_s15 + $0x10] sm:$0xff] }
0x2522   :  { %8322 = vmatprep.subr.msk.mxu1 %vm1223_vm2, %v5858_v18 }
0x2525   :  { %8323 = vmatpush3.xpose.msk.msra.mxu1 %vm1223_vm2, %v5858_v18  ;;  %v6227_v18 = vld [vmem:[%s11242_s15 + $0x8] sm:$0xff] }
0x2528   :  { %8325 = vmatmul.mubr.msk.f32.vlgmr.msra.gmra.mxu1 %vm1223_vm2, %v5856_v20  ;;  %v6226_v20 = vld [vmem:[%s11242_s15] sm:$0xff] }
0x25d0   :  { %v8305_v23 = vpop.f32.mrf.mxu0 }
0x25d2   :  { %v5666_v12 = vpop.f32.mrf.mxu0 }
0x25d8   :  { %v8319_v26 = vpop.f32.mrf.mxu0 }
0x25d9   :  { %v5945_v27 = vsub.f32 %v8319_v26, %v10247_v22 }
0x25da   :  { %v5844_v19 = vpop.f32.mrf.mxu0 }
0x25db   :  { %v5944_v29 = vsub.f32 %v5844_v19, %v10247_v22  ;;  %v5951_v33 = vsel %vm1416_vm3, %v5945_v27, -inf }
0x25dc   :  { %5952 = vmax.xlane.f32.xlu1 %v5951_v33 }
0x25dd   :  { %v5948_v35 = vsel %vm1416_vm3, %v5944_v29, -inf }
0x25de   :  { %5949 = vmax.xlane.f32.xlu0 %v5948_v35 }
0x25e0   :  { %v8312_v36 = vpop.f32.mrf.mxu1 }
0x25e2   :  { %v5753_v40 = vpop.f32.mrf.mxu1 }
0x25e8   :  { %v8326_v37 = vpop.f32.mrf.mxu1 }
0x25e9   :  { %v5947_v50 = vsub.f32 %v8326_v37, %v10253_v32 }
0x25ea   :  { %v5935_v48 = vpop.f32.mrf.mxu1 }
0x25eb   :  { %v5946_v59 = vsub.f32 %v5935_v48, %v10253_v32  ;;  %v5957_v44 = vsel %vm1416_vm3, %v5947_v50, -inf }
0x25ed   :  { %v5954_v41 = vsel %vm1416_vm3, %v5946_v59, -inf }
0x25ee   :  { %5955 = vmax.xlane.f32.xlu0 %v5954_v41 }
0x25f2   :  { %5958 = vmax.xlane.f32.xlu0 %v5957_v44 }
0x2665   :  { %v5953_v22 = vpop.xlane.xlu1 %5952 }
0x2666   :  { %v5961_v49 = vsub.f32 %v5945_v27, %v5953_v22 }
0x2667   :  { %v5950_v46 = vpop.xlane.xlu0 %5949 }
0x2668   :  { %v5966_v57 = vmul.f32 1.442695, %v5961_v49  ;;  %v5960_v3 = vsub.f32 %v5944_v29, %v5950_v46 }
0x266a   :  { %8784 = vpow2.f32 %v5966_v57  ;;  %v5964_v52 = vmul.f32 1.442695, %v5960_v3 }
0x266c   :  { %8786 = vpow2.f32 %v5964_v52 }
0x2677   :  { %v8785_v5 = vpop.eup %8784  ;;  %v5956_v30 = vpop.xlane.xlu0 %5955 }
0x2678   :  { %v5962_v34 = vsub.f32 %v5946_v59, %v5956_v30  ;;  %v5975_v60 = vsel %vm1416_vm3, %v8785_v5, 0.0 }
0x2679   :  { %v8787_v32 = vpop.eup %8786  ;;  %5976 = vadd.xlane.f32.xlu1 %v5975_v60 }
0x267a   :  { %v5968_v54 = vmul.f32 1.442695, %v5962_v34  ;;  %v5972_v4 = vsel %vm1416_vm3, %v8787_v32, 0.0 }
0x267b   :  { %5973 = vadd.xlane.f32.xlu0 %v5972_v4  ;;  %v5959_v1 = vpop.xlane.xlu0 %5958 }
0x267c   :  { %8788 = vpow2.f32 %v5968_v54  ;;  %v5963_v55 = vsub.f32 %v5947_v50, %v5959_v1  ;;  %v7630_v54 = vld [vmem:[#allocation30] ss:$0 sm:$0xff] }
0x267e   :  { %v5970_v63 = vmul.f32 1.442695, %v5963_v55 }
0x2680   :  { %8790 = vpow2.f32 %v5970_v63 }
0x2689   :  { %v8789_v6 = vpop.eup %8788 }
0x268a   :  { %v5978_v31 = vsel %vm1416_vm3, %v8789_v6, 0.0 }
0x268b   :  { %5979 = vadd.xlane.f32.xlu0 %v5978_v31 }
0x268d   :  { %v8791_v7 = vpop.eup %8790 }
0x268e   :  { %v5981_v56 = vsel %vm1416_vm3, %v8791_v7, 0.0 }
0x268f   :  { %5982 = vadd.xlane.f32.xlu1 %v5981_v56 }
0x26a0   :  { %5992 = vrot.lane.b32.xlu1 %v10726_v42, %s9744_s6 }
0x26a1   :  { %5994 = vrot.lane.b32.xlu0 %v10724_v38, %s9744_s6 }
0x26a4   :  { %6081 = vrot.lane.b32.xlu1 %v10737_v51, %s9744_s6 }
0x26a5   :  { %6170 = vrot.lane.b32.xlu0 %v10882_v9, %s9723_s26 }
0x26a8   :  { %6079 = vrot.lane.b32.xlu1 %v10739_v39, %s9744_s6 }
0x26a9   :  { %6186 = vrot.lane.b32.xlu0 %v5666_v12, %s9725_s1 }
0x26ac   :  { %6172 = vrot.lane.b32.xlu1 %v10880_v8, %s9723_s26 }
0x26ad   :  { %6174 = vrot.lane.b32.xlu0 %v10890_v17, %s9723_s26 }
0x26b0   :  { %6188 = vrot.lane.b32.xlu1 %v8305_v23, %s9725_s1 }
0x26b1   :  { %6190 = vrot.lane.b32.xlu0 %v5753_v40, %s9725_s1 }
0x26b4   :  { %6176 = vrot.lane.b32.xlu1 %v10888_v16, %s9723_s26 }
0x26b8   :  { %6192 = vrot.lane.b32.xlu1 %v8312_v36, %s9725_s1  ;;  %s11243_s1 = sld [smem:[#allocation121_spill]] }
0x2702   :  { %v5977_v42 = vpop.xlane.xlu1 %5976 }
0x2704   :  { %v5974_v38 = vpop.xlane.xlu0 %5973 }
0x2705   :  { %8792 = vrcp.f32 %v5974_v38 }
0x2706   :  { %8794 = vrcp.f32 %v5977_v42 }
0x2712   :  { %v8793_v51 = vpop.eup %8792 }
0x2713   :  { %v5985_v39 = vmul.f32 %v8793_v51, %v8787_v32  ;;  %v8795_v11 = vpop.eup %8794 }
0x2714   :  { %v5980_v9 = vpop.xlane.xlu0 %5979  ;;  %v5987_v16 = vmul.f32 %v8795_v11, %v8785_v5 }
0x2715   :  { %8796 = vrcp.f32 %v5980_v9  ;;  %8331 = vmatprep.mubr.msk.f32.mxu0 %vm1416_vm3, %v5985_v39 }
0x2718   :  { %v5983_v8 = vpop.xlane.xlu1 %5982  ;;  %v5995_v17 = vpop.permute.xlu0 %5994 }
0x2719   :  { %8798 = vrcp.f32 %v5983_v8  ;;  %8327 = vmatprep.subr.mxu0 %v5995_v17 }
0x271a   :  { %8328 = vmatpush3.msra.mxu0 %v5995_v17 }
0x271c   :  { %v5993_v13 = vpop.permute.xlu1 %5992  ;;  %v6171_v29 = vpop.permute.xlu0 %6170 }
0x271d   :  { %8329 = vmatprep.subr.mxu0 %v5993_v13  ;;  %v6214_v59 = vsel %vm1223_vm2, %v10822_v58, %v6171_v29 }
0x271e   :  { %8330 = vmatpush3.msra.mxu0 %v5993_v13 }
0x271f   :  { %8332 = vmatmul.mubr.msk.f32.vlgmr.msra.gmra.mxu0 %vm1416_vm3, %v5987_v16  ;;  %8341 = vmatprep.subr.mxu0 %v6229_v62 }
0x2720   :  { %v6082_v14 = vpop.permute.xlu1 %6081  ;;  %8342 = vmatpush3.msra.mxu0 %v6229_v62  ;;  %v6187_v35 = vpop.permute.xlu0 %6186 }
0x2721   :  { %8334 = vmatprep.subr.mxu1 %v6082_v14  ;;  %8343 = vmatprep.subr.mxu0 %v6228_v2  ;;  %v6218_v41 = vsel %vm1416_vm3, %v6214_v59, %v6187_v35 }
0x2722   :  { %v8797_v47 = vpop.eup %8796  ;;  %8335 = vmatpush3.msra.mxu1 %v6082_v14  ;;  %8344 = vmatpush3.msra.mxu0 %v6228_v2 }
0x2723   :  { %v5989_v0 = vmul.f32 %v8797_v47, %v8789_v6  ;;  %8345 = vmatprep.subr.mxu0 %v6227_v18 }
0x2724   :  { %v6080_v43 = vpop.permute.xlu1 %6079  ;;  %8346 = vmatpush3.msra.mxu0 %v6227_v18  ;;  %v6175_v40 = vpop.permute.xlu0 %6174 }
0x2725   :  { %8336 = vmatprep.subr.mxu1 %v6080_v43  ;;  %8338 = vmatprep.mubr.msk.f32.mxu1 %vm1416_vm3, %v5989_v0  ;;  %v6216_v58 = vsel %vm1223_vm2, %v10830_v61, %v6175_v40 }
0x2726   :  { %v8799_v45 = vpop.eup %8798  ;;  %8337 = vmatpush3.msra.mxu1 %v6080_v43  ;;  %8347 = vmatprep.subr.mxu0 %v6226_v20 }
0x2727   :  { %v5991_v15 = vmul.f32 %v8799_v45, %v8791_v7  ;;  %8348 = vmatpush3.msra.mxu0 %v6226_v20 }
0x2728   :  { %v6173_v19 = vpop.permute.xlu1 %6172  ;;  %v6191_v48 = vpop.permute.xlu0 %6190 }
0x2729   :  { %8339 = vmatmul.mubr.msk.f32.vlgmr.msra.gmra.mxu1 %vm1416_vm3, %v5991_v15  ;;  %v6215_v44 = vsel %vm1223_vm2, %v10820_v53, %v6173_v19  ;;  %v6220_v52 = vsel %vm1416_vm3, %v6216_v58, %v6191_v48  ;;  %v6416_v19 = vld [vmem:[#allocation35] sm:$0xff] }
0x272c   :  { %v6189_v33 = vpop.permute.xlu1 %6188 }
0x272d   :  { %v6219_v49 = vsel %vm1416_vm3, %v6215_v44, %v6189_v33 }
0x2730   :  { %v6177_v36 = vpop.permute.xlu1 %6176 }
0x2731   :  { %v6217_v53 = vsel %vm1223_vm2, %v10827_v10, %v6177_v36 }
0x2734   :  { %v6193_v37 = vpop.permute.xlu1 %6192 }
0x2735   :  { %v6221_v30 = vsel %vm1416_vm3, %v6217_v53, %v6193_v37  ;;  %v7632_v53 = vld [vmem:[#allocation33] ss:$0 sm:$0xff] }
0x27df   :  { %v8333_v23 = vpop.f32.mrf.mxu0 }
0x27e0   :  { %6204 = vrot.lane.b32.xlu1 %v8333_v23, %s9745_s24 }
0x27e1   :  { %v6070_v12 = vpop.f32.mrf.mxu0 }
0x27e2   :  { %6202 = vrot.lane.b32.xlu0 %v6070_v12, %s9745_s24  ;;  %v6419_v12 = vld [vmem:[#allocation35 + $0x18] sm:$0xff] }
0x27e3   :  { %8355 = vmatprep.subr.mxu1 %v6419_v12 }
0x27e4   :  { %8356 = vmatpush3.msra.mxu1 %v6419_v12 }
0x27e9   :  { %v8340_v26 = vpop.f32.mrf.mxu1 }
0x27ea   :  { %6208 = vrot.lane.b32.xlu1 %v8340_v26, %s9745_s24  ;;  %v6418_v26 = vld [vmem:[#allocation35 + $0x10] sm:$0xff] }
0x27eb   :  { %v6157_v27 = vpop.f32.mrf.mxu1  ;;  %8357 = vmatprep.subr.mxu1 %v6418_v26 }
0x27ec   :  { %6206 = vrot.lane.b32.xlu0 %v6157_v27, %s9745_s24  ;;  %v6417_v27 = vld [vmem:[#allocation35 + $0x8] sm:$0xff]  ;;  %8358 = vmatpush3.msra.mxu1 %v6418_v26 }
0x27ed   :  { %8359 = vmatprep.subr.mxu1 %v6417_v27  ;;  %v6833_v26 = vld [vmem:[#allocation44 + $0x18] sm:$0xff] }
0x27ee   :  { %8360 = vmatpush3.msra.mxu1 %v6417_v27  ;;  %v6832_v27 = vld [vmem:[#allocation44 + $0x10] sm:$0xff]  ;;  %8369 = vmatprep.subr.mxu0 %v6833_v26 }
0x27ef   :  { %8361 = vmatprep.subr.mxu1 %v6416_v19 }
0x27f0   :  { %8362 = vmatpush3.msra.mxu1 %v6416_v19  ;;  %v6831_v19 = vld [vmem:[#allocation44 + $0x8] sm:$0xff] }
0x2852   :  { %v6205_v50 = vpop.permute.xlu1 %6204 }
0x2853   :  { %v6223_v57 = vsel %vm2903_vm4, %v6219_v49, %v6205_v50 }
0x2854   :  { %v6203_v22 = vpop.permute.xlu0 %6202 }
0x2855   :  { %v6222_v46 = vsel %vm2903_vm4, %v6218_v41, %v6203_v22 }
0x2856   :  { %8349 = vmatprep.mubr.msk.f32.mxu0 %vm700_vm0, %v6222_v46 }
0x2857   :  { %8350 = vmatmul.mubr.msk.f32.vlgmr.msra.gmra.mxu0 %vm700_vm0, %v6223_v57  ;;  %v7631_v57 = vld [vmem:[#allocation32] ss:$0 sm:$0xff] }
0x2858   :  { %8370 = vmatpush3.msra.mxu0 %v6833_v26 }
0x2859   :  { %8371 = vmatprep.subr.mxu0 %v6832_v27 }
0x285a   :  { %8372 = vmatpush3.msra.mxu0 %v6832_v27 }
0x285b   :  { %8373 = vmatprep.subr.mxu0 %v6831_v19 }
0x285c   :  { %v6209_v3 = vpop.permute.xlu1 %6208  ;;  %8374 = vmatpush3.msra.mxu0 %v6831_v19 }
0x285d   :  { %v6225_v60 = vsel %vm2903_vm4, %v6221_v30, %v6209_v3 }
0x285e   :  { %v6207_v5 = vpop.permute.xlu0 %6206 }
0x285f   :  { %v6224_v34 = vsel %vm2903_vm4, %v6220_v52, %v6207_v5 }
0x2860   :  { %8352 = vmatprep.mubr.msk.f32.mxu0 %vm700_vm0, %v6224_v34 }
0x2861   :  { %8353 = vmatmul.mubr.msk.f32.gmra.mxu0 %vm700_vm0, %v6225_v60 }
0x2917   :  { %v8351_v32 = vpop.f32.mrf.mxu0 }
0x2918   :  { %v6328_v61 = vadd.f32 %v8351_v32, %v10689_v21 }
0x2919   :  { %v6308_v4 = vpop.f32.mrf.mxu0 }
0x291a   :  { %v11005_v1 = vadd.f32 %v7630_v54, %v6328_v61  ;;  %v6327_v10 = vadd.f32 %v6308_v4, %v10692_v24 }
0x291c   :  { %v11008_v55 = vadd.f32 %v7630_v54, %v6327_v10  ;;  %v6347_v63 = vsel %vm700_vm0, %v11005_v1, 0.0 }
0x291d   :  { %6348 = vadd.xlane.f32.xlu1 %v6347_v63 }
0x291e   :  { %v6344_v6 = vsel %vm700_vm0, %v11008_v55, 0.0 }
0x291f   :  { %6345 = vadd.xlane.f32.xlu0 %v6344_v6 }
0x2921   :  { %v8354_v31 = vpop.f32.mrf.mxu0 }
0x2922   :  { %v6330_v56 = vadd.f32 %v8354_v31, %v10699_v25  ;;  %v7633_v31 = vld [vmem:[#allocation36] ss:$0 sm:$0xff] }
0x2923   :  { %v6318_v7 = vpop.f32.mrf.mxu0 }
0x2924   :  { %v6329_v21 = vadd.f32 %v6318_v7, %v10702_v28  ;;  %v11018_v42 = vadd.f32 %v7630_v54, %v6330_v56 }
0x2926   :  { %v11016_v38 = vadd.f32 %v7630_v54, %v6329_v21  ;;  %v6353_v51 = vsel %vm700_vm0, %v11018_v42, 0.0 }
0x2928   :  { %v6350_v24 = vsel %vm700_vm0, %v11016_v38, 0.0 }
0x2929   :  { %6351 = vadd.xlane.f32.xlu0 %v6350_v24 }
0x292d   :  { %6354 = vadd.xlane.f32.xlu0 %v6353_v51 }
0x29a6   :  { %v6349_v39 = vpop.xlane.xlu1 %6348 }
0x29a7   :  { %v6357_v9 = vmul.f32 0.03125, %v6349_v39 }
0x29a8   :  { %v6346_v8 = vpop.xlane.xlu0 %6345 }
0x29a9   :  { %v6361_v17 = vsub.f32 %v11005_v1, %v6357_v9  ;;  %v6356_v25 = vmul.f32 0.03125, %v6346_v8 }
0x29ab   :  { %v6360_v28 = vsub.f32 %v11008_v55, %v6356_v25  ;;  %v6365_v11 = vmul.f32 %v6361_v17, %v6361_v17 }
0x29ad   :  { %v6371_v13 = vsel %vm700_vm0, %v6365_v11, 0.0  ;;  %v6364_v16 = vmul.f32 %v6360_v28, %v6360_v28 }
0x29ae   :  { %6372 = vadd.xlane.f32.xlu1 %v6371_v13 }
0x29af   :  { %v6368_v14 = vsel %vm700_vm0, %v6364_v16, 0.0 }
0x29b0   :  { %6369 = vadd.xlane.f32.xlu0 %v6368_v14 }
0x29b2   :  { %v6352_v47 = vpop.xlane.xlu0 %6351 }
0x29b3   :  { %v6358_v0 = vmul.f32 0.03125, %v6352_v47 }
0x29b5   :  { %v6362_v43 = vsub.f32 %v11016_v38, %v6358_v0 }
0x29b6   :  { %v6355_v45 = vpop.xlane.xlu0 %6354 }
0x29b7   :  { %v6359_v15 = vmul.f32 0.03125, %v6355_v45  ;;  %v6366_v62 = vmul.f32 %v6362_v43, %v6362_v43 }
0x29b9   :  { %v6363_v2 = vsub.f32 %v11018_v42, %v6359_v15  ;;  %v6374_v18 = vsel %vm700_vm0, %v6366_v62, 0.0 }
0x29ba   :  { %6375 = vadd.xlane.f32.xlu0 %v6374_v18 }
0x29bb   :  { %v6367_v20 = vmul.f32 %v6363_v2, %v6363_v2 }
0x29bd   :  { %v6377_v23 = vsel %vm700_vm0, %v6367_v20, 0.0 }
0x29be   :  { %6378 = vadd.xlane.f32.xlu1 %v6377_v23 }
0x2a37   :  { %v6373_v29 = vpop.xlane.xlu1 %6372 }
0x2a38   :  { %v6381_v33 = vmul.f32 0.03125, %v6373_v29 }
0x2a39   :  { %v6370_v35 = vpop.xlane.xlu0 %6369 }
0x2a3a   :  { %v6385_v36 = vadd.f32 1e-05, %v6381_v33  ;;  %v6380_v40 = vmul.f32 0.03125, %v6370_v35  ;;  %v6830_v33 = vld [vmem:[#allocation44] sm:$0xff] }
0x2a3b   :  { %8375 = vmatprep.subr.mxu0 %v6830_v33 }
0x2a3c   :  { %8800 = vrsqrt.f32 %v6385_v36  ;;  %v6384_v37 = vadd.f32 1e-05, %v6380_v40  ;;  %8376 = vmatpush3.msra.mxu0 %v6830_v33 }
0x2a3e   :  { %8802 = vrsqrt.f32 %v6384_v37 }
0x2a43   :  { %v6376_v48 = vpop.xlane.xlu0 %6375 }
0x2a44   :  { %v6382_v59 = vmul.f32 0.03125, %v6376_v48 }
0x2a46   :  { %v6386_v50 = vadd.f32 1e-05, %v6382_v59 }
0x2a47   :  { %v6379_v41 = vpop.xlane.xlu1 %6378 }
0x2a48   :  { %8804 = vrsqrt.f32 %v6386_v50  ;;  %v6383_v44 = vmul.f32 0.03125, %v6379_v41 }
0x2a49   :  { %v8801_v22 = vpop.eup %8800 }
0x2a4a   :  { %v6393_v49 = vmul.f32 %v8801_v22, %v6361_v17  ;;  %v6387_v46 = vadd.f32 1e-05, %v6383_v44 }
0x2a4b   :  { %v8803_v58 = vpop.eup %8802 }
0x2a4c   :  { %8806 = vrsqrt.f32 %v6387_v46  ;;  %v6392_v3 = vmul.f32 %v8803_v58, %v6360_v28  ;;  %v6403_v52 = vmul.f32 %v7631_v57, %v6393_v49  ;;  %v7638_v49 = vld [vmem:[#allocation38] ss:$0 sm:$0xff]  ;;  %v7639_v46 = vld [vmem:[#allocation38 + $0x1] ss:$0 sm:$0xff] }
0x2a4e   :  { %v6402_v5 = vmul.f32 %v7631_v57, %v6392_v3  ;;  %v6413_v34 = vadd.f32 %v7632_v53, %v6403_v52 }
0x2a50   :  { %v6412_v30 = vadd.f32 %v7632_v53, %v6402_v5 }
0x2a52   :  { %8363 = vmatprep.mubr.msk.f32.mxu1 %vm700_vm0, %v6412_v30 }
0x2a53   :  { %8364 = vmatmul.mubr.msk.f32.vlgmr.msra.gmra.mxu1 %vm700_vm0, %v6413_v34 }
0x2a55   :  { %v8805_v60 = vpop.eup %8804 }
0x2a56   :  { %v6394_v32 = vmul.f32 %v8805_v60, %v6362_v43 }
0x2a58   :  { %v6404_v54 = vmul.f32 %v7631_v57, %v6394_v32 }
0x2a59   :  { %v8807_v61 = vpop.eup %8806 }
0x2a5a   :  { %v6414_v4 = vadd.f32 %v7632_v53, %v6404_v54  ;;  %v6395_v10 = vmul.f32 %v8807_v61, %v6363_v2 }
0x2a5c   :  { %8366 = vmatprep.mubr.msk.f32.mxu1 %vm700_vm0, %v6414_v4  ;;  %v6405_v63 = vmul.f32 %v7631_v57, %v6395_v10  ;;  %v11049_v57 = vld [vmem:[#allocation38 + $0x2] ss:$0 sm:$0xff] }
0x2a5e   :  { %v6415_v6 = vadd.f32 %v7632_v53, %v6405_v63 }
0x2a60   :  { %8367 = vmatmul.mubr.msk.f32.gmra.mxu1 %vm700_vm0, %v6415_v6 }
0x2b13   :  { %v8365_v7 = vpop.f32.mrf.mxu1 }
0x2b14   :  { %v6511_v56 = vadd.f32 %v8365_v7, %v7633_v31  ;;  %v7641_v7 = vld [vmem:[#allocation38 + $0x3] ss:$0 sm:$0xff] }
0x2b15   :  { %v6505_v21 = vpop.f32.mrf.mxu1 }
0x2b16   :  { %v6525_v24 = vsub.f32 0.0, %v6511_v56  ;;  %v6506_v51 = vadd.f32 %v7633_v31, %v6505_v21 }
0x2b18   :  { %v6530_v39 = vmul.f32 1.442695, %v6525_v24  ;;  %v6524_v9 = vsub.f32 0.0, %v6506_v51 }
0x2b1a   :  { %8808 = vpow2.f32 %v6530_v39  ;;  %v6528_v8 = vmul.f32 1.442695, %v6524_v9 }
0x2b1c   :  { %8810 = vpow2.f32 %v6528_v8 }
0x2b20   :  { %v8368_v17 = vpop.f32.mrf.mxu1 }
0x2b21   :  { %v11036_v25 = vadd.f32 %v8368_v17, %v7633_v31 }
0x2b22   :  { %v6515_v28 = vpop.f32.mrf.mxu1 }
0x2b23   :  { %v6527_v11 = vsub.f32 0.0, %v11036_v25  ;;  %v6516_v13 = vadd.f32 %v7633_v31, %v6515_v28 }
0x2b25   :  { %v6534_v16 = vmul.f32 1.442695, %v6527_v11  ;;  %v6526_v14 = vsub.f32 0.0, %v6516_v13 }
0x2b27   :  { %v8809_v47 = vpop.eup %8808  ;;  %v6532_v0 = vmul.f32 1.442695, %v6526_v14  ;;  %8812 = vpow2.f32 %v6534_v16  ;;  %v7642_v16 = vld [vmem:[#allocation38 + $0x4] ss:$0 sm:$0xff] }
0x2b28   :  { %v6537_v43 = vadd.f32 1.0, %v8809_v47 }
0x2b29   :  { %v8811_v45 = vpop.eup %8810  ;;  %8814 = vpow2.f32 %v6532_v0 }
0x2b2a   :  { %8816 = vrcp.f32 %v6537_v43  ;;  %v6536_v15 = vadd.f32 1.0, %v8811_v45 }
0x2b2c   :  { %8818 = vrcp.f32 %v6536_v15 }
0x2b34   :  { %v8813_v62 = vpop.eup %8812 }
0x2b35   :  { %v6539_v12 = vadd.f32 1.0, %v8813_v62 }
0x2b36   :  { %v8815_v2 = vpop.eup %8814 }
0x2b37   :  { %v8817_v18 = vpop.eup %8816  ;;  %v6538_v20 = vadd.f32 1.0, %v8815_v2  ;;  %v7643_v2 = vld [vmem:[#allocation38 + $0x5] ss:$0 sm:$0xff] }
0x2b38   :  { %6554 = vrot.lane.b32.xlu1 %v8817_v18, %s9733_s8 }
0x2b39   :  { %v8819_v23 = vpop.eup %8818  ;;  %8820 = vrcp.f32 %v6538_v20 }
0x2b3a   :  { %6552 = vrot.lane.b32.xlu0 %v8819_v23, %s9733_s8  ;;  %8822 = vrcp.f32 %v6539_v12 }
0x2b46   :  { %v8821_v29 = vpop.eup %8820 }
0x2b47   :  { %6556 = vrot.lane.b32.xlu1 %v8821_v29, %s9733_s8  ;;  %v8823_v35 = vpop.eup %8822  ;;  %v7644_v29 = vld [vmem:[#allocation38 + $0x6] ss:$0 sm:$0xff] }
0x2b4b   :  { %6558 = vrot.lane.b32.xlu1 %v8823_v35, %s9733_s8  ;;  %s9746_s8 = smov [#allocation57]  }
0x2b4c   :  { %s7359_s20 = sshll.u32 %s9746_s8, 4  ;;  %s7360_s20 = int_to_ptr.vmem [resolvable:$true] %s7359_s20 }
0x2b4d   :  { %s9574_s16 = scalar_lea.vmem %s7360_s20, 512  ;;  %p9579_p8 = scmp.lt.s32.totalorder %s7360_s20, %s7360_s20 }
0x2b4e   :  { %p9575_p7 = scmp.ne.s32.totalorder %s7360_s20, %s9574_s16  ;;  %p9580_p9 = scmp.lt.s32.totalorder %s9574_s16, %s9574_s16 }
0x2b50   :  { %p9581_p10 = por %p9580_p9, %p9579_p8 }
0x2b52   :  { %p9582_p11 = pnand %p9581_p10, %p9575_p7 }
0x2baa   :  { %v6555_v36 = vpop.permute.xlu1 %6554 }
0x2bab   :  { %v6565_v40 = vmul.f32 %v6555_v36, %v6511_v56 }
0x2bac   :  { %v6553_v37 = vpop.permute.xlu0 %6552 }
0x2bad   :  { %v6573_v48 = vrot.slane %v6565_v40, 5  ;;  %v6564_v59 = vmul.f32 %v6553_v37, %v6506_v51 }
0x2baf   :  { %v6586_v50 = vsel %vm3254_vm5, %v6573_v48, 0.0  ;;  %v6572_v41 = vrot.slane %v6564_v59, 5 }
0x2bb0   :  { %6590 = vst.msk [vmem:[#allocation2 + $0x10] sm:$0x3f] %vm3273_vm6, %v6586_v50 }
0x2bb1   :  { %v6574_v44 = vsel %vm3254_vm5, %v6572_v41, %v6573_v48  ;;  %v6584_v22 = vsel %vm3254_vm5, 0.0, %v6572_v41 }
0x2bb2   :  { %6588 = vst.msk [vmem:[#allocation2] sm:$0xff] %vm700_vm0, %v6584_v22  ;;  %6589 = vst.msk [vmem:[#allocation2 + $0x8] sm:$0xff] %vm700_vm0, %v6574_v44 }
0x2bb9   :  { %v6557_v58 = vpop.permute.xlu1 %6556  ;;  %v6601_v3 = vld [vmem:[#allocation2] sm:$0xff]  ;;  %v6602_v52 = vld [vmem:[#allocation2 + $0x8] sm:$0xff] }
0x2bba   :  { %v6619_v53 = vld [vmem:[#allocation2 + $0x1] sm:$0xff]  ;;  %v6566_v5 = vmul.f32 %v6557_v58, %v6516_v13  ;;  %v6611_v30 = vmul.f32 %v7638_v49, %v6601_v3  ;;  %v6612_v34 = vmul.f32 %v7638_v49, %v6602_v52  ;;  %v6620_v60 = vld [vmem:[#allocation2 + $0x9] sm:$0xff] }
0x2bbb   :  { %v6629_v32 = vmul.f32 %v7639_v46, %v6619_v53  ;;  %v6637_v54 = vld [vmem:[#allocation2 + $0x2] sm:$0xff]  ;;  %v6638_v61 = vld [vmem:[#allocation2 + $0xa] sm:$0xff]  ;;  %v6630_v4 = vmul.f32 %v7639_v46, %v6620_v60 }
0x2bbc   :  { %v6575_v10 = vrot.slane %v6566_v5, 5  ;;  %v6647_v6 = vmul.f32 %v11049_v57, %v6637_v54  ;;  %v6648_v21 = vmul.f32 %v11049_v57, %v6638_v61  ;;  %v6655_v24 = vld [vmem:[#allocation2 + $0x3] sm:$0xff]  ;;  %v6656_v51 = vld [vmem:[#allocation2 + $0xb] sm:$0xff] }
0x2bbd   :  { %v6633_v63 = vadd.f32 %v6629_v32, %v6611_v30  ;;  %v6559_v31 = vpop.permute.xlu1 %6558  ;;  %v6634_v56 = vadd.f32 %v6630_v4, %v6612_v34  ;;  %v6665_v11 = vmul.f32 %v7641_v7, %v6655_v24  ;;  %v6666_v13 = vmul.f32 %v7641_v7, %v6656_v51  ;;  %v6673_v14 = vld [vmem:[#allocation2 + $0x4] sm:$0xff]  ;;  %v6674_v47 = vld [vmem:[#allocation2 + $0xc] sm:$0xff] }
0x2bbe   :  { %v6585_v39 = vsel %vm3254_vm5, 0.0, %v6575_v10  ;;  %v6567_v9 = vmul.f32 %v6559_v31, %v11036_v25  ;;  %v6683_v25 = vmul.f32 %v7642_v16, %v6673_v14  ;;  %v6684_v62 = vmul.f32 %v7642_v16, %v6674_v47  ;;  %v6691_v18 = vld [vmem:[#allocation2 + $0x5] sm:$0xff]  ;;  %v6692_v20 = vld [vmem:[#allocation2 + $0xd] sm:$0xff] }
0x2bbf   :  { %v6651_v8 = vadd.f32 %v6647_v6, %v6633_v63  ;;  %6591 = vst.msk [vmem:[#allocation2 + $0x18] sm:$0xff] %vm700_vm0, %v6585_v39  ;;  %v6652_v17 = vadd.f32 %v6648_v21, %v6634_v56  ;;  %v6701_v27 = vmul.f32 %v7643_v2, %v6691_v18  ;;  %v6702_v19 = vmul.f32 %v7643_v2, %v6692_v20  ;;  %v6709_v33 = vld [vmem:[#allocation2 + $0x6] sm:$0xff]  ;;  %v6710_v35 = vld [vmem:[#allocation2 + $0xe] sm:$0xff]  ;;  %v7645_v56 = vld [vmem:[#allocation39] ss:$0 sm:$0xff] }
0x2bc0   :  { %v6576_v28 = vrot.slane %v6567_v9, 5  ;;  %v6719_v5 = vmul.f32 %v7644_v29, %v6709_v33  ;;  %v6720_v30 = vmul.f32 %v7644_v29, %v6710_v35 }
0x2bc1   :  { %v6669_v45 = vadd.f32 %v6665_v11, %v6651_v8  ;;  %v6670_v15 = vadd.f32 %v6666_v13, %v6652_v17 }
0x2bc2   :  { %v6577_v0 = vsel %vm3254_vm5, %v6575_v10, %v6576_v28  ;;  %v6587_v43 = vsel %vm3254_vm5, %v6576_v28, 0.0 }
0x2bc3   :  { %6593 = vst.msk [vmem:[#allocation2 + $0x28] sm:$0x3f] %vm3273_vm6, %v6587_v43  ;;  %v6687_v23 = vadd.f32 %v6683_v25, %v6669_v45  ;;  %v6688_v12 = vadd.f32 %v6684_v62, %v6670_v15 }
0x2bc4   :  { %6592 = vst.msk [vmem:[#allocation2 + $0x20] sm:$0xff] %vm700_vm0, %v6577_v0 }
0x2bc5   :  { %v6705_v48 = vadd.f32 %v6701_v27, %v6687_v23  ;;  %v6706_v59 = vadd.f32 %v6702_v19, %v6688_v12 }
0x2bc6   :  { %v6603_v26 = vld [vmem:[#allocation2 + $0x18] sm:$0xff] }
0x2bc7   :  { %v6613_v50 = vmul.f32 %v7638_v49, %v6603_v26  ;;  %v6723_v10 = vadd.f32 %v6719_v5, %v6705_v48  ;;  %v6724_v63 = vadd.f32 %v6720_v30, %v6706_v59 }
0x2bc9   :  { %v6734_v11 = vadd.f32 %v7645_v56, %v6723_v10  ;;  %v6735_v13 = vadd.f32 %v7645_v56, %v6724_v63 }
0x2bcb   :  { %v6604_v36 = vld [vmem:[#allocation2 + $0x20] sm:$0xff]  ;;  %v6738_v18 = vsel %vm700_vm0, %v6734_v11, 0.0  ;;  %v6739_v20 = vsel %vm700_vm0, %v6735_v13, 0.0 }
0x2bcc   :  { %v6621_v40 = vld [vmem:[#allocation2 + $0x19] sm:$0xff]  ;;  %v6622_v37 = vld [vmem:[#allocation2 + $0x21] sm:$0xff]  ;;  %v6614_v41 = vmul.f32 %v7638_v49, %v6604_v36  ;;  %v6740_v12 = vadd.f32 %v6739_v20, %v6738_v18 }
0x2bcd   :  { %v6631_v44 = vmul.f32 %v7639_v46, %v6621_v40  ;;  %v6632_v22 = vmul.f32 %v7639_v46, %v6622_v37  ;;  %v6639_v58 = vld [vmem:[#allocation2 + $0x1a] sm:$0xff]  ;;  %v6640_v3 = vld [vmem:[#allocation2 + $0x22] sm:$0xff] }
0x2bce   :  { %v6657_v52 = vld [vmem:[#allocation2 + $0x1b] sm:$0xff]  ;;  %v6658_v53 = vld [vmem:[#allocation2 + $0x23] sm:$0xff]  ;;  %v6649_v32 = vmul.f32 %v11049_v57, %v6639_v58  ;;  %v6650_v54 = vmul.f32 %v11049_v57, %v6640_v3 }
0x2bcf   :  { %v6635_v34 = vadd.f32 %v6631_v44, %v6613_v50  ;;  %v6636_v60 = vadd.f32 %v6632_v22, %v6614_v41  ;;  %v6675_v61 = vld [vmem:[#allocation2 + $0x1c] sm:$0xff]  ;;  %v6676_v4 = vld [vmem:[#allocation2 + $0x24] sm:$0xff]  ;;  %v6667_v31 = vmul.f32 %v7641_v7, %v6657_v52  ;;  %v6668_v46 = vmul.f32 %v7641_v7, %v6658_v53 }
0x2bd0   :  { %v6693_v21 = vld [vmem:[#allocation2 + $0x1d] sm:$0xff]  ;;  %v6694_v24 = vld [vmem:[#allocation2 + $0x25] sm:$0xff]  ;;  %v6685_v9 = vmul.f32 %v7642_v16, %v6675_v61  ;;  %v6686_v8 = vmul.f32 %v7642_v16, %v6676_v4 }
0x2bd1   :  { %v6653_v6 = vadd.f32 %v6649_v32, %v6635_v34  ;;  %v6654_v49 = vadd.f32 %v6650_v54, %v6636_v60  ;;  %v6711_v17 = vld [vmem:[#allocation2 + $0x1e] sm:$0xff]  ;;  %v6712_v28 = vld [vmem:[#allocation2 + $0x26] sm:$0xff]  ;;  %v6703_v47 = vmul.f32 %v7643_v2, %v6693_v21  ;;  %v6704_v0 = vmul.f32 %v7643_v2, %v6694_v24 }
0x2bd2   :  { %v6721_v15 = vmul.f32 %v7644_v29, %v6711_v17  ;;  %v6722_v25 = vmul.f32 %v7644_v29, %v6712_v28  ;;  %v7646_v21 = vld [vmem:[#allocation41] ss:$0 sm:$0xff] }
0x2bd3   :  { %v6671_v51 = vadd.f32 %v6667_v31, %v6653_v6  ;;  %v6672_v39 = vadd.f32 %v6668_v46, %v6654_v49 }
0x2bd5   :  { %v6689_v57 = vadd.f32 %v6685_v9, %v6671_v51  ;;  %v6690_v14 = vadd.f32 %v6686_v8, %v6672_v39  ;;  %v7647_v8 = vld [vmem:[#allocation42] ss:$0 sm:$0xff] }
0x2bd7   :  { %v6707_v43 = vadd.f32 %v6703_v47, %v6689_v57  ;;  %v6708_v45 = vadd.f32 %v6704_v0, %v6690_v14 }
0x2bd9   :  { %v6725_v7 = vadd.f32 %v6721_v15, %v6707_v43  ;;  %v6726_v62 = vadd.f32 %v6722_v25, %v6708_v45 }
0x2bdb   :  { %v6736_v23 = vadd.f32 %v7645_v56, %v6725_v7  ;;  %v6737_v16 = vadd.f32 %v7645_v56, %v6726_v62 }
0x2bdd   :  { %v6741_v26 = vsel %vm700_vm0, %v6736_v23, 0.0  ;;  %v6743_v19 = vsel %vm700_vm0, %v6737_v16, 0.0 }
0x2bde   :  { %v6742_v27 = vadd.f32 %v6741_v26, %v6740_v12 }
0x2be0   :  { %v6744_v33 = vadd.f32 %v6743_v19, %v6742_v27 }
0x2be2   :  { %v6745_v2 = vrot.slane %v6744_v33, 4 }
0x2be4   :  { %v6746_v35 = vadd.f32 %v6745_v2, %v6744_v33 }
0x2be6   :  { %v6747_v36 = vrot.slane %v6746_v35, 2 }
0x2be8   :  { %v6748_v40 = vadd.f32 %v6747_v36, %v6746_v35 }
0x2bea   :  { %v6749_v29 = vrot.slane %v6748_v40, 1 }
0x2bec   :  { %v6750_v37 = vadd.f32 %v6749_v29, %v6748_v40 }
0x2bee   :  { %v6751_v48 = vmul.f32 0.03125, %v6750_v37 }
0x2bf0   :  { %v6752_v59 = vsub.f32 %v6734_v11, %v6751_v48  ;;  %v6753_v50 = vsub.f32 %v6735_v13, %v6751_v48  ;;  %v6754_v41 = vsub.f32 %v6736_v23, %v6751_v48  ;;  %v6755_v44 = vsub.f32 %v6737_v16, %v6751_v48 }
0x2bf2   :  { %v6756_v22 = vmul.f32 %v6752_v59, %v6752_v59  ;;  %v6757_v58 = vmul.f32 %v6753_v50, %v6753_v50  ;;  %v6758_v3 = vmul.f32 %v6754_v41, %v6754_v41  ;;  %v6759_v52 = vmul.f32 %v6755_v44, %v6755_v44 }
0x2bf4   :  { %v6760_v53 = vsel %vm700_vm0, %v6756_v22, 0.0  ;;  %v6761_v5 = vsel %vm700_vm0, %v6757_v58, 0.0  ;;  %v6763_v34 = vsel %vm700_vm0, %v6758_v3, 0.0  ;;  %v6765_v32 = vsel %vm700_vm0, %v6759_v52, 0.0 }
0x2bf5   :  { %v6762_v30 = vadd.f32 %v6761_v5, %v6760_v53 }
0x2bf7   :  { %v6764_v60 = vadd.f32 %v6763_v34, %v6762_v30 }
0x2bf9   :  { %v6766_v54 = vadd.f32 %v6765_v32, %v6764_v60 }
0x2bfb   :  { %v6767_v61 = vrot.slane %v6766_v54, 4 }
0x2bfd   :  { %v6768_v4 = vadd.f32 %v6767_v61, %v6766_v54 }
0x2bff   :  { %v6769_v10 = vrot.slane %v6768_v4, 2 }
0x2c01   :  { %v6770_v63 = vadd.f32 %v6769_v10, %v6768_v4 }
0x2c03   :  { %v6771_v6 = vrot.slane %v6770_v63, 1 }
0x2c05   :  { %v6772_v49 = vadd.f32 %v6771_v6, %v6770_v63 }
0x2c07   :  { %v6773_v31 = vmul.f32 0.03125, %v6772_v49 }
0x2c09   :  { %v6774_v46 = vadd.f32 1e-05, %v6773_v31 }
0x2c0b   :  { %8824 = vrsqrt.f32 %v6774_v46 }
0x2c18   :  { %v8825_v56 = vpop.eup %8824 }
0x2c19   :  { %v6776_v24 = vmul.f32 %v8825_v56, %v6752_v59  ;;  %v6777_v51 = vmul.f32 %v8825_v56, %v6753_v50  ;;  %v6778_v39 = vmul.f32 %v8825_v56, %v6754_v41  ;;  %v6779_v9 = vmul.f32 %v8825_v56, %v6755_v44  ;;  %v7652_v44 = vld [vmem:[#allocation45] ss:$0 sm:$0xff] }
0x2c1b   :  { %v6787_v17 = vmul.f32 %v7646_v21, %v6776_v24  ;;  %v6788_v28 = vmul.f32 %v7646_v21, %v6777_v51  ;;  %v6789_v11 = vmul.f32 %v7646_v21, %v6778_v39  ;;  %v6790_v13 = vmul.f32 %v7646_v21, %v6779_v9 }
0x2c1d   :  { %v6798_v57 = vadd.f32 %v7647_v8, %v6787_v17  ;;  %v6799_v14 = vadd.f32 %v7647_v8, %v6788_v28  ;;  %v6800_v47 = vadd.f32 %v7647_v8, %v6789_v11  ;;  %v6801_v0 = vadd.f32 %v7647_v8, %v6790_v13 }
0x2c1f   :  { %v6802_v43 = vsub.f32 0.0, %v6798_v57  ;;  %v6803_v45 = vsub.f32 0.0, %v6799_v14  ;;  %v6804_v15 = vsub.f32 0.0, %v6800_v47  ;;  %v6805_v25 = vsub.f32 0.0, %v6801_v0 }
0x2c21   :  { %v6806_v7 = vmul.f32 1.442695, %v6802_v43  ;;  %v6808_v62 = vmul.f32 1.442695, %v6803_v45  ;;  %v6810_v18 = vmul.f32 1.442695, %v6804_v15 }
0x2c22   :  { %v6812_v20 = vmul.f32 1.442695, %v6805_v25  ;;  %v7020_v43 = vld [vmem:[#allocation50] sm:$0xff] }
0x2c23   :  { %8826 = vpow2.f32 %v6806_v7 }
0x2c24   :  { %8828 = vpow2.f32 %v6808_v62 }
0x2c25   :  { %8830 = vpow2.f32 %v6810_v18 }
0x2c26   :  { %8832 = vpow2.f32 %v6812_v20 }
0x2c30   :  { %v8827_v23 = vpop.eup %8826 }
0x2c31   :  { %v8829_v16 = vpop.eup %8828  ;;  %v6814_v12 = vadd.f32 1.0, %v8827_v23 }
0x2c32   :  { %v8831_v26 = vpop.eup %8830  ;;  %v6815_v27 = vadd.f32 1.0, %v8829_v16 }
0x2c33   :  { %v8833_v19 = vpop.eup %8832  ;;  %8834 = vrcp.f32 %v6814_v12  ;;  %v6816_v33 = vadd.f32 1.0, %v8831_v26 }
0x2c34   :  { %8836 = vrcp.f32 %v6815_v27  ;;  %v6817_v2 = vadd.f32 1.0, %v8833_v19 }
0x2c35   :  { %8838 = vrcp.f32 %v6816_v33 }
0x2c36   :  { %8840 = vrcp.f32 %v6817_v2  ;;  %v7653_v2 = vld [vmem:[#allocation47] ss:$0 sm:$0xff] }
0x2c40   :  { %v8835_v35 = vpop.eup %8834 }
0x2c41   :  { %v8837_v36 = vpop.eup %8836  ;;  %v6826_v40 = vmul.f32 %v8835_v35, %v6798_v57 }
0x2c42   :  { %v8839_v29 = vpop.eup %8838  ;;  %v6827_v37 = vmul.f32 %v8837_v36, %v6799_v14  ;;  %v7023_v14 = vld [vmem:[#allocation50 + $0x18] sm:$0xff] }
0x2c43   :  { %v8841_v48 = vpop.eup %8840  ;;  %8377 = vmatprep.mubr.msk.f32.mxu0 %vm700_vm0, %v6826_v40  ;;  %v6828_v59 = vmul.f32 %v8839_v29, %v6800_v47  ;;  %v7022_v47 = vld [vmem:[#allocation50 + $0x10] sm:$0xff]  ;;  %8383 = vmatprep.subr.mxu1 %v7023_v14  ;;  %v7654_v29 = vld [vmem:[#allocation48] ss:$0 sm:$0xff] }
0x2c44   :  { %8378 = vmatmul.mubr.msk.f32.vlgmr.msra.gmra.mxu0 %vm700_vm0, %v6827_v37  ;;  %v6829_v50 = vmul.f32 %v8841_v48, %v6801_v0  ;;  %8384 = vmatpush3.msra.mxu1 %v7023_v14  ;;  %v7021_v0 = vld [vmem:[#allocation50 + $0x8] sm:$0xff] }
0x2c45   :  { %8380 = vmatprep.mubr.msk.f32.mxu0 %vm700_vm0, %v6828_v59  ;;  %8385 = vmatprep.subr.mxu1 %v7022_v47 }
0x2c46   :  { %8386 = vmatpush3.msra.mxu1 %v7022_v47 }
0x2c47   :  { %8387 = vmatprep.subr.mxu1 %v7021_v0 }
0x2c48   :  { %8381 = vmatmul.mubr.msk.f32.gmra.mxu0 %vm700_vm0, %v6829_v50  ;;  %8388 = vmatpush3.msra.mxu1 %v7021_v0 }
0x2c49   :  { %8389 = vmatprep.subr.mxu1 %v7020_v43 }
0x2c4a   :  { %8390 = vmatpush3.msra.mxu1 %v7020_v43 }
0x2d04   :  { %v8379_v41 = vpop.f32.mrf.mxu0 }
0x2d05   :  { %v6932_v22 = vadd.f32 %v8379_v41, %v11005_v1 }
0x2d06   :  { %v6912_v58 = vpop.f32.mrf.mxu0 }
0x2d07   :  { %v11075_v3 = vadd.f32 %v7652_v44, %v6932_v22  ;;  %v6931_v52 = vadd.f32 %v6912_v58, %v11008_v55 }
0x2d08   :  { %v8382_v53 = vpop.f32.mrf.mxu0 }
0x2d09   :  { %v11078_v5 = vadd.f32 %v7652_v44, %v6931_v52  ;;  %v6951_v30 = vsel %vm700_vm0, %v11075_v3, 0.0  ;;  %v6934_v60 = vadd.f32 %v8382_v53, %v11018_v42 }
0x2d0a   :  { %6952 = vadd.xlane.f32.xlu1 %v6951_v30  ;;  %v6922_v34 = vpop.f32.mrf.mxu0 }
0x2d0b   :  { %v6933_v32 = vadd.f32 %v6922_v34, %v11016_v38  ;;  %v6948_v1 = vsel %vm700_vm0, %v11078_v5, 0.0  ;;  %v11088_v61 = vadd.f32 %v7652_v44, %v6934_v60  ;;  %v7163_v34 = vld [vmem:[%s11243_s1 + $0x38] sm:$0xff]  ;;  %v7162_v60 = vld [vmem:[%s11243_s1 + $0x30] sm:$0xff] }
0x2d0c   :  { %6949 = vadd.xlane.f32.xlu0 %v6948_v1  ;;  %8397 = vmatprep.subr.mxu0 %v7163_v34  ;;  %v7160_v1 = vld [vmem:[%s11243_s1 + $0x20] sm:$0xff] }
0x2d0d   :  { %v11086_v54 = vadd.f32 %v7652_v44, %v6933_v32  ;;  %v6957_v4 = vsel %vm700_vm0, %v11088_v61, 0.0  ;;  %8398 = vmatpush3.msra.mxu0 %v7163_v34  ;;  %v7161_v32 = vld [vmem:[%s11243_s1 + $0x28] sm:$0xff] }
0x2d0e   :  { %8399 = vmatprep.subr.mxu0 %v7162_v60 }
0x2d0f   :  { %v6954_v55 = vsel %vm700_vm0, %v11086_v54, 0.0  ;;  %8400 = vmatpush3.msra.mxu0 %v7162_v60 }
0x2d10   :  { %6955 = vadd.xlane.f32.xlu0 %v6954_v55  ;;  %8401 = vmatprep.subr.mxu0 %v7161_v32  ;;  %v7159_v55 = vld [vmem:[%s11243_s1 + $0x18] sm:$0xff] }
0x2d11   :  { %8402 = vmatpush3.msra.mxu0 %v7161_v32 }
0x2d12   :  { %8403 = vmatprep.subr.mxu0 %v7160_v1 }
0x2d13   :  { %8404 = vmatpush3.msra.mxu0 %v7160_v1 }
0x2d14   :  { %6958 = vadd.xlane.f32.xlu0 %v6957_v4  ;;  %8405 = vmatprep.subr.mxu0 %v7159_v55  ;;  %v7158_v4 = vld [vmem:[%s11243_s1 + $0x10] sm:$0xff] }
0x2d15   :  { %8406 = vmatpush3.msra.mxu0 %v7159_v55 }
0x2d16   :  { %8407 = vmatprep.subr.mxu0 %v7158_v4 }
0x2d17   :  { %8408 = vmatpush3.msra.mxu0 %v7158_v4 }
0x2d93   :  { %v6953_v10 = vpop.xlane.xlu1 %6952 }
0x2d94   :  { %v6961_v42 = vmul.f32 0.03125, %v6953_v10  ;;  %v7157_v10 = vld [vmem:[%s11243_s1 + $0x8] sm:$0xff] }
0x2d95   :  { %v6950_v63 = vpop.xlane.xlu0 %6949  ;;  %8409 = vmatprep.subr.mxu0 %v7157_v10 }
0x2d96   :  { %v6965_v38 = vsub.f32 %v11075_v3, %v6961_v42  ;;  %v6960_v6 = vmul.f32 0.03125, %v6950_v63  ;;  %8410 = vmatpush3.msra.mxu0 %v7157_v10  ;;  %v7156_v42 = vld [vmem:[%s11243_s1] sm:$0xff]  ;;  %v7655_v63 = vld [vmem:[#allocation51] ss:$0 sm:$0xff] }
0x2d97   :  { %8411 = vmatprep.subr.mxu0 %v7156_v42 }
0x2d98   :  { %v6964_v49 = vsub.f32 %v11078_v5, %v6960_v6  ;;  %v6969_v31 = vmul.f32 %v6965_v38, %v6965_v38  ;;  %8412 = vmatpush3.msra.mxu0 %v7156_v42 }
0x2d99   :  { %v6956_v46 = vpop.xlane.xlu0 %6955 }
0x2d9a   :  { %v6962_v56 = vmul.f32 0.03125, %v6956_v46  ;;  %v6975_v21 = vsel %vm700_vm0, %v6969_v31, 0.0  ;;  %v6968_v24 = vmul.f32 %v6964_v49, %v6964_v49 }
0x2d9b   :  { %6976 = vadd.xlane.f32.xlu1 %v6975_v21 }
0x2d9c   :  { %v6966_v51 = vsub.f32 %v11086_v54, %v6962_v56  ;;  %v6972_v39 = vsel %vm700_vm0, %v6968_v24, 0.0 }
0x2d9d   :  { %6973 = vadd.xlane.f32.xlu0 %v6972_v39  ;;  %v6959_v9 = vpop.xlane.xlu0 %6958 }
0x2d9e   :  { %v6963_v8 = vmul.f32 0.03125, %v6959_v9  ;;  %v6970_v17 = vmul.f32 %v6966_v51, %v6966_v51 }
0x2da0   :  { %v6967_v28 = vsub.f32 %v11088_v61, %v6963_v8  ;;  %v6978_v11 = vsel %vm700_vm0, %v6970_v17, 0.0 }
0x2da1   :  { %6979 = vadd.xlane.f32.xlu0 %v6978_v11 }
0x2da2   :  { %v6971_v13 = vmul.f32 %v6967_v28, %v6967_v28 }
0x2da4   :  { %v6981_v57 = vsel %vm700_vm0, %v6971_v13, 0.0 }
0x2da5   :  { %6982 = vadd.xlane.f32.xlu1 %v6981_v57 }
0x2e24   :  { %v6977_v45 = vpop.xlane.xlu1 %6976 }
0x2e25   :  { %v6985_v15 = vmul.f32 0.03125, %v6977_v45 }
0x2e26   :  { %v6974_v25 = vpop.xlane.xlu0 %6973 }
0x2e27   :  { %v6989_v7 = vadd.f32 1e-05, %v6985_v15  ;;  %v6984_v62 = vmul.f32 0.03125, %v6974_v25 }
0x2e29   :  { %8842 = vrsqrt.f32 %v6989_v7  ;;  %v6988_v18 = vadd.f32 1e-05, %v6984_v62 }
0x2e2a   :  { %v6980_v20 = vpop.xlane.xlu0 %6979 }
0x2e2b   :  { %8844 = vrsqrt.f32 %v6988_v18  ;;  %v6986_v23 = vmul.f32 0.03125, %v6980_v20 }
0x2e2d   :  { %v6990_v16 = vadd.f32 1e-05, %v6986_v23 }
0x2e2e   :  { %v6983_v12 = vpop.xlane.xlu1 %6982 }
0x2e2f   :  { %8846 = vrsqrt.f32 %v6990_v16  ;;  %v6987_v26 = vmul.f32 0.03125, %v6983_v12 }
0x2e31   :  { %v6991_v27 = vadd.f32 1e-05, %v6987_v26 }
0x2e33   :  { %8848 = vrsqrt.f32 %v6991_v27  ;;  %v7660_v27 = vld [vmem:[#allocation53] ss:$0 sm:$0xff] }
0x2e36   :  { %v8843_v19 = vpop.eup %8842 }
0x2e37   :  { %v6997_v33 = vmul.f32 %v8843_v19, %v6965_v38 }
0x2e38   :  { %v8845_v35 = vpop.eup %8844 }
0x2e39   :  { %v6996_v36 = vmul.f32 %v8845_v35, %v6964_v49  ;;  %v7007_v40 = vmul.f32 %v7653_v2, %v6997_v33 }
0x2e3b   :  { %v7006_v37 = vmul.f32 %v7653_v2, %v6996_v36  ;;  %v7017_v41 = vadd.f32 %v7654_v29, %v7007_v40 }
0x2e3c   :  { %v8847_v48 = vpop.eup %8846 }
0x2e3d   :  { %v7016_v59 = vadd.f32 %v7654_v29, %v7006_v37  ;;  %v6998_v50 = vmul.f32 %v8847_v48, %v6966_v51 }
0x2e3f   :  { %8391 = vmatprep.mubr.msk.f32.mxu1 %vm700_vm0, %v7016_v59  ;;  %v7008_v44 = vmul.f32 %v7653_v2, %v6998_v50 }
0x2e40   :  { %v8849_v22 = vpop.eup %8848  ;;  %8392 = vmatmul.mubr.msk.f32.vlgmr.msra.gmra.mxu1 %vm700_vm0, %v7017_v41 }
0x2e41   :  { %v7018_v58 = vadd.f32 %v7654_v29, %v7008_v44  ;;  %v6999_v52 = vmul.f32 %v8849_v22, %v6967_v28 }
0x2e43   :  { %8394 = vmatprep.mubr.msk.f32.mxu1 %vm700_vm0, %v7018_v58  ;;  %v7009_v53 = vmul.f32 %v7653_v2, %v6999_v52 }
0x2e45   :  { %v7019_v30 = vadd.f32 %v7654_v29, %v7009_v53 }
0x2e47   :  { %8395 = vmatmul.mubr.msk.f32.gmra.mxu1 %vm700_vm0, %v7019_v30 }
0x2f00   :  { %v8393_v38 = vpop.f32.mrf.mxu1 }
0x2f01   :  { %v7115_v6 = vadd.f32 %v8393_v38, %v7655_v63 }
0x2f02   :  { %v7109_v49 = vpop.f32.mrf.mxu1 }
0x2f03   :  { %v7129_v31 = vsub.f32 0.0, %v7115_v6  ;;  %v7110_v46 = vadd.f32 %v7655_v63, %v7109_v49 }
0x2f05   :  { %v7134_v56 = vmul.f32 1.442695, %v7129_v31  ;;  %v7128_v21 = vsub.f32 0.0, %v7110_v46 }
0x2f07   :  { %8850 = vpow2.f32 %v7134_v56  ;;  %v7132_v24 = vmul.f32 1.442695, %v7128_v21  ;;  %v8396_v51 = vpop.f32.mrf.mxu1 }
0x2f08   :  { %v7125_v39 = vadd.f32 %v8396_v51, %v7655_v63 }
0x2f09   :  { %8852 = vpow2.f32 %v7132_v24  ;;  %v7119_v9 = vpop.f32.mrf.mxu1 }
0x2f0a   :  { %v7131_v8 = vsub.f32 0.0, %v7125_v39  ;;  %v7120_v17 = vadd.f32 %v7655_v63, %v7119_v9 }
0x2f0c   :  { %v7138_v28 = vmul.f32 1.442695, %v7131_v8  ;;  %v7130_v11 = vsub.f32 0.0, %v7120_v17 }
0x2f0e   :  { %8854 = vpow2.f32 %v7138_v28  ;;  %v7136_v13 = vmul.f32 1.442695, %v7130_v11 }
0x2f10   :  { %8856 = vpow2.f32 %v7136_v13 }
0x2f14   :  { %v8851_v57 = vpop.eup %8850 }
0x2f15   :  { %v7141_v14 = vadd.f32 1.0, %v8851_v57 }
0x2f16   :  { %v8853_v47 = vpop.eup %8852 }
0x2f17   :  { %v7140_v0 = vadd.f32 1.0, %v8853_v47  ;;  %8858 = vrcp.f32 %v7141_v14 }
0x2f19   :  { %8860 = vrcp.f32 %v7140_v0 }
0x2f1b   :  { %v8855_v43 = vpop.eup %8854 }
0x2f1c   :  { %v7143_v45 = vadd.f32 1.0, %v8855_v43 }
0x2f1d   :  { %v8857_v15 = vpop.eup %8856 }
0x2f1e   :  { %v7142_v25 = vadd.f32 1.0, %v8857_v15  ;;  %8862 = vrcp.f32 %v7143_v45  ;;  %v7665_v15 = vld [vmem:[#allocation54] ss:$0 sm:$0xff] }
0x2f20   :  { %8864 = vrcp.f32 %v7142_v25 }
0x2f24   :  { %v8859_v7 = vpop.eup %8858 }
0x2f25   :  { %v7153_v20 = vmul.f32 %v8859_v7, %v7115_v6 }
0x2f26   :  { %v8861_v62 = vpop.eup %8860 }
0x2f27   :  { %v7152_v18 = vmul.f32 %v8861_v62, %v7110_v46  ;;  %v7666_v62 = vld [vmem:[#allocation56] ss:$0 sm:$0xff] }
0x2f29   :  { %8413 = vmatprep.mubr.msk.f32.mxu0 %vm925_vm1, %v7152_v18 }
0x2f2a   :  { %8414 = vmatmul.mubr.msk.f32.vlgmr.msra.gmra.mxu0 %vm925_vm1, %v7153_v20 }
0x2f2b   :  { %v8863_v23 = vpop.eup %8862 }
0x2f2c   :  { %v7155_v26 = vmul.f32 %v8863_v23, %v7125_v39 }
0x2f2d   :  { %v8865_v16 = vpop.eup %8864 }
0x2f2e   :  { %v7154_v12 = vmul.f32 %v8865_v16, %v7120_v17 }
0x2f30   :  { %8416 = vmatprep.mubr.msk.f32.mxu0 %vm925_vm1, %v7154_v12 }
0x2f31   :  { %8417 = vmatmul.mubr.msk.f32.gmra.mxu0 %vm925_vm1, %v7155_v26 }
0x2fea   :  { %v8415_v19 = vpop.f32.mrf.mxu0 }
0x2feb   :  { %v7255_v33 = vadd.f32 %v8415_v19, %v7660_v27 }
0x2fec   :  { %v7249_v2 = vpop.f32.mrf.mxu0 }
0x2fed   :  { %v7269_v35 = vmul.f32 0.5, %v7255_v33  ;;  %v7250_v36 = vadd.f32 %v7660_v27, %v7249_v2 }
0x2fef   :  { %v7273_v40 = vadd.f32 %v7269_v35, %v11075_v3  ;;  %v7268_v29 = vmul.f32 0.5, %v7250_v36 }
0x2ff1   :  { %v7272_v37 = vadd.f32 %v7268_v29, %v11078_v5  ;;  %v8418_v48 = vpop.f32.mrf.mxu0  ;;  %v7281_v59 = vsel %vm700_vm0, %v7273_v40, 0.0 }
0x2ff2   :  { %v7265_v50 = vadd.f32 %v8418_v48, %v7660_v27  ;;  %7282 = vadd.xlane.f32.xlu1 %v7281_v59 }
0x2ff3   :  { %v7259_v41 = vpop.f32.mrf.mxu0  ;;  %v7278_v44 = vsel %vm700_vm0, %v7272_v37, 0.0 }
0x2ff4   :  { %v7271_v22 = vmul.f32 0.5, %v7265_v50  ;;  %v7260_v58 = vadd.f32 %v7660_v27, %v7259_v41  ;;  %7279 = vadd.xlane.f32.xlu0 %v7278_v44 }
0x2ff6   :  { %v7275_v52 = vadd.f32 %v7271_v22, %v11088_v61  ;;  %v7270_v53 = vmul.f32 0.5, %v7260_v58 }
0x2ff8   :  { %v7274_v30 = vadd.f32 %v7270_v53, %v11086_v54  ;;  %v7287_v3 = vsel %vm700_vm0, %v7275_v52, 0.0 }
0x2ff9   :  { %7288 = vadd.xlane.f32.xlu1 %v7287_v3 }
0x2ffa   :  { %v7284_v5 = vsel %vm700_vm0, %v7274_v30, 0.0 }
0x2ffb   :  { %7285 = vadd.xlane.f32.xlu0 %v7284_v5 }
0x307b   :  { %v7283_v34 = vpop.xlane.xlu1 %7282 }
0x307c   :  { %v7291_v60 = vmul.f32 0.03125, %v7283_v34 }
0x307d   :  { %v7280_v32 = vpop.xlane.xlu0 %7279 }
0x307e   :  { %v7295_v1 = vsub.f32 %v7273_v40, %v7291_v60  ;;  %v7290_v55 = vmul.f32 0.03125, %v7280_v32 }
0x3080   :  { %v7294_v4 = vsub.f32 %v7272_v37, %v7290_v55  ;;  %v7299_v10 = vmul.f32 %v7295_v1, %v7295_v1 }
0x3082   :  { %v7289_v42 = vpop.xlane.xlu1 %7288  ;;  %v7305_v63 = vsel %vm700_vm0, %v7299_v10, 0.0  ;;  %v7298_v61 = vmul.f32 %v7294_v4, %v7294_v4 }
0x3083   :  { %v7293_v38 = vmul.f32 0.03125, %v7289_v42  ;;  %7306 = vadd.xlane.f32.xlu1 %v7305_v63 }
0x3084   :  { %v7286_v54 = vpop.xlane.xlu0 %7285  ;;  %v7302_v6 = vsel %vm700_vm0, %v7298_v61, 0.0 }
0x3085   :  { %v7297_v49 = vsub.f32 %v7275_v52, %v7293_v38  ;;  %v7292_v31 = vmul.f32 0.03125, %v7286_v54  ;;  %7303 = vadd.xlane.f32.xlu0 %v7302_v6 }
0x3087   :  { %v7296_v46 = vsub.f32 %v7274_v30, %v7292_v31  ;;  %v7301_v56 = vmul.f32 %v7297_v49, %v7297_v49 }
0x3089   :  { %v7311_v21 = vsel %vm700_vm0, %v7301_v56, 0.0  ;;  %v7300_v24 = vmul.f32 %v7296_v46, %v7296_v46 }
0x308a   :  { %7312 = vadd.xlane.f32.xlu1 %v7311_v21 }
0x308b   :  { %v7308_v51 = vsel %vm700_vm0, %v7300_v24, 0.0 }
0x308c   :  { %7309 = vadd.xlane.f32.xlu0 %v7308_v51 }
0x310c   :  { %v7307_v39 = vpop.xlane.xlu1 %7306 }
0x310d   :  { %v7315_v9 = vmul.f32 0.03125, %v7307_v39 }
0x310e   :  { %v7304_v8 = vpop.xlane.xlu0 %7303 }
0x310f   :  { %v7319_v17 = vadd.f32 1e-05, %v7315_v9  ;;  %v7314_v28 = vmul.f32 0.03125, %v7304_v8 }
0x3111   :  { %8866 = vrsqrt.f32 %v7319_v17  ;;  %v7318_v11 = vadd.f32 1e-05, %v7314_v28 }
0x3113   :  { %8868 = vrsqrt.f32 %v7318_v11  ;;  %v7313_v13 = vpop.xlane.xlu1 %7312 }
0x3114   :  { %v7317_v57 = vmul.f32 0.03125, %v7313_v13 }
0x3115   :  { %v7310_v14 = vpop.xlane.xlu0 %7309 }
0x3116   :  { %v7321_v47 = vadd.f32 1e-05, %v7317_v57  ;;  %v7316_v0 = vmul.f32 0.03125, %v7310_v14 }
0x3118   :  { %8870 = vrsqrt.f32 %v7321_v47  ;;  %v7320_v43 = vadd.f32 1e-05, %v7316_v0 }
0x311a   :  { %8872 = vrsqrt.f32 %v7320_v43 }
0x311e   :  { %v8867_v45 = vpop.eup %8866 }
0x311f   :  { %v7327_v25 = vmul.f32 %v8867_v45, %v7295_v1 }
0x3120   :  { %v8869_v7 = vpop.eup %8868 }
0x3121   :  { %v7326_v18 = vmul.f32 %v8869_v7, %v7294_v4  ;;  %v7337_v20 = vmul.f32 %v7665_v15, %v7327_v25 }
0x3123   :  { %v7336_v23 = vmul.f32 %v7665_v15, %v7326_v18  ;;  %v7347_v16 = vadd.f32 %v7666_v62, %v7337_v20 }
0x3125   :  { %v8871_v12 = vpop.eup %8870  ;;  %v7346_v26 = vadd.f32 %v7666_v62, %v7336_v23  ;;  %7351 = vst.msk [vmem:[#allocation57 + $0x8] sm:$0xff] %vm700_vm0, %v7347_v16 }
0x3126   :  { %v7329_v27 = vmul.f32 %v8871_v12, %v7297_v49 }
0x3127   :  { %v8873_v19 = vpop.eup %8872  ;;  %7350 = vst.msk [vmem:[#allocation57] sm:$0xff] %vm700_vm0, %v7346_v26 }
0x3128   :  { %v7328_v33 = vmul.f32 %v8873_v19, %v7296_v46  ;;  %v7339_v2 = vmul.f32 %v7665_v15, %v7329_v27 }
0x312a   :  { %v7338_v35 = vmul.f32 %v7665_v15, %v7328_v33  ;;  %v7349_v36 = vadd.f32 %v7666_v62, %v7339_v2 }
0x312c   :  { %v7348_v40 = vadd.f32 %v7666_v62, %v7338_v35  ;;  %7353 = vst.msk [vmem:[#allocation57 + $0x18] sm:$0xff] %vm700_vm0, %v7349_v36 }
0x312e   :  { %7352 = vst.msk [vmem:[#allocation57 + $0x10] sm:$0xff] %vm700_vm0, %v7348_v40 }
0x312f   :  { %9585 = shalt.err (!%p9582_p11)
}
0x3130   :  { %7365 = dma.vmem_to_hbm [thread:$0]  %s7360_s20, 512, %s10065_s19, [#allocation5], %s9722_s21, %s9722_s21, %s9723_s26  }
0x3131   :  { %9630 = dma.done.wait [#allocation5], 512  }
0x3132   :  { %9631 = vsyncadd [#allocation5], 4294966784 }
0x3133   :  { %7369 = vsyncpa [#allocation4], 1 }
0x3134   :  { %7370 = vsyncpa [#allocation7], 1 }
0x3135   :  { %7371 = vsyncpa [#allocation10], 1 }
0x3136   :  { %7372 = vsyncpa [#allocation13], 1 }
0x3137   :  { %7373 = vsyncpa [#allocation16], 1 }
0x3138   :  { %7374 = vsyncpa [#allocation19], 1 }
0x3139   :  { %7375 = vsyncpa [#allocation22], 1 }
0x313a   :  { %7376 = vsyncpa [#allocation25], 1 }
0x313b   :  { %7377 = vsyncpa [#allocation28], 1 }
0x313c   :  { %7378 = vsyncpa [#allocation31], 1 }
0x313d   :  { %7379 = vsyncpa [#allocation34], 1 }
0x313e   :  { %7380 = vsyncpa [#allocation37], 1 }
0x313f   :  { %7381 = vsyncpa [#allocation40], 1 }
0x3140   :  { %7382 = vsyncpa [#allocation43], 1 }
0x3141   :  { %7383 = vsyncpa [#allocation46], 1 }
0x3142   :  { %7384 = vsyncpa [#allocation49], 1 }
0x3143   :  { %7385 = vsyncpa [#allocation52], 1 }
0x3144   :  { %7386 = vsyncpa [#allocation55], 1 }
0x3145   :  { %7387 = vsyncpa [#allocation5], 1 }

</bundles_post_ra>
